<compile_context>
chip_gen: v6e
topology: v6e:2x2x1
jax: 0.10.0
libtpu: 0.0.40
codegen_flags: <defaults>
</compile_context>

<pallas_src>
import jax
import jax.numpy as jnp
from jax import lax
from jax.experimental import pallas as pl
from jax.experimental.pallas import tpu as pltpu

# ---- small, forward-consistent hyper-parameters -----------------------------
VOCAB = 32          # vocab_size
N_FEATURES = 8      # n_features (card_data features)
N_UNITS = 128       # n_units (lane-aligned)
LSTM_LAYERS = 2
BATCH = 8           # sublane-aligned batch (kernel pads any B up to multiple of 8)
SEQ = 8

_BN_EPS = 1e-5
_VPAD = 128         # logits padded to a full lane width -> unmasked stores
_SUB = 8            # sublane granularity


def _elu(x):
    # ELU(alpha=1): x if x > 0 else exp(x) - 1
    return jnp.where(x > 0, x, jnp.exp(jnp.minimum(x, 0.0)) - 1.0)


# =============================================================================
# The single fused kernel
# =============================================================================
def namenet_kernel(card_ref, ids_ref,
                   iw0_ref, ib0_ref, iw1_ref, ib1_ref, iw2_ref, ib2_ref,
                   wih0e_ref, wih_r_ref, whh_ref, lb_ref, wd_ref, bd_ref,
                   logits_ref, hn_ref, cn_ref,
                   xproj_ref, seq_ref):
    BP = card_ref.shape[0]                  # padded batch (multiple of 8)
    TB = ids_ref.shape[0]                   # T * BP (time-major rows)
    T = TB // BP
    L, _, U = hn_ref.shape
    V = wih0e_ref.shape[0]

    # ---- InitializerNets (hidden + cell branches), BN folded into linears ---
    card = card_ref[...]                                            # (BP, F)
    states = []
    for idx in range(2 * L):                # [hid l0, hid l1, cell l0, cell l1]
        y = jnp.dot(card, iw0_ref[idx],
                    preferred_element_type=jnp.float32) + ib0_ref[idx]
        d = _elu(jnp.dot(y, iw1_ref[idx],
                         preferred_element_type=jnp.float32) + ib1_ref[idx])
        d = _elu(jnp.dot(d, iw2_ref[idx],
                         preferred_element_type=jnp.float32) + ib2_ref[idx])
        z = d + y + 1e-6                                            # residual
        # UnitNorm(ord=1, dim=1)
        states.append(z / (1e-6 + jnp.sum(jnp.abs(z), axis=1, keepdims=True)))
    h = states[:L]                          # recurrent state lives in registers
    c = states[L:]

    # ---- embedding lookup as a one-hot matmul (table folded into W_ih[0]) ---
    lanes = lax.broadcasted_iota(jnp.int32, (TB, V), 1)
    onehot = (lanes == ids_ref[...]).astype(jnp.float32)            # (TB, V)

    for layer in range(L):
        # whole-sequence input projection: ONE matmul, bias folded in
        if layer == 0:
            xproj_ref[...] = (jnp.dot(onehot, wih0e_ref[...],
                                      preferred_element_type=jnp.float32)
                              + lb_ref[0])
        else:
            xproj_ref[...] = (jnp.dot(seq_ref[...], wih_r_ref[layer - 1],
                                      preferred_element_type=jnp.float32)
                              + lb_ref[layer])

        h_l = h[layer]
        c_l = c[layer]
        # fully unrolled recurrence: only h @ W_hh + elementwise per step
        for t in range(T):
            gates = (xproj_ref[t * BP:(t + 1) * BP, :]
                     + jnp.dot(h_l, whh_ref[layer],
                               preferred_element_type=jnp.float32))  # (BP, 4U)
            sig = jax.nn.sigmoid(gates[:, :3 * U])     # gate order [i, f, o | g]
            g_t = jnp.tanh(gates[:, 3 * U:])
            c_l = sig[:, U:2 * U] * c_l + sig[:, :U] * g_t
            h_l = sig[:, 2 * U:3 * U] * jnp.tanh(c_l)
            seq_ref[t * BP:(t + 1) * BP, :] = h_l       # aligned (8,128) store
        hn_ref[layer] = h_l                             # written once per layer
        cn_ref[layer] = c_l

    # ---- dense head over the full sequence, lane-dense (V padded to 128) ----
    logits_ref[...] = (jnp.dot(seq_ref[...], wd_ref[...],
                               preferred_element_type=jnp.float32)
                       + bd_ref[...])


def _fused_forward(card_p, ids_col, prep):
    BP, F = card_p.shape
    TB = ids_col.shape[0]
    L, U, G = prep["whh"].shape                     # G = 4 * U
    V = prep["wih0_emb"].shape[0]

    def full(shape):
        return pl.BlockSpec(shape, lambda i: (0,) * len(shape))

    grid_spec = pltpu.PrefetchScalarGridSpec(
        num_scalar_prefetch=0,
        grid=(1,),
        in_specs=[
            full((BP, F)),                 # card_data (padded)
            full((TB, 1)),                 # token ids, time-major column
            full((2 * L, F, U)), full((2 * L, 1, U)),      # init w0 / b0
            full((2 * L, U, U)), full((2 * L, 1, U)),      # init w1 / b1 (BN folded)
            full((2 * L, U, U)), full((2 * L, 1, U)),      # init w2 / b2 (BN folded)
            full((V, G)),                  # emb @ W_ih[0]   (layer-0 projection)
            full((L - 1, U, G)),           # W_ih[1:]
            full((L, U, G)),               # W_hh
            full((L, 1, G)),               # lstm bias (b_ih + b_hh)
            full((U, _VPAD)),              # dense head weight, lane-padded
            full((1, _VPAD)),              # dense head bias,   lane-padded
        ],
        out_specs=(
            full((TB, _VPAD)),             # logits (time-major, lane-dense)
            full((L, BP, U)),              # h_n
            full((L, BP, U)),              # c_n
        ),
        scratch_shapes=[pltpu.VMEM((TB, G), jnp.float32),   # x-projection
                        pltpu.VMEM((TB, U), jnp.float32)],  # layer output seq
    )
    return pl.pallas_call(
        namenet_kernel,
        out_shape=(jax.ShapeDtypeStruct((TB, _VPAD), jnp.float32),
                   jax.ShapeDtypeStruct((L, BP, U), jnp.float32),
                   jax.ShapeDtypeStruct((L, BP, U), jnp.float32)),
        grid_spec=grid_spec,
        compiler_params=pltpu.CompilerParams(
            dimension_semantics=("arbitrary",)),
    )(card_p, ids_col,
      prep["iw0"], prep["ib0"], prep["iw1"], prep["ib1"],
      prep["iw2"], prep["ib2"],
      prep["wih0_emb"], prep["wih_rest"], prep["whh"], prep["lstm_b"],
      prep["wd_pad"], prep["bd_pad"])


# =============================================================================
# One-time parameter preparation (constant folding; kept out of the hot path)
# =============================================================================
def prepare_params(params):
    U, V, L = N_UNITS, VOCAB, LSTM_LAYERS

    def fold_bn(w, b, bn):                 # bn rows: [gamma, beta, mean, var]
        gamma, beta, mean, var = bn[:, 0], bn[:, 1], bn[:, 2], bn[:, 3]
        scale = gamma / jnp.sqrt(var + _BN_EPS)                    # (L, U)
        return w * scale[:, None, :], ((b[:, 0] - mean) * scale + beta)[:, None, :]

    def fold_branch(p):
        w1, b1 = fold_bn(p["w1"], p["b1"], p["bn1"])
        w2, b2 = fold_bn(p["w2"], p["b2"], p["bn2"])
        return p["w0"], p["b0"], w1, b1, w2, b2

    hid = fold_branch(params["hidden_init"])
    cel = fold_branch(params["cell_init"])
    iw0, ib0, iw1, ib1, iw2, ib2 = [
        jnp.concatenate([a, b], axis=0) for a, b in zip(hid, cel)]

    def reorder(a):                        # [i, f, g, o] -> [i, f, o, g]
        i, f, g, o = jnp.split(a, 4, axis=-1)
        return jnp.concatenate([i, f, o, g], axis=-1)

    wih = reorder(params["wih_t"])                                  # (L, U, 4U)
    return {
        "iw0": iw0, "ib0": ib0, "iw1": iw1, "ib1": ib1, "iw2": iw2, "ib2": ib2,
        "wih0_emb": params["emb"] @ wih[0],                         # (V, 4U)
        "wih_rest": wih[1:],                                        # (L-1, U, 4U)
        "whh": reorder(params["whh_t"]),
        "lstm_b": reorder(params["lstm_b"]),
        "wd_pad": jnp.zeros((U, _VPAD), jnp.float32).at[:, :V].set(params["wd_t"]),
        "bd_pad": jnp.zeros((1, _VPAD), jnp.float32).at[:, :V].set(params["bd"]),
    }


# =============================================================================
# NameNet forward (thin glue around the single fused kernel)
# =============================================================================
def namenet_forward(name_ids, card_data, prep):
    B, T = name_ids.shape
    BP = ((B + _SUB - 1) // _SUB) * _SUB        # pad batch to a sublane multiple

    card_p = card_data
    ids_tb = jnp.transpose(name_ids).astype(jnp.int32)              # (T, B)
    if BP != B:
        card_p = jnp.zeros((BP, card_data.shape[1]),
                           card_data.dtype).at[:B].set(card_data)
        ids_tb = jnp.zeros((T, BP), jnp.int32).at[:, :B].set(ids_tb)
    ids_col = ids_tb.reshape(T * BP, 1)                             # time-major

    logits_pad, h_n, c_n = _fused_forward(card_p, ids_col, prep)

    logits = logits_pad.reshape(T, BP, _VPAD)[:, :B, :VOCAB]        # (T, B, V)
    logits_bvt = jnp.transpose(logits, (1, 2, 0))                   # (B, V, T)
    return logits_bvt, (h_n[:, :B], c_n[:, :B])


# =============================================================================
# Deterministic synthetic parameters (shapes per NameNet.__init__)
# =============================================================================
def make_params(key):
    ks = iter(jax.random.split(key, 64))

    def nrm(shape, scale):
        return (scale * jax.random.normal(next(ks), shape)).astype(jnp.float32)

    params = {}

    # nn.Embedding(vocab, n_units, max_norm=1.0, padding_idx=0)
    # TODO(synk): PyTorch applies the max_norm renorm lazily per access; here
    # it is applied once to the whole table at construction time.
    emb = jax.random.normal(next(ks), (VOCAB, N_UNITS), jnp.float32)
    row_norm = jnp.linalg.norm(emb, axis=1, keepdims=True)
    emb = emb * jnp.minimum(1.0, 1.0 / (row_norm + 1e-7))
    emb = emb.at[0].set(0.0)                                        # padding_idx
    params["emb"] = emb

    def initializer_params():
        p = {
            "w0": nrm((LSTM_LAYERS, N_FEATURES, N_UNITS), 0.30),    # (in, out)
            "b0": nrm((LSTM_LAYERS, 1, N_UNITS), 0.10),
            "w1": nrm((LSTM_LAYERS, N_UNITS, N_UNITS), 0.08),
            "b1": nrm((LSTM_LAYERS, 1, N_UNITS), 0.10),
            "w2": nrm((LSTM_LAYERS, N_UNITS, N_UNITS), 0.08),
            "b2": nrm((LSTM_LAYERS, 1, N_UNITS), 0.10),
        }

        def bn():  # rows: [gamma, beta, running_mean, running_var]
            gamma = 1.0 + nrm((LSTM_LAYERS, 1, N_UNITS), 0.05)
            beta = nrm((LSTM_LAYERS, 1, N_UNITS), 0.05)
            rmean = nrm((LSTM_LAYERS, 1, N_UNITS), 0.05)
            rvar = 1.0 + 0.1 * jnp.abs(nrm((LSTM_LAYERS, 1, N_UNITS), 1.0))
            return jnp.concatenate([gamma, beta, rmean, rvar], axis=1)  # (L,4,U)

        p["bn1"] = bn()
        p["bn2"] = bn()
        return p

    params["hidden_init"] = initializer_params()
    params["cell_init"] = initializer_params()

    # nn.LSTM(n_units, n_units, num_layers=2, batch_first=True): pre-transposed
    params["wih_t"] = nrm((LSTM_LAYERS, N_UNITS, 4 * N_UNITS), 0.08)
    params["whh_t"] = nrm((LSTM_LAYERS, N_UNITS, 4 * N_UNITS), 0.08)
    params["lstm_b"] = nrm((LSTM_LAYERS, 1, 4 * N_UNITS), 0.10)     # b_ih + b_hh
    # dense head: Linear(n_units, vocab)
    params["wd_t"] = nrm((N_UNITS, VOCAB), 0.08)
    params["bd"] = nrm((1, VOCAB), 0.10)
    return params


# =============================================================================
# Pure-JAX reference of the same forward (raw params: explicit BN, gather, ...)
# =============================================================================
def reference_forward(name_ids, card_data, params):
    def init_net(x, p):
        outs = []
        for l in range(LSTM_LAYERS):
            y = x @ p["w0"][l] + p["b0"][l]
            d = y @ p["w1"][l] + p["b1"][l]
            bn = p["bn1"][l]
            d = (d - bn[2]) / jnp.sqrt(bn[3] + _BN_EPS) * bn[0] + bn[1]
            d = _elu(d)
            d = d @ p["w2"][l] + p["b2"][l]
            bn = p["bn2"][l]
            d = (d - bn[2]) / jnp.sqrt(bn[3] + _BN_EPS) * bn[0] + bn[1]
            d = _elu(d)
            z = d + y + 1e-6
            outs.append(z / (1e-6 + jnp.sum(jnp.abs(z), axis=1, keepdims=True)))
        return jnp.stack(outs, 0)

    h = list(init_net(card_data, params["hidden_init"]))
    c = list(init_net(card_data, params["cell_init"]))
    x = jnp.take(params["emb"], name_ids, axis=0)                   # (B, T, U)
    U = N_UNITS
    layer_in = x
    for l in range(LSTM_LAYERS):
        outs = []
        for t in range(SEQ):
            gates = (layer_in[:, t] @ params["wih_t"][l]
                     + h[l] @ params["whh_t"][l] + params["lstm_b"][l])
            i = jax.nn.sigmoid(gates[:, :U])
            f = jax.nn.sigmoid(gates[:, U:2 * U])
            g = jnp.tanh(gates[:, 2 * U:3 * U])
            o = jax.nn.sigmoid(gates[:, 3 * U:])
            c[l] = f * c[l] + i * g
            h[l] = o * jnp.tanh(c[l])
            outs.append(h[l])
        layer_in = jnp.stack(outs, axis=1)                          # (B, T, U)
    logits = layer_in @ params["wd_t"] + params["bd"]               # (B, T, V)
    return jnp.transpose(logits, (0, 2, 1)), (jnp.stack(h, 0), jnp.stack(c, 0))


if __name__ == "__main__":
    key = jax.random.PRNGKey(0)
    kp, kn, kc = jax.random.split(key, 3)
    params = make_params(kp)
    prep = prepare_params(params)          # one-time constant folding

    name_ids = jax.random.randint(kn, (BATCH, SEQ), 0, VOCAB, dtype=jnp.int32)
    card_data = jax.random.normal(kc, (BATCH, N_FEATURES), dtype=jnp.float32)

    fwd = jax.jit(namenet_forward)
    out = fwd(name_ids, card_data, prep)
    out = jax.block_until_ready(out)
    logits, (h_n, c_n) = out

    assert logits.shape == (BATCH, VOCAB, SEQ)
    assert h_n.shape == (LSTM_LAYERS, BATCH, N_UNITS)
    assert c_n.shape == (LSTM_LAYERS, BATCH, N_UNITS)

    ref_logits, (ref_h, ref_c) = reference_forward(name_ids, card_data, params)
    assert jnp.allclose(logits, ref_logits, atol=3e-3, rtol=3e-3)
    assert jnp.allclose(h_n, ref_h, atol=3e-3, rtol=3e-3)
    assert jnp.allclose(c_n, ref_c, atol=3e-3, rtol=3e-3)

    print("KERNEL_OK")
</pallas_src>

<mosaic_0001>
module attributes {stable_mosaic.version = 11 : i64} {
  func.func @namenet_kernel(%arg0: i32, %arg1: memref<8x8xf32, #tpu.memory_space<vmem>>, %arg2: memref<64x1xi32, #tpu.memory_space<vmem>>, %arg3: memref<4x8x128xf32, #tpu.memory_space<vmem>>, %arg4: memref<4x1x128xf32, #tpu.memory_space<vmem>>, %arg5: memref<4x128x128xf32, #tpu.memory_space<vmem>>, %arg6: memref<4x1x128xf32, #tpu.memory_space<vmem>>, %arg7: memref<4x128x128xf32, #tpu.memory_space<vmem>>, %arg8: memref<4x1x128xf32, #tpu.memory_space<vmem>>, %arg9: memref<32x512xf32, #tpu.memory_space<vmem>>, %arg10: memref<1x128x512xf32, #tpu.memory_space<vmem>>, %arg11: memref<2x128x512xf32, #tpu.memory_space<vmem>>, %arg12: memref<2x1x512xf32, #tpu.memory_space<vmem>>, %arg13: memref<128x128xf32, #tpu.memory_space<vmem>>, %arg14: memref<1x128xf32, #tpu.memory_space<vmem>>, %arg15: memref<64x128xf32, #tpu.memory_space<vmem>>, %arg16: memref<2x8x128xf32, #tpu.memory_space<vmem>>, %arg17: memref<2x8x128xf32, #tpu.memory_space<vmem>>, %arg18: memref<64x512xf32, #tpu.memory_space<vmem>>, %arg19: memref<64x128xf32, #tpu.memory_space<vmem>>) attributes {dimension_semantics = [#tpu.dimension_semantics<arbitrary>], iteration_bounds = array<i64: 1>, scalar_prefetch = 0 : i64, scratch_operands = 2 : i64, tpu.core_type = #tpu.core_type<tc>, window_params = [{pipeline_mode = #tpu.pipeline_mode<synchronous>, transform_indices = @transform_0, window_bounds = array<i64: 8, 8>}, {pipeline_mode = #tpu.pipeline_mode<synchronous>, transform_indices = @transform_1, window_bounds = array<i64: 64, 1>}, {pipeline_mode = #tpu.pipeline_mode<synchronous>, transform_indices = @transform_2, window_bounds = array<i64: 4, 8, 128>}, {pipeline_mode = #tpu.pipeline_mode<synchronous>, transform_indices = @transform_3, window_bounds = array<i64: 4, 1, 128>}, {pipeline_mode = #tpu.pipeline_mode<synchronous>, transform_indices = @transform_4, window_bounds = array<i64: 4, 128, 128>}, {pipeline_mode = #tpu.pipeline_mode<synchronous>, transform_indices = @transform_5, window_bounds = array<i64: 4, 1, 128>}, {pipeline_mode = #tpu.pipeline_mode<synchronous>, transform_indices = @transform_6, window_bounds = array<i64: 4, 128, 128>}, {pipeline_mode = #tpu.pipeline_mode<synchronous>, transform_indices = @transform_7, window_bounds = array<i64: 4, 1, 128>}, {pipeline_mode = #tpu.pipeline_mode<synchronous>, transform_indices = @transform_8, window_bounds = array<i64: 32, 512>}, {pipeline_mode = #tpu.pipeline_mode<synchronous>, transform_indices = @transform_9, window_bounds = array<i64: 1, 128, 512>}, {pipeline_mode = #tpu.pipeline_mode<synchronous>, transform_indices = @transform_10, window_bounds = array<i64: 2, 128, 512>}, {pipeline_mode = #tpu.pipeline_mode<synchronous>, transform_indices = @transform_11, window_bounds = array<i64: 2, 1, 512>}, {pipeline_mode = #tpu.pipeline_mode<synchronous>, transform_indices = @transform_12, window_bounds = array<i64: 128, 128>}, {pipeline_mode = #tpu.pipeline_mode<synchronous>, transform_indices = @transform_13, window_bounds = array<i64: 1, 128>}, {pipeline_mode = #tpu.pipeline_mode<synchronous>, transform_indices = @transform_14, window_bounds = array<i64: 64, 128>}, {pipeline_mode = #tpu.pipeline_mode<synchronous>, transform_indices = @transform_15, window_bounds = array<i64: 2, 8, 128>}, {pipeline_mode = #tpu.pipeline_mode<synchronous>, transform_indices = @transform_16, window_bounds = array<i64: 2, 8, 128>}]} {
    %c0 = arith.constant 0 : index
    %c0_0 = arith.constant 0 : index
    %0 = vector.load %arg1[%c0, %c0_0] : memref<8x8xf32, #tpu.memory_space<vmem>>, vector<8x8xf32>
    %c0_1 = arith.constant 0 : index
    %c0_2 = arith.constant 0 : index
    %c0_3 = arith.constant 0 : index
    %1 = vector.load %arg3[%c0_1, %c0_2, %c0_3] : memref<4x8x128xf32, #tpu.memory_space<vmem>>, vector<1x8x128xf32>
    %2 = vector.shape_cast %1 : vector<1x8x128xf32> to vector<8x128xf32>
    %cst = arith.constant dense<0.000000e+00> : vector<8x128xf32>
    %3 = tpu.matmul %0, %2, %cst {dimension_numbers = #tpu.dot_dimension_numbers<[1], [0], [0], [1], [0, 0, 1, 1], [], []>} : vector<8x8xf32>, vector<8x128xf32>, vector<8x128xf32> -> vector<8x128xf32>
    %c0_4 = arith.constant 0 : index
    %c0_5 = arith.constant 0 : index
    %c0_6 = arith.constant 0 : index
    %4 = vector.load %arg4[%c0_4, %c0_5, %c0_6] : memref<4x1x128xf32, #tpu.memory_space<vmem>>, vector<1x1x128xf32>
    %5 = vector.shape_cast %4 : vector<1x1x128xf32> to vector<1x128xf32>
    %6 = vector.broadcast %5 : vector<1x128xf32> to vector<8x128xf32>
    %7 = arith.addf %3, %6 : vector<8x128xf32>
    %c0_7 = arith.constant 0 : index
    %c0_8 = arith.constant 0 : index
    %c0_9 = arith.constant 0 : index
    %8 = vector.load %arg5[%c0_7, %c0_8, %c0_9] : memref<4x128x128xf32, #tpu.memory_space<vmem>>, vector<1x128x128xf32>
    %9 = vector.shape_cast %8 : vector<1x128x128xf32> to vector<128x128xf32>
    %cst_10 = arith.constant dense<0.000000e+00> : vector<8x128xf32>
    %10 = tpu.matmul %7, %9, %cst_10 {dimension_numbers = #tpu.dot_dimension_numbers<[1], [0], [0], [1], [0, 0, 1, 1], [], []>} : vector<8x128xf32>, vector<128x128xf32>, vector<8x128xf32> -> vector<8x128xf32>
    %c0_11 = arith.constant 0 : index
    %c0_12 = arith.constant 0 : index
    %c0_13 = arith.constant 0 : index
    %11 = vector.load %arg6[%c0_11, %c0_12, %c0_13] : memref<4x1x128xf32, #tpu.memory_space<vmem>>, vector<1x1x128xf32>
    %12 = vector.shape_cast %11 : vector<1x1x128xf32> to vector<1x128xf32>
    %13 = vector.broadcast %12 : vector<1x128xf32> to vector<8x128xf32>
    %14 = arith.addf %10, %13 : vector<8x128xf32>
    %cst_14 = arith.constant 0.000000e+00 : f32
    %15 = vector.broadcast %cst_14 : f32 to vector<8x128xf32>
    %16 = arith.cmpf ogt, %14, %15 : vector<8x128xf32>
    %cst_15 = arith.constant 0.000000e+00 : f32
    %17 = vector.broadcast %cst_15 : f32 to vector<8x128xf32>
    %18 = arith.minimumf %14, %17 : vector<8x128xf32>
    %19 = math.exp %18 : vector<8x128xf32>
    %cst_16 = arith.constant 1.000000e+00 : f32
    %20 = vector.broadcast %cst_16 : f32 to vector<8x128xf32>
    %21 = arith.subf %19, %20 : vector<8x128xf32>
    %22 = arith.select %16, %14, %21 : vector<8x128xi1>, vector<8x128xf32>
    %c0_17 = arith.constant 0 : index
    %c0_18 = arith.constant 0 : index
    %c0_19 = arith.constant 0 : index
    %23 = vector.load %arg7[%c0_17, %c0_18, %c0_19] : memref<4x128x128xf32, #tpu.memory_space<vmem>>, vector<1x128x128xf32>
    %24 = vector.shape_cast %23 : vector<1x128x128xf32> to vector<128x128xf32>
    %cst_20 = arith.constant dense<0.000000e+00> : vector<8x128xf32>
    %25 = tpu.matmul %22, %24, %cst_20 {dimension_numbers = #tpu.dot_dimension_numbers<[1], [0], [0], [1], [0, 0, 1, 1], [], []>} : vector<8x128xf32>, vector<128x128xf32>, vector<8x128xf32> -> vector<8x128xf32>
    %c0_21 = arith.constant 0 : index
    %c0_22 = arith.constant 0 : index
    %c0_23 = arith.constant 0 : index
    %26 = vector.load %arg8[%c0_21, %c0_22, %c0_23] : memref<4x1x128xf32, #tpu.memory_space<vmem>>, vector<1x1x128xf32>
    %27 = vector.shape_cast %26 : vector<1x1x128xf32> to vector<1x128xf32>
    %28 = vector.broadcast %27 : vector<1x128xf32> to vector<8x128xf32>
    %29 = arith.addf %25, %28 : vector<8x128xf32>
    %cst_24 = arith.constant 0.000000e+00 : f32
    %30 = vector.broadcast %cst_24 : f32 to vector<8x128xf32>
    %31 = arith.cmpf ogt, %29, %30 : vector<8x128xf32>
    %cst_25 = arith.constant 0.000000e+00 : f32
    %32 = vector.broadcast %cst_25 : f32 to vector<8x128xf32>
    %33 = arith.minimumf %29, %32 : vector<8x128xf32>
    %34 = math.exp %33 : vector<8x128xf32>
    %cst_26 = arith.constant 1.000000e+00 : f32
    %35 = vector.broadcast %cst_26 : f32 to vector<8x128xf32>
    %36 = arith.subf %34, %35 : vector<8x128xf32>
    %37 = arith.select %31, %29, %36 : vector<8x128xi1>, vector<8x128xf32>
    %38 = arith.addf %37, %7 : vector<8x128xf32>
    %cst_27 = arith.constant 9.99999997E-7 : f32
    %39 = vector.broadcast %cst_27 : f32 to vector<8x128xf32>
    %40 = arith.addf %38, %39 : vector<8x128xf32>
    %41 = math.absf %40 : vector<8x128xf32>
    %cst_28 = arith.constant dense<0.000000e+00> : vector<8xf32>
    %42 = vector.multi_reduction <add>, %41, %cst_28 [1] : vector<8x128xf32> to vector<8xf32>
    %43 = vector.shape_cast %42 : vector<8xf32> to vector<8x1xf32>
    %cst_29 = arith.constant 9.99999997E-7 : f32
    %44 = vector.broadcast %cst_29 : f32 to vector<8x1xf32>
    %45 = arith.addf %44, %43 : vector<8x1xf32>
    %46 = vector.broadcast %45 : vector<8x1xf32> to vector<8x128xf32>
    %47 = arith.divf %40, %46 : vector<8x128xf32>
    %c1 = arith.constant 1 : index
    %c0_30 = arith.constant 0 : index
    %c0_31 = arith.constant 0 : index
    %48 = vector.load %arg3[%c1, %c0_30, %c0_31] : memref<4x8x128xf32, #tpu.memory_space<vmem>>, vector<1x8x128xf32>
    %49 = vector.shape_cast %48 : vector<1x8x128xf32> to vector<8x128xf32>
    %cst_32 = arith.constant dense<0.000000e+00> : vector<8x128xf32>
    %50 = tpu.matmul %0, %49, %cst_32 {dimension_numbers = #tpu.dot_dimension_numbers<[1], [0], [0], [1], [0, 0, 1, 1], [], []>} : vector<8x8xf32>, vector<8x128xf32>, vector<8x128xf32> -> vector<8x128xf32>
    %c1_33 = arith.constant 1 : index
    %c0_34 = arith.constant 0 : index
    %c0_35 = arith.constant 0 : index
    %51 = vector.load %arg4[%c1_33, %c0_34, %c0_35] : memref<4x1x128xf32, #tpu.memory_space<vmem>>, vector<1x1x128xf32>
    %52 = vector.shape_cast %51 : vector<1x1x128xf32> to vector<1x128xf32>
    %53 = vector.broadcast %52 : vector<1x128xf32> to vector<8x128xf32>
    %54 = arith.addf %50, %53 : vector<8x128xf32>
    %c1_36 = arith.constant 1 : index
    %c0_37 = arith.constant 0 : index
    %c0_38 = arith.constant 0 : index
    %55 = vector.load %arg5[%c1_36, %c0_37, %c0_38] : memref<4x128x128xf32, #tpu.memory_space<vmem>>, vector<1x128x128xf32>
    %56 = vector.shape_cast %55 : vector<1x128x128xf32> to vector<128x128xf32>
    %cst_39 = arith.constant dense<0.000000e+00> : vector<8x128xf32>
    %57 = tpu.matmul %54, %56, %cst_39 {dimension_numbers = #tpu.dot_dimension_numbers<[1], [0], [0], [1], [0, 0, 1, 1], [], []>} : vector<8x128xf32>, vector<128x128xf32>, vector<8x128xf32> -> vector<8x128xf32>
    %c1_40 = arith.constant 1 : index
    %c0_41 = arith.constant 0 : index
    %c0_42 = arith.constant 0 : index
    %58 = vector.load %arg6[%c1_40, %c0_41, %c0_42] : memref<4x1x128xf32, #tpu.memory_space<vmem>>, vector<1x1x128xf32>
    %59 = vector.shape_cast %58 : vector<1x1x128xf32> to vector<1x128xf32>
    %60 = vector.broadcast %59 : vector<1x128xf32> to vector<8x128xf32>
    %61 = arith.addf %57, %60 : vector<8x128xf32>
    %cst_43 = arith.constant 0.000000e+00 : f32
    %62 = vector.broadcast %cst_43 : f32 to vector<8x128xf32>
    %63 = arith.cmpf ogt, %61, %62 : vector<8x128xf32>
    %cst_44 = arith.constant 0.000000e+00 : f32
    %64 = vector.broadcast %cst_44 : f32 to vector<8x128xf32>
    %65 = arith.minimumf %61, %64 : vector<8x128xf32>
    %66 = math.exp %65 : vector<8x128xf32>
    %cst_45 = arith.constant 1.000000e+00 : f32
    %67 = vector.broadcast %cst_45 : f32 to vector<8x128xf32>
    %68 = arith.subf %66, %67 : vector<8x128xf32>
    %69 = arith.select %63, %61, %68 : vector<8x128xi1>, vector<8x128xf32>
    %c1_46 = arith.constant 1 : index
    %c0_47 = arith.constant 0 : index
    %c0_48 = arith.constant 0 : index
    %70 = vector.load %arg7[%c1_46, %c0_47, %c0_48] : memref<4x128x128xf32, #tpu.memory_space<vmem>>, vector<1x128x128xf32>
    %71 = vector.shape_cast %70 : vector<1x128x128xf32> to vector<128x128xf32>
    %cst_49 = arith.constant dense<0.000000e+00> : vector<8x128xf32>
    %72 = tpu.matmul %69, %71, %cst_49 {dimension_numbers = #tpu.dot_dimension_numbers<[1], [0], [0], [1], [0, 0, 1, 1], [], []>} : vector<8x128xf32>, vector<128x128xf32>, vector<8x128xf32> -> vector<8x128xf32>
    %c1_50 = arith.constant 1 : index
    %c0_51 = arith.constant 0 : index
    %c0_52 = arith.constant 0 : index
    %73 = vector.load %arg8[%c1_50, %c0_51, %c0_52] : memref<4x1x128xf32, #tpu.memory_space<vmem>>, vector<1x1x128xf32>
    %74 = vector.shape_cast %73 : vector<1x1x128xf32> to vector<1x128xf32>
    %75 = vector.broadcast %74 : vector<1x128xf32> to vector<8x128xf32>
    %76 = arith.addf %72, %75 : vector<8x128xf32>
    %cst_53 = arith.constant 0.000000e+00 : f32
    %77 = vector.broadcast %cst_53 : f32 to vector<8x128xf32>
    %78 = arith.cmpf ogt, %76, %77 : vector<8x128xf32>
    %cst_54 = arith.constant 0.000000e+00 : f32
    %79 = vector.broadcast %cst_54 : f32 to vector<8x128xf32>
    %80 = arith.minimumf %76, %79 : vector<8x128xf32>
    %81 = math.exp %80 : vector<8x128xf32>
    %cst_55 = arith.constant 1.000000e+00 : f32
    %82 = vector.broadcast %cst_55 : f32 to vector<8x128xf32>
    %83 = arith.subf %81, %82 : vector<8x128xf32>
    %84 = arith.select %78, %76, %83 : vector<8x128xi1>, vector<8x128xf32>
    %85 = arith.addf %84, %54 : vector<8x128xf32>
    %cst_56 = arith.constant 9.99999997E-7 : f32
    %86 = vector.broadcast %cst_56 : f32 to vector<8x128xf32>
    %87 = arith.addf %85, %86 : vector<8x128xf32>
    %88 = math.absf %87 : vector<8x128xf32>
    %cst_57 = arith.constant dense<0.000000e+00> : vector<8xf32>
    %89 = vector.multi_reduction <add>, %88, %cst_57 [1] : vector<8x128xf32> to vector<8xf32>
    %90 = vector.shape_cast %89 : vector<8xf32> to vector<8x1xf32>
    %cst_58 = arith.constant 9.99999997E-7 : f32
    %91 = vector.broadcast %cst_58 : f32 to vector<8x1xf32>
    %92 = arith.addf %91, %90 : vector<8x1xf32>
    %93 = vector.broadcast %92 : vector<8x1xf32> to vector<8x128xf32>
    %94 = arith.divf %87, %93 : vector<8x128xf32>
    %c2 = arith.constant 2 : index
    %c0_59 = arith.constant 0 : index
    %c0_60 = arith.constant 0 : index
    %95 = vector.load %arg3[%c2, %c0_59, %c0_60] : memref<4x8x128xf32, #tpu.memory_space<vmem>>, vector<1x8x128xf32>
    %96 = vector.shape_cast %95 : vector<1x8x128xf32> to vector<8x128xf32>
    %cst_61 = arith.constant dense<0.000000e+00> : vector<8x128xf32>
    %97 = tpu.matmul %0, %96, %cst_61 {dimension_numbers = #tpu.dot_dimension_numbers<[1], [0], [0], [1], [0, 0, 1, 1], [], []>} : vector<8x8xf32>, vector<8x128xf32>, vector<8x128xf32> -> vector<8x128xf32>
    %c2_62 = arith.constant 2 : index
    %c0_63 = arith.constant 0 : index
    %c0_64 = arith.constant 0 : index
    %98 = vector.load %arg4[%c2_62, %c0_63, %c0_64] : memref<4x1x128xf32, #tpu.memory_space<vmem>>, vector<1x1x128xf32>
    %99 = vector.shape_cast %98 : vector<1x1x128xf32> to vector<1x128xf32>
    %100 = vector.broadcast %99 : vector<1x128xf32> to vector<8x128xf32>
    %101 = arith.addf %97, %100 : vector<8x128xf32>
    %c2_65 = arith.constant 2 : index
    %c0_66 = arith.constant 0 : index
    %c0_67 = arith.constant 0 : index
    %102 = vector.load %arg5[%c2_65, %c0_66, %c0_67] : memref<4x128x128xf32, #tpu.memory_space<vmem>>, vector<1x128x128xf32>
    %103 = vector.shape_cast %102 : vector<1x128x128xf32> to vector<128x128xf32>
    %cst_68 = arith.constant dense<0.000000e+00> : vector<8x128xf32>
    %104 = tpu.matmul %101, %103, %cst_68 {dimension_numbers = #tpu.dot_dimension_numbers<[1], [0], [0], [1], [0, 0, 1, 1], [], []>} : vector<8x128xf32>, vector<128x128xf32>, vector<8x128xf32> -> vector<8x128xf32>
    %c2_69 = arith.constant 2 : index
    %c0_70 = arith.constant 0 : index
    %c0_71 = arith.constant 0 : index
    %105 = vector.load %arg6[%c2_69, %c0_70, %c0_71] : memref<4x1x128xf32, #tpu.memory_space<vmem>>, vector<1x1x128xf32>
    %106 = vector.shape_cast %105 : vector<1x1x128xf32> to vector<1x128xf32>
    %107 = vector.broadcast %106 : vector<1x128xf32> to vector<8x128xf32>
    %108 = arith.addf %104, %107 : vector<8x128xf32>
    %cst_72 = arith.constant 0.000000e+00 : f32
    %109 = vector.broadcast %cst_72 : f32 to vector<8x128xf32>
    %110 = arith.cmpf ogt, %108, %109 : vector<8x128xf32>
    %cst_73 = arith.constant 0.000000e+00 : f32
    %111 = vector.broadcast %cst_73 : f32 to vector<8x128xf32>
    %112 = arith.minimumf %108, %111 : vector<8x128xf32>
    %113 = math.exp %112 : vector<8x128xf32>
    %cst_74 = arith.constant 1.000000e+00 : f32
    %114 = vector.broadcast %cst_74 : f32 to vector<8x128xf32>
    %115 = arith.subf %113, %114 : vector<8x128xf32>
    %116 = arith.select %110, %108, %115 : vector<8x128xi1>, vector<8x128xf32>
    %c2_75 = arith.constant 2 : index
    %c0_76 = arith.constant 0 : index
    %c0_77 = arith.constant 0 : index
    %117 = vector.load %arg7[%c2_75, %c0_76, %c0_77] : memref<4x128x128xf32, #tpu.memory_space<vmem>>, vector<1x128x128xf32>
    %118 = vector.shape_cast %117 : vector<1x128x128xf32> to vector<128x128xf32>
    %cst_78 = arith.constant dense<0.000000e+00> : vector<8x128xf32>
    %119 = tpu.matmul %116, %118, %cst_78 {dimension_numbers = #tpu.dot_dimension_numbers<[1], [0], [0], [1], [0, 0, 1, 1], [], []>} : vector<8x128xf32>, vector<128x128xf32>, vector<8x128xf32> -> vector<8x128xf32>
    %c2_79 = arith.constant 2 : index
    %c0_80 = arith.constant 0 : index
    %c0_81 = arith.constant 0 : index
    %120 = vector.load %arg8[%c2_79, %c0_80, %c0_81] : memref<4x1x128xf32, #tpu.memory_space<vmem>>, vector<1x1x128xf32>
    %121 = vector.shape_cast %120 : vector<1x1x128xf32> to vector<1x128xf32>
    %122 = vector.broadcast %121 : vector<1x128xf32> to vector<8x128xf32>
    %123 = arith.addf %119, %122 : vector<8x128xf32>
    %cst_82 = arith.constant 0.000000e+00 : f32
    %124 = vector.broadcast %cst_82 : f32 to vector<8x128xf32>
    %125 = arith.cmpf ogt, %123, %124 : vector<8x128xf32>
    %cst_83 = arith.constant 0.000000e+00 : f32
    %126 = vector.broadcast %cst_83 : f32 to vector<8x128xf32>
    %127 = arith.minimumf %123, %126 : vector<8x128xf32>
    %128 = math.exp %127 : vector<8x128xf32>
    %cst_84 = arith.constant 1.000000e+00 : f32
    %129 = vector.broadcast %cst_84 : f32 to vector<8x128xf32>
    %130 = arith.subf %128, %129 : vector<8x128xf32>
    %131 = arith.select %125, %123, %130 : vector<8x128xi1>, vector<8x128xf32>
    %132 = arith.addf %131, %101 : vector<8x128xf32>
    %cst_85 = arith.constant 9.99999997E-7 : f32
    %133 = vector.broadcast %cst_85 : f32 to vector<8x128xf32>
    %134 = arith.addf %132, %133 : vector<8x128xf32>
    %135 = math.absf %134 : vector<8x128xf32>
    %cst_86 = arith.constant dense<0.000000e+00> : vector<8xf32>
    %136 = vector.multi_reduction <add>, %135, %cst_86 [1] : vector<8x128xf32> to vector<8xf32>
    %137 = vector.shape_cast %136 : vector<8xf32> to vector<8x1xf32>
    %cst_87 = arith.constant 9.99999997E-7 : f32
    %138 = vector.broadcast %cst_87 : f32 to vector<8x1xf32>
    %139 = arith.addf %138, %137 : vector<8x1xf32>
    %140 = vector.broadcast %139 : vector<8x1xf32> to vector<8x128xf32>
    %141 = arith.divf %134, %140 : vector<8x128xf32>
    %c3 = arith.constant 3 : index
    %c0_88 = arith.constant 0 : index
    %c0_89 = arith.constant 0 : index
    %142 = vector.load %arg3[%c3, %c0_88, %c0_89] : memref<4x8x128xf32, #tpu.memory_space<vmem>>, vector<1x8x128xf32>
    %143 = vector.shape_cast %142 : vector<1x8x128xf32> to vector<8x128xf32>
    %cst_90 = arith.constant dense<0.000000e+00> : vector<8x128xf32>
    %144 = tpu.matmul %0, %143, %cst_90 {dimension_numbers = #tpu.dot_dimension_numbers<[1], [0], [0], [1], [0, 0, 1, 1], [], []>} : vector<8x8xf32>, vector<8x128xf32>, vector<8x128xf32> -> vector<8x128xf32>
    %c3_91 = arith.constant 3 : index
    %c0_92 = arith.constant 0 : index
    %c0_93 = arith.constant 0 : index
    %145 = vector.load %arg4[%c3_91, %c0_92, %c0_93] : memref<4x1x128xf32, #tpu.memory_space<vmem>>, vector<1x1x128xf32>
    %146 = vector.shape_cast %145 : vector<1x1x128xf32> to vector<1x128xf32>
    %147 = vector.broadcast %146 : vector<1x128xf32> to vector<8x128xf32>
    %148 = arith.addf %144, %147 : vector<8x128xf32>
    %c3_94 = arith.constant 3 : index
    %c0_95 = arith.constant 0 : index
    %c0_96 = arith.constant 0 : index
    %149 = vector.load %arg5[%c3_94, %c0_95, %c0_96] : memref<4x128x128xf32, #tpu.memory_space<vmem>>, vector<1x128x128xf32>
    %150 = vector.shape_cast %149 : vector<1x128x128xf32> to vector<128x128xf32>
    %cst_97 = arith.constant dense<0.000000e+00> : vector<8x128xf32>
    %151 = tpu.matmul %148, %150, %cst_97 {dimension_numbers = #tpu.dot_dimension_numbers<[1], [0], [0], [1], [0, 0, 1, 1], [], []>} : vector<8x128xf32>, vector<128x128xf32>, vector<8x128xf32> -> vector<8x128xf32>
    %c3_98 = arith.constant 3 : index
    %c0_99 = arith.constant 0 : index
    %c0_100 = arith.constant 0 : index
    %152 = vector.load %arg6[%c3_98, %c0_99, %c0_100] : memref<4x1x128xf32, #tpu.memory_space<vmem>>, vector<1x1x128xf32>
    %153 = vector.shape_cast %152 : vector<1x1x128xf32> to vector<1x128xf32>
    %154 = vector.broadcast %153 : vector<1x128xf32> to vector<8x128xf32>
    %155 = arith.addf %151, %154 : vector<8x128xf32>
    %cst_101 = arith.constant 0.000000e+00 : f32
    %156 = vector.broadcast %cst_101 : f32 to vector<8x128xf32>
    %157 = arith.cmpf ogt, %155, %156 : vector<8x128xf32>
    %cst_102 = arith.constant 0.000000e+00 : f32
    %158 = vector.broadcast %cst_102 : f32 to vector<8x128xf32>
    %159 = arith.minimumf %155, %158 : vector<8x128xf32>
    %160 = math.exp %159 : vector<8x128xf32>
    %cst_103 = arith.constant 1.000000e+00 : f32
    %161 = vector.broadcast %cst_103 : f32 to vector<8x128xf32>
    %162 = arith.subf %160, %161 : vector<8x128xf32>
    %163 = arith.select %157, %155, %162 : vector<8x128xi1>, vector<8x128xf32>
    %c3_104 = arith.constant 3 : index
    %c0_105 = arith.constant 0 : index
    %c0_106 = arith.constant 0 : index
    %164 = vector.load %arg7[%c3_104, %c0_105, %c0_106] : memref<4x128x128xf32, #tpu.memory_space<vmem>>, vector<1x128x128xf32>
    %165 = vector.shape_cast %164 : vector<1x128x128xf32> to vector<128x128xf32>
    %cst_107 = arith.constant dense<0.000000e+00> : vector<8x128xf32>
    %166 = tpu.matmul %163, %165, %cst_107 {dimension_numbers = #tpu.dot_dimension_numbers<[1], [0], [0], [1], [0, 0, 1, 1], [], []>} : vector<8x128xf32>, vector<128x128xf32>, vector<8x128xf32> -> vector<8x128xf32>
    %c3_108 = arith.constant 3 : index
    %c0_109 = arith.constant 0 : index
    %c0_110 = arith.constant 0 : index
    %167 = vector.load %arg8[%c3_108, %c0_109, %c0_110] : memref<4x1x128xf32, #tpu.memory_space<vmem>>, vector<1x1x128xf32>
    %168 = vector.shape_cast %167 : vector<1x1x128xf32> to vector<1x128xf32>
    %169 = vector.broadcast %168 : vector<1x128xf32> to vector<8x128xf32>
    %170 = arith.addf %166, %169 : vector<8x128xf32>
    %cst_111 = arith.constant 0.000000e+00 : f32
    %171 = vector.broadcast %cst_111 : f32 to vector<8x128xf32>
    %172 = arith.cmpf ogt, %170, %171 : vector<8x128xf32>
    %cst_112 = arith.constant 0.000000e+00 : f32
    %173 = vector.broadcast %cst_112 : f32 to vector<8x128xf32>
    %174 = arith.minimumf %170, %173 : vector<8x128xf32>
    %175 = math.exp %174 : vector<8x128xf32>
    %cst_113 = arith.constant 1.000000e+00 : f32
    %176 = vector.broadcast %cst_113 : f32 to vector<8x128xf32>
    %177 = arith.subf %175, %176 : vector<8x128xf32>
    %178 = arith.select %172, %170, %177 : vector<8x128xi1>, vector<8x128xf32>
    %179 = arith.addf %178, %148 : vector<8x128xf32>
    %cst_114 = arith.constant 9.99999997E-7 : f32
    %180 = vector.broadcast %cst_114 : f32 to vector<8x128xf32>
    %181 = arith.addf %179, %180 : vector<8x128xf32>
    %182 = math.absf %181 : vector<8x128xf32>
    %cst_115 = arith.constant dense<0.000000e+00> : vector<8xf32>
    %183 = vector.multi_reduction <add>, %182, %cst_115 [1] : vector<8x128xf32> to vector<8xf32>
    %184 = vector.shape_cast %183 : vector<8xf32> to vector<8x1xf32>
    %cst_116 = arith.constant 9.99999997E-7 : f32
    %185 = vector.broadcast %cst_116 : f32 to vector<8x1xf32>
    %186 = arith.addf %185, %184 : vector<8x1xf32>
    %187 = vector.broadcast %186 : vector<8x1xf32> to vector<8x128xf32>
    %188 = arith.divf %181, %187 : vector<8x128xf32>
    %189 = tpu.iota {dimensions = array<i32: 1>} : vector<64x32xi32>
    %c0_117 = arith.constant 0 : index
    %c0_118 = arith.constant 0 : index
    %190 = vector.load %arg2[%c0_117, %c0_118] : memref<64x1xi32, #tpu.memory_space<vmem>>, vector<64x1xi32>
    %191 = vector.broadcast %190 : vector<64x1xi32> to vector<64x32xi32>
    %192 = arith.cmpi eq, %189, %191 : vector<64x32xi32>
    %193 = arith.extui %192 : vector<64x32xi1> to vector<64x32xi32>
    %194 = arith.sitofp %193 : vector<64x32xi32> to vector<64x32xf32>
    %c0_119 = arith.constant 0 : index
    %c0_120 = arith.constant 0 : index
    %195 = vector.load %arg9[%c0_119, %c0_120] : memref<32x512xf32, #tpu.memory_space<vmem>>, vector<32x512xf32>
    %cst_121 = arith.constant dense<0.000000e+00> : vector<64x512xf32>
    %196 = tpu.matmul %194, %195, %cst_121 {dimension_numbers = #tpu.dot_dimension_numbers<[1], [0], [0], [1], [0, 0, 1, 1], [], []>} : vector<64x32xf32>, vector<32x512xf32>, vector<64x512xf32> -> vector<64x512xf32>
    %c0_122 = arith.constant 0 : index
    %c0_123 = arith.constant 0 : index
    %c0_124 = arith.constant 0 : index
    %197 = vector.load %arg12[%c0_122, %c0_123, %c0_124] : memref<2x1x512xf32, #tpu.memory_space<vmem>>, vector<1x1x512xf32>
    %198 = vector.shape_cast %197 : vector<1x1x512xf32> to vector<1x512xf32>
    %199 = vector.broadcast %198 : vector<1x512xf32> to vector<64x512xf32>
    %200 = arith.addf %196, %199 : vector<64x512xf32>
    %c0_125 = arith.constant 0 : index
    %c0_126 = arith.constant 0 : index
    %201 = vector.load %arg18[%c0_125, %c0_126] : memref<64x512xf32, #tpu.memory_space<vmem>>, vector<64x512xf32>
    tpu.vector_store %arg18[%c0_125, %c0_126], %200 {strides = array<i32>} : memref<64x512xf32, #tpu.memory_space<vmem>>, vector<64x512xf32>,
    %c0_127 = arith.constant 0 : index
    %c0_128 = arith.constant 0 : index
    %202 = vector.load %arg18[%c0_127, %c0_128] : memref<64x512xf32, #tpu.memory_space<vmem>>, vector<8x512xf32>
    %c0_129 = arith.constant 0 : index
    %c0_130 = arith.constant 0 : index
    %c0_131 = arith.constant 0 : index
    %203 = vector.load %arg11[%c0_129, %c0_130, %c0_131] : memref<2x128x512xf32, #tpu.memory_space<vmem>>, vector<1x128x512xf32>
    %204 = vector.shape_cast %203 : vector<1x128x512xf32> to vector<128x512xf32>
    %cst_132 = arith.constant dense<0.000000e+00> : vector<8x512xf32>
    %205 = tpu.matmul %47, %204, %cst_132 {dimension_numbers = #tpu.dot_dimension_numbers<[1], [0], [0], [1], [0, 0, 1, 1], [], []>} : vector<8x128xf32>, vector<128x512xf32>, vector<8x512xf32> -> vector<8x512xf32>
    %206 = arith.addf %202, %205 : vector<8x512xf32>
    %207 = vector.extract_strided_slice %206 {offsets = [0, 0], sizes = [8, 384], strides = [1, 1]} : vector<8x512xf32> to vector<8x384xf32>
    %208 = arith.negf %207 : vector<8x384xf32>
    %209 = math.exp %208 : vector<8x384xf32>
    %cst_133 = arith.constant 1.000000e+00 : f32
    %210 = vector.broadcast %cst_133 : f32 to vector<8x384xf32>
    %211 = arith.addf %210, %209 : vector<8x384xf32>
    %212 = arith.divf %210, %211 : vector<8x384xf32>
    %213 = vector.extract_strided_slice %206 {offsets = [0, 384], sizes = [8, 128], strides = [1, 1]} : vector<8x512xf32> to vector<8x128xf32>
    %214 = math.tanh %213 : vector<8x128xf32>
    %215 = vector.extract_strided_slice %212 {offsets = [0, 128], sizes = [8, 128], strides = [1, 1]} : vector<8x384xf32> to vector<8x128xf32>
    %216 = arith.mulf %215, %141 : vector<8x128xf32>
    %217 = vector.extract_strided_slice %212 {offsets = [0, 0], sizes = [8, 128], strides = [1, 1]} : vector<8x384xf32> to vector<8x128xf32>
    %218 = arith.mulf %217, %214 : vector<8x128xf32>
    %219 = arith.addf %216, %218 : vector<8x128xf32>
    %220 = vector.extract_strided_slice %212 {offsets = [0, 256], sizes = [8, 128], strides = [1, 1]} : vector<8x384xf32> to vector<8x128xf32>
    %221 = math.tanh %219 : vector<8x128xf32>
    %222 = arith.mulf %220, %221 : vector<8x128xf32>
    %c0_134 = arith.constant 0 : index
    %c0_135 = arith.constant 0 : index
    %223 = vector.load %arg19[%c0_134, %c0_135] : memref<64x128xf32, #tpu.memory_space<vmem>>, vector<8x128xf32>
    tpu.vector_store %arg19[%c0_134, %c0_135], %222 {strides = array<i32>} : memref<64x128xf32, #tpu.memory_space<vmem>>, vector<8x128xf32>,
    %c8 = arith.constant 8 : index
    %c0_136 = arith.constant 0 : index
    %224 = vector.load %arg18[%c8, %c0_136] : memref<64x512xf32, #tpu.memory_space<vmem>>, vector<8x512xf32>
    %c0_137 = arith.constant 0 : index
    %c0_138 = arith.constant 0 : index
    %c0_139 = arith.constant 0 : index
    %225 = vector.load %arg11[%c0_137, %c0_138, %c0_139] : memref<2x128x512xf32, #tpu.memory_space<vmem>>, vector<1x128x512xf32>
    %226 = vector.shape_cast %225 : vector<1x128x512xf32> to vector<128x512xf32>
    %cst_140 = arith.constant dense<0.000000e+00> : vector<8x512xf32>
    %227 = tpu.matmul %222, %226, %cst_140 {dimension_numbers = #tpu.dot_dimension_numbers<[1], [0], [0], [1], [0, 0, 1, 1], [], []>} : vector<8x128xf32>, vector<128x512xf32>, vector<8x512xf32> -> vector<8x512xf32>
    %228 = arith.addf %224, %227 : vector<8x512xf32>
    %229 = vector.extract_strided_slice %228 {offsets = [0, 0], sizes = [8, 384], strides = [1, 1]} : vector<8x512xf32> to vector<8x384xf32>
    %230 = arith.negf %229 : vector<8x384xf32>
    %231 = math.exp %230 : vector<8x384xf32>
    %cst_141 = arith.constant 1.000000e+00 : f32
    %232 = vector.broadcast %cst_141 : f32 to vector<8x384xf32>
    %233 = arith.addf %232, %231 : vector<8x384xf32>
    %234 = arith.divf %232, %233 : vector<8x384xf32>
    %235 = vector.extract_strided_slice %228 {offsets = [0, 384], sizes = [8, 128], strides = [1, 1]} : vector<8x512xf32> to vector<8x128xf32>
    %236 = math.tanh %235 : vector<8x128xf32>
    %237 = vector.extract_strided_slice %234 {offsets = [0, 128], sizes = [8, 128], strides = [1, 1]} : vector<8x384xf32> to vector<8x128xf32>
    %238 = arith.mulf %237, %219 : vector<8x128xf32>
    %239 = vector.extract_strided_slice %234 {offsets = [0, 0], sizes = [8, 128], strides = [1, 1]} : vector<8x384xf32> to vector<8x128xf32>
    %240 = arith.mulf %239, %236 : vector<8x128xf32>
    %241 = arith.addf %238, %240 : vector<8x128xf32>
    %242 = vector.extract_strided_slice %234 {offsets = [0, 256], sizes = [8, 128], strides = [1, 1]} : vector<8x384xf32> to vector<8x128xf32>
    %243 = math.tanh %241 : vector<8x128xf32>
    %244 = arith.mulf %242, %243 : vector<8x128xf32>
    %c8_142 = arith.constant 8 : index
    %c0_143 = arith.constant 0 : index
    %245 = vector.load %arg19[%c8_142, %c0_143] : memref<64x128xf32, #tpu.memory_space<vmem>>, vector<8x128xf32>
    tpu.vector_store %arg19[%c8_142, %c0_143], %244 {strides = array<i32>} : memref<64x128xf32, #tpu.memory_space<vmem>>, vector<8x128xf32>,
    %c16 = arith.constant 16 : index
    %c0_144 = arith.constant 0 : index
    %246 = vector.load %arg18[%c16, %c0_144] : memref<64x512xf32, #tpu.memory_space<vmem>>, vector<8x512xf32>
    %c0_145 = arith.constant 0 : index
    %c0_146 = arith.constant 0 : index
    %c0_147 = arith.constant 0 : index
    %247 = vector.load %arg11[%c0_145, %c0_146, %c0_147] : memref<2x128x512xf32, #tpu.memory_space<vmem>>, vector<1x128x512xf32>
    %248 = vector.shape_cast %247 : vector<1x128x512xf32> to vector<128x512xf32>
    %cst_148 = arith.constant dense<0.000000e+00> : vector<8x512xf32>
    %249 = tpu.matmul %244, %248, %cst_148 {dimension_numbers = #tpu.dot_dimension_numbers<[1], [0], [0], [1], [0, 0, 1, 1], [], []>} : vector<8x128xf32>, vector<128x512xf32>, vector<8x512xf32> -> vector<8x512xf32>
    %250 = arith.addf %246, %249 : vector<8x512xf32>
    %251 = vector.extract_strided_slice %250 {offsets = [0, 0], sizes = [8, 384], strides = [1, 1]} : vector<8x512xf32> to vector<8x384xf32>
    %252 = arith.negf %251 : vector<8x384xf32>
    %253 = math.exp %252 : vector<8x384xf32>
    %cst_149 = arith.constant 1.000000e+00 : f32
    %254 = vector.broadcast %cst_149 : f32 to vector<8x384xf32>
    %255 = arith.addf %254, %253 : vector<8x384xf32>
    %256 = arith.divf %254, %255 : vector<8x384xf32>
    %257 = vector.extract_strided_slice %250 {offsets = [0, 384], sizes = [8, 128], strides = [1, 1]} : vector<8x512xf32> to vector<8x128xf32>
    %258 = math.tanh %257 : vector<8x128xf32>
    %259 = vector.extract_strided_slice %256 {offsets = [0, 128], sizes = [8, 128], strides = [1, 1]} : vector<8x384xf32> to vector<8x128xf32>
    %260 = arith.mulf %259, %241 : vector<8x128xf32>
    %261 = vector.extract_strided_slice %256 {offsets = [0, 0], sizes = [8, 128], strides = [1, 1]} : vector<8x384xf32> to vector<8x128xf32>
    %262 = arith.mulf %261, %258 : vector<8x128xf32>
    %263 = arith.addf %260, %262 : vector<8x128xf32>
    %264 = vector.extract_strided_slice %256 {offsets = [0, 256], sizes = [8, 128], strides = [1, 1]} : vector<8x384xf32> to vector<8x128xf32>
    %265 = math.tanh %263 : vector<8x128xf32>
    %266 = arith.mulf %264, %265 : vector<8x128xf32>
    %c16_150 = arith.constant 16 : index
    %c0_151 = arith.constant 0 : index
    %267 = vector.load %arg19[%c16_150, %c0_151] : memref<64x128xf32, #tpu.memory_space<vmem>>, vector<8x128xf32>
    tpu.vector_store %arg19[%c16_150, %c0_151], %266 {strides = array<i32>} : memref<64x128xf32, #tpu.memory_space<vmem>>, vector<8x128xf32>,
    %c24 = arith.constant 24 : index
    %c0_152 = arith.constant 0 : index
    %268 = vector.load %arg18[%c24, %c0_152] : memref<64x512xf32, #tpu.memory_space<vmem>>, vector<8x512xf32>
    %c0_153 = arith.constant 0 : index
    %c0_154 = arith.constant 0 : index
    %c0_155 = arith.constant 0 : index
    %269 = vector.load %arg11[%c0_153, %c0_154, %c0_155] : memref<2x128x512xf32, #tpu.memory_space<vmem>>, vector<1x128x512xf32>
    %270 = vector.shape_cast %269 : vector<1x128x512xf32> to vector<128x512xf32>
    %cst_156 = arith.constant dense<0.000000e+00> : vector<8x512xf32>
    %271 = tpu.matmul %266, %270, %cst_156 {dimension_numbers = #tpu.dot_dimension_numbers<[1], [0], [0], [1], [0, 0, 1, 1], [], []>} : vector<8x128xf32>, vector<128x512xf32>, vector<8x512xf32> -> vector<8x512xf32>
    %272 = arith.addf %268, %271 : vector<8x512xf32>
    %273 = vector.extract_strided_slice %272 {offsets = [0, 0], sizes = [8, 384], strides = [1, 1]} : vector<8x512xf32> to vector<8x384xf32>
    %274 = arith.negf %273 : vector<8x384xf32>
    %275 = math.exp %274 : vector<8x384xf32>
    %cst_157 = arith.constant 1.000000e+00 : f32
    %276 = vector.broadcast %cst_157 : f32 to vector<8x384xf32>
    %277 = arith.addf %276, %275 : vector<8x384xf32>
    %278 = arith.divf %276, %277 : vector<8x384xf32>
    %279 = vector.extract_strided_slice %272 {offsets = [0, 384], sizes = [8, 128], strides = [1, 1]} : vector<8x512xf32> to vector<8x128xf32>
    %280 = math.tanh %279 : vector<8x128xf32>
    %281 = vector.extract_strided_slice %278 {offsets = [0, 128], sizes = [8, 128], strides = [1, 1]} : vector<8x384xf32> to vector<8x128xf32>
    %282 = arith.mulf %281, %263 : vector<8x128xf32>
    %283 = vector.extract_strided_slice %278 {offsets = [0, 0], sizes = [8, 128], strides = [1, 1]} : vector<8x384xf32> to vector<8x128xf32>
    %284 = arith.mulf %283, %280 : vector<8x128xf32>
    %285 = arith.addf %282, %284 : vector<8x128xf32>
    %286 = vector.extract_strided_slice %278 {offsets = [0, 256], sizes = [8, 128], strides = [1, 1]} : vector<8x384xf32> to vector<8x128xf32>
    %287 = math.tanh %285 : vector<8x128xf32>
    %288 = arith.mulf %286, %287 : vector<8x128xf32>
    %c24_158 = arith.constant 24 : index
    %c0_159 = arith.constant 0 : index
    %289 = vector.load %arg19[%c24_158, %c0_159] : memref<64x128xf32, #tpu.memory_space<vmem>>, vector<8x128xf32>
    tpu.vector_store %arg19[%c24_158, %c0_159], %288 {strides = array<i32>} : memref<64x128xf32, #tpu.memory_space<vmem>>, vector<8x128xf32>,
    %c32 = arith.constant 32 : index
    %c0_160 = arith.constant 0 : index
    %290 = vector.load %arg18[%c32, %c0_160] : memref<64x512xf32, #tpu.memory_space<vmem>>, vector<8x512xf32>
    %c0_161 = arith.constant 0 : index
    %c0_162 = arith.constant 0 : index
    %c0_163 = arith.constant 0 : index
    %291 = vector.load %arg11[%c0_161, %c0_162, %c0_163] : memref<2x128x512xf32, #tpu.memory_space<vmem>>, vector<1x128x512xf32>
    %292 = vector.shape_cast %291 : vector<1x128x512xf32> to vector<128x512xf32>
    %cst_164 = arith.constant dense<0.000000e+00> : vector<8x512xf32>
    %293 = tpu.matmul %288, %292, %cst_164 {dimension_numbers = #tpu.dot_dimension_numbers<[1], [0], [0], [1], [0, 0, 1, 1], [], []>} : vector<8x128xf32>, vector<128x512xf32>, vector<8x512xf32> -> vector<8x512xf32>
    %294 = arith.addf %290, %293 : vector<8x512xf32>
    %295 = vector.extract_strided_slice %294 {offsets = [0, 0], sizes = [8, 384], strides = [1, 1]} : vector<8x512xf32> to vector<8x384xf32>
    %296 = arith.negf %295 : vector<8x384xf32>
    %297 = math.exp %296 : vector<8x384xf32>
    %cst_165 = arith.constant 1.000000e+00 : f32
    %298 = vector.broadcast %cst_165 : f32 to vector<8x384xf32>
    %299 = arith.addf %298, %297 : vector<8x384xf32>
    %300 = arith.divf %298, %299 : vector<8x384xf32>
    %301 = vector.extract_strided_slice %294 {offsets = [0, 384], sizes = [8, 128], strides = [1, 1]} : vector<8x512xf32> to vector<8x128xf32>
    %302 = math.tanh %301 : vector<8x128xf32>
    %303 = vector.extract_strided_slice %300 {offsets = [0, 128], sizes = [8, 128], strides = [1, 1]} : vector<8x384xf32> to vector<8x128xf32>
    %304 = arith.mulf %303, %285 : vector<8x128xf32>
    %305 = vector.extract_strided_slice %300 {offsets = [0, 0], sizes = [8, 128], strides = [1, 1]} : vector<8x384xf32> to vector<8x128xf32>
    %306 = arith.mulf %305, %302 : vector<8x128xf32>
    %307 = arith.addf %304, %306 : vector<8x128xf32>
    %308 = vector.extract_strided_slice %300 {offsets = [0, 256], sizes = [8, 128], strides = [1, 1]} : vector<8x384xf32> to vector<8x128xf32>
    %309 = math.tanh %307 : vector<8x128xf32>
    %310 = arith.mulf %308, %309 : vector<8x128xf32>
    %c32_166 = arith.constant 32 : index
    %c0_167 = arith.constant 0 : index
    %311 = vector.load %arg19[%c32_166, %c0_167] : memref<64x128xf32, #tpu.memory_space<vmem>>, vector<8x128xf32>
    tpu.vector_store %arg19[%c32_166, %c0_167], %310 {strides = array<i32>} : memref<64x128xf32, #tpu.memory_space<vmem>>, vector<8x128xf32>,
    %c40 = arith.constant 40 : index
    %c0_168 = arith.constant 0 : index
    %312 = vector.load %arg18[%c40, %c0_168] : memref<64x512xf32, #tpu.memory_space<vmem>>, vector<8x512xf32>
    %c0_169 = arith.constant 0 : index
    %c0_170 = arith.constant 0 : index
    %c0_171 = arith.constant 0 : index
    %313 = vector.load %arg11[%c0_169, %c0_170, %c0_171] : memref<2x128x512xf32, #tpu.memory_space<vmem>>, vector<1x128x512xf32>
    %314 = vector.shape_cast %313 : vector<1x128x512xf32> to vector<128x512xf32>
    %cst_172 = arith.constant dense<0.000000e+00> : vector<8x512xf32>
    %315 = tpu.matmul %310, %314, %cst_172 {dimension_numbers = #tpu.dot_dimension_numbers<[1], [0], [0], [1], [0, 0, 1, 1], [], []>} : vector<8x128xf32>, vector<128x512xf32>, vector<8x512xf32> -> vector<8x512xf32>
    %316 = arith.addf %312, %315 : vector<8x512xf32>
    %317 = vector.extract_strided_slice %316 {offsets = [0, 0], sizes = [8, 384], strides = [1, 1]} : vector<8x512xf32> to vector<8x384xf32>
    %318 = arith.negf %317 : vector<8x384xf32>
    %319 = math.exp %318 : vector<8x384xf32>
    %cst_173 = arith.constant 1.000000e+00 : f32
    %320 = vector.broadcast %cst_173 : f32 to vector<8x384xf32>
    %321 = arith.addf %320, %319 : vector<8x384xf32>
    %322 = arith.divf %320, %321 : vector<8x384xf32>
    %323 = vector.extract_strided_slice %316 {offsets = [0, 384], sizes = [8, 128], strides = [1, 1]} : vector<8x512xf32> to vector<8x128xf32>
    %324 = math.tanh %323 : vector<8x128xf32>
    %325 = vector.extract_strided_slice %322 {offsets = [0, 128], sizes = [8, 128], strides = [1, 1]} : vector<8x384xf32> to vector<8x128xf32>
    %326 = arith.mulf %325, %307 : vector<8x128xf32>
    %327 = vector.extract_strided_slice %322 {offsets = [0, 0], sizes = [8, 128], strides = [1, 1]} : vector<8x384xf32> to vector<8x128xf32>
    %328 = arith.mulf %327, %324 : vector<8x128xf32>
    %329 = arith.addf %326, %328 : vector<8x128xf32>
    %330 = vector.extract_strided_slice %322 {offsets = [0, 256], sizes = [8, 128], strides = [1, 1]} : vector<8x384xf32> to vector<8x128xf32>
    %331 = math.tanh %329 : vector<8x128xf32>
    %332 = arith.mulf %330, %331 : vector<8x128xf32>
    %c40_174 = arith.constant 40 : index
    %c0_175 = arith.constant 0 : index
    %333 = vector.load %arg19[%c40_174, %c0_175] : memref<64x128xf32, #tpu.memory_space<vmem>>, vector<8x128xf32>
    tpu.vector_store %arg19[%c40_174, %c0_175], %332 {strides = array<i32>} : memref<64x128xf32, #tpu.memory_space<vmem>>, vector<8x128xf32>,
    %c48 = arith.constant 48 : index
    %c0_176 = arith.constant 0 : index
    %334 = vector.load %arg18[%c48, %c0_176] : memref<64x512xf32, #tpu.memory_space<vmem>>, vector<8x512xf32>
    %c0_177 = arith.constant 0 : index
    %c0_178 = arith.constant 0 : index
    %c0_179 = arith.constant 0 : index
    %335 = vector.load %arg11[%c0_177, %c0_178, %c0_179] : memref<2x128x512xf32, #tpu.memory_space<vmem>>, vector<1x128x512xf32>
    %336 = vector.shape_cast %335 : vector<1x128x512xf32> to vector<128x512xf32>
    %cst_180 = arith.constant dense<0.000000e+00> : vector<8x512xf32>
    %337 = tpu.matmul %332, %336, %cst_180 {dimension_numbers = #tpu.dot_dimension_numbers<[1], [0], [0], [1], [0, 0, 1, 1], [], []>} : vector<8x128xf32>, vector<128x512xf32>, vector<8x512xf32> -> vector<8x512xf32>
    %338 = arith.addf %334, %337 : vector<8x512xf32>
    %339 = vector.extract_strided_slice %338 {offsets = [0, 0], sizes = [8, 384], strides = [1, 1]} : vector<8x512xf32> to vector<8x384xf32>
    %340 = arith.negf %339 : vector<8x384xf32>
    %341 = math.exp %340 : vector<8x384xf32>
    %cst_181 = arith.constant 1.000000e+00 : f32
    %342 = vector.broadcast %cst_181 : f32 to vector<8x384xf32>
    %343 = arith.addf %342, %341 : vector<8x384xf32>
    %344 = arith.divf %342, %343 : vector<8x384xf32>
    %345 = vector.extract_strided_slice %338 {offsets = [0, 384], sizes = [8, 128], strides = [1, 1]} : vector<8x512xf32> to vector<8x128xf32>
    %346 = math.tanh %345 : vector<8x128xf32>
    %347 = vector.extract_strided_slice %344 {offsets = [0, 128], sizes = [8, 128], strides = [1, 1]} : vector<8x384xf32> to vector<8x128xf32>
    %348 = arith.mulf %347, %329 : vector<8x128xf32>
    %349 = vector.extract_strided_slice %344 {offsets = [0, 0], sizes = [8, 128], strides = [1, 1]} : vector<8x384xf32> to vector<8x128xf32>
    %350 = arith.mulf %349, %346 : vector<8x128xf32>
    %351 = arith.addf %348, %350 : vector<8x128xf32>
    %352 = vector.extract_strided_slice %344 {offsets = [0, 256], sizes = [8, 128], strides = [1, 1]} : vector<8x384xf32> to vector<8x128xf32>
    %353 = math.tanh %351 : vector<8x128xf32>
    %354 = arith.mulf %352, %353 : vector<8x128xf32>
    %c48_182 = arith.constant 48 : index
    %c0_183 = arith.constant 0 : index
    %355 = vector.load %arg19[%c48_182, %c0_183] : memref<64x128xf32, #tpu.memory_space<vmem>>, vector<8x128xf32>
    tpu.vector_store %arg19[%c48_182, %c0_183], %354 {strides = array<i32>} : memref<64x128xf32, #tpu.memory_space<vmem>>, vector<8x128xf32>,
    %c56 = arith.constant 56 : index
    %c0_184 = arith.constant 0 : index
    %356 = vector.load %arg18[%c56, %c0_184] : memref<64x512xf32, #tpu.memory_space<vmem>>, vector<8x512xf32>
    %c0_185 = arith.constant 0 : index
    %c0_186 = arith.constant 0 : index
    %c0_187 = arith.constant 0 : index
    %357 = vector.load %arg11[%c0_185, %c0_186, %c0_187] : memref<2x128x512xf32, #tpu.memory_space<vmem>>, vector<1x128x512xf32>
    %358 = vector.shape_cast %357 : vector<1x128x512xf32> to vector<128x512xf32>
    %cst_188 = arith.constant dense<0.000000e+00> : vector<8x512xf32>
    %359 = tpu.matmul %354, %358, %cst_188 {dimension_numbers = #tpu.dot_dimension_numbers<[1], [0], [0], [1], [0, 0, 1, 1], [], []>} : vector<8x128xf32>, vector<128x512xf32>, vector<8x512xf32> -> vector<8x512xf32>
    %360 = arith.addf %356, %359 : vector<8x512xf32>
    %361 = vector.extract_strided_slice %360 {offsets = [0, 0], sizes = [8, 384], strides = [1, 1]} : vector<8x512xf32> to vector<8x384xf32>
    %362 = arith.negf %361 : vector<8x384xf32>
    %363 = math.exp %362 : vector<8x384xf32>
    %cst_189 = arith.constant 1.000000e+00 : f32
    %364 = vector.broadcast %cst_189 : f32 to vector<8x384xf32>
    %365 = arith.addf %364, %363 : vector<8x384xf32>
    %366 = arith.divf %364, %365 : vector<8x384xf32>
    %367 = vector.extract_strided_slice %360 {offsets = [0, 384], sizes = [8, 128], strides = [1, 1]} : vector<8x512xf32> to vector<8x128xf32>
    %368 = math.tanh %367 : vector<8x128xf32>
    %369 = vector.extract_strided_slice %366 {offsets = [0, 128], sizes = [8, 128], strides = [1, 1]} : vector<8x384xf32> to vector<8x128xf32>
    %370 = arith.mulf %369, %351 : vector<8x128xf32>
    %371 = vector.extract_strided_slice %366 {offsets = [0, 0], sizes = [8, 128], strides = [1, 1]} : vector<8x384xf32> to vector<8x128xf32>
    %372 = arith.mulf %371, %368 : vector<8x128xf32>
    %373 = arith.addf %370, %372 : vector<8x128xf32>
    %374 = vector.extract_strided_slice %366 {offsets = [0, 256], sizes = [8, 128], strides = [1, 1]} : vector<8x384xf32> to vector<8x128xf32>
    %375 = math.tanh %373 : vector<8x128xf32>
    %376 = arith.mulf %374, %375 : vector<8x128xf32>
    %c56_190 = arith.constant 56 : index
    %c0_191 = arith.constant 0 : index
    %377 = vector.load %arg19[%c56_190, %c0_191] : memref<64x128xf32, #tpu.memory_space<vmem>>, vector<8x128xf32>
    tpu.vector_store %arg19[%c56_190, %c0_191], %376 {strides = array<i32>} : memref<64x128xf32, #tpu.memory_space<vmem>>, vector<8x128xf32>,
    %c0_192 = arith.constant 0 : index
    %c0_193 = arith.constant 0 : index
    %c0_194 = arith.constant 0 : index
    %378 = vector.load %arg16[%c0_192, %c0_193, %c0_194] : memref<2x8x128xf32, #tpu.memory_space<vmem>>, vector<1x8x128xf32>
    %379 = vector.shape_cast %378 : vector<1x8x128xf32> to vector<8x128xf32>
    %380 = vector.shape_cast %376 : vector<8x128xf32> to vector<1x8x128xf32>
    tpu.vector_store %arg16[%c0_192, %c0_193, %c0_194], %380 {strides = array<i32>} : memref<2x8x128xf32, #tpu.memory_space<vmem>>, vector<1x8x128xf32>,
    %c0_195 = arith.constant 0 : index
    %c0_196 = arith.constant 0 : index
    %c0_197 = arith.constant 0 : index
    %381 = vector.load %arg17[%c0_195, %c0_196, %c0_197] : memref<2x8x128xf32, #tpu.memory_space<vmem>>, vector<1x8x128xf32>
    %382 = vector.shape_cast %381 : vector<1x8x128xf32> to vector<8x128xf32>
    %383 = vector.shape_cast %373 : vector<8x128xf32> to vector<1x8x128xf32>
    tpu.vector_store %arg17[%c0_195, %c0_196, %c0_197], %383 {strides = array<i32>} : memref<2x8x128xf32, #tpu.memory_space<vmem>>, vector<1x8x128xf32>,
    %c0_198 = arith.constant 0 : index
    %c0_199 = arith.constant 0 : index
    %384 = vector.load %arg19[%c0_198, %c0_199] : memref<64x128xf32, #tpu.memory_space<vmem>>, vector<64x128xf32>
    %c0_200 = arith.constant 0 : index
    %c0_201 = arith.constant 0 : index
    %c0_202 = arith.constant 0 : index
    %385 = vector.load %arg10[%c0_200, %c0_201, %c0_202] : memref<1x128x512xf32, #tpu.memory_space<vmem>>, vector<1x128x512xf32>
    %386 = vector.shape_cast %385 : vector<1x128x512xf32> to vector<128x512xf32>
    %cst_203 = arith.constant dense<0.000000e+00> : vector<64x512xf32>
    %387 = tpu.matmul %384, %386, %cst_203 {dimension_numbers = #tpu.dot_dimension_numbers<[1], [0], [0], [1], [0, 0, 1, 1], [], []>} : vector<64x128xf32>, vector<128x512xf32>, vector<64x512xf32> -> vector<64x512xf32>
    %c1_204 = arith.constant 1 : index
    %c0_205 = arith.constant 0 : index
    %c0_206 = arith.constant 0 : index
    %388 = vector.load %arg12[%c1_204, %c0_205, %c0_206] : memref<2x1x512xf32, #tpu.memory_space<vmem>>, vector<1x1x512xf32>
    %389 = vector.shape_cast %388 : vector<1x1x512xf32> to vector<1x512xf32>
    %390 = vector.broadcast %389 : vector<1x512xf32> to vector<64x512xf32>
    %391 = arith.addf %387, %390 : vector<64x512xf32>
    %c0_207 = arith.constant 0 : index
    %c0_208 = arith.constant 0 : index
    %392 = vector.load %arg18[%c0_207, %c0_208] : memref<64x512xf32, #tpu.memory_space<vmem>>, vector<64x512xf32>
    tpu.vector_store %arg18[%c0_207, %c0_208], %391 {strides = array<i32>} : memref<64x512xf32, #tpu.memory_space<vmem>>, vector<64x512xf32>,
    %c0_209 = arith.constant 0 : index
    %c0_210 = arith.constant 0 : index
    %393 = vector.load %arg18[%c0_209, %c0_210] : memref<64x512xf32, #tpu.memory_space<vmem>>, vector<8x512xf32>
    %c1_211 = arith.constant 1 : index
    %c0_212 = arith.constant 0 : index
    %c0_213 = arith.constant 0 : index
    %394 = vector.load %arg11[%c1_211, %c0_212, %c0_213] : memref<2x128x512xf32, #tpu.memory_space<vmem>>, vector<1x128x512xf32>
    %395 = vector.shape_cast %394 : vector<1x128x512xf32> to vector<128x512xf32>
    %cst_214 = arith.constant dense<0.000000e+00> : vector<8x512xf32>
    %396 = tpu.matmul %94, %395, %cst_214 {dimension_numbers = #tpu.dot_dimension_numbers<[1], [0], [0], [1], [0, 0, 1, 1], [], []>} : vector<8x128xf32>, vector<128x512xf32>, vector<8x512xf32> -> vector<8x512xf32>
    %397 = arith.addf %393, %396 : vector<8x512xf32>
    %398 = vector.extract_strided_slice %397 {offsets = [0, 0], sizes = [8, 384], strides = [1, 1]} : vector<8x512xf32> to vector<8x384xf32>
    %399 = arith.negf %398 : vector<8x384xf32>
    %400 = math.exp %399 : vector<8x384xf32>
    %cst_215 = arith.constant 1.000000e+00 : f32
    %401 = vector.broadcast %cst_215 : f32 to vector<8x384xf32>
    %402 = arith.addf %401, %400 : vector<8x384xf32>
    %403 = arith.divf %401, %402 : vector<8x384xf32>
    %404 = vector.extract_strided_slice %397 {offsets = [0, 384], sizes = [8, 128], strides = [1, 1]} : vector<8x512xf32> to vector<8x128xf32>
    %405 = math.tanh %404 : vector<8x128xf32>
    %406 = vector.extract_strided_slice %403 {offsets = [0, 128], sizes = [8, 128], strides = [1, 1]} : vector<8x384xf32> to vector<8x128xf32>
    %407 = arith.mulf %406, %188 : vector<8x128xf32>
    %408 = vector.extract_strided_slice %403 {offsets = [0, 0], sizes = [8, 128], strides = [1, 1]} : vector<8x384xf32> to vector<8x128xf32>
    %409 = arith.mulf %408, %405 : vector<8x128xf32>
    %410 = arith.addf %407, %409 : vector<8x128xf32>
    %411 = vector.extract_strided_slice %403 {offsets = [0, 256], sizes = [8, 128], strides = [1, 1]} : vector<8x384xf32> to vector<8x128xf32>
    %412 = math.tanh %410 : vector<8x128xf32>
    %413 = arith.mulf %411, %412 : vector<8x128xf32>
    %c0_216 = arith.constant 0 : index
    %c0_217 = arith.constant 0 : index
    %414 = vector.load %arg19[%c0_216, %c0_217] : memref<64x128xf32, #tpu.memory_space<vmem>>, vector<8x128xf32>
    tpu.vector_store %arg19[%c0_216, %c0_217], %413 {strides = array<i32>} : memref<64x128xf32, #tpu.memory_space<vmem>>, vector<8x128xf32>,
    %c8_218 = arith.constant 8 : index
    %c0_219 = arith.constant 0 : index
    %415 = vector.load %arg18[%c8_218, %c0_219] : memref<64x512xf32, #tpu.memory_space<vmem>>, vector<8x512xf32>
    %c1_220 = arith.constant 1 : index
    %c0_221 = arith.constant 0 : index
    %c0_222 = arith.constant 0 : index
    %416 = vector.load %arg11[%c1_220, %c0_221, %c0_222] : memref<2x128x512xf32, #tpu.memory_space<vmem>>, vector<1x128x512xf32>
    %417 = vector.shape_cast %416 : vector<1x128x512xf32> to vector<128x512xf32>
    %cst_223 = arith.constant dense<0.000000e+00> : vector<8x512xf32>
    %418 = tpu.matmul %413, %417, %cst_223 {dimension_numbers = #tpu.dot_dimension_numbers<[1], [0], [0], [1], [0, 0, 1, 1], [], []>} : vector<8x128xf32>, vector<128x512xf32>, vector<8x512xf32> -> vector<8x512xf32>
    %419 = arith.addf %415, %418 : vector<8x512xf32>
    %420 = vector.extract_strided_slice %419 {offsets = [0, 0], sizes = [8, 384], strides = [1, 1]} : vector<8x512xf32> to vector<8x384xf32>
    %421 = arith.negf %420 : vector<8x384xf32>
    %422 = math.exp %421 : vector<8x384xf32>
    %cst_224 = arith.constant 1.000000e+00 : f32
    %423 = vector.broadcast %cst_224 : f32 to vector<8x384xf32>
    %424 = arith.addf %423, %422 : vector<8x384xf32>
    %425 = arith.divf %423, %424 : vector<8x384xf32>
    %426 = vector.extract_strided_slice %419 {offsets = [0, 384], sizes = [8, 128], strides = [1, 1]} : vector<8x512xf32> to vector<8x128xf32>
    %427 = math.tanh %426 : vector<8x128xf32>
    %428 = vector.extract_strided_slice %425 {offsets = [0, 128], sizes = [8, 128], strides = [1, 1]} : vector<8x384xf32> to vector<8x128xf32>
    %429 = arith.mulf %428, %410 : vector<8x128xf32>
    %430 = vector.extract_strided_slice %425 {offsets = [0, 0], sizes = [8, 128], strides = [1, 1]} : vector<8x384xf32> to vector<8x128xf32>
    %431 = arith.mulf %430, %427 : vector<8x128xf32>
    %432 = arith.addf %429, %431 : vector<8x128xf32>
    %433 = vector.extract_strided_slice %425 {offsets = [0, 256], sizes = [8, 128], strides = [1, 1]} : vector<8x384xf32> to vector<8x128xf32>
    %434 = math.tanh %432 : vector<8x128xf32>
    %435 = arith.mulf %433, %434 : vector<8x128xf32>
    %c8_225 = arith.constant 8 : index
    %c0_226 = arith.constant 0 : index
    %436 = vector.load %arg19[%c8_225, %c0_226] : memref<64x128xf32, #tpu.memory_space<vmem>>, vector<8x128xf32>
    tpu.vector_store %arg19[%c8_225, %c0_226], %435 {strides = array<i32>} : memref<64x128xf32, #tpu.memory_space<vmem>>, vector<8x128xf32>,
    %c16_227 = arith.constant 16 : index
    %c0_228 = arith.constant 0 : index
    %437 = vector.load %arg18[%c16_227, %c0_228] : memref<64x512xf32, #tpu.memory_space<vmem>>, vector<8x512xf32>
    %c1_229 = arith.constant 1 : index
    %c0_230 = arith.constant 0 : index
    %c0_231 = arith.constant 0 : index
    %438 = vector.load %arg11[%c1_229, %c0_230, %c0_231] : memref<2x128x512xf32, #tpu.memory_space<vmem>>, vector<1x128x512xf32>
    %439 = vector.shape_cast %438 : vector<1x128x512xf32> to vector<128x512xf32>
    %cst_232 = arith.constant dense<0.000000e+00> : vector<8x512xf32>
    %440 = tpu.matmul %435, %439, %cst_232 {dimension_numbers = #tpu.dot_dimension_numbers<[1], [0], [0], [1], [0, 0, 1, 1], [], []>} : vector<8x128xf32>, vector<128x512xf32>, vector<8x512xf32> -> vector<8x512xf32>
    %441 = arith.addf %437, %440 : vector<8x512xf32>
    %442 = vector.extract_strided_slice %441 {offsets = [0, 0], sizes = [8, 384], strides = [1, 1]} : vector<8x512xf32> to vector<8x384xf32>
    %443 = arith.negf %442 : vector<8x384xf32>
    %444 = math.exp %443 : vector<8x384xf32>
    %cst_233 = arith.constant 1.000000e+00 : f32
    %445 = vector.broadcast %cst_233 : f32 to vector<8x384xf32>
    %446 = arith.addf %445, %444 : vector<8x384xf32>
    %447 = arith.divf %445, %446 : vector<8x384xf32>
    %448 = vector.extract_strided_slice %441 {offsets = [0, 384], sizes = [8, 128], strides = [1, 1]} : vector<8x512xf32> to vector<8x128xf32>
    %449 = math.tanh %448 : vector<8x128xf32>
    %450 = vector.extract_strided_slice %447 {offsets = [0, 128], sizes = [8, 128], strides = [1, 1]} : vector<8x384xf32> to vector<8x128xf32>
    %451 = arith.mulf %450, %432 : vector<8x128xf32>
    %452 = vector.extract_strided_slice %447 {offsets = [0, 0], sizes = [8, 128], strides = [1, 1]} : vector<8x384xf32> to vector<8x128xf32>
    %453 = arith.mulf %452, %449 : vector<8x128xf32>
    %454 = arith.addf %451, %453 : vector<8x128xf32>
    %455 = vector.extract_strided_slice %447 {offsets = [0, 256], sizes = [8, 128], strides = [1, 1]} : vector<8x384xf32> to vector<8x128xf32>
    %456 = math.tanh %454 : vector<8x128xf32>
    %457 = arith.mulf %455, %456 : vector<8x128xf32>
    %c16_234 = arith.constant 16 : index
    %c0_235 = arith.constant 0 : index
    %458 = vector.load %arg19[%c16_234, %c0_235] : memref<64x128xf32, #tpu.memory_space<vmem>>, vector<8x128xf32>
    tpu.vector_store %arg19[%c16_234, %c0_235], %457 {strides = array<i32>} : memref<64x128xf32, #tpu.memory_space<vmem>>, vector<8x128xf32>,
    %c24_236 = arith.constant 24 : index
    %c0_237 = arith.constant 0 : index
    %459 = vector.load %arg18[%c24_236, %c0_237] : memref<64x512xf32, #tpu.memory_space<vmem>>, vector<8x512xf32>
    %c1_238 = arith.constant 1 : index
    %c0_239 = arith.constant 0 : index
    %c0_240 = arith.constant 0 : index
    %460 = vector.load %arg11[%c1_238, %c0_239, %c0_240] : memref<2x128x512xf32, #tpu.memory_space<vmem>>, vector<1x128x512xf32>
    %461 = vector.shape_cast %460 : vector<1x128x512xf32> to vector<128x512xf32>
    %cst_241 = arith.constant dense<0.000000e+00> : vector<8x512xf32>
    %462 = tpu.matmul %457, %461, %cst_241 {dimension_numbers = #tpu.dot_dimension_numbers<[1], [0], [0], [1], [0, 0, 1, 1], [], []>} : vector<8x128xf32>, vector<128x512xf32>, vector<8x512xf32> -> vector<8x512xf32>
    %463 = arith.addf %459, %462 : vector<8x512xf32>
    %464 = vector.extract_strided_slice %463 {offsets = [0, 0], sizes = [8, 384], strides = [1, 1]} : vector<8x512xf32> to vector<8x384xf32>
    %465 = arith.negf %464 : vector<8x384xf32>
    %466 = math.exp %465 : vector<8x384xf32>
    %cst_242 = arith.constant 1.000000e+00 : f32
    %467 = vector.broadcast %cst_242 : f32 to vector<8x384xf32>
    %468 = arith.addf %467, %466 : vector<8x384xf32>
    %469 = arith.divf %467, %468 : vector<8x384xf32>
    %470 = vector.extract_strided_slice %463 {offsets = [0, 384], sizes = [8, 128], strides = [1, 1]} : vector<8x512xf32> to vector<8x128xf32>
    %471 = math.tanh %470 : vector<8x128xf32>
    %472 = vector.extract_strided_slice %469 {offsets = [0, 128], sizes = [8, 128], strides = [1, 1]} : vector<8x384xf32> to vector<8x128xf32>
    %473 = arith.mulf %472, %454 : vector<8x128xf32>
    %474 = vector.extract_strided_slice %469 {offsets = [0, 0], sizes = [8, 128], strides = [1, 1]} : vector<8x384xf32> to vector<8x128xf32>
    %475 = arith.mulf %474, %471 : vector<8x128xf32>
    %476 = arith.addf %473, %475 : vector<8x128xf32>
    %477 = vector.extract_strided_slice %469 {offsets = [0, 256], sizes = [8, 128], strides = [1, 1]} : vector<8x384xf32> to vector<8x128xf32>
    %478 = math.tanh %476 : vector<8x128xf32>
    %479 = arith.mulf %477, %478 : vector<8x128xf32>
    %c24_243 = arith.constant 24 : index
    %c0_244 = arith.constant 0 : index
    %480 = vector.load %arg19[%c24_243, %c0_244] : memref<64x128xf32, #tpu.memory_space<vmem>>, vector<8x128xf32>
    tpu.vector_store %arg19[%c24_243, %c0_244], %479 {strides = array<i32>} : memref<64x128xf32, #tpu.memory_space<vmem>>, vector<8x128xf32>,
    %c32_245 = arith.constant 32 : index
    %c0_246 = arith.constant 0 : index
    %481 = vector.load %arg18[%c32_245, %c0_246] : memref<64x512xf32, #tpu.memory_space<vmem>>, vector<8x512xf32>
    %c1_247 = arith.constant 1 : index
    %c0_248 = arith.constant 0 : index
    %c0_249 = arith.constant 0 : index
    %482 = vector.load %arg11[%c1_247, %c0_248, %c0_249] : memref<2x128x512xf32, #tpu.memory_space<vmem>>, vector<1x128x512xf32>
    %483 = vector.shape_cast %482 : vector<1x128x512xf32> to vector<128x512xf32>
    %cst_250 = arith.constant dense<0.000000e+00> : vector<8x512xf32>
    %484 = tpu.matmul %479, %483, %cst_250 {dimension_numbers = #tpu.dot_dimension_numbers<[1], [0], [0], [1], [0, 0, 1, 1], [], []>} : vector<8x128xf32>, vector<128x512xf32>, vector<8x512xf32> -> vector<8x512xf32>
    %485 = arith.addf %481, %484 : vector<8x512xf32>
    %486 = vector.extract_strided_slice %485 {offsets = [0, 0], sizes = [8, 384], strides = [1, 1]} : vector<8x512xf32> to vector<8x384xf32>
    %487 = arith.negf %486 : vector<8x384xf32>
    %488 = math.exp %487 : vector<8x384xf32>
    %cst_251 = arith.constant 1.000000e+00 : f32
    %489 = vector.broadcast %cst_251 : f32 to vector<8x384xf32>
    %490 = arith.addf %489, %488 : vector<8x384xf32>
    %491 = arith.divf %489, %490 : vector<8x384xf32>
    %492 = vector.extract_strided_slice %485 {offsets = [0, 384], sizes = [8, 128], strides = [1, 1]} : vector<8x512xf32> to vector<8x128xf32>
    %493 = math.tanh %492 : vector<8x128xf32>
    %494 = vector.extract_strided_slice %491 {offsets = [0, 128], sizes = [8, 128], strides = [1, 1]} : vector<8x384xf32> to vector<8x128xf32>
    %495 = arith.mulf %494, %476 : vector<8x128xf32>
    %496 = vector.extract_strided_slice %491 {offsets = [0, 0], sizes = [8, 128], strides = [1, 1]} : vector<8x384xf32> to vector<8x128xf32>
    %497 = arith.mulf %496, %493 : vector<8x128xf32>
    %498 = arith.addf %495, %497 : vector<8x128xf32>
    %499 = vector.extract_strided_slice %491 {offsets = [0, 256], sizes = [8, 128], strides = [1, 1]} : vector<8x384xf32> to vector<8x128xf32>
    %500 = math.tanh %498 : vector<8x128xf32>
    %501 = arith.mulf %499, %500 : vector<8x128xf32>
    %c32_252 = arith.constant 32 : index
    %c0_253 = arith.constant 0 : index
    %502 = vector.load %arg19[%c32_252, %c0_253] : memref<64x128xf32, #tpu.memory_space<vmem>>, vector<8x128xf32>
    tpu.vector_store %arg19[%c32_252, %c0_253], %501 {strides = array<i32>} : memref<64x128xf32, #tpu.memory_space<vmem>>, vector<8x128xf32>,
    %c40_254 = arith.constant 40 : index
    %c0_255 = arith.constant 0 : index
    %503 = vector.load %arg18[%c40_254, %c0_255] : memref<64x512xf32, #tpu.memory_space<vmem>>, vector<8x512xf32>
    %c1_256 = arith.constant 1 : index
    %c0_257 = arith.constant 0 : index
    %c0_258 = arith.constant 0 : index
    %504 = vector.load %arg11[%c1_256, %c0_257, %c0_258] : memref<2x128x512xf32, #tpu.memory_space<vmem>>, vector<1x128x512xf32>
    %505 = vector.shape_cast %504 : vector<1x128x512xf32> to vector<128x512xf32>
    %cst_259 = arith.constant dense<0.000000e+00> : vector<8x512xf32>
    %506 = tpu.matmul %501, %505, %cst_259 {dimension_numbers = #tpu.dot_dimension_numbers<[1], [0], [0], [1], [0, 0, 1, 1], [], []>} : vector<8x128xf32>, vector<128x512xf32>, vector<8x512xf32> -> vector<8x512xf32>
    %507 = arith.addf %503, %506 : vector<8x512xf32>
    %508 = vector.extract_strided_slice %507 {offsets = [0, 0], sizes = [8, 384], strides = [1, 1]} : vector<8x512xf32> to vector<8x384xf32>
    %509 = arith.negf %508 : vector<8x384xf32>
    %510 = math.exp %509 : vector<8x384xf32>
    %cst_260 = arith.constant 1.000000e+00 : f32
    %511 = vector.broadcast %cst_260 : f32 to vector<8x384xf32>
    %512 = arith.addf %511, %510 : vector<8x384xf32>
    %513 = arith.divf %511, %512 : vector<8x384xf32>
    %514 = vector.extract_strided_slice %507 {offsets = [0, 384], sizes = [8, 128], strides = [1, 1]} : vector<8x512xf32> to vector<8x128xf32>
    %515 = math.tanh %514 : vector<8x128xf32>
    %516 = vector.extract_strided_slice %513 {offsets = [0, 128], sizes = [8, 128], strides = [1, 1]} : vector<8x384xf32> to vector<8x128xf32>
    %517 = arith.mulf %516, %498 : vector<8x128xf32>
    %518 = vector.extract_strided_slice %513 {offsets = [0, 0], sizes = [8, 128], strides = [1, 1]} : vector<8x384xf32> to vector<8x128xf32>
    %519 = arith.mulf %518, %515 : vector<8x128xf32>
    %520 = arith.addf %517, %519 : vector<8x128xf32>
    %521 = vector.extract_strided_slice %513 {offsets = [0, 256], sizes = [8, 128], strides = [1, 1]} : vector<8x384xf32> to vector<8x128xf32>
    %522 = math.tanh %520 : vector<8x128xf32>
    %523 = arith.mulf %521, %522 : vector<8x128xf32>
    %c40_261 = arith.constant 40 : index
    %c0_262 = arith.constant 0 : index
    %524 = vector.load %arg19[%c40_261, %c0_262] : memref<64x128xf32, #tpu.memory_space<vmem>>, vector<8x128xf32>
    tpu.vector_store %arg19[%c40_261, %c0_262], %523 {strides = array<i32>} : memref<64x128xf32, #tpu.memory_space<vmem>>, vector<8x128xf32>,
    %c48_263 = arith.constant 48 : index
    %c0_264 = arith.constant 0 : index
    %525 = vector.load %arg18[%c48_263, %c0_264] : memref<64x512xf32, #tpu.memory_space<vmem>>, vector<8x512xf32>
    %c1_265 = arith.constant 1 : index
    %c0_266 = arith.constant 0 : index
    %c0_267 = arith.constant 0 : index
    %526 = vector.load %arg11[%c1_265, %c0_266, %c0_267] : memref<2x128x512xf32, #tpu.memory_space<vmem>>, vector<1x128x512xf32>
    %527 = vector.shape_cast %526 : vector<1x128x512xf32> to vector<128x512xf32>
    %cst_268 = arith.constant dense<0.000000e+00> : vector<8x512xf32>
    %528 = tpu.matmul %523, %527, %cst_268 {dimension_numbers = #tpu.dot_dimension_numbers<[1], [0], [0], [1], [0, 0, 1, 1], [], []>} : vector<8x128xf32>, vector<128x512xf32>, vector<8x512xf32> -> vector<8x512xf32>
    %529 = arith.addf %525, %528 : vector<8x512xf32>
    %530 = vector.extract_strided_slice %529 {offsets = [0, 0], sizes = [8, 384], strides = [1, 1]} : vector<8x512xf32> to vector<8x384xf32>
    %531 = arith.negf %530 : vector<8x384xf32>
    %532 = math.exp %531 : vector<8x384xf32>
    %cst_269 = arith.constant 1.000000e+00 : f32
    %533 = vector.broadcast %cst_269 : f32 to vector<8x384xf32>
    %534 = arith.addf %533, %532 : vector<8x384xf32>
    %535 = arith.divf %533, %534 : vector<8x384xf32>
    %536 = vector.extract_strided_slice %529 {offsets = [0, 384], sizes = [8, 128], strides = [1, 1]} : vector<8x512xf32> to vector<8x128xf32>
    %537 = math.tanh %536 : vector<8x128xf32>
    %538 = vector.extract_strided_slice %535 {offsets = [0, 128], sizes = [8, 128], strides = [1, 1]} : vector<8x384xf32> to vector<8x128xf32>
    %539 = arith.mulf %538, %520 : vector<8x128xf32>
    %540 = vector.extract_strided_slice %535 {offsets = [0, 0], sizes = [8, 128], strides = [1, 1]} : vector<8x384xf32> to vector<8x128xf32>
    %541 = arith.mulf %540, %537 : vector<8x128xf32>
    %542 = arith.addf %539, %541 : vector<8x128xf32>
    %543 = vector.extract_strided_slice %535 {offsets = [0, 256], sizes = [8, 128], strides = [1, 1]} : vector<8x384xf32> to vector<8x128xf32>
    %544 = math.tanh %542 : vector<8x128xf32>
    %545 = arith.mulf %543, %544 : vector<8x128xf32>
    %c48_270 = arith.constant 48 : index
    %c0_271 = arith.constant 0 : index
    %546 = vector.load %arg19[%c48_270, %c0_271] : memref<64x128xf32, #tpu.memory_space<vmem>>, vector<8x128xf32>
    tpu.vector_store %arg19[%c48_270, %c0_271], %545 {strides = array<i32>} : memref<64x128xf32, #tpu.memory_space<vmem>>, vector<8x128xf32>,
    %c56_272 = arith.constant 56 : index
    %c0_273 = arith.constant 0 : index
    %547 = vector.load %arg18[%c56_272, %c0_273] : memref<64x512xf32, #tpu.memory_space<vmem>>, vector<8x512xf32>
    %c1_274 = arith.constant 1 : index
    %c0_275 = arith.constant 0 : index
    %c0_276 = arith.constant 0 : index
    %548 = vector.load %arg11[%c1_274, %c0_275, %c0_276] : memref<2x128x512xf32, #tpu.memory_space<vmem>>, vector<1x128x512xf32>
    %549 = vector.shape_cast %548 : vector<1x128x512xf32> to vector<128x512xf32>
    %cst_277 = arith.constant dense<0.000000e+00> : vector<8x512xf32>
    %550 = tpu.matmul %545, %549, %cst_277 {dimension_numbers = #tpu.dot_dimension_numbers<[1], [0], [0], [1], [0, 0, 1, 1], [], []>} : vector<8x128xf32>, vector<128x512xf32>, vector<8x512xf32> -> vector<8x512xf32>
    %551 = arith.addf %547, %550 : vector<8x512xf32>
    %552 = vector.extract_strided_slice %551 {offsets = [0, 0], sizes = [8, 384], strides = [1, 1]} : vector<8x512xf32> to vector<8x384xf32>
    %553 = arith.negf %552 : vector<8x384xf32>
    %554 = math.exp %553 : vector<8x384xf32>
    %cst_278 = arith.constant 1.000000e+00 : f32
    %555 = vector.broadcast %cst_278 : f32 to vector<8x384xf32>
    %556 = arith.addf %555, %554 : vector<8x384xf32>
    %557 = arith.divf %555, %556 : vector<8x384xf32>
    %558 = vector.extract_strided_slice %551 {offsets = [0, 384], sizes = [8, 128], strides = [1, 1]} : vector<8x512xf32> to vector<8x128xf32>
    %559 = math.tanh %558 : vector<8x128xf32>
    %560 = vector.extract_strided_slice %557 {offsets = [0, 128], sizes = [8, 128], strides = [1, 1]} : vector<8x384xf32> to vector<8x128xf32>
    %561 = arith.mulf %560, %542 : vector<8x128xf32>
    %562 = vector.extract_strided_slice %557 {offsets = [0, 0], sizes = [8, 128], strides = [1, 1]} : vector<8x384xf32> to vector<8x128xf32>
    %563 = arith.mulf %562, %559 : vector<8x128xf32>
    %564 = arith.addf %561, %563 : vector<8x128xf32>
    %565 = vector.extract_strided_slice %557 {offsets = [0, 256], sizes = [8, 128], strides = [1, 1]} : vector<8x384xf32> to vector<8x128xf32>
    %566 = math.tanh %564 : vector<8x128xf32>
    %567 = arith.mulf %565, %566 : vector<8x128xf32>
    %c56_279 = arith.constant 56 : index
    %c0_280 = arith.constant 0 : index
    %568 = vector.load %arg19[%c56_279, %c0_280] : memref<64x128xf32, #tpu.memory_space<vmem>>, vector<8x128xf32>
    tpu.vector_store %arg19[%c56_279, %c0_280], %567 {strides = array<i32>} : memref<64x128xf32, #tpu.memory_space<vmem>>, vector<8x128xf32>,
    %c1_281 = arith.constant 1 : index
    %c0_282 = arith.constant 0 : index
    %c0_283 = arith.constant 0 : index
    %569 = vector.load %arg16[%c1_281, %c0_282, %c0_283] : memref<2x8x128xf32, #tpu.memory_space<vmem>>, vector<1x8x128xf32>
    %570 = vector.shape_cast %569 : vector<1x8x128xf32> to vector<8x128xf32>
    %571 = vector.shape_cast %567 : vector<8x128xf32> to vector<1x8x128xf32>
    tpu.vector_store %arg16[%c1_281, %c0_282, %c0_283], %571 {strides = array<i32>} : memref<2x8x128xf32, #tpu.memory_space<vmem>>, vector<1x8x128xf32>,
    %c1_284 = arith.constant 1 : index
    %c0_285 = arith.constant 0 : index
    %c0_286 = arith.constant 0 : index
    %572 = vector.load %arg17[%c1_284, %c0_285, %c0_286] : memref<2x8x128xf32, #tpu.memory_space<vmem>>, vector<1x8x128xf32>
    %573 = vector.shape_cast %572 : vector<1x8x128xf32> to vector<8x128xf32>
    %574 = vector.shape_cast %564 : vector<8x128xf32> to vector<1x8x128xf32>
    tpu.vector_store %arg17[%c1_284, %c0_285, %c0_286], %574 {strides = array<i32>} : memref<2x8x128xf32, #tpu.memory_space<vmem>>, vector<1x8x128xf32>,
    %c0_287 = arith.constant 0 : index
    %c0_288 = arith.constant 0 : index
    %575 = vector.load %arg19[%c0_287, %c0_288] : memref<64x128xf32, #tpu.memory_space<vmem>>, vector<64x128xf32>
    %c0_289 = arith.constant 0 : index
    %c0_290 = arith.constant 0 : index
    %576 = vector.load %arg13[%c0_289, %c0_290] : memref<128x128xf32, #tpu.memory_space<vmem>>, vector<128x128xf32>
    %cst_291 = arith.constant dense<0.000000e+00> : vector<64x128xf32>
    %577 = tpu.matmul %575, %576, %cst_291 {dimension_numbers = #tpu.dot_dimension_numbers<[1], [0], [0], [1], [0, 0, 1, 1], [], []>} : vector<64x128xf32>, vector<128x128xf32>, vector<64x128xf32> -> vector<64x128xf32>
    %c0_292 = arith.constant 0 : index
    %c0_293 = arith.constant 0 : index
    %578 = vector.load %arg14[%c0_292, %c0_293] : memref<1x128xf32, #tpu.memory_space<vmem>>, vector<1x128xf32>
    %579 = vector.broadcast %578 : vector<1x128xf32> to vector<64x128xf32>
    %580 = arith.addf %577, %579 : vector<64x128xf32>
    %c0_294 = arith.constant 0 : index
    %c0_295 = arith.constant 0 : index
    %581 = vector.load %arg15[%c0_294, %c0_295] : memref<64x128xf32, #tpu.memory_space<vmem>>, vector<64x128xf32>
    tpu.vector_store %arg15[%c0_294, %c0_295], %580 {strides = array<i32>} : memref<64x128xf32, #tpu.memory_space<vmem>>, vector<64x128xf32>,
    return
  }
  func.func @transform_0(%arg0: i32) -> (i32, i32) {
    %c0_i32 = arith.constant 0 : i32
    %c0_i32_0 = arith.constant 0 : i32
    %c0_i32_1 = arith.constant 0 : i32
    return %c0_i32, %c0_i32_0 : i32, i32
  }
  func.func @transform_1(%arg0: i32) -> (i32, i32) {
    %c0_i32 = arith.constant 0 : i32
    %c0_i32_0 = arith.constant 0 : i32
    %c0_i32_1 = arith.constant 0 : i32
    return %c0_i32, %c0_i32_0 : i32, i32
  }
  func.func @transform_2(%arg0: i32) -> (i32, i32, i32) {
    %c0_i32 = arith.constant 0 : i32
    %c0_i32_0 = arith.constant 0 : i32
    %c0_i32_1 = arith.constant 0 : i32
    %c0_i32_2 = arith.constant 0 : i32
    return %c0_i32, %c0_i32_0, %c0_i32_1 : i32, i32, i32
  }
  func.func @transform_3(%arg0: i32) -> (i32, i32, i32) {
    %c0_i32 = arith.constant 0 : i32
    %c0_i32_0 = arith.constant 0 : i32
    %c0_i32_1 = arith.constant 0 : i32
    %c0_i32_2 = arith.constant 0 : i32
    return %c0_i32, %c0_i32_0, %c0_i32_1 : i32, i32, i32
  }
  func.func @transform_4(%arg0: i32) -> (i32, i32, i32) {
    %c0_i32 = arith.constant 0 : i32
    %c0_i32_0 = arith.constant 0 : i32
    %c0_i32_1 = arith.constant 0 : i32
    %c0_i32_2 = arith.constant 0 : i32
    return %c0_i32, %c0_i32_0, %c0_i32_1 : i32, i32, i32
  }
  func.func @transform_5(%arg0: i32) -> (i32, i32, i32) {
    %c0_i32 = arith.constant 0 : i32
    %c0_i32_0 = arith.constant 0 : i32
    %c0_i32_1 = arith.constant 0 : i32
    %c0_i32_2 = arith.constant 0 : i32
    return %c0_i32, %c0_i32_0, %c0_i32_1 : i32, i32, i32
  }
  func.func @transform_6(%arg0: i32) -> (i32, i32, i32) {
    %c0_i32 = arith.constant 0 : i32
    %c0_i32_0 = arith.constant 0 : i32
    %c0_i32_1 = arith.constant 0 : i32
    %c0_i32_2 = arith.constant 0 : i32
    return %c0_i32, %c0_i32_0, %c0_i32_1 : i32, i32, i32
  }
  func.func @transform_7(%arg0: i32) -> (i32, i32, i32) {
    %c0_i32 = arith.constant 0 : i32
    %c0_i32_0 = arith.constant 0 : i32
    %c0_i32_1 = arith.constant 0 : i32
    %c0_i32_2 = arith.constant 0 : i32
    return %c0_i32, %c0_i32_0, %c0_i32_1 : i32, i32, i32
  }
  func.func @transform_8(%arg0: i32) -> (i32, i32) {
    %c0_i32 = arith.constant 0 : i32
    %c0_i32_0 = arith.constant 0 : i32
    %c0_i32_1 = arith.constant 0 : i32
    return %c0_i32, %c0_i32_0 : i32, i32
  }
  func.func @transform_9(%arg0: i32) -> (i32, i32, i32) {
    %c0_i32 = arith.constant 0 : i32
    %c0_i32_0 = arith.constant 0 : i32
    %c0_i32_1 = arith.constant 0 : i32
    %c0_i32_2 = arith.constant 0 : i32
    return %c0_i32, %c0_i32_0, %c0_i32_1 : i32, i32, i32
  }
  func.func @transform_10(%arg0: i32) -> (i32, i32, i32) {
    %c0_i32 = arith.constant 0 : i32
    %c0_i32_0 = arith.constant 0 : i32
    %c0_i32_1 = arith.constant 0 : i32
    %c0_i32_2 = arith.constant 0 : i32
    return %c0_i32, %c0_i32_0, %c0_i32_1 : i32, i32, i32
  }
  func.func @transform_11(%arg0: i32) -> (i32, i32, i32) {
    %c0_i32 = arith.constant 0 : i32
    %c0_i32_0 = arith.constant 0 : i32
    %c0_i32_1 = arith.constant 0 : i32
    %c0_i32_2 = arith.constant 0 : i32
    return %c0_i32, %c0_i32_0, %c0_i32_1 : i32, i32, i32
  }
  func.func @transform_12(%arg0: i32) -> (i32, i32) {
    %c0_i32 = arith.constant 0 : i32
    %c0_i32_0 = arith.constant 0 : i32
    %c0_i32_1 = arith.constant 0 : i32
    return %c0_i32, %c0_i32_0 : i32, i32
  }
  func.func @transform_13(%arg0: i32) -> (i32, i32) {
    %c0_i32 = arith.constant 0 : i32
    %c0_i32_0 = arith.constant 0 : i32
    %c0_i32_1 = arith.constant 0 : i32
    return %c0_i32, %c0_i32_0 : i32, i32
  }
  func.func @transform_14(%arg0: i32) -> (i32, i32) {
    %c0_i32 = arith.constant 0 : i32
    %c0_i32_0 = arith.constant 0 : i32
    %c0_i32_1 = arith.constant 0 : i32
    return %c0_i32, %c0_i32_0 : i32, i32
  }
  func.func @transform_15(%arg0: i32) -> (i32, i32, i32) {
    %c0_i32 = arith.constant 0 : i32
    %c0_i32_0 = arith.constant 0 : i32
    %c0_i32_1 = arith.constant 0 : i32
    %c0_i32_2 = arith.constant 0 : i32
    return %c0_i32, %c0_i32_0, %c0_i32_1 : i32, i32, i32
  }
  func.func @transform_16(%arg0: i32) -> (i32, i32, i32) {
    %c0_i32 = arith.constant 0 : i32
    %c0_i32_0 = arith.constant 0 : i32
    %c0_i32_1 = arith.constant 0 : i32
    %c0_i32_2 = arith.constant 0 : i32
    return %c0_i32, %c0_i32_0, %c0_i32_1 : i32, i32, i32
  }
}

</mosaic_0001>

<bundles_post_ra>
// kernel: namenet_forward.1
= control target key start
LH: loop header
LB: loop body
LE: loop exit
PB: predicated region body
PF: predicated region fallthrough
CT: control target
= control target key end

     0   :  { %s9666_s0 = inlined_call_operand.vmem [shape: f32[8,8], index: 0, kind: input, shape index: {}]   ;;  %s9667_s1 = inlined_call_operand.vmem [shape: s32[64,1], index: 1, kind: input, shape index: {}]   ;;  %s9668_s2 = inlined_call_operand.vmem [shape: f32[4,8,128], index: 2, kind: input, shape index: {}]   ;;  %s9669_s3 = inlined_call_operand.vmem [shape: f32[4,1,128], index: 3, kind: input, shape index: {}]   ;;  %s9670_s4 = inlined_call_operand.hbm [shape: f32[4,128,128], index: 4, kind: input, shape index: {}]   ;;  %s9671_s5 = inlined_call_operand.vmem [shape: f32[4,1,128], index: 5, kind: input, shape index: {}]   ;;  %s9672_s6 = inlined_call_operand.hbm [shape: f32[4,128,128], index: 6, kind: input, shape index: {}]   ;;  %s9673_s7 = inlined_call_operand.vmem [shape: f32[4,1,128], index: 7, kind: input, shape index: {}]   ;;  %s9674_s8 = inlined_call_operand.hbm [shape: f32[32,512], index: 8, kind: input, shape index: {}]   ;;  %s9675_s9 = inlined_call_operand.hbm [shape: f32[1,128,512], index: 9, kind: input, shape index: {}]   ;;  %s9676_s10 = inlined_call_operand.hbm [shape: f32[2,128,512], index: 10, kind: input, shape index: {}]   ;;  %s9677_s11 = inlined_call_operand.vmem [shape: f32[2,1,512], index: 11, kind: input, shape index: {}]   ;;  %s9678_s12 = inlined_call_operand.hbm [shape: f32[128,128], index: 12, kind: input, shape index: {}]   ;;  %s9679_s13 = inlined_call_operand.vmem [shape: f32[1,128], index: 13, kind: input, shape index: {}]   ;;  %s9680_s14 = inlined_call_operand.vmem [shape: f32[64,128], index: 14, kind: output, shape index: {0}]   ;;  %s9681_s15 = inlined_call_operand.hbm [shape: f32[2,8,128], index: 15, kind: output, shape index: {1}]   ;;  %s9682_s16 = inlined_call_operand.hbm [shape: f32[2,8,128], index: 16, kind: output, shape index: {2}]  }
   0x1   :  { %9885 = sst [smem:[#allocation75_spill]] %s9666_s0 }
   0x2   :  { %22 = vsyncpa [#allocation5], 0 }
   0x3   :  { %23 = vsyncpa [#allocation8], 0 }
   0x4   :  { %24 = vsyncpa [#allocation11], 0 }
   0x5   :  { %25 = vsyncpa [#allocation14], 0 }
   0x6   :  { %26 = vsyncpa [#allocation6], 0 }
   0x7   :  { %27 = vsyncpa [#allocation17], 0  ;;  %s7131_s21 = smov [#allocation7]  }
   0x8   :  { %s55_s22 = sshll.u32 %s7131_s21, 4  ;;  %s56_s22 = int_to_ptr.vmem [resolvable:$true] %s55_s22 }
   0x9   :  { %s6967_s23 = scalar_lea.vmem %s56_s22, 8192  ;;  %p6972_p1 = scmp.lt.s32.totalorder %s56_s22, %s56_s22 }
   0xa   :  { %p6968_p0 = scmp.ne.s32.totalorder %s56_s22, %s6967_s23  ;;  %p6973_p2 = scmp.lt.s32.totalorder %s6967_s23, %s6967_s23 }
   0xc   :  { %p6974_p3 = por %p6973_p2, %p6972_p1 }
   0xe   :  { %p6975_p4 = pnand %p6974_p3, %p6968_p0 }
  0x10   :  { %6978 = shalt.err (!%p6975_p4)
}
  0x11   :  { %s7132_s24 = smov 128   ;;  %s7133_s25 = smov 8  }
  0x12   :  { %61 = dma.hbm_to_vmem [thread:$0]  %s9672_s6, 8192, %s56_s22, [#allocation8], %s7132_s24, %s7132_s24, %s7133_s25  }
  0x13   :  { %s7134_s28 = smov [#allocation10]   ;;  %s7135_s30 = smov [#allocation4]  }
  0x14   :  { %s81_s29 = sshll.u32 %s7134_s28, 4  ;;  %s41_s0 = sshll.u32 %s7135_s30, 4  ;;  %s82_s29 = int_to_ptr.vmem [resolvable:$true] %s81_s29  ;;  %s42_s0 = int_to_ptr.vmem [resolvable:$true] %s41_s0 }
  0x15   :  { %s6987_s17 = scalar_lea.vmem %s82_s29, 8192  ;;  %p6992_p6 = scmp.lt.s32.totalorder %s82_s29, %s82_s29 }
  0x16   :  { %p6988_p5 = scmp.ne.s32.totalorder %s82_s29, %s6987_s17  ;;  %p6993_p7 = scmp.lt.s32.totalorder %s6987_s17, %s6987_s17 }
  0x18   :  { %p6994_p8 = por %p6993_p7, %p6992_p6 }
  0x1a   :  { %p6995_p9 = pnand %p6994_p8, %p6988_p5 }
  0x1c   :  { %6998 = shalt.err (!%p6995_p9)
}
  0x1d   :  { %s7136_s18 = smov 512   ;;  %s7137_s19 = smov 32  }
  0x1e   :  { %87 = dma.hbm_to_vmem [thread:$0]  %s9675_s9, 8192, %s82_s29, [#allocation11], %s7136_s18, %s7136_s18, %s7137_s19  }
  0x1f   :  { %s7007_s6 = scalar_lea.vmem %s42_s0, 8192  ;;  %p7012_p11 = scmp.lt.s32.totalorder %s42_s0, %s42_s0 }
  0x20   :  { %p7008_p10 = scmp.ne.s32.totalorder %s42_s0, %s7007_s6  ;;  %p7013_p12 = scmp.lt.s32.totalorder %s7007_s6, %s7007_s6 }
  0x22   :  { %p7014_p13 = por %p7013_p12, %p7012_p11 }
  0x24   :  { %p7015_p0 = pnand %p7014_p13, %p7008_p10 }
  0x26   :  { %7018 = shalt.err (!%p7015_p0)
}
  0x27   :  { %47 = dma.hbm_to_vmem [thread:$0]  %s9670_s4, 8192, %s42_s0, [#allocation5], %s7132_s24, %s7132_s24, %s7133_s25  }
  0x28   :  { %s7138_s26 = smov [#allocation9]   ;;  %s7139_s28 = smov [#allocation12]  }
  0x29   :  { %s69_s27 = sshll.u32 %s7138_s26, 4  ;;  %s93_s9 = sshll.u32 %s7139_s28, 4  ;;  %s70_s27 = int_to_ptr.vmem [resolvable:$true] %s69_s27  ;;  %s94_s9 = int_to_ptr.vmem [resolvable:$true] %s93_s9 }
  0x2a   :  { %s7027_s29 = scalar_lea.vmem %s70_s27, 2048  ;;  %p7032_p2 = scmp.lt.s32.totalorder %s70_s27, %s70_s27 }
  0x2b   :  { %p7028_p1 = scmp.ne.s32.totalorder %s70_s27, %s7027_s29  ;;  %p7033_p3 = scmp.lt.s32.totalorder %s7027_s29, %s7027_s29 }
  0x2d   :  { %p7034_p4 = por %p7033_p3, %p7032_p2 }
  0x2f   :  { %p7035_p5 = pnand %p7034_p4, %p7028_p1 }
  0x31   :  { %7038 = shalt.err (!%p7035_p5)
}
  0x32   :  { %75 = dma.hbm_to_vmem [thread:$0]  %s9674_s8, 2048, %s70_s27, [#allocation8], %s7136_s18, %s7136_s18, %s7137_s19  }
  0x33   :  { %s7047_s4 = scalar_lea.vmem %s94_s9, 16384  ;;  %p7052_p7 = scmp.lt.s32.totalorder %s94_s9, %s94_s9 }
  0x34   :  { %p7048_p6 = scmp.ne.s32.totalorder %s94_s9, %s7047_s4  ;;  %p7053_p8 = scmp.lt.s32.totalorder %s7047_s4, %s7047_s4 }
  0x36   :  { %p7054_p9 = por %p7053_p8, %p7052_p7 }
  0x38   :  { %p7055_p10 = pnand %p7054_p9, %p7048_p6 }
  0x3a   :  { %7058 = shalt.err (!%p7055_p10)
}
  0x3b   :  { %99 = dma.hbm_to_vmem [thread:$0]  %s9676_s10, 16384, %s94_s9, [#allocation11], %s7136_s18, %s7136_s18, %s7137_s19  }
  0x3c   :  { %s7140_s21 = smov [#allocation13]  }
  0x3d   :  { %s107_s6 = sshll.u32 %s7140_s21, 4  ;;  %s108_s6 = int_to_ptr.vmem [resolvable:$true] %s107_s6 }
  0x3e   :  { %s7067_s22 = scalar_lea.vmem %s108_s6, 2048  ;;  %p7072_p12 = scmp.lt.s32.totalorder %s108_s6, %s108_s6 }
  0x3f   :  { %p7068_p11 = scmp.ne.s32.totalorder %s108_s6, %s7067_s22  ;;  %p7073_p13 = scmp.lt.s32.totalorder %s7067_s22, %s7067_s22 }
  0x41   :  { %p7074_p0 = por %p7073_p13, %p7072_p12 }
  0x43   :  { %p7075_p1 = pnand %p7074_p0, %p7068_p11 }
  0x45   :  { %7078 = shalt.err (!%p7075_p1)
}
  0x46   :  { %113 = dma.hbm_to_vmem [thread:$0]  %s9678_s12, 2048, %s108_s6, [#allocation14], %s7132_s24, %s7132_s24, %s7133_s25  }
  0x47   :  { %7119 = dma.done.wait [#allocation5], 8192  }
  0x48   :  { %7120 = vsyncadd [#allocation5], 4294959104 }
  0x49   :  { %7121 = dma.done.wait [#allocation8], 10240  }
  0x4a   :  { %7122 = vsyncadd [#allocation8], 4294957056 }
  0x4b   :  { %7123 = dma.done.wait [#allocation11], 24576  }
  0x4c   :  { %7124 = vsyncadd [#allocation11], 4294942720 }
  0x4d   :  { %7125 = dma.done.wait [#allocation14], 2048  }
  0x4e   :  { %7126 = vsyncadd [#allocation14], 4294965248  ;;  %v9685_v0 = vmov 0.0   ;;  %vm7142_vm0 = vmmov 0   ;;  %vm143_vm1 = vcmask 64512   ;;  %v135_v1 = vld [vmem:[%s9668_s2] sm:$0xff] }
  0x4f   :  { %6318 = vmatprep.subr.mxu0 %v9685_v0  ;;  %6320 = vmatprep.mubr.msk.f32.mxu0 %vm7142_vm0, %v9685_v0  ;;  %s9886_s26 = sld [smem:[#allocation75_spill]]  ;;  %v6046_v3 = vld [vmem:[%s9668_s2 + $0x8] sm:$0xff]  ;;  %v232_v4 = vld [vmem:[#allocation4 + $0x78] sm:$0xff]  ;;  %v231_v5 = vld [vmem:[#allocation4 + $0x70] sm:$0xff]  ;;  %v7143_v62 = vmov 0   ;;  %vm1389_vm8 = vcmask 261120  }
  0x50   :  { %6323 = vmatprep.subr.mxu1 %v9685_v0  ;;  %6355 = vmatprep.mubr.msk.f32.mxu1 %vm7142_vm0, %v9685_v0  ;;  %v519_v6 = vld [vmem:[#allocation4 + $0xf8] sm:$0xff]  ;;  %v230_v7 = vld [vmem:[#allocation4 + $0x68] sm:$0xff]  ;;  %v518_v8 = vld [vmem:[#allocation4 + $0xf0] sm:$0xff]  ;;  %s7145_s27 = smov [#allocation16]  }
  0x51   :  { %6319 = vmatpush3.msra.mxu0 %v135_v1  ;;  %6324 = vmatpush3.msra.mxu1 %v232_v4  ;;  %v229_v9 = vld [vmem:[#allocation4 + $0x60] sm:$0xff]  ;;  %v517_v10 = vld [vmem:[#allocation4 + $0xe8] sm:$0xff]  ;;  %v228_v11 = vld [vmem:[#allocation4 + $0x58] sm:$0xff]  ;;  %s6019_s28 = sshll.u32 %s7145_s27, 4  ;;  %s6020_s28 = int_to_ptr.vmem [resolvable:$true] %s6019_s28 }
  0x52   :  { %6393 = vmatprep.subr.mxu0 %v9685_v0  ;;  %6325 = vmatprep.subr.mxu1 %v9685_v0  ;;  %v516_v12 = vld [vmem:[#allocation4 + $0xe0] sm:$0xff]  ;;  %v227_v13 = vld [vmem:[#allocation4 + $0x50] sm:$0xff]  ;;  %v515_v14 = vld [vmem:[#allocation4 + $0xd8] sm:$0xff] }
  0x53   :  { %6326 = vmatpush3.msra.mxu1 %v231_v5  ;;  %v226_v15 = vld [vmem:[#allocation4 + $0x48] sm:$0xff]  ;;  %v514_v16 = vld [vmem:[#allocation4 + $0xd0] sm:$0xff]  ;;  %v225_v17 = vld [vmem:[#allocation4 + $0x40] sm:$0xff]  ;;  %6678 = vset.pattern.permute.xlu1 %v7143_v62 }
  0x54   :  { %6327 = vmatprep.subr.mxu1 %v9685_v0  ;;  %v513_v18 = vld [vmem:[#allocation4 + $0xc8] sm:$0xff]  ;;  %v224_v19 = vld [vmem:[#allocation4 + $0x38] sm:$0xff]  ;;  %v512_v20 = vld [vmem:[#allocation4 + $0xc0] sm:$0xff]  ;;  %6677 = vset.pattern.permute.xlu0 %v7143_v62 }
  0x55   :  { %v7279_v2 = vld [vmem:[%s9886_s26] sm:$0xff]  ;;  %6328 = vmatpush3.msra.mxu1 %v230_v7  ;;  %v223_v21 = vld [vmem:[#allocation4 + $0x30] sm:$0xff]  ;;  %v222_v22 = vld [vmem:[#allocation4 + $0x28] sm:$0xff] }
  0x56   :  { %6321 = vmatmul.mubr.msk.f32.vlgmr.msra.gmra.mxu0 %vm143_vm1, %v7279_v2  ;;  %6329 = vmatprep.subr.mxu1 %v9685_v0  ;;  %v221_v23 = vld [vmem:[#allocation4 + $0x20] sm:$0xff]  ;;  %v220_v24 = vld [vmem:[#allocation4 + $0x18] sm:$0xff]  ;;  %v219_v25 = vld [vmem:[#allocation4 + $0x10] sm:$0xff] }
  0x57   :  { %6394 = vmatpush3.msra.mxu0 %v6046_v3  ;;  %6395 = vmatprep.mubr.msk.f32.mxu0 %vm7142_vm0, %v9685_v0  ;;  %v218_v26 = vld [vmem:[#allocation4 + $0x8] sm:$0xff]  ;;  %v511_v27 = vld [vmem:[#allocation4 + $0xb8] sm:$0xff]  ;;  %v217_v28 = vld [vmem:[#allocation4] sm:$0xff] }
  0x58   :  { %6398 = vmatprep.subr.mxu0 %v9685_v0  ;;  %6330 = vmatpush3.msra.mxu1 %v229_v9  ;;  %v510_v29 = vld [vmem:[#allocation4 + $0xb0] sm:$0xff]  ;;  %v509_v30 = vld [vmem:[#allocation4 + $0xa8] sm:$0xff]  ;;  %v508_v31 = vld [vmem:[#allocation4 + $0xa0] sm:$0xff] }
  0x59   :  { %6331 = vmatprep.subr.mxu1 %v9685_v0  ;;  %v507_v32 = vld [vmem:[#allocation4 + $0x98] sm:$0xff]  ;;  %v506_v33 = vld [vmem:[#allocation4 + $0x90] sm:$0xff]  ;;  %v505_v34 = vld [vmem:[#allocation4 + $0x88] sm:$0xff] }
  0x5a   :  { %6396 = vmatmul.mubr.msk.f32.vlgmr.msra.gmra.mxu0 %vm143_vm1, %v7279_v2  ;;  %6332 = vmatpush3.msra.mxu1 %v228_v11  ;;  %v504_v35 = vld [vmem:[#allocation4 + $0x80] sm:$0xff]  ;;  %v331_v39 = vld [vmem:[#allocation7 + $0x78] sm:$0xff]  ;;  %v330_v42 = vld [vmem:[#allocation7 + $0x70] sm:$0xff] }
  0x5b   :  { %6399 = vmatpush3.msra.mxu0 %v519_v6  ;;  %6333 = vmatprep.subr.mxu1 %v9685_v0  ;;  %v6040_v36 = vld [vmem:[%s9669_s3] ss:$0 sm:$0xff]  ;;  %v6048_v41 = vld [vmem:[%s9669_s3 + $0x1] ss:$0 sm:$0xff]  ;;  %v6056_v45 = vld [vmem:[%s9668_s2 + $0x10] sm:$0xff] }
  0x5c   :  { %6400 = vmatprep.subr.mxu0 %v9685_v0  ;;  %6334 = vmatpush3.msra.mxu1 %v227_v13  ;;  %v329_v47 = vld [vmem:[#allocation7 + $0x68] sm:$0xff]  ;;  %v328_v48 = vld [vmem:[#allocation7 + $0x60] sm:$0xff]  ;;  %v327_v49 = vld [vmem:[#allocation7 + $0x58] sm:$0xff] }
  0x5d   :  { %6401 = vmatpush3.msra.mxu0 %v518_v8  ;;  %6335 = vmatprep.subr.mxu1 %v9685_v0  ;;  %v326_v50 = vld [vmem:[#allocation7 + $0x50] sm:$0xff]  ;;  %v325_v51 = vld [vmem:[#allocation7 + $0x48] sm:$0xff]  ;;  %v324_v52 = vld [vmem:[#allocation7 + $0x40] sm:$0xff] }
  0x5e   :  { %6402 = vmatprep.subr.mxu0 %v9685_v0  ;;  %6336 = vmatpush3.msra.mxu1 %v226_v15  ;;  %v323_v53 = vld [vmem:[#allocation7 + $0x38] sm:$0xff]  ;;  %v322_v54 = vld [vmem:[#allocation7 + $0x30] sm:$0xff]  ;;  %v321_v55 = vld [vmem:[#allocation7 + $0x28] sm:$0xff] }
  0x5f   :  { %6403 = vmatpush3.msra.mxu0 %v517_v10  ;;  %6337 = vmatprep.subr.mxu1 %v9685_v0  ;;  %v320_v56 = vld [vmem:[#allocation7 + $0x20] sm:$0xff]  ;;  %v319_v57 = vld [vmem:[#allocation7 + $0x18] sm:$0xff]  ;;  %v318_v58 = vld [vmem:[#allocation7 + $0x10] sm:$0xff] }
  0x60   :  { %6404 = vmatprep.subr.mxu0 %v9685_v0  ;;  %6338 = vmatpush3.msra.mxu1 %v225_v17  ;;  %v317_v59 = vld [vmem:[#allocation7 + $0x8] sm:$0xff]  ;;  %v316_v60 = vld [vmem:[#allocation7] sm:$0xff]  ;;  %v1297_v61 = vld [vmem:[%s9667_s1 + $0x10] sm:$0xff] }
  0x61   :  { %6405 = vmatpush3.msra.mxu0 %v516_v12  ;;  %6339 = vmatprep.subr.mxu1 %v9685_v0  ;;  %v6042_v63 = vld [vmem:[%s9671_s5] ss:$0 sm:$0xff]  ;;  %v6051_v12 = vld [vmem:[%s9671_s5 + $0x1] ss:$0 sm:$0xff]  ;;  %v619_v17 = vld [vmem:[#allocation7 + $0xf0] sm:$0xff] }
  0x62   :  { %6406 = vmatprep.subr.mxu0 %v9685_v0  ;;  %6340 = vmatpush3.msra.mxu1 %v224_v19  ;;  %v905_v62 = vld [vmem:[#allocation7 + $0x150] sm:$0xff] }
  0x63   :  { %6407 = vmatpush3.msra.mxu0 %v515_v14  ;;  %6341 = vmatprep.subr.mxu1 %v9685_v0  ;;  %v620_v14 = vld [vmem:[#allocation7 + $0xf8] sm:$0xff] }
  0x64   :  { %6408 = vmatprep.subr.mxu0 %v9685_v0  ;;  %6342 = vmatpush3.msra.mxu1 %v223_v21  ;;  %v616_v21 = vld [vmem:[#allocation7 + $0xd8] sm:$0xff] }
  0x65   :  { %6409 = vmatpush3.msra.mxu0 %v514_v16  ;;  %6343 = vmatprep.subr.mxu1 %v9685_v0 }
  0x66   :  { %6410 = vmatprep.subr.mxu0 %v9685_v0  ;;  %6430 = vmatprep.mubr.msk.f32.mxu0 %vm7142_vm0, %v9685_v0 }
  0x67   :  { %6411 = vmatpush3.msra.mxu0 %v513_v18  ;;  %6344 = vmatpush3.msra.mxu1 %v222_v22  ;;  %v618_v18 = vld [vmem:[#allocation7 + $0xe8] sm:$0xff] }
  0x68   :  { %6412 = vmatprep.subr.mxu0 %v9685_v0  ;;  %6345 = vmatprep.subr.mxu1 %v9685_v0 }
  0x69   :  { %6413 = vmatpush3.msra.mxu0 %v512_v20  ;;  %6346 = vmatpush3.msra.mxu1 %v221_v23  ;;  %v617_v20 = vld [vmem:[#allocation7 + $0xe0] sm:$0xff]  ;;  %v615_v23 = vld [vmem:[#allocation7 + $0xd0] sm:$0xff] }
  0x6a   :  { %6414 = vmatprep.subr.mxu0 %v9685_v0  ;;  %6347 = vmatprep.subr.mxu1 %v9685_v0 }
  0x6b   :  { %6348 = vmatpush3.msra.mxu1 %v220_v24  ;;  %6415 = vmatpush3.msra.mxu0 %v511_v27  ;;  %v614_v24 = vld [vmem:[#allocation7 + $0xc8] sm:$0xff]  ;;  %v611_v27 = vld [vmem:[#allocation7 + $0xb0] sm:$0xff] }
  0x6c   :  { %6349 = vmatprep.subr.mxu1 %v9685_v0  ;;  %6416 = vmatprep.subr.mxu0 %v9685_v0 }
  0x6d   :  { %6350 = vmatpush3.msra.mxu1 %v219_v25  ;;  %6417 = vmatpush3.msra.mxu0 %v510_v29  ;;  %v613_v25 = vld [vmem:[#allocation7 + $0xc0] sm:$0xff] }
  0x6e   :  { %6351 = vmatprep.subr.mxu1 %v9685_v0  ;;  %6418 = vmatprep.subr.mxu0 %v9685_v0  ;;  %v609_v29 = vld [vmem:[#allocation7 + $0xa0] sm:$0xff] }
  0x6f   :  { %6352 = vmatpush3.msra.mxu1 %v218_v26  ;;  %6419 = vmatpush3.msra.mxu0 %v509_v30  ;;  %v612_v26 = vld [vmem:[#allocation7 + $0xb8] sm:$0xff] }
  0x70   :  { %6353 = vmatprep.subr.mxu1 %v9685_v0  ;;  %6420 = vmatprep.subr.mxu0 %v9685_v0  ;;  %v608_v30 = vld [vmem:[#allocation7 + $0x98] sm:$0xff] }
  0x71   :  { %6354 = vmatpush3.msra.mxu1 %v217_v28  ;;  %6421 = vmatpush3.msra.mxu0 %v508_v31  ;;  %v610_v28 = vld [vmem:[#allocation7 + $0xa8] sm:$0xff] }
  0x72   :  { %6358 = vmatprep.subr.mxu1 %v9685_v0  ;;  %6422 = vmatprep.subr.mxu0 %v9685_v0 }
  0x73   :  { %6423 = vmatpush3.msra.mxu0 %v507_v32  ;;  %1310 = vperm.xlu1 %6678, %v1297_v61   ;;  %v607_v32 = vld [vmem:[#allocation7 + $0x90] sm:$0xff]  ;;  %v906_v61 = vld [vmem:[#allocation7 + $0x158] sm:$0xff] }
  0x74   :  { %6424 = vmatprep.subr.mxu0 %v9685_v0 }
  0x75   :  { %6425 = vmatpush3.msra.mxu0 %v506_v33  ;;  %v606_v33 = vld [vmem:[#allocation7 + $0x88] sm:$0xff] }
  0x76   :  { %6426 = vmatprep.subr.mxu0 %v9685_v0 }
  0x77   :  { %6427 = vmatpush3.msra.mxu0 %v505_v34 }
  0x78   :  { %6428 = vmatprep.subr.mxu0 %v9685_v0 }
  0x79   :  { %6429 = vmatpush3.msra.mxu0 %v504_v35  ;;  %v605_v35 = vld [vmem:[#allocation7 + $0x80] sm:$0xff] }
  0x7a   :  { %6468 = vmatprep.subr.mxu0 %v9685_v0 }
 0x116   :  { %v213_v37 = vpop.f32.mrf.mxu0 }
 0x117   :  { %v7329_v38 = vadd.f32 %v6040_v36, %v213_v37  ;;  %v809_v36 = vld [vmem:[#allocation4 + $0x178] sm:$0xff] }
 0x118   :  { %v6322_v40 = vpop.f32.mrf.mxu0 }
 0x119   :  { %6356 = vmatmul.mubr.f32.vlgmr.msra.gmra.mxu1 %v7329_v38  ;;  %v807_v40 = vld [vmem:[#allocation4 + $0x168] sm:$0xff] }
 0x11a   :  { %v499_v43 = vpop.f32.mrf.mxu0  ;;  %6359 = vmatpush3.msra.mxu1 %v331_v39  ;;  %6390 = vmatprep.mubr.msk.f32.mxu1 %vm7142_vm0, %v9685_v0  ;;  %v808_v39 = vld [vmem:[#allocation4 + $0x170] sm:$0xff] }
 0x11b   :  { %v7337_v44 = vadd.f32 %v6048_v41, %v499_v43  ;;  %6360 = vmatprep.subr.mxu1 %v9685_v0  ;;  %v806_v41 = vld [vmem:[#allocation4 + $0x160] sm:$0xff]  ;;  %v804_v43 = vld [vmem:[#allocation4 + $0x150] sm:$0xff] }
 0x11c   :  { %v6397_v46 = vpop.f32.mrf.mxu0  ;;  %6361 = vmatpush3.msra.mxu1 %v330_v42  ;;  %v805_v42 = vld [vmem:[#allocation4 + $0x158] sm:$0xff] }
 0x11d   :  { %6431 = vmatmul.mubr.f32.vlgmr.msra.gmra.mxu0 %v7337_v44  ;;  %6362 = vmatprep.subr.mxu1 %v9685_v0  ;;  %v802_v46 = vld [vmem:[#allocation4 + $0x140] sm:$0xff] }
 0x11e   :  { %6469 = vmatpush3.msra.mxu0 %v6056_v45  ;;  %6470 = vmatprep.mubr.msk.f32.mxu0 %vm7142_vm0, %v9685_v0  ;;  %v803_v45 = vld [vmem:[#allocation4 + $0x148] sm:$0xff] }
 0x11f   :  { %6363 = vmatpush3.msra.mxu1 %v329_v47  ;;  %6508 = vmatprep.subr.mxu0 %v9685_v0  ;;  %v801_v47 = vld [vmem:[#allocation4 + $0x138] sm:$0xff] }
 0x120   :  { %6364 = vmatprep.subr.mxu1 %v9685_v0 }
 0x121   :  { %6471 = vmatmul.mubr.msk.f32.vlgmr.msra.gmra.mxu0 %vm143_vm1, %v7279_v2  ;;  %6365 = vmatpush3.msra.mxu1 %v328_v48  ;;  %v800_v48 = vld [vmem:[#allocation4 + $0x130] sm:$0xff] }
 0x122   :  { %6366 = vmatprep.subr.mxu1 %v9685_v0  ;;  %6540 = vmatprep.mubr.msk.f32.mxu0 %vm7142_vm0, %v9685_v0 }
 0x123   :  { %6367 = vmatpush3.msra.mxu1 %v327_v49  ;;  %v799_v49 = vld [vmem:[#allocation4 + $0x128] sm:$0xff] }
 0x124   :  { %6368 = vmatprep.subr.mxu1 %v9685_v0 }
 0x125   :  { %6369 = vmatpush3.msra.mxu1 %v326_v50  ;;  %v798_v50 = vld [vmem:[#allocation4 + $0x120] sm:$0xff] }
 0x126   :  { %6370 = vmatprep.subr.mxu1 %v9685_v0 }
 0x127   :  { %6371 = vmatpush3.msra.mxu1 %v325_v51  ;;  %v797_v51 = vld [vmem:[#allocation4 + $0x118] sm:$0xff] }
 0x128   :  { %6372 = vmatprep.subr.mxu1 %v9685_v0 }
 0x129   :  { %6373 = vmatpush3.msra.mxu1 %v324_v52  ;;  %v796_v52 = vld [vmem:[#allocation4 + $0x110] sm:$0xff] }
 0x12a   :  { %6374 = vmatprep.subr.mxu1 %v9685_v0 }
 0x12b   :  { %6375 = vmatpush3.msra.mxu1 %v323_v53  ;;  %v6058_v53 = vld [vmem:[%s9669_s3 + $0x2] ss:$0 sm:$0xff] }
 0x12c   :  { %6376 = vmatprep.subr.mxu1 %v9685_v0 }
 0x12d   :  { %6377 = vmatpush3.msra.mxu1 %v322_v54  ;;  %v795_v54 = vld [vmem:[#allocation4 + $0x108] sm:$0xff] }
 0x12e   :  { %6378 = vmatprep.subr.mxu1 %v9685_v0 }
 0x12f   :  { %6379 = vmatpush3.msra.mxu1 %v321_v55 }
 0x130   :  { %6380 = vmatprep.subr.mxu1 %v9685_v0 }
 0x131   :  { %6381 = vmatpush3.msra.mxu1 %v320_v56  ;;  %v794_v56 = vld [vmem:[#allocation4 + $0x100] sm:$0xff] }
 0x132   :  { %6382 = vmatprep.subr.mxu1 %v9685_v0 }
 0x133   :  { %6383 = vmatpush3.msra.mxu1 %v319_v57  ;;  %v910_v57 = vld [vmem:[#allocation7 + $0x178] sm:$0xff] }
 0x134   :  { %6384 = vmatprep.subr.mxu1 %v9685_v0  ;;  %6509 = vmatpush3.msra.mxu0 %v910_v57  ;;  %v1095_v57 = vld [vmem:[#allocation4 + $0x1d8] sm:$0xff] }
 0x135   :  { %6385 = vmatpush3.msra.mxu1 %v318_v58  ;;  %v909_v58 = vld [vmem:[#allocation7 + $0x170] sm:$0xff]  ;;  %6510 = vmatprep.subr.mxu0 %v9685_v0 }
 0x136   :  { %6386 = vmatprep.subr.mxu1 %v9685_v0  ;;  %6511 = vmatpush3.msra.mxu0 %v909_v58  ;;  %v1093_v58 = vld [vmem:[#allocation4 + $0x1c8] sm:$0xff] }
 0x137   :  { %6387 = vmatpush3.msra.mxu1 %v317_v59  ;;  %v908_v59 = vld [vmem:[#allocation7 + $0x168] sm:$0xff]  ;;  %6512 = vmatprep.subr.mxu0 %v9685_v0 }
 0x138   :  { %6388 = vmatprep.subr.mxu1 %v9685_v0  ;;  %6513 = vmatpush3.msra.mxu0 %v908_v59  ;;  %v1092_v59 = vld [vmem:[#allocation4 + $0x1c0] sm:$0xff] }
 0x139   :  { %6389 = vmatpush3.msra.mxu1 %v316_v60  ;;  %6514 = vmatprep.subr.mxu0 %v9685_v0  ;;  %v907_v60 = vld [vmem:[#allocation7 + $0x160] sm:$0xff] }
 0x13a   :  { %6433 = vmatprep.subr.mxu1 %v9685_v0  ;;  %6515 = vmatpush3.msra.mxu0 %v907_v60  ;;  %v1091_v60 = vld [vmem:[#allocation4 + $0x1b8] sm:$0xff] }
 0x13b   :  { %6516 = vmatprep.subr.mxu0 %v9685_v0 }
 0x13c   :  { %6517 = vmatpush3.msra.mxu0 %v906_v61  ;;  %v1090_v61 = vld [vmem:[#allocation4 + $0x1b0] sm:$0xff] }
 0x13d   :  { %6518 = vmatprep.subr.mxu0 %v9685_v0 }
 0x13e   :  { %6519 = vmatpush3.msra.mxu0 %v905_v62  ;;  %v1089_v62 = vld [vmem:[#allocation4 + $0x1a8] sm:$0xff] }
 0x13f   :  { %6520 = vmatprep.subr.mxu0 %v9685_v0 }
 0x1d9   :  { %v306_v1 = vpop.f32.mrf.mxu1 }
 0x1da   :  { %v307_v3 = vadd.f32 %v6042_v63, %v306_v1  ;;  %v904_v63 = vld [vmem:[#allocation7 + $0x148] sm:$0xff]  ;;  %v903_v1 = vld [vmem:[#allocation7 + $0x140] sm:$0xff] }
 0x1db   :  { %v6357_v4 = vpop.f32.mrf.mxu1  ;;  %6521 = vmatpush3.msra.mxu0 %v904_v63  ;;  %v1088_v63 = vld [vmem:[#allocation4 + $0x1a0] sm:$0xff] }
 0x1dc   :  { %v311_v5 = vmin.f32 %v307_v3, 0.0  ;;  %vm310_vm2 = vcmp.gt.f32.partialorder %v307_v3, 0.0  ;;  %6522 = vmatprep.subr.mxu0 %v9685_v0  ;;  %v901_v4 = vld [vmem:[#allocation7 + $0x130] sm:$0xff] }
 0x1dd   :  { %v594_v6 = vpop.f32.mrf.mxu0  ;;  %6523 = vmatpush3.msra.mxu0 %v903_v1  ;;  %v1087_v1 = vld [vmem:[#allocation4 + $0x198] sm:$0xff] }
 0x1de   :  { %v312_v7 = vmul.f32 1.442695, %v311_v5  ;;  %v595_v15 = vadd.f32 %v6051_v12, %v594_v6  ;;  %6524 = vmatprep.subr.mxu0 %v9685_v0  ;;  %v900_v5 = vld [vmem:[#allocation7 + $0x128] sm:$0xff]  ;;  %v899_v6 = vld [vmem:[#allocation7 + $0x120] sm:$0xff] }
 0x1df   :  { %v6432_v8 = vpop.f32.mrf.mxu0  ;;  %v6044_v12 = vld [vmem:[%s9673_s7] ss:$0 sm:$0xff] }
 0x1e0   :  { %6679 = vpow2.f32 %v312_v7  ;;  %v599_v19 = vmin.f32 %v595_v15, 0.0  ;;  %vm598_vm3 = vcmp.gt.f32.partialorder %v595_v15, 0.0  ;;  %v898_v7 = vld [vmem:[#allocation7 + $0x118] sm:$0xff]  ;;  %v897_v8 = vld [vmem:[#allocation7 + $0x110] sm:$0xff] }
 0x1e1   :  { %v7372_v9 = vpop.f32.mrf.mxu0 }
 0x1e2   :  { %v600_v22 = vmul.f32 1.442695, %v599_v19  ;;  %v7414_v55 = vadd.f32 %v6058_v53, %v7372_v9  ;;  %v896_v9 = vld [vmem:[#allocation7 + $0x108] sm:$0xff]  ;;  %v1098_v53 = vld [vmem:[#allocation4 + $0x1f0] sm:$0xff] }
 0x1e3   :  { %v6472_v10 = vpop.f32.mrf.mxu0 }
 0x1e4   :  { %6681 = vpow2.f32 %v600_v22  ;;  %v895_v10 = vld [vmem:[#allocation7 + $0x100] sm:$0xff] }
 0x1ed   :  { %v6680_v11 = vpop.eup %6679 }
 0x1ee   :  { %v6043_v13 = vadd.f32 -1.0, %v6680_v11  ;;  %v1295_v11 = vld [vmem:[%s9667_s1] sm:$0xff] }
 0x1ef   :  { %1304 = vperm.xlu0 %6677, %v1295_v11  }
 0x1f0   :  { %v315_v16 = vsel %vm310_vm2, %v307_v3, %v6043_v13  ;;  %v902_v3 = vld [vmem:[#allocation7 + $0x138] sm:$0xff] }
 0x1f1   :  { %6391 = vmatmul.mubr.f32.vlgmr.msra.gmra.mxu1 %v315_v16  ;;  %v6682_v31 = vpop.eup %6681  ;;  %6525 = vmatpush3.msra.mxu0 %v902_v3  ;;  %v1086_v3 = vld [vmem:[#allocation4 + $0x190] sm:$0xff] }
 0x1f2   :  { %6434 = vmatpush3.msra.mxu1 %v620_v14  ;;  %6465 = vmatprep.mubr.msk.f32.mxu1 %vm7142_vm0, %v9685_v0  ;;  %v6052_v34 = vadd.f32 -1.0, %v6682_v31  ;;  %v1299_v31 = vld [vmem:[%s9667_s1 + $0x20] sm:$0xff] }
 0x1f3   :  { %6435 = vmatprep.subr.mxu1 %v9685_v0  ;;  %6526 = vmatprep.subr.mxu0 %v9685_v0 }
 0x1f4   :  { %6436 = vmatpush3.msra.mxu1 %v619_v17  ;;  %v603_v37 = vsel %vm598_vm3, %v595_v15, %v6052_v34  ;;  %6527 = vmatpush3.msra.mxu0 %v901_v4  ;;  %v1085_v4 = vld [vmem:[#allocation4 + $0x188] sm:$0xff] }
 0x1f5   :  { %6437 = vmatprep.subr.mxu1 %v9685_v0  ;;  %6528 = vmatprep.subr.mxu0 %v9685_v0 }
 0x1f6   :  { %6438 = vmatpush3.msra.mxu1 %v618_v18  ;;  %6529 = vmatpush3.msra.mxu0 %v900_v5  ;;  %v1084_v5 = vld [vmem:[#allocation4 + $0x180] sm:$0xff] }
 0x1f7   :  { %6439 = vmatprep.subr.mxu1 %v9685_v0  ;;  %6530 = vmatprep.subr.mxu0 %v9685_v0 }
 0x1f8   :  { %6440 = vmatpush3.msra.mxu1 %v617_v20  ;;  %6531 = vmatpush3.msra.mxu0 %v899_v6  ;;  %v1364_v6 = vld [vmem:[#allocation9 + $0x68] sm:$0xff] }
 0x1f9   :  { %6441 = vmatprep.subr.mxu1 %v9685_v0  ;;  %6532 = vmatprep.subr.mxu0 %v9685_v0 }
 0x1fa   :  { %6442 = vmatpush3.msra.mxu1 %v616_v21  ;;  %6533 = vmatpush3.msra.mxu0 %v898_v7  ;;  %v6064_v7 = vld [vmem:[%s9673_s7 + $0x2] ss:$0 sm:$0xff] }
 0x1fb   :  { %6443 = vmatprep.subr.mxu1 %v9685_v0  ;;  %6534 = vmatprep.subr.mxu0 %v9685_v0 }
 0x1fc   :  { %6444 = vmatpush3.msra.mxu1 %v615_v23  ;;  %6535 = vmatpush3.msra.mxu0 %v897_v8 }
 0x1fd   :  { %6445 = vmatprep.subr.mxu1 %v9685_v0  ;;  %6536 = vmatprep.subr.mxu0 %v9685_v0 }
 0x1fe   :  { %6446 = vmatpush3.msra.mxu1 %v614_v24  ;;  %6537 = vmatpush3.msra.mxu0 %v896_v9  ;;  %v6054_v24 = vld [vmem:[%s9673_s7 + $0x1] ss:$0 sm:$0xff] }
 0x1ff   :  { %6447 = vmatprep.subr.mxu1 %v9685_v0  ;;  %6538 = vmatprep.subr.mxu0 %v9685_v0 }
 0x200   :  { %6448 = vmatpush3.msra.mxu1 %v613_v25  ;;  %6539 = vmatpush3.msra.mxu0 %v895_v10  ;;  %v1293_v10 = vlaneseq }
 0x201   :  { %6449 = vmatprep.subr.mxu1 %v9685_v0  ;;  %6543 = vmatprep.subr.mxu0 %v9685_v0 }
 0x202   :  { %6450 = vmatpush3.msra.mxu1 %v612_v26 }
 0x203   :  { %6451 = vmatprep.subr.mxu1 %v9685_v0 }
 0x204   :  { %6452 = vmatpush3.msra.mxu1 %v611_v27 }
 0x205   :  { %6453 = vmatprep.subr.mxu1 %v9685_v0 }
 0x206   :  { %6454 = vmatpush3.msra.mxu1 %v610_v28 }
 0x207   :  { %6455 = vmatprep.subr.mxu1 %v9685_v0 }
 0x208   :  { %6456 = vmatpush3.msra.mxu1 %v609_v29 }
 0x209   :  { %6457 = vmatprep.subr.mxu1 %v9685_v0 }
 0x20a   :  { %6458 = vmatpush3.msra.mxu1 %v608_v30  ;;  %v1296_v30 = vld [vmem:[%s9667_s1 + $0x8] sm:$0xff] }
 0x20b   :  { %6459 = vmatprep.subr.mxu1 %v9685_v0  ;;  %1307 = vperm.xlu0 %6677, %v1296_v30  }
 0x20c   :  { %6460 = vmatpush3.msra.mxu1 %v607_v32 }
 0x20d   :  { %6461 = vmatprep.subr.mxu1 %v9685_v0 }
 0x20e   :  { %6462 = vmatpush3.msra.mxu1 %v606_v33  ;;  %v1300_v33 = vld [vmem:[%s9667_s1 + $0x28] sm:$0xff] }
 0x20f   :  { %6463 = vmatprep.subr.mxu1 %v9685_v0 }
 0x210   :  { %6464 = vmatpush3.msra.mxu1 %v605_v35 }
 0x211   :  { %6466 = vmatmul.mubr.f32.vlgmr.msra.gmra.mxu1 %v603_v37  ;;  %6473 = vmatprep.subr.mxu1 %v9685_v0  ;;  %v1301_v37 = vld [vmem:[%s9667_s1 + $0x30] sm:$0xff] }
 0x212   :  { %6474 = vmatpush3.msra.mxu1 %v809_v36  ;;  %6505 = vmatprep.mubr.msk.f32.mxu1 %vm7142_vm0, %v9685_v0 }
 0x213   :  { %6475 = vmatprep.subr.mxu1 %v9685_v0 }
 0x214   :  { %6476 = vmatpush3.msra.mxu1 %v808_v39 }
 0x215   :  { %6477 = vmatprep.subr.mxu1 %v9685_v0 }
 0x216   :  { %6478 = vmatpush3.msra.mxu1 %v807_v40 }
 0x217   :  { %6479 = vmatprep.subr.mxu1 %v9685_v0 }
 0x218   :  { %6480 = vmatpush3.msra.mxu1 %v806_v41  ;;  %v1302_v41 = vld [vmem:[%s9667_s1 + $0x38] sm:$0xff] }
 0x219   :  { %6481 = vmatprep.subr.mxu1 %v9685_v0 }
 0x21a   :  { %6482 = vmatpush3.msra.mxu1 %v805_v42  ;;  %v6061_v42 = vld [vmem:[%s9671_s5 + $0x2] ss:$0 sm:$0xff] }
 0x21b   :  { %6483 = vmatprep.subr.mxu1 %v9685_v0 }
 0x21c   :  { %6484 = vmatpush3.msra.mxu1 %v804_v43 }
 0x21d   :  { %6485 = vmatprep.subr.mxu1 %v9685_v0 }
 0x21e   :  { %6486 = vmatpush3.msra.mxu1 %v803_v45 }
 0x21f   :  { %6487 = vmatprep.subr.mxu1 %v9685_v0 }
 0x220   :  { %6488 = vmatpush3.msra.mxu1 %v802_v46 }
 0x221   :  { %6489 = vmatprep.subr.mxu1 %v9685_v0 }
 0x222   :  { %6490 = vmatpush3.msra.mxu1 %v801_v47 }
 0x223   :  { %6491 = vmatprep.subr.mxu1 %v9685_v0 }
 0x224   :  { %6492 = vmatpush3.msra.mxu1 %v800_v48 }
 0x225   :  { %6493 = vmatprep.subr.mxu1 %v9685_v0 }
 0x226   :  { %6494 = vmatpush3.msra.mxu1 %v799_v49 }
 0x227   :  { %6495 = vmatprep.subr.mxu1 %v9685_v0 }
 0x228   :  { %6496 = vmatpush3.msra.mxu1 %v798_v50  ;;  %v6066_v50 = vld [vmem:[%s9668_s2 + $0x18] sm:$0xff] }
 0x229   :  { %6497 = vmatprep.subr.mxu1 %v9685_v0 }
 0x22a   :  { %6498 = vmatpush3.msra.mxu1 %v797_v51 }
 0x22b   :  { %6499 = vmatprep.subr.mxu1 %v9685_v0 }
 0x22c   :  { %6500 = vmatpush3.msra.mxu1 %v796_v52  ;;  %v1099_v52 = vld [vmem:[#allocation4 + $0x1f8] sm:$0xff] }
 0x22d   :  { %6501 = vmatprep.subr.mxu1 %v9685_v0 }
 0x22e   :  { %6502 = vmatpush3.msra.mxu1 %v795_v54  ;;  %v1097_v54 = vld [vmem:[#allocation4 + $0x1e8] sm:$0xff] }
 0x22f   :  { %6503 = vmatprep.subr.mxu1 %v9685_v0 }
 0x230   :  { %6504 = vmatpush3.msra.mxu1 %v794_v56  ;;  %v1096_v56 = vld [vmem:[#allocation4 + $0x1e0] sm:$0xff] }
 0x231   :  { %6506 = vmatmul.mubr.f32.vlgmr.msra.gmra.mxu1 %v7414_v55  ;;  %6583 = vmatprep.subr.mxu1 %v9685_v0 }
 0x232   :  { %6615 = vmatprep.mubr.msk.f32.mxu1 %vm7142_vm0, %v9685_v0 }
 0x26a   :  { %v1305_v9 = vpop.permute.xlu0 %1304 }
 0x2b1   :  { %v405_v13 = vpop.f32.mrf.mxu1 }
 0x2b2   :  { %v406_v14 = vadd.f32 %v6044_v12, %v405_v13  ;;  %v6068_v13 = vld [vmem:[%s9669_s3 + $0x3] ss:$0 sm:$0xff] }
 0x2b3   :  { %v6392_v15 = vpop.f32.mrf.mxu1 }
 0x2b4   :  { %v410_v16 = vmin.f32 %v406_v14, 0.0  ;;  %vm409_vm4 = vcmp.gt.f32.partialorder %v406_v14, 0.0 }
 0x2b6   :  { %v411_v17 = vmul.f32 1.442695, %v410_v16  ;;  %v7511_v16 = vand.u32 127, %v1293_v10 }
 0x2b8   :  { %6683 = vpow2.f32 %v411_v17  ;;  %vm1327_vm7 = vcmp.eq.s32.totalorder %v7511_v16, %v1305_v9 }
 0x2b9   :  { %v7519_v30 = vsel %vm1327_vm7, 1.0, %v9685_v0 }
 0x2c5   :  { %v6684_v18 = vpop.eup %6683 }
 0x2c6   :  { %v6045_v19 = vadd.f32 -1.0, %v6684_v18 }
 0x2c8   :  { %v414_v20 = vsel %vm409_vm4, %v406_v14, %v6045_v19  ;;  %v1363_v19 = vld [vmem:[#allocation9 + $0x60] sm:$0xff] }
 0x2c9   :  { %v415_v21 = vadd.f32 %v414_v20, %v7329_v38  ;;  %v1298_v38 = vld [vmem:[%s9667_s1 + $0x18] sm:$0xff]  ;;  %s7144_s1 = smov [#allocation15]  }
 0x2ca   :  { %1313 = vperm.xlu0 %6677, %v1298_v38   ;;  %v7521_v38 = vld [vmem:[#allocation12 + $0x1e8] sm:$0xff]  ;;  %s6007_s2 = sshll.u32 %s7144_s1, 4  ;;  %s6008_s2 = int_to_ptr.vmem [resolvable:$true] %s6007_s2 }
 0x2cb   :  { %v7445_v22 = vadd.f32 1e-06, %v415_v21  ;;  %v1360_v21 = vld [vmem:[#allocation9 + $0x48] sm:$0xff]  ;;  %s7079_s3 = scalar_lea.vmem %s6008_s2, 256  ;;  %p7084_p3 = scmp.lt.s32.totalorder %s6008_s2, %s6008_s2 }
 0x2cc   :  { %p7080_p2 = scmp.ne.s32.totalorder %s6008_s2, %s7079_s3  ;;  %p7085_p4 = scmp.lt.s32.totalorder %s7079_s3, %s7079_s3 }
 0x2cd   :  { %v417_v23 = vand.u32 2147483647, %v7445_v22 }
 0x2ce   :  { %1316 = vperm.xlu0 %6677, %v1299_v31   ;;  %v7524_v31 = vld [vmem:[#allocation12 + $0x1e0] sm:$0xff]  ;;  %p7086_p5 = por %p7085_p4, %p7084_p3 }
 0x2cf   :  { %418 = vadd.xlane.f32.xlu1 %v417_v23  ;;  %v1308_v23 = vpop.permute.xlu0 %1307 }
 0x2d0   :  { %vm1328_vm9 = vcmp.eq.s32.totalorder %v7511_v16, %v1308_v23  ;;  %v1677_v23 = vld [vmem:[#allocation12 + $0x8] sm:$0xff]  ;;  %p7087_p6 = pnand %p7086_p5, %p7080_p2 }
 0x2d1   :  { %v695_v25 = vpop.f32.mrf.mxu1 }
 0x2d2   :  { %v696_v26 = vadd.f32 %v6054_v24, %v695_v25  ;;  %1319 = vperm.xlu0 %6677, %v1300_v33   ;;  %v1359_v24 = vld [vmem:[#allocation9 + $0x40] sm:$0xff]  ;;  %v1356_v25 = vld [vmem:[#allocation9 + $0x28] sm:$0xff] }
 0x2d3   :  { %v6467_v27 = vpop.f32.mrf.mxu1  ;;  %v7531_v33 = vld [vmem:[#allocation12 + $0x1c0] sm:$0xff] }
 0x2d4   :  { %v700_v28 = vmin.f32 %v696_v26, 0.0  ;;  %vm699_vm5 = vcmp.gt.f32.partialorder %v696_v26, 0.0  ;;  %v1352_v27 = vld [vmem:[#allocation9 + $0x8] sm:$0xff] }
 0x2d6   :  { %v701_v29 = vmul.f32 1.442695, %v700_v28  ;;  %1322 = vperm.xlu0 %6677, %v1301_v37  }
 0x2d8   :  { %6685 = vpow2.f32 %v701_v29  ;;  %v1351_v29 = vld [vmem:[#allocation9] sm:$0xff] }
 0x2da   :  { %1325 = vperm.xlu0 %6677, %v1302_v41   ;;  %v7545_v41 = vld [vmem:[#allocation12 + $0x188] sm:$0xff] }
 0x2e5   :  { %v6686_v32 = vpop.eup %6685 }
 0x2e6   :  { %v6055_v34 = vadd.f32 -1.0, %v6686_v32  ;;  %v7526_v32 = vld [vmem:[#allocation12 + $0x1c8] sm:$0xff] }
 0x2e8   :  { %v704_v35 = vsel %vm699_vm5, %v696_v26, %v6055_v34  ;;  %v1355_v26 = vld [vmem:[#allocation9 + $0x20] sm:$0xff]  ;;  %v1311_v34 = vpop.permute.xlu1 %1310 }
 0x2e9   :  { %v705_v36 = vadd.f32 %v704_v35, %v7337_v44  ;;  %v7534_v35 = vsel %vm1328_vm9, 1.0, %v9685_v0  ;;  %vm1329_vm10 = vcmp.eq.s32.totalorder %v7511_v16, %v1311_v34  ;;  %v1191_v34 = vld [vmem:[#allocation7 + $0x1b0] sm:$0xff] }
 0x2eb   :  { %v7467_v39 = vadd.f32 1e-06, %v705_v36  ;;  %v7538_v36 = vld [vmem:[#allocation12 + $0x1a8] sm:$0xff] }
 0x2ed   :  { %9887 = vst [vmem:[#allocation24_spill] sm:$0xff] %v7467_v39  ;;  %v707_v40 = vand.u32 2147483647, %v7467_v39 }
 0x2ef   :  { %708 = vadd.xlane.f32.xlu1 %v707_v40  ;;  %v7542_v40 = vld [vmem:[#allocation12 + $0x1a0] sm:$0xff] }
 0x2f1   :  { %v884_v44 = vpop.f32.mrf.mxu1 }
 0x2f2   :  { %v885_v43 = vadd.f32 %v6061_v42, %v884_v44  ;;  %v7550_v42 = vld [vmem:[#allocation12 + $0x180] sm:$0xff] }
 0x2f3   :  { %v6507_v45 = vpop.f32.mrf.mxu1 }
 0x2f4   :  { %v889_v46 = vmin.f32 %v885_v43, 0.0  ;;  %vm888_vm6 = vcmp.gt.f32.partialorder %v885_v43, 0.0  ;;  %v7557_v45 = vld [vmem:[#allocation12 + $0x168] sm:$0xff] }
 0x2f6   :  { %v890_v47 = vmul.f32 1.442695, %v889_v46  ;;  %v7561_v46 = vld [vmem:[#allocation12 + $0x160] sm:$0xff] }
 0x2f8   :  { %6687 = vpow2.f32 %v890_v47 }
 0x305   :  { %v6688_v48 = vpop.eup %6687 }
 0x306   :  { %v6062_v49 = vadd.f32 -1.0, %v6688_v48 }
 0x308   :  { %v893_v51 = vsel %vm888_vm6, %v885_v43, %v6062_v49  ;;  %v7553_v43 = vsel %vm1329_vm10, 1.0, %v9685_v0  ;;  %v7565_v49 = vld [vmem:[#allocation12 + $0x148] sm:$0xff] }
 0x309   :  { %6541 = vmatmul.mubr.f32.vlgmr.msra.gmra.mxu0 %v893_v51  ;;  %v7570_v51 = vld [vmem:[#allocation12 + $0x140] sm:$0xff] }
 0x30a   :  { %6544 = vmatpush3.msra.mxu0 %v6066_v50  ;;  %6545 = vmatprep.mubr.msk.f32.mxu0 %vm7142_vm0, %v9685_v0 }
 0x30b   :  { %6548 = vmatprep.subr.mxu0 %v9685_v0 }
 0x30d   :  { %6546 = vmatmul.mubr.msk.f32.vlgmr.msra.gmra.mxu0 %vm143_vm1, %v7279_v2  ;;  %v1094_v2 = vld [vmem:[#allocation4 + $0x1d0] sm:$0xff] }
 0x30e   :  { %6549 = vmatpush3.msra.mxu0 %v1099_v52  ;;  %6580 = vmatprep.mubr.msk.f32.mxu0 %vm7142_vm0, %v9685_v0 }
 0x30f   :  { %6550 = vmatprep.subr.mxu0 %v9685_v0 }
 0x310   :  { %6551 = vmatpush3.msra.mxu0 %v1098_v53 }
 0x311   :  { %6552 = vmatprep.subr.mxu0 %v9685_v0 }
 0x312   :  { %6553 = vmatpush3.msra.mxu0 %v1097_v54  ;;  %v7578_v54 = vld [vmem:[#allocation12 + $0x128] sm:$0xff] }
 0x313   :  { %6554 = vmatprep.subr.mxu0 %v9685_v0 }
 0x314   :  { %6555 = vmatpush3.msra.mxu0 %v1096_v56 }
 0x315   :  { %6556 = vmatprep.subr.mxu0 %v9685_v0 }
 0x316   :  { %6557 = vmatpush3.msra.mxu0 %v1095_v57 }
 0x317   :  { %6558 = vmatprep.subr.mxu0 %v9685_v0 }
 0x318   :  { %6559 = vmatpush3.msra.mxu0 %v1094_v2  ;;  %v7583_v2 = vld [vmem:[#allocation12 + $0x120] sm:$0xff] }
 0x319   :  { %6560 = vmatprep.subr.mxu0 %v9685_v0 }
 0x31a   :  { %6561 = vmatpush3.msra.mxu0 %v1093_v58  ;;  %v7586_v58 = vld [vmem:[#allocation12 + $0x108] sm:$0xff] }
 0x31b   :  { %6562 = vmatprep.subr.mxu0 %v9685_v0 }
 0x31c   :  { %6563 = vmatpush3.msra.mxu0 %v1092_v59 }
 0x31d   :  { %6564 = vmatprep.subr.mxu0 %v9685_v0 }
 0x31e   :  { %6565 = vmatpush3.msra.mxu0 %v1091_v60  ;;  %v7593_v60 = vld [vmem:[#allocation12 + $0x100] sm:$0xff] }
 0x31f   :  { %6566 = vmatprep.subr.mxu0 %v9685_v0 }
 0x320   :  { %6567 = vmatpush3.msra.mxu0 %v1090_v61 }
 0x321   :  { %6568 = vmatprep.subr.mxu0 %v9685_v0 }
 0x322   :  { %6569 = vmatpush3.msra.mxu0 %v1089_v62  ;;  %v7601_v62 = vld [vmem:[#allocation12 + $0xe8] sm:$0xff] }
 0x323   :  { %6570 = vmatprep.subr.mxu0 %v9685_v0 }
 0x324   :  { %6571 = vmatpush3.msra.mxu0 %v1088_v63 }
 0x325   :  { %6572 = vmatprep.subr.mxu0 %v9685_v0 }
 0x326   :  { %6573 = vmatpush3.msra.mxu0 %v1087_v1  ;;  %v7605_v1 = vld [vmem:[#allocation12 + $0xe0] sm:$0xff] }
 0x327   :  { %6574 = vmatprep.subr.mxu0 %v9685_v0 }
 0x328   :  { %6575 = vmatpush3.msra.mxu0 %v1086_v3  ;;  %v7608_v3 = vld [vmem:[#allocation12 + $0xc8] sm:$0xff] }
 0x329   :  { %6576 = vmatprep.subr.mxu0 %v9685_v0 }
 0x32a   :  { %6577 = vmatpush3.msra.mxu0 %v1085_v4  ;;  %v7613_v4 = vld [vmem:[#allocation12 + $0xc0] sm:$0xff] }
 0x32b   :  { %6578 = vmatprep.subr.mxu0 %v9685_v0 }
 0x32c   :  { %6579 = vmatpush3.msra.mxu0 %v1084_v5 }
 0x32d   :  { %1438 = vmatprep.subr.mxu0 %v1364_v6  ;;  %v7620_v6 = vld [vmem:[#allocation12 + $0xa8] sm:$0xff] }
 0x345   :  { %v1314_v28 = vpop.permute.xlu0 %1313 }
 0x346   :  { %vm1330_vm11 = vcmp.eq.s32.totalorder %v7511_v16, %v1314_v28  ;;  %v1197_v28 = vld [vmem:[#allocation7 + $0x1e0] sm:$0xff] }
 0x347   :  { %v7574_v53 = vsel %vm1330_vm11, 1.0, %v9685_v0 }
 0x349   :  { %v1317_v37 = vpop.permute.xlu0 %1316 }
 0x34a   :  { %vm1331_vm13 = vcmp.eq.s32.totalorder %v7511_v16, %v1317_v37  ;;  %v1189_v37 = vld [vmem:[#allocation7 + $0x1a0] sm:$0xff] }
 0x34d   :  { %v1320_v50 = vpop.permute.xlu0 %1319 }
 0x34e   :  { %vm1332_vm14 = vcmp.eq.s32.totalorder %v7511_v16, %v1320_v50  ;;  %v7715_v50 = vshrl.u32 %v1293_v10, 7 }
 0x34f   :  { %v7616_v5 = vsel %vm1332_vm14, 1.0, %v9685_v0 }
 0x350   :  { %9888 = vst [vmem:[#allocation25_spill] sm:$0xff] %v7715_v50  ;;  %v9691_v39 = vsub.s32 3, %v7715_v50 }
 0x351   :  { %v1323_v63 = vpop.permute.xlu0 %1322 }
 0x352   :  { %vm1333_vm15 = vcmp.eq.s32.totalorder %v7511_v16, %v1323_v63 }
 0x355   :  { %v1326_v9 = vpop.permute.xlu0 %1325 }
 0x356   :  { %vm1334_vm0 = vcmp.eq.s32.totalorder %v7511_v16, %v1326_v9  ;;  %v1681_v16 = vld [vmem:[#allocation12 + $0x28] sm:$0xff] }
 0x358   :  { %v419_v48 = vpop.xlane.xlu1 %418 }
 0x359   :  { %v420_v57 = vadd.f32 1e-06, %v419_v48 }
 0x3c9   :  { %v985_v8 = vpop.f32.mrf.mxu0 }
 0x3ca   :  { %v7504_v11 = vadd.f32 %v6064_v7, %v985_v8  ;;  %v7624_v7 = vld [vmem:[#allocation12 + $0xa0] sm:$0xff]  ;;  %v7627_v8 = vld [vmem:[#allocation12 + $0x88] sm:$0xff] }
 0x3cb   :  { %v6542_v12 = vpop.f32.mrf.mxu0 }
 0x3cc   :  { %v990_v14 = vmin.f32 %v7504_v11, 0.0  ;;  %vm989_vm12 = vcmp.gt.f32.partialorder %v7504_v11, 0.0  ;;  %v7635_v12 = vsel %vm1333_vm15, 1.0, %v9685_v0 }
 0x3cd   :  { %v1079_v15 = vpop.f32.mrf.mxu0 }
 0x3ce   :  { %v991_v17 = vmul.f32 1.442695, %v990_v14  ;;  %v7513_v18 = vadd.f32 %v6068_v13, %v1079_v15  ;;  %v7639_v13 = vld [vmem:[#allocation12 + $0x68] sm:$0xff]  ;;  %v7643_v14 = vld [vmem:[#allocation12 + $0x60] sm:$0xff] }
 0x3cf   :  { %v6547_v20 = vpop.f32.mrf.mxu0  ;;  %v7646_v15 = vld [vmem:[#allocation12 + $0x48] sm:$0xff] }
 0x3d0   :  { %6689 = vpow2.f32 %v991_v17  ;;  %6581 = vmatmul.mubr.f32.vlgmr.msra.gmra.mxu0 %v7513_v18  ;;  %v7651_v17 = vld [vmem:[#allocation12 + $0x40] sm:$0xff] }
 0x3d1   :  { %1439 = vmatpush1.msra.mxu0 %v1363_v19  ;;  %1478 = vmatprep.mubr.f32.mxu0 %v9685_v0  ;;  %6691 = vrcp.f32 %v420_v57  ;;  %v7654_v19 = vsel %vm1334_vm0, 1.0, %v9685_v0  ;;  %v1680_v20 = vld [vmem:[#allocation12 + $0x20] sm:$0xff] }
 0x3d2   :  { %1440 = vmatprep.subr.mxu0 %v1360_v21 }
 0x3d3   :  { %1441 = vmatpush1.msra.mxu0 %v1359_v24  ;;  %v1676_v24 = vld [vmem:[#allocation12] sm:$0xff] }
 0x3d4   :  { %1442 = vmatprep.subr.mxu0 %v1356_v25 }
 0x3d5   :  { %1443 = vmatpush1.msra.mxu0 %v1355_v26  ;;  %v1199_v26 = vld [vmem:[#allocation7 + $0x1f0] sm:$0xff] }
 0x3d6   :  { %1444 = vmatprep.subr.mxu0 %v1352_v27  ;;  %v1198_v27 = vld [vmem:[#allocation7 + $0x1e8] sm:$0xff] }
 0x3d7   :  { %1445 = vmatpush1.msra.mxu0 %v1351_v29  ;;  %v1196_v29 = vld [vmem:[#allocation7 + $0x1d8] sm:$0xff] }
 0x3d8   :  { %6084 = vmatmul.mubr.msk.f32.vlgmr.msra.gmra.mxu0 %vm1389_vm8, %v7519_v30  ;;  %1740 = vmatprep.subr.mxu0 %v7521_v38 }
 0x3d9   :  { %1741 = vmatpush1.msra.mxu0 %v7524_v31  ;;  %1484 = vmatprep.mubr.f32.mxu0 %v9685_v0 }
 0x3da   :  { %1742 = vmatprep.subr.mxu0 %v7526_v32 }
 0x3db   :  { %1743 = vmatpush1.msra.mxu0 %v7531_v33 }
 0x3dc   :  { %6085 = vmatmul.mubr.msk.f32.gmra.mxu0 %vm1389_vm8, %v7534_v35  ;;  %1744 = vmatprep.subr.mxu0 %v7538_v36 }
 0x3dd   :  { %v6690_v44 = vpop.eup %6689  ;;  %1745 = vmatpush1.msra.mxu0 %v7542_v40  ;;  %1490 = vmatprep.mubr.f32.mxu0 %v9685_v0 }
 0x3de   :  { %1746 = vmatprep.subr.mxu0 %v7545_v41  ;;  %v6065_v47 = vadd.f32 -1.0, %v6690_v44  ;;  %v6692_v21 = vpop.eup %6691  ;;  %v1185_v44 = vld [vmem:[#allocation7 + $0x180] sm:$0xff] }
 0x3df   :  { %1747 = vmatpush1.msra.mxu0 %v7550_v42  ;;  %v7664_v25 = vmul.f32 %v6692_v21, %v7445_v22  ;;  %v1200_v22 = vld [vmem:[#allocation7 + $0x1f8] sm:$0xff] }
 0x3e0   :  { %6086 = vmatmul.mubr.msk.f32.gmra.mxu0 %vm1389_vm8, %v7553_v43  ;;  %1748 = vmatprep.subr.mxu0 %v7557_v45  ;;  %v994_v52 = vsel %vm989_vm12, %v7504_v11, %v6065_v47  ;;  %v7632_v11 = vld [vmem:[#allocation12 + $0x80] sm:$0xff] }
 0x3e1   :  { %1749 = vmatpush1.msra.mxu0 %v7561_v46  ;;  %1496 = vmatprep.mubr.f32.mxu0 %v9685_v0  ;;  %v995_v56 = vadd.f32 %v994_v52, %v7414_v55  ;;  %v7596_v55 = vsel %vm1331_vm13, 1.0, %v9685_v0 }
 0x3e2   :  { %1750 = vmatprep.subr.mxu0 %v7565_v49  ;;  %6584 = vmatpush3.msra.mxu1 %v1200_v22  ;;  %v1358_v22 = vld [vmem:[#allocation9 + $0x38] sm:$0xff] }
 0x3e3   :  { %1751 = vmatpush1.msra.mxu0 %v7570_v51  ;;  %v7588_v59 = vadd.f32 1e-06, %v995_v56  ;;  %6585 = vmatprep.subr.mxu1 %v9685_v0  ;;  %v7721_v56 = vld [vmem:[%s9677_s11] sm:$0xf] }
 0x3e4   :  { %6087 = vmatmul.mubr.msk.f32.gmra.mxu0 %vm1389_vm8, %v7574_v53  ;;  %1752 = vmatprep.subr.mxu0 %v7578_v54 }
 0x3e5   :  { %1753 = vmatpush1.msra.mxu0 %v7583_v2  ;;  %1502 = vmatprep.mubr.f32.mxu0 %v9685_v0  ;;  %v997_v61 = vand.u32 2147483647, %v7588_v59 }
 0x3e6   :  { %1754 = vmatprep.subr.mxu0 %v7586_v58  ;;  %6586 = vmatpush3.msra.mxu1 %v1199_v26 }
 0x3e7   :  { %1755 = vmatpush1.msra.mxu0 %v7593_v60  ;;  %998 = vadd.xlane.f32.xlu0 %v997_v61 }
 0x3e8   :  { %6088 = vmatmul.mubr.msk.f32.gmra.mxu0 %vm1389_vm8, %v7596_v55  ;;  %1756 = vmatprep.subr.mxu0 %v7601_v62 }
 0x3e9   :  { %1757 = vmatpush1.msra.mxu0 %v7605_v1  ;;  %1508 = vmatprep.mubr.f32.mxu0 %v9685_v0 }
 0x3ea   :  { %1758 = vmatprep.subr.mxu0 %v7608_v3  ;;  %6587 = vmatprep.subr.mxu1 %v9685_v0 }
 0x3eb   :  { %1759 = vmatpush1.msra.mxu0 %v7613_v4  ;;  %6588 = vmatpush3.msra.mxu1 %v1198_v27  ;;  %v1357_v27 = vld [vmem:[#allocation9 + $0x30] sm:$0xff] }
 0x3ec   :  { %6089 = vmatmul.mubr.msk.f32.gmra.mxu0 %vm1389_vm8, %v7616_v5  ;;  %1760 = vmatprep.subr.mxu0 %v7620_v6 }
 0x3ed   :  { %1761 = vmatpush1.msra.mxu0 %v7624_v7  ;;  %1514 = vmatprep.mubr.f32.mxu0 %v9685_v0 }
 0x3ee   :  { %1762 = vmatprep.subr.mxu0 %v7627_v8  ;;  %6589 = vmatprep.subr.mxu1 %v9685_v0 }
 0x3ef   :  { %1763 = vmatpush1.msra.mxu0 %v7632_v11  ;;  %6590 = vmatpush3.msra.mxu1 %v1197_v28 }
 0x3f0   :  { %6090 = vmatmul.mubr.msk.f32.gmra.mxu0 %vm1389_vm8, %v7635_v12  ;;  %1764 = vmatprep.subr.mxu0 %v7639_v13 }
 0x3f1   :  { %1765 = vmatpush1.msra.mxu0 %v7643_v14  ;;  %1520 = vmatprep.mubr.f32.mxu0 %v9685_v0 }
 0x3f2   :  { %1766 = vmatprep.subr.mxu0 %v7646_v15  ;;  %6591 = vmatprep.subr.mxu1 %v9685_v0 }
 0x3f3   :  { %1767 = vmatpush1.msra.mxu0 %v7651_v17  ;;  %6592 = vmatpush3.msra.mxu1 %v1196_v29  ;;  %v1354_v29 = vld [vmem:[#allocation9 + $0x18] sm:$0xff] }
 0x3f4   :  { %6091 = vmatmul.mubr.msk.f32.gmra.mxu0 %vm1389_vm8, %v7654_v19  ;;  %1768 = vmatprep.subr.mxu0 %v1681_v16 }
 0x3f5   :  { %1769 = vmatpush1.msra.mxu0 %v1680_v20  ;;  %1804 = vmatprep.mubr.f32.mxu0 %v9685_v0 }
 0x3f6   :  { %1770 = vmatprep.subr.mxu0 %v1677_v23  ;;  %6593 = vmatprep.subr.mxu1 %v9685_v0 }
 0x3f7   :  { %1771 = vmatpush1.msra.mxu0 %v1676_v24 }
 0x3f8   :  { %1805 = vmatmul.mubr.f32.vlgmr.msra.gmra.mxu0 %v7664_v25  ;;  %1979 = vmatprep.subr.mxu0 %v7521_v38  ;;  %v1195_v38 = vld [vmem:[#allocation7 + $0x1d0] sm:$0xff] }
 0x3f9   :  { %1980 = vmatpush1.msra.mxu0 %v7524_v31  ;;  %2043 = vmatprep.mubr.f32.mxu0 %v9685_v0  ;;  %v1194_v31 = vld [vmem:[#allocation7 + $0x1c8] sm:$0xff] }
 0x3fa   :  { %1981 = vmatprep.subr.mxu0 %v7526_v32  ;;  %6594 = vmatpush3.msra.mxu1 %v1195_v38  ;;  %v1193_v32 = vld [vmem:[#allocation7 + $0x1c0] sm:$0xff] }
 0x3fb   :  { %1982 = vmatpush1.msra.mxu0 %v7531_v33  ;;  %6595 = vmatprep.subr.mxu1 %v9685_v0  ;;  %v1192_v33 = vld [vmem:[#allocation7 + $0x1b8] sm:$0xff] }
 0x3fc   :  { %1983 = vmatprep.subr.mxu0 %v7538_v36  ;;  %6596 = vmatpush3.msra.mxu1 %v1194_v31  ;;  %v1190_v36 = vld [vmem:[#allocation7 + $0x1a8] sm:$0xff]  ;;  %v1353_v31 = vld [vmem:[#allocation9 + $0x10] sm:$0xff] }
 0x3fd   :  { %1984 = vmatpush1.msra.mxu0 %v7542_v40  ;;  %6597 = vmatprep.subr.mxu1 %v9685_v0  ;;  %v1188_v40 = vld [vmem:[#allocation7 + $0x198] sm:$0xff] }
 0x3fe   :  { %1985 = vmatprep.subr.mxu0 %v7545_v41  ;;  %6598 = vmatpush3.msra.mxu1 %v1193_v32  ;;  %v1187_v41 = vld [vmem:[#allocation7 + $0x190] sm:$0xff] }
 0x3ff   :  { %1986 = vmatpush1.msra.mxu0 %v7550_v42  ;;  %6599 = vmatprep.subr.mxu1 %v9685_v0  ;;  %v1186_v42 = vld [vmem:[#allocation7 + $0x188] sm:$0xff] }
 0x400   :  { %1987 = vmatprep.subr.mxu0 %v7557_v45  ;;  %6600 = vmatpush3.msra.mxu1 %v1192_v33  ;;  %v1366_v45 = vld [vmem:[#allocation9 + $0x78] sm:$0xff] }
 0x401   :  { %1988 = vmatpush1.msra.mxu0 %v7561_v46  ;;  %6601 = vmatprep.subr.mxu1 %v9685_v0  ;;  %v6071_v46 = vld [vmem:[%s9671_s5 + $0x3] ss:$0 sm:$0xff]  ;;  %v7766_v33 = vld [vmem:[#allocation12 + $0x1f8] sm:$0xff] }
 0x402   :  { %1989 = vmatprep.subr.mxu0 %v7565_v49  ;;  %6602 = vmatpush3.msra.mxu1 %v1191_v34 }
 0x403   :  { %1990 = vmatpush1.msra.mxu0 %v7570_v51  ;;  %6603 = vmatprep.subr.mxu1 %v9685_v0 }
 0x404   :  { %1991 = vmatprep.subr.mxu0 %v7578_v54  ;;  %6604 = vmatpush3.msra.mxu1 %v1190_v36  ;;  %v9684_v54 = vsub.s32 0, %v7715_v50  ;;  %v7768_v36 = vld [vmem:[#allocation12 + $0x1f0] sm:$0xff] }
 0x405   :  { %1992 = vmatpush1.msra.mxu0 %v7583_v2  ;;  %6605 = vmatprep.subr.mxu1 %v9685_v0  ;;  %v9683_v2 = vsub.s32 1, %v7715_v50 }
 0x406   :  { %1993 = vmatprep.subr.mxu0 %v7586_v58  ;;  %6606 = vmatpush3.msra.mxu1 %v1189_v37  ;;  %v7731_v10 = vrot.slane %v7721_v56, %v9684_v54 }
 0x407   :  { %1994 = vmatpush1.msra.mxu0 %v7593_v60  ;;  %6607 = vmatprep.subr.mxu1 %v9685_v0  ;;  %v7736_v61 = vrot.slane %v7721_v56, %v9683_v2  ;;  %v9688_v2 = vsub.s32 2, %v7715_v50 }
 0x408   :  { %1995 = vmatprep.subr.mxu0 %v7601_v62  ;;  %6608 = vmatpush3.msra.mxu1 %v1188_v40  ;;  %v7773_v40 = vld [vmem:[#allocation12 + $0x1d8] sm:$0xff] }
 0x409   :  { %1996 = vmatpush1.msra.mxu0 %v7605_v1  ;;  %6609 = vmatprep.subr.mxu1 %v9685_v0 }
 0x40a   :  { %1997 = vmatprep.subr.mxu0 %v7608_v3  ;;  %6610 = vmatpush3.msra.mxu1 %v1187_v41 }
 0x40b   :  { %1998 = vmatpush1.msra.mxu0 %v7613_v4  ;;  %6611 = vmatprep.subr.mxu1 %v9685_v0 }
 0x40c   :  { %1999 = vmatprep.subr.mxu0 %v7620_v6  ;;  %6612 = vmatpush3.msra.mxu1 %v1186_v42  ;;  %v7778_v42 = vld [vmem:[#allocation12 + $0x1d0] sm:$0xff] }
 0x40d   :  { %2000 = vmatpush1.msra.mxu0 %v7624_v7  ;;  %6613 = vmatprep.subr.mxu1 %v9685_v0 }
 0x40e   :  { %2001 = vmatprep.subr.mxu0 %v7627_v8  ;;  %6614 = vmatpush3.msra.mxu1 %v1185_v44 }
 0x40f   :  { %2002 = vmatpush1.msra.mxu0 %v7632_v11  ;;  %1551 = vmatprep.subr.mxu1 %v1366_v45  ;;  %v7785_v45 = vld [vmem:[#allocation12 + $0x1b8] sm:$0xff] }
 0x410   :  { %2003 = vmatprep.subr.mxu0 %v7639_v13 }
 0x411   :  { %2004 = vmatpush1.msra.mxu0 %v7643_v14 }
 0x412   :  { %2005 = vmatprep.subr.mxu0 %v7646_v15  ;;  %v1365_v15 = vld [vmem:[#allocation9 + $0x70] sm:$0xff] }
 0x413   :  { %2006 = vmatpush1.msra.mxu0 %v7651_v17 }
 0x414   :  { %2007 = vmatprep.subr.mxu0 %v1681_v16 }
 0x415   :  { %2008 = vmatpush1.msra.mxu0 %v1680_v20  ;;  %v1362_v20 = vld [vmem:[#allocation9 + $0x58] sm:$0xff] }
 0x416   :  { %2009 = vmatprep.subr.mxu0 %v1677_v23  ;;  %v1361_v23 = vld [vmem:[#allocation9 + $0x50] sm:$0xff] }
 0x417   :  { %2010 = vmatpush1.msra.mxu0 %v1676_v24 }
 0x490   :  { %v1174_v47 = vpop.f32.mrf.mxu0 }
 0x491   :  { %v1175_v48 = vadd.f32 %v6071_v46, %v1174_v47  ;;  %v7788_v47 = vld [vmem:[#allocation12 + $0x1b0] sm:$0xff] }
 0x492   :  { %v6582_v49 = vpop.f32.mrf.mxu0 }
 0x493   :  { %v1179_v51 = vmin.f32 %v1175_v48, 0.0  ;;  %vm1178_vm1 = vcmp.gt.f32.partialorder %v1175_v48, 0.0 }
 0x495   :  { %v1180_v52 = vmul.f32 1.442695, %v1179_v51  ;;  %v7799_v51 = vld [vmem:[#allocation12 + $0x190] sm:$0xff] }
 0x497   :  { %6693 = vpow2.f32 %v1180_v52 }
 0x498   :  { %v7723_v57 = vpop.f32.mrf.mxu0 }
 0x49a   :  { %v7726_v58 = vpop.f32.mrf.mxu0 }
 0x49c   :  { %v1486_v60 = vpop.f32.mrf.mxu0 }
 0x49d   :  { %v7739_v62 = vadd.f32 %v1486_v60, %v7731_v10  ;;  %v7806_v60 = vld [vmem:[#allocation12 + $0x178] sm:$0xff] }
 0x49e   :  { %v1488_v63 = vpop.f32.mrf.mxu0 }
 0x49f   :  { %v7742_v1 = vadd.f32 %v1488_v63, %v7736_v61 }
 0x4a0   :  { %v1492_v3 = vpop.f32.mrf.mxu0 }
 0x4a1   :  { %v7745_v4 = vadd.f32 %v1492_v3, %v7731_v10  ;;  %v7809_v3 = vld [vmem:[#allocation12 + $0x170] sm:$0xff] }
 0x4a2   :  { %v1494_v6 = vpop.f32.mrf.mxu0 }
 0x4a3   :  { %9889 = vst [vmem:[#allocation26_spill] sm:$0xff] %v7745_v4  ;;  %v7748_v7 = vadd.f32 %v1494_v6, %v7736_v61  ;;  %v7815_v6 = vld [vmem:[#allocation12 + $0x158] sm:$0xff]  ;;  %v8104_v4 = vld [vmem:[#allocation12 + $0x40] sm:$0xff] }
 0x4a4   :  { %v6694_v8 = vpop.eup %6693  ;;  %v1498_v9 = vpop.f32.mrf.mxu0  ;;  %9928 = vst [vmem:[#allocation64_spill] sm:$0xff] %v8104_v4 }
 0x4a5   :  { %9890 = vst [vmem:[#allocation27_spill] sm:$0xff] %v7748_v7  ;;  %v7751_v11 = vadd.f32 %v1498_v9, %v7731_v10  ;;  %v6072_v13 = vadd.f32 -1.0, %v6694_v8  ;;  %v7820_v8 = vld [vmem:[#allocation12 + $0x150] sm:$0xff]  ;;  %v7824_v9 = vld [vmem:[#allocation12 + $0x138] sm:$0xff]  ;;  %v8101_v7 = vld [vmem:[#allocation12 + $0x48] sm:$0xff] }
 0x4a6   :  { %v1500_v14 = vpop.f32.mrf.mxu0  ;;  %9927 = vst [vmem:[#allocation63_spill] sm:$0xff] %v8101_v7 }
 0x4a7   :  { %9891 = vst [vmem:[#allocation28_spill] sm:$0xff] %v7751_v11  ;;  %v7754_v17 = vadd.f32 %v1500_v14, %v7736_v61  ;;  %v1183_v16 = vsel %vm1178_vm1, %v1175_v48, %v6072_v13  ;;  %v7794_v48 = vld [vmem:[#allocation12 + $0x198] sm:$0xff]  ;;  %v7827_v13 = vld [vmem:[#allocation12 + $0x130] sm:$0xff] }
 0x4a8   :  { %v1504_v21 = vpop.f32.mrf.mxu0  ;;  %6616 = vmatmul.mubr.f32.vlgmr.msra.gmra.mxu1 %v1183_v16  ;;  %v7830_v14 = vld [vmem:[#allocation12 + $0x118] sm:$0xff]  ;;  %v7842_v16 = vld [vmem:[#allocation12 + $0xf0] sm:$0xff] }
 0x4a9   :  { %9892 = vst [vmem:[#allocation29_spill] sm:$0xff] %v7754_v17  ;;  %v7757_v24 = vadd.f32 %v1504_v21, %v7731_v10  ;;  %1552 = vmatpush1.msra.mxu1 %v1365_v15  ;;  %1591 = vmatprep.mubr.f32.mxu1 %v9685_v0  ;;  %v7839_v15 = vld [vmem:[#allocation12 + $0xf8] sm:$0xff] }
 0x4aa   :  { %v1506_v26 = vpop.f32.mrf.mxu0  ;;  %1553 = vmatprep.subr.mxu1 %v1362_v20  ;;  %v7845_v20 = vld [vmem:[#allocation12 + $0xd8] sm:$0xff] }
 0x4ab   :  { %9893 = vst [vmem:[#allocation30_spill] sm:$0xff] %v7757_v24  ;;  %v7761_v28 = vadd.f32 %v1506_v26, %v7736_v61  ;;  %1554 = vmatpush1.msra.mxu1 %v1361_v23  ;;  %v7854_v21 = vld [vmem:[#allocation12 + $0xb8] sm:$0xff]  ;;  %v7857_v23 = vld [vmem:[#allocation12 + $0xb0] sm:$0xff] }
 0x4ac   :  { %v1510_v38 = vpop.f32.mrf.mxu0  ;;  %1555 = vmatprep.subr.mxu1 %v1358_v22  ;;  %v7860_v22 = vld [vmem:[#allocation12 + $0x98] sm:$0xff] }
 0x4ad   :  { %9894 = vst [vmem:[#allocation31_spill] sm:$0xff] %v7761_v28  ;;  %v7764_v32 = vadd.f32 %v1510_v38, %v7731_v10  ;;  %1556 = vmatpush1.msra.mxu1 %v1357_v27  ;;  %v7869_v26 = vld [vmem:[#allocation12 + $0x78] sm:$0xff]  ;;  %v7872_v27 = vld [vmem:[#allocation12 + $0x70] sm:$0xff] }
 0x4ae   :  { %v1512_v34 = vpop.f32.mrf.mxu0  ;;  %1557 = vmatprep.subr.mxu1 %v1354_v29  ;;  %9902 = vst [vmem:[#allocation39_spill] sm:$0xff] %v7869_v26  ;;  %9903 = vst [vmem:[#allocation40_spill] sm:$0xff] %v7872_v27  ;;  %v7875_v29 = vld [vmem:[#allocation12 + $0x58] sm:$0xff] }
 0x4af   :  { %9895 = vst [vmem:[#allocation32_spill] sm:$0xff] %v7764_v32  ;;  %v7771_v37 = vadd.f32 %v1512_v34, %v7736_v61  ;;  %1558 = vmatpush1.msra.mxu1 %v1353_v31  ;;  %9904 = vst [vmem:[#allocation41_spill] sm:$0xff] %v7875_v29  ;;  %v7884_v38 = vld [vmem:[#allocation12 + $0x38] sm:$0xff]  ;;  %v7887_v31 = vld [vmem:[#allocation12 + $0x30] sm:$0xff] }
 0x4b0   :  { %v1516_v41 = vpop.f32.mrf.mxu0  ;;  %6092 = vmatmul.mubr.msk.f32.vlgmr.msra.gmra.mxu1 %vm1389_vm8, %v7519_v30  ;;  %1811 = vmatprep.subr.mxu1 %v7766_v33  ;;  %9906 = vst [vmem:[#allocation43_spill] sm:$0xff] %v7884_v38  ;;  %9907 = vst [vmem:[#allocation44_spill] sm:$0xff] %v7887_v31  ;;  %v7890_v34 = vld [vmem:[#allocation12 + $0x18] sm:$0xff] }
 0x4b1   :  { %9896 = vst [vmem:[#allocation33_spill] sm:$0xff] %v7771_v37  ;;  %v7781_v44 = vadd.f32 %v1516_v41, %v7731_v10  ;;  %1812 = vmatpush1.msra.mxu1 %v7768_v36  ;;  %1597 = vmatprep.mubr.f32.mxu1 %v9685_v0  ;;  %9908 = vst [vmem:[#allocation45_spill] sm:$0xff] %v7890_v34 }
 0x4b2   :  { %v1518_v46 = vpop.f32.mrf.mxu0  ;;  %1813 = vmatprep.subr.mxu1 %v7773_v40 }
 0x4b3   :  { %9897 = vst [vmem:[#allocation34_spill] sm:$0xff] %v7781_v44  ;;  %v7791_v30 = vadd.f32 %v1518_v46, %v7736_v61  ;;  %1814 = vmatpush1.msra.mxu1 %v7778_v42 }
 0x4b4   :  { %v1522_v49 = vpop.f32.mrf.mxu0  ;;  %6093 = vmatmul.mubr.msk.f32.gmra.mxu1 %vm1389_vm8, %v7534_v35  ;;  %1815 = vmatprep.subr.mxu1 %v7785_v45 }
 0x4b5   :  { %9898 = vst [vmem:[#allocation35_spill] sm:$0xff] %v7791_v30  ;;  %v7802_v52 = vadd.f32 %v1522_v49, %v7731_v10  ;;  %1816 = vmatpush1.msra.mxu1 %v7788_v47  ;;  %1603 = vmatprep.mubr.f32.mxu1 %v9685_v0  ;;  %v1380_v30 = vrot.slane %v7721_v56, %v9688_v2 }
 0x4b6   :  { %v1524_v63 = vpop.f32.mrf.mxu0  ;;  %1817 = vmatprep.subr.mxu1 %v7794_v48 }
 0x4b7   :  { %9899 = vst [vmem:[#allocation36_spill] sm:$0xff] %v7802_v52  ;;  %v7812_v35 = vadd.f32 %v1524_v63, %v7736_v61  ;;  %1818 = vmatpush1.msra.mxu1 %v7799_v51  ;;  %v1481_v52 = vadd.f32 %v7723_v57, %v7731_v10 }
 0x4b8   :  { %6094 = vmatmul.mubr.msk.f32.gmra.mxu1 %vm1389_vm8, %v7553_v43  ;;  %1819 = vmatprep.subr.mxu1 %v7806_v60  ;;  %v7835_v43 = vld [vmem:[#allocation12 + $0x110] sm:$0xff] }
 0x4b9   :  { %9900 = vst [vmem:[#allocation37_spill] sm:$0xff] %v7812_v35  ;;  %1820 = vmatpush1.msra.mxu1 %v7809_v3  ;;  %1609 = vmatprep.mubr.f32.mxu1 %v9685_v0 }
 0x4ba   :  { %1821 = vmatprep.subr.mxu1 %v7815_v6 }
 0x4bb   :  { %1822 = vmatpush1.msra.mxu1 %v7820_v8 }
 0x4bc   :  { %6095 = vmatmul.mubr.msk.f32.gmra.mxu1 %vm1389_vm8, %v7574_v53  ;;  %1823 = vmatprep.subr.mxu1 %v7824_v9  ;;  %v7850_v53 = vld [vmem:[#allocation12 + $0xd0] sm:$0xff] }
 0x4bd   :  { %1824 = vmatpush1.msra.mxu1 %v7827_v13  ;;  %1615 = vmatprep.mubr.f32.mxu1 %v9685_v0 }
 0x4be   :  { %1825 = vmatprep.subr.mxu1 %v7830_v14 }
 0x4bf   :  { %1826 = vmatpush1.msra.mxu1 %v7835_v43 }
 0x4c0   :  { %6096 = vmatmul.mubr.msk.f32.gmra.mxu1 %vm1389_vm8, %v7596_v55  ;;  %1827 = vmatprep.subr.mxu1 %v7839_v15  ;;  %v7865_v55 = vld [vmem:[#allocation12 + $0x90] sm:$0xff] }
 0x4c1   :  { %1828 = vmatpush1.msra.mxu1 %v7842_v16  ;;  %1621 = vmatprep.mubr.f32.mxu1 %v9685_v0  ;;  %9901 = vst [vmem:[#allocation38_spill] sm:$0xff] %v7865_v55 }
 0x4c2   :  { %1829 = vmatprep.subr.mxu1 %v7845_v20 }
 0x4c3   :  { %1830 = vmatpush1.msra.mxu1 %v7850_v53 }
 0x4c4   :  { %6097 = vmatmul.mubr.msk.f32.gmra.mxu1 %vm1389_vm8, %v7616_v5  ;;  %1831 = vmatprep.subr.mxu1 %v7854_v21  ;;  %v7880_v5 = vld [vmem:[#allocation12 + $0x50] sm:$0xff] }
 0x4c5   :  { %1832 = vmatpush1.msra.mxu1 %v7857_v23  ;;  %1627 = vmatprep.mubr.f32.mxu1 %v9685_v0  ;;  %9905 = vst [vmem:[#allocation42_spill] sm:$0xff] %v7880_v5 }
 0x4c6   :  { %1833 = vmatprep.subr.mxu1 %v7860_v22 }
 0x4c7   :  { %1834 = vmatpush1.msra.mxu1 %v7865_v55 }
 0x4c8   :  { %6098 = vmatmul.mubr.msk.f32.gmra.mxu1 %vm1389_vm8, %v7635_v12  ;;  %1835 = vmatprep.subr.mxu1 %v7869_v26  ;;  %v7895_v12 = vld [vmem:[#allocation12 + $0x10] sm:$0xff] }
 0x4c9   :  { %1836 = vmatpush1.msra.mxu1 %v7872_v27  ;;  %1633 = vmatprep.mubr.f32.mxu1 %v9685_v0 }
 0x4ca   :  { %1837 = vmatprep.subr.mxu1 %v7875_v29 }
 0x4cb   :  { %1838 = vmatpush1.msra.mxu1 %v7880_v5 }
 0x4cc   :  { %6099 = vmatmul.mubr.msk.f32.gmra.mxu1 %vm1389_vm8, %v7654_v19  ;;  %1839 = vmatprep.subr.mxu1 %v7884_v38  ;;  %v6074_v19 = vld [vmem:[%s9673_s7 + $0x3] ss:$0 sm:$0xff] }
 0x4cd   :  { %1840 = vmatpush1.msra.mxu1 %v7887_v31  ;;  %1875 = vmatprep.mubr.f32.mxu1 %v9685_v0 }
 0x4ce   :  { %1841 = vmatprep.subr.mxu1 %v7890_v34 }
 0x4cf   :  { %1842 = vmatpush1.msra.mxu1 %v7895_v12 }
 0x4d0   :  { %1876 = vmatmul.mubr.f32.vlgmr.msra.gmra.mxu1 %v7664_v25  ;;  %2050 = vmatprep.subr.mxu1 %v7766_v33 }
 0x4d1   :  { %2051 = vmatpush1.msra.mxu1 %v7768_v36  ;;  %2114 = vmatprep.mubr.f32.mxu1 %v9685_v0  ;;  %v1806_v0 = vpop.f32.mrf.mxu0 }
 0x4d2   :  { %2052 = vmatprep.subr.mxu1 %v7773_v40  ;;  %v1882_v37 = vadd.f32 %v1806_v0, %v1481_v52 }
 0x4d3   :  { %2053 = vmatpush1.msra.mxu1 %v7778_v42 }
 0x4d4   :  { %2054 = vmatprep.subr.mxu1 %v7785_v45  ;;  %v6100_v24 = vmul.f32 -1.442695, %v1882_v37 }
 0x4d5   :  { %2055 = vmatpush1.msra.mxu1 %v7788_v47 }
 0x4d6   :  { %2056 = vmatprep.subr.mxu1 %v7794_v48 }
 0x4d7   :  { %2057 = vmatpush1.msra.mxu1 %v7799_v51 }
 0x4d8   :  { %2058 = vmatprep.subr.mxu1 %v7806_v60 }
 0x4d9   :  { %2059 = vmatpush1.msra.mxu1 %v7809_v3 }
 0x4da   :  { %2060 = vmatprep.subr.mxu1 %v7815_v6 }
 0x4db   :  { %2061 = vmatpush1.msra.mxu1 %v7820_v8 }
 0x4dc   :  { %2062 = vmatprep.subr.mxu1 %v7824_v9 }
 0x4dd   :  { %2063 = vmatpush1.msra.mxu1 %v7827_v13 }
 0x4de   :  { %2064 = vmatprep.subr.mxu1 %v7830_v14 }
 0x4df   :  { %2065 = vmatpush1.msra.mxu1 %v7835_v43 }
 0x4e0   :  { %2066 = vmatprep.subr.mxu1 %v7839_v15 }
 0x4e1   :  { %2067 = vmatpush1.msra.mxu1 %v7842_v16 }
 0x4e2   :  { %2068 = vmatprep.subr.mxu1 %v7845_v20 }
 0x4e3   :  { %2069 = vmatpush1.msra.mxu1 %v7850_v53 }
 0x4e4   :  { %2070 = vmatprep.subr.mxu1 %v7854_v21 }
 0x4e5   :  { %2071 = vmatpush1.msra.mxu1 %v7857_v23 }
 0x4e6   :  { %2072 = vmatprep.subr.mxu1 %v7860_v22 }
 0x4e7   :  { %2073 = vmatpush1.msra.mxu1 %v7865_v55 }
 0x4e8   :  { %2074 = vmatprep.subr.mxu1 %v7869_v26 }
 0x4e9   :  { %2075 = vmatpush1.msra.mxu1 %v7872_v27 }
 0x4ea   :  { %2076 = vmatprep.subr.mxu1 %v7875_v29 }
 0x4eb   :  { %2077 = vmatpush1.msra.mxu1 %v7880_v5 }
 0x4ec   :  { %2078 = vmatprep.subr.mxu1 %v7884_v38 }
 0x4ed   :  { %2079 = vmatpush1.msra.mxu1 %v7887_v31 }
 0x4ee   :  { %2080 = vmatprep.subr.mxu1 %v7890_v34 }
 0x4ef   :  { %2081 = vmatpush1.msra.mxu1 %v7895_v12 }
 0x4f0   :  { %2289 = vmatprep.subr.mxu1 %v7766_v33 }
 0x568   :  { %v1275_v25 = vpop.f32.mrf.mxu1 }
 0x569   :  { %v1276_v41 = vadd.f32 %v6074_v19, %v1275_v25  ;;  %v1483_v19 = vadd.f32 %v7726_v58, %v7736_v61 }
 0x56a   :  { %v6617_v46 = vpop.f32.mrf.mxu1 }
 0x56b   :  { %v1280_v49 = vmin.f32 %v1276_v41, 0.0  ;;  %v1808_v46 = vpop.f32.mrf.mxu0  ;;  %vm1279_vm2 = vcmp.gt.f32.partialorder %v1276_v41, 0.0 }
 0x56c   :  { %v1883_v57 = vadd.f32 %v1808_v46, %v1483_v19 }
 0x56d   :  { %v1281_v63 = vmul.f32 1.442695, %v1280_v49  ;;  %v1384_v49 = vrot.slane %v7721_v56, %v9691_v39 }
 0x56e   :  { %v6101_v61 = vmul.f32 -1.442695, %v1883_v57 }
 0x56f   :  { %6695 = vpow2.f32 %v1281_v63 }
 0x570   :  { %v1593_v54 = vpop.f32.mrf.mxu1  ;;  %6697 = vpow2.f32 %v6100_v24 }
 0x571   :  { %6699 = vpow2.f32 %v6101_v61 }
 0x572   :  { %v1595_v35 = vpop.f32.mrf.mxu1 }
 0x574   :  { %v1599_v25 = vpop.f32.mrf.mxu1 }
 0x575   :  { %v7951_v63 = vadd.f32 %v1599_v25, %v1380_v30 }
 0x576   :  { %v1601_v44 = vpop.f32.mrf.mxu1 }
 0x577   :  { %v7953_v32 = vadd.f32 %v1601_v44, %v1384_v49 }
 0x578   :  { %v1605_v10 = vpop.f32.mrf.mxu1 }
 0x579   :  { %v7955_v28 = vadd.f32 %v1605_v10, %v1380_v30 }
 0x57a   :  { %v1607_v2 = vpop.f32.mrf.mxu1 }
 0x57b   :  { %9909 = vst [vmem:[#allocation46_spill] sm:$0xff] %v7955_v28  ;;  %v7957_v17 = vadd.f32 %v1607_v2, %v1384_v49  ;;  %v8098_v28 = vld [vmem:[#allocation12 + $0x60] sm:$0xff] }
 0x57c   :  { %v6696_v58 = vpop.eup %6695  ;;  %v1611_v11 = vpop.f32.mrf.mxu1  ;;  %9926 = vst [vmem:[#allocation62_spill] sm:$0xff] %v8098_v28 }
 0x57d   :  { %9910 = vst [vmem:[#allocation47_spill] sm:$0xff] %v7957_v17  ;;  %v7959_v50 = vadd.f32 %v1611_v11, %v1380_v30  ;;  %v6075_v56 = vadd.f32 -1.0, %v6696_v58  ;;  %v8095_v17 = vld [vmem:[#allocation12 + $0x68] sm:$0xff] }
 0x57e   :  { %v1613_v25 = vpop.f32.mrf.mxu1  ;;  %9925 = vst [vmem:[#allocation61_spill] sm:$0xff] %v8095_v17 }
 0x57f   :  { %9911 = vst [vmem:[#allocation48_spill] sm:$0xff] %v7959_v50  ;;  %v7961_v0 = vadd.f32 %v1613_v25, %v1384_v49  ;;  %v1284_v44 = vsel %vm1279_vm2, %v1276_v41, %v6075_v56  ;;  %v999_v56 = vpop.xlane.xlu0 %998  ;;  %v8092_v50 = vld [vmem:[#allocation12 + $0x80] sm:$0xff] }
 0x580   :  { %v1617_v52 = vpop.f32.mrf.mxu1  ;;  %v1285_v19 = vadd.f32 %v1284_v44, %v7513_v18 }
 0x581   :  { %9912 = vst [vmem:[#allocation49_spill] sm:$0xff] %v7961_v0  ;;  %v7964_v46 = vadd.f32 %v1617_v52, %v1380_v30  ;;  %v6698_v52 = vpop.eup %6697 }
 0x582   :  { %v1619_v2 = vpop.f32.mrf.mxu1  ;;  %v7966_v37 = vadd.f32 1e-06, %v1285_v19 }
 0x583   :  { %9913 = vst [vmem:[#allocation50_spill] sm:$0xff] %v7964_v46  ;;  %v7968_v57 = vadd.f32 %v1619_v2, %v1384_v49  ;;  %v6700_v2 = vpop.eup %6699 }
 0x584   :  { %9914 = vst [vmem:[#allocation51_spill] sm:$0xff] %v7966_v37  ;;  %v1623_v11 = vpop.f32.mrf.mxu1  ;;  %v1287_v10 = vand.u32 2147483647, %v7966_v37 }
 0x585   :  { %9915 = vst [vmem:[#allocation52_spill] sm:$0xff] %v7968_v57  ;;  %v7971_v58 = vadd.f32 %v1623_v11, %v1380_v30  ;;  %v1000_v57 = vadd.f32 1e-06, %v999_v56  ;;  %v1895_v11 = vadd.f32 1.0, %v6698_v52 }
 0x586   :  { %v1625_v24 = vpop.f32.mrf.mxu1  ;;  %1288 = vadd.xlane.f32.xlu1 %v1287_v10  ;;  %v1896_v10 = vadd.f32 1.0, %v6700_v2 }
 0x587   :  { %9916 = vst [vmem:[#allocation53_spill] sm:$0xff] %v7971_v58  ;;  %v7973_v25 = vadd.f32 %v1625_v24, %v1384_v49  ;;  %v1594_v58 = vadd.f32 %v1593_v54, %v1380_v30  ;;  %6701 = vrcp.f32 %v1000_v57 }
 0x588   :  { %v1629_v41 = vpop.f32.mrf.mxu1  ;;  %6703 = vrcp.f32 %v1895_v11  ;;  %v8046_v11 = vld [vmem:[#allocation12 + $0x180] sm:$0xff] }
 0x589   :  { %9917 = vst [vmem:[#allocation54_spill] sm:$0xff] %v7973_v25  ;;  %v7975_v61 = vadd.f32 %v1629_v41, %v1380_v30  ;;  %v1596_v25 = vadd.f32 %v1595_v35, %v1384_v49  ;;  %6705 = vrcp.f32 %v1896_v10  ;;  %v8049_v10 = vld [vmem:[#allocation12 + $0x168] sm:$0xff] }
 0x58a   :  { %v1631_v18 = vpop.f32.mrf.mxu1 }
 0x58b   :  { %9918 = vst [vmem:[#allocation55_spill] sm:$0xff] %v7975_v61  ;;  %v7977_v44 = vadd.f32 %v1631_v18, %v1384_v49 }
 0x58c   :  { %v1635_v19 = vpop.f32.mrf.mxu1 }
 0x58d   :  { %9919 = vst [vmem:[#allocation56_spill] sm:$0xff] %v7977_v44  ;;  %v7979_v39 = vadd.f32 %v1635_v19, %v1380_v30 }
 0x58e   :  { %v1637_v37 = vpop.f32.mrf.mxu1 }
 0x58f   :  { %9920 = vst [vmem:[#allocation57_spill] sm:$0xff] %v7979_v39  ;;  %v7981_v46 = vadd.f32 %v1637_v37, %v1384_v49 }
 0x590   :  { %v1877_v24 = vpop.f32.mrf.mxu1 }
 0x591   :  { %9921 = vst [vmem:[#allocation58_spill] sm:$0xff] %v7981_v46  ;;  %v1884_v41 = vadd.f32 %v1877_v24, %v1594_v58  ;;  %v8052_v24 = vld [vmem:[#allocation12 + $0x160] sm:$0xff] }
 0x592   :  { %v1879_v61 = vpop.f32.mrf.mxu1  ;;  %v8086_v46 = vld [vmem:[#allocation12 + $0xa0] sm:$0xff] }
 0x593   :  { %v6102_v18 = vmul.f32 -1.442695, %v1884_v41  ;;  %v1885_v44 = vadd.f32 %v1879_v61, %v1596_v25  ;;  %v8031_v25 = vld [vmem:[#allocation12 + $0x1c8] sm:$0xff]  ;;  %v8034_v61 = vld [vmem:[#allocation12 + $0x1c0] sm:$0xff] }
 0x594   :  { %v6702_v19 = vpop.eup %6701  ;;  %v8055_v41 = vld [vmem:[#allocation12 + $0x148] sm:$0xff] }
 0x595   :  { %6707 = vpow2.f32 %v6102_v18  ;;  %v6704_v39 = vpop.eup %6703  ;;  %v1002_v54 = vmul.f32 %v6702_v19, %v7588_v59  ;;  %v9923_v59 = vmov 0.0   ;;  %v8058_v18 = vld [vmem:[#allocation12 + $0x140] sm:$0xff]  ;;  %v8061_v19 = vld [vmem:[#allocation12 + $0x128] sm:$0xff] }
 0x596   :  { %6709 = vtanh.f32 %v1885_v44  ;;  %v6706_v56 = vpop.eup %6705  ;;  %v8037_v44 = vld [vmem:[#allocation12 + $0x1a8] sm:$0xff] }
 0x597   :  { %v1905_v52 = vmul.f32 %v6706_v56, %v1002_v54  ;;  %v8064_v56 = vld [vmem:[#allocation12 + $0x120] sm:$0xff]  ;;  %v8067_v54 = vld [vmem:[#allocation12 + $0x108] sm:$0xff] }
 0x5a2   :  { %v6708_v0 = vpop.eup %6707 }
 0x5a3   :  { %v6710_v30 = vpop.eup %6709  ;;  %v1897_v37 = vadd.f32 1.0, %v6708_v0  ;;  %v8028_v0 = vld [vmem:[#allocation12 + $0x1e0] sm:$0xff] }
 0x5a4   :  { %v1906_v2 = vmul.f32 %v6710_v30, %v6704_v39  ;;  %v8025_v39 = vld [vmem:[#allocation12 + $0x1e8] sm:$0xff]  ;;  %v8069_v30 = vld [vmem:[#allocation12 + $0x100] sm:$0xff] }
 0x5a5   :  { %6711 = vrcp.f32 %v1897_v37  ;;  %9924 = vst [vmem:[#allocation60_spill] sm:$0xff] %v8025_v39  ;;  %2218 = vmatprep.subr.mxu0 %v8025_v39  ;;  %v8071_v37 = vld [vmem:[#allocation12 + $0xe8] sm:$0xff] }
 0x5a6   :  { %v7984_v35 = vadd.f32 %v1906_v2, %v1905_v52  ;;  %v8074_v52 = vld [vmem:[#allocation12 + $0xe0] sm:$0xff]  ;;  %v8077_v2 = vld [vmem:[#allocation12 + $0xc8] sm:$0xff] }
 0x5a8   :  { %6713 = vtanh.f32 %v7984_v35 }
 0x5b2   :  { %v6712_v49 = vpop.eup %6711 }
 0x5b5   :  { %v6714_v57 = vpop.eup %6713 }
 0x5b6   :  { %v7987_v58 = vmul.f32 %v6714_v57, %v6712_v49  ;;  %v8080_v49 = vld [vmem:[#allocation12 + $0xc0] sm:$0xff]  ;;  %v8083_v57 = vld [vmem:[#allocation12 + $0xa8] sm:$0xff] }
 0x5b8   :  { %9922 = vst [vmem:[#allocation59_spill] sm:$0xff] %v7987_v58  ;;  %2044 = vmatmul.mubr.f32.vlgmr.msra.gmra.mxu0 %v7987_v58  ;;  %2115 = vmatmul.mubr.f32.vlgmr.msra.gmra.mxu1 %v7987_v58  ;;  %v8089_v58 = vld [vmem:[#allocation12 + $0x88] sm:$0xff] }
 0x5b9   :  { %2290 = vmatpush1.msra.mxu1 %v7768_v36  ;;  %2282 = vmatprep.mubr.f32.mxu0 %v9923_v59 }
 0x5ba   :  { %2291 = vmatprep.subr.mxu1 %v7773_v40  ;;  %2353 = vmatprep.mubr.f32.mxu1 %v9923_v59  ;;  %v8107_v59 = vld [vmem:[#allocation12 + $0x28] sm:$0xff] }
 0x5bb   :  { %2292 = vmatpush1.msra.mxu1 %v7778_v42  ;;  %2219 = vmatpush1.msra.mxu0 %v8028_v0  ;;  %9929 = vst [vmem:[#allocation65_spill] sm:$0xff] %v8107_v59 }
 0x5bc   :  { %2293 = vmatprep.subr.mxu1 %v7785_v45  ;;  %2220 = vmatprep.subr.mxu0 %v8031_v25 }
 0x5bd   :  { %2294 = vmatpush1.msra.mxu1 %v7788_v47  ;;  %2221 = vmatpush1.msra.mxu0 %v8034_v61 }
 0x5be   :  { %2295 = vmatprep.subr.mxu1 %v7794_v48  ;;  %2222 = vmatprep.subr.mxu0 %v8037_v44 }
 0x5bf   :  { %2296 = vmatpush1.msra.mxu1 %v7799_v51 }
 0x5c0   :  { %2297 = vmatprep.subr.mxu1 %v7806_v60 }
 0x5c1   :  { %2298 = vmatpush1.msra.mxu1 %v7809_v3 }
 0x5c2   :  { %2299 = vmatprep.subr.mxu1 %v7815_v6 }
 0x5c3   :  { %2300 = vmatpush1.msra.mxu1 %v7820_v8 }
 0x5c4   :  { %2301 = vmatprep.subr.mxu1 %v7824_v9 }
 0x5c5   :  { %2302 = vmatpush1.msra.mxu1 %v7827_v13 }
 0x5c6   :  { %2303 = vmatprep.subr.mxu1 %v7830_v14 }
 0x5c7   :  { %2304 = vmatpush1.msra.mxu1 %v7835_v43 }
 0x5c8   :  { %2305 = vmatprep.subr.mxu1 %v7839_v15 }
 0x5c9   :  { %2306 = vmatpush1.msra.mxu1 %v7842_v16 }
 0x5ca   :  { %2307 = vmatprep.subr.mxu1 %v7845_v20 }
 0x5cb   :  { %2308 = vmatpush1.msra.mxu1 %v7850_v53 }
 0x5cc   :  { %2309 = vmatprep.subr.mxu1 %v7854_v21 }
 0x5cd   :  { %2310 = vmatpush1.msra.mxu1 %v7857_v23 }
 0x5ce   :  { %2311 = vmatprep.subr.mxu1 %v7860_v22 }
 0x5cf   :  { %2312 = vmatpush1.msra.mxu1 %v7865_v55 }
 0x5d0   :  { %2313 = vmatprep.subr.mxu1 %v7869_v26 }
 0x5d1   :  { %2314 = vmatpush1.msra.mxu1 %v7872_v27 }
 0x5d2   :  { %2315 = vmatprep.subr.mxu1 %v7875_v29 }
 0x5d3   :  { %2316 = vmatpush1.msra.mxu1 %v7880_v5 }
 0x5d4   :  { %2317 = vmatprep.subr.mxu1 %v7884_v38  ;;  %v8116_v38 = vld [vmem:[#allocation12] sm:$0xff] }
 0x5d5   :  { %2318 = vmatpush1.msra.mxu1 %v7887_v31  ;;  %v8113_v31 = vld [vmem:[#allocation12 + $0x8] sm:$0xff]  ;;  %9932 = vst [vmem:[#allocation68_spill] sm:$0xff] %v8116_v38 }
 0x5d6   :  { %2319 = vmatprep.subr.mxu1 %v7890_v34  ;;  %v8110_v34 = vld [vmem:[#allocation12 + $0x20] sm:$0xff]  ;;  %9931 = vst [vmem:[#allocation67_spill] sm:$0xff] %v8113_v31 }
 0x5d7   :  { %2320 = vmatpush1.msra.mxu1 %v7895_v12  ;;  %v8043_v12 = vld [vmem:[#allocation12 + $0x188] sm:$0xff]  ;;  %9930 = vst [vmem:[#allocation66_spill] sm:$0xff] %v8110_v34 }
 0x5d8   :  { %2528 = vmatprep.subr.mxu1 %v7766_v33  ;;  %v8040_v33 = vld [vmem:[#allocation12 + $0x1a0] sm:$0xff] }
 0x5d9   :  { %2223 = vmatpush1.msra.mxu0 %v8040_v33 }
 0x5da   :  { %2224 = vmatprep.subr.mxu0 %v8043_v12 }
 0x5db   :  { %2225 = vmatpush1.msra.mxu0 %v8046_v11 }
 0x5dc   :  { %2226 = vmatprep.subr.mxu0 %v8049_v10 }
 0x5dd   :  { %2227 = vmatpush1.msra.mxu0 %v8052_v24 }
 0x5de   :  { %2228 = vmatprep.subr.mxu0 %v8055_v41 }
 0x5df   :  { %2229 = vmatpush1.msra.mxu0 %v8058_v18 }
 0x5e0   :  { %2230 = vmatprep.subr.mxu0 %v8061_v19 }
 0x5e1   :  { %2231 = vmatpush1.msra.mxu0 %v8064_v56 }
 0x5e2   :  { %2232 = vmatprep.subr.mxu0 %v8067_v54 }
 0x5e3   :  { %2233 = vmatpush1.msra.mxu0 %v8069_v30 }
 0x5e4   :  { %2234 = vmatprep.subr.mxu0 %v8071_v37 }
 0x5e5   :  { %2235 = vmatpush1.msra.mxu0 %v8074_v52 }
 0x5e6   :  { %2236 = vmatprep.subr.mxu0 %v8077_v2 }
 0x5e7   :  { %2237 = vmatpush1.msra.mxu0 %v8080_v49 }
 0x5e8   :  { %2238 = vmatprep.subr.mxu0 %v8083_v57 }
 0x5e9   :  { %2239 = vmatpush1.msra.mxu0 %v8086_v46 }
 0x5ea   :  { %2240 = vmatprep.subr.mxu0 %v8089_v58 }
 0x5eb   :  { %2241 = vmatpush1.msra.mxu0 %v8092_v50 }
 0x5ec   :  { %2242 = vmatprep.subr.mxu0 %v8095_v17 }
 0x5ed   :  { %2243 = vmatpush1.msra.mxu0 %v8098_v28 }
 0x5ee   :  { %2244 = vmatprep.subr.mxu0 %v8101_v7 }
 0x5ef   :  { %2245 = vmatpush1.msra.mxu0 %v8104_v4 }
 0x5f0   :  { %2246 = vmatprep.subr.mxu0 %v8107_v59 }
 0x5f1   :  { %2247 = vmatpush1.msra.mxu0 %v8110_v34 }
 0x5f2   :  { %2248 = vmatprep.subr.mxu0 %v8113_v31 }
 0x5f3   :  { %2249 = vmatpush1.msra.mxu0 %v8116_v38 }
 0x5f4   :  { %2457 = vmatprep.subr.mxu0 %v8025_v39 }
 0x678   :  { %v2045_v5 = vpop.f32.mrf.mxu0  ;;  %v2116_v59 = vpop.f32.mrf.mxu1 }
 0x679   :  { %v2121_v29 = vadd.f32 %v2045_v5, %v7739_v62  ;;  %v2123_v26 = vadd.f32 %v2116_v59, %v7951_v63 }
 0x67a   :  { %v2047_v7 = vpop.f32.mrf.mxu0  ;;  %v2118_v34 = vpop.f32.mrf.mxu1 }
 0x67b   :  { %v6103_v27 = vmul.f32 -1.442695, %v2121_v29  ;;  %v2122_v4 = vadd.f32 %v2047_v7, %v7742_v1  ;;  %v6105_v17 = vmul.f32 -1.442695, %v2123_v26  ;;  %v2124_v31 = vadd.f32 %v2118_v34, %v7953_v32 }
 0x67d   :  { %6715 = vpow2.f32 %v6103_v27  ;;  %v6104_v28 = vmul.f32 -1.442695, %v2122_v4 }
 0x67f   :  { %6717 = vpow2.f32 %v6104_v28 }
 0x680   :  { %6719 = vpow2.f32 %v6105_v17 }
 0x681   :  { %6721 = vtanh.f32 %v2124_v31  ;;  %v9954_v31 = vld [vmem:[#allocation27_spill] sm:$0xff] }
 0x68a   :  { %v6716_v38 = vpop.eup %6715 }
 0x68b   :  { %v2134_v55 = vadd.f32 1.0, %v6716_v38 }
 0x68c   :  { %v6718_v39 = vpop.eup %6717 }
 0x68d   :  { %6723 = vrcp.f32 %v2134_v55  ;;  %v2135_v62 = vadd.f32 1.0, %v6718_v39  ;;  %v6720_v29 = vpop.eup %6719  ;;  %v9955_v39 = vld [vmem:[#allocation46_spill] sm:$0xff] }
 0x68e   :  { %v6722_v1 = vpop.eup %6721  ;;  %v2136_v27 = vadd.f32 1.0, %v6720_v29 }
 0x68f   :  { %6725 = vrcp.f32 %v2135_v62 }
 0x690   :  { %6727 = vrcp.f32 %v2136_v27 }
 0x69a   :  { %v6724_v7 = vpop.eup %6723 }
 0x69b   :  { %v2145_v4 = vmul.f32 %v6724_v7, %v6722_v1  ;;  %v9956_v7 = vld [vmem:[#allocation47_spill] sm:$0xff] }
 0x69c   :  { %v6726_v28 = vpop.eup %6725 }
 0x69d   :  { %v2144_v5 = vmul.f32 %v6726_v28, %v7984_v35  ;;  %v6728_v32 = vpop.eup %6727 }
 0x69f   :  { %v8127_v63 = vadd.f32 %v2145_v4, %v2144_v5 }
 0x6a1   :  { %6729 = vtanh.f32 %v8127_v63 }
 0x6ae   :  { %v6730_v17 = vpop.eup %6729 }
 0x6af   :  { %v8130_v26 = vmul.f32 %v6730_v17, %v6728_v32 }
 0x6b1   :  { %9933 = vst [vmem:[#allocation69_spill] sm:$0xff] %v8130_v26  ;;  %2283 = vmatmul.mubr.f32.vlgmr.msra.gmra.mxu0 %v8130_v26  ;;  %2354 = vmatmul.mubr.f32.vlgmr.msra.gmra.mxu1 %v8130_v26  ;;  %v8332_v26 = vld [vmem:[#allocation12 + $0x30] sm:$0xff] }
 0x6b2   :  { %2458 = vmatpush1.msra.mxu0 %v8028_v0  ;;  %2529 = vmatpush1.msra.mxu1 %v7768_v36  ;;  %v9934_v36 = vld [vmem:[#allocation38_spill] sm:$0xff] }
 0x6b3   :  { %2459 = vmatprep.subr.mxu0 %v8031_v25  ;;  %2530 = vmatprep.subr.mxu1 %v7773_v40  ;;  %v9935_v40 = vld [vmem:[#allocation61_spill] sm:$0xff] }
 0x6b4   :  { %2460 = vmatpush1.msra.mxu0 %v8034_v61  ;;  %2531 = vmatpush1.msra.mxu1 %v7778_v42  ;;  %v9936_v42 = vld [vmem:[#allocation39_spill] sm:$0xff] }
 0x6b5   :  { %2461 = vmatprep.subr.mxu0 %v8037_v44  ;;  %2532 = vmatprep.subr.mxu1 %v7785_v45  ;;  %v9937_v45 = vld [vmem:[#allocation62_spill] sm:$0xff] }
 0x6b6   :  { %2462 = vmatpush1.msra.mxu0 %v8040_v33  ;;  %2533 = vmatpush1.msra.mxu1 %v7788_v47  ;;  %v9938_v47 = vld [vmem:[#allocation40_spill] sm:$0xff] }
 0x6b7   :  { %2463 = vmatprep.subr.mxu0 %v8043_v12  ;;  %2534 = vmatprep.subr.mxu1 %v7794_v48  ;;  %v9939_v48 = vld [vmem:[#allocation63_spill] sm:$0xff] }
 0x6b8   :  { %2464 = vmatpush1.msra.mxu0 %v8046_v11  ;;  %2535 = vmatpush1.msra.mxu1 %v7799_v51  ;;  %v9940_v51 = vld [vmem:[#allocation41_spill] sm:$0xff] }
 0x6b9   :  { %2465 = vmatprep.subr.mxu0 %v8049_v10  ;;  %2536 = vmatprep.subr.mxu1 %v7806_v60  ;;  %v9941_v60 = vld [vmem:[#allocation64_spill] sm:$0xff] }
 0x6ba   :  { %2466 = vmatpush1.msra.mxu0 %v8052_v24  ;;  %2537 = vmatpush1.msra.mxu1 %v7809_v3  ;;  %v9942_v3 = vld [vmem:[#allocation42_spill] sm:$0xff] }
 0x6bb   :  { %2467 = vmatprep.subr.mxu0 %v8055_v41  ;;  %2538 = vmatprep.subr.mxu1 %v7815_v6  ;;  %v9943_v6 = vld [vmem:[#allocation65_spill] sm:$0xff] }
 0x6bc   :  { %2468 = vmatpush1.msra.mxu0 %v8058_v18  ;;  %2539 = vmatpush1.msra.mxu1 %v7820_v8  ;;  %v9944_v8 = vld [vmem:[#allocation43_spill] sm:$0xff] }
 0x6bd   :  { %2469 = vmatprep.subr.mxu0 %v8061_v19  ;;  %2540 = vmatprep.subr.mxu1 %v7824_v9  ;;  %v9945_v9 = vld [vmem:[#allocation66_spill] sm:$0xff] }
 0x6be   :  { %2470 = vmatpush1.msra.mxu0 %v8064_v56  ;;  %2541 = vmatpush1.msra.mxu1 %v7827_v13  ;;  %v9946_v13 = vld [vmem:[#allocation44_spill] sm:$0xff] }
 0x6bf   :  { %2471 = vmatprep.subr.mxu0 %v8067_v54  ;;  %2542 = vmatprep.subr.mxu1 %v7830_v14  ;;  %v9947_v14 = vld [vmem:[#allocation67_spill] sm:$0xff] }
 0x6c0   :  { %2472 = vmatpush1.msra.mxu0 %v8069_v30  ;;  %2543 = vmatpush1.msra.mxu1 %v7835_v43  ;;  %v9948_v43 = vld [vmem:[#allocation45_spill] sm:$0xff] }
 0x6c1   :  { %2473 = vmatprep.subr.mxu0 %v8071_v37  ;;  %2544 = vmatprep.subr.mxu1 %v7839_v15  ;;  %v9949_v15 = vld [vmem:[#allocation68_spill] sm:$0xff] }
 0x6c2   :  { %2474 = vmatpush1.msra.mxu0 %v8074_v52  ;;  %2545 = vmatpush1.msra.mxu1 %v7842_v16  ;;  %v9950_v16 = vmov 0.0  }
 0x6c3   :  { %2475 = vmatprep.subr.mxu0 %v8077_v2  ;;  %2546 = vmatprep.subr.mxu1 %v7845_v20  ;;  %v9951_v20 = vld [vmem:[#allocation60_spill] sm:$0xff] }
 0x6c4   :  { %2476 = vmatpush1.msra.mxu0 %v8080_v49  ;;  %2547 = vmatpush1.msra.mxu1 %v7850_v53  ;;  %v8198_v53 = vld [vmem:[#allocation12 + $0x10] sm:$0xff] }
 0x6c5   :  { %2477 = vmatprep.subr.mxu0 %v8083_v57  ;;  %2548 = vmatprep.subr.mxu1 %v7854_v21  ;;  %9952 = vst [vmem:[#allocation38_spill] sm:$0xff] %v8198_v53 }
 0x6c6   :  { %2478 = vmatpush1.msra.mxu0 %v8086_v46  ;;  %2549 = vmatpush1.msra.mxu1 %v7857_v23  ;;  %v9953_v23 = vld [vmem:[#allocation26_spill] sm:$0xff] }
 0x6c7   :  { %2479 = vmatprep.subr.mxu0 %v8089_v58  ;;  %2550 = vmatprep.subr.mxu1 %v7860_v22  ;;  %9965 = vst [vmem:[#allocation26_spill] sm:$0xff] %v8332_v26 }
 0x6c8   :  { %2480 = vmatpush1.msra.mxu0 %v8092_v50  ;;  %2551 = vmatpush1.msra.mxu1 %v9934_v36 }
 0x6c9   :  { %2481 = vmatprep.subr.mxu0 %v9935_v40  ;;  %2552 = vmatprep.subr.mxu1 %v9936_v42 }
 0x6ca   :  { %2482 = vmatpush1.msra.mxu0 %v9937_v45  ;;  %2553 = vmatpush1.msra.mxu1 %v9938_v47 }
 0x6cb   :  { %2483 = vmatprep.subr.mxu0 %v9939_v48  ;;  %2554 = vmatprep.subr.mxu1 %v9940_v51 }
 0x6cc   :  { %2484 = vmatpush1.msra.mxu0 %v9941_v60  ;;  %2555 = vmatpush1.msra.mxu1 %v9942_v3 }
 0x6cd   :  { %2485 = vmatprep.subr.mxu0 %v9943_v6  ;;  %2556 = vmatprep.subr.mxu1 %v9944_v8 }
 0x6ce   :  { %2486 = vmatpush1.msra.mxu0 %v9945_v9  ;;  %2557 = vmatpush1.msra.mxu1 %v9946_v13 }
 0x6cf   :  { %2487 = vmatprep.subr.mxu0 %v9947_v14  ;;  %2558 = vmatprep.subr.mxu1 %v9948_v43 }
 0x6d0   :  { %2488 = vmatpush1.msra.mxu0 %v9949_v15  ;;  %2521 = vmatprep.mubr.f32.mxu0 %v9950_v16 }
 0x6d1   :  { %2592 = vmatprep.mubr.f32.mxu1 %v9950_v16  ;;  %2696 = vmatprep.subr.mxu0 %v9951_v20 }
 0x6d2   :  { %2559 = vmatpush1.msra.mxu1 %v8198_v53 }
 0x771   :  { %v2284_v21 = vpop.f32.mrf.mxu0  ;;  %v2355_v59 = vpop.f32.mrf.mxu1 }
 0x772   :  { %v2360_v22 = vadd.f32 %v2284_v21, %v9953_v23  ;;  %v2362_v62 = vadd.f32 %v2355_v59, %v9955_v39  ;;  %v8271_v59 = vld [vmem:[#allocation12 + $0x178] sm:$0xff]  ;;  %v8274_v39 = vld [vmem:[#allocation12 + $0x170] sm:$0xff] }
 0x773   :  { %v2286_v55 = vpop.f32.mrf.mxu0  ;;  %v2357_v29 = vpop.f32.mrf.mxu1 }
 0x774   :  { %v6106_v38 = vmul.f32 -1.442695, %v2360_v22  ;;  %v2361_v34 = vadd.f32 %v2286_v55, %v9954_v31  ;;  %v6108_v1 = vmul.f32 -1.442695, %v2362_v62  ;;  %v2363_v4 = vadd.f32 %v2357_v29, %v9956_v7  ;;  %v8250_v22 = vld [vmem:[#allocation12 + $0x1f0] sm:$0xff]  ;;  %v8253_v55 = vld [vmem:[#allocation12 + $0x1d8] sm:$0xff] }
 0x775   :  { %v8259_v31 = vld [vmem:[#allocation12 + $0x1b8] sm:$0xff]  ;;  %v8280_v29 = vld [vmem:[#allocation12 + $0x150] sm:$0xff] }
 0x776   :  { %6731 = vpow2.f32 %v6106_v38  ;;  %v6107_v35 = vmul.f32 -1.442695, %v2361_v34  ;;  %v8256_v38 = vld [vmem:[#allocation12 + $0x1d0] sm:$0xff]  ;;  %v8265_v34 = vld [vmem:[#allocation12 + $0x198] sm:$0xff] }
 0x777   :  { %v8277_v62 = vld [vmem:[#allocation12 + $0x158] sm:$0xff]  ;;  %v8286_v7 = vld [vmem:[#allocation12 + $0x130] sm:$0xff] }
 0x778   :  { %6733 = vpow2.f32 %v6107_v35  ;;  %v8268_v35 = vld [vmem:[#allocation12 + $0x190] sm:$0xff] }
 0x779   :  { %6735 = vpow2.f32 %v6108_v1  ;;  %v8283_v1 = vld [vmem:[#allocation12 + $0x138] sm:$0xff] }
 0x77a   :  { %6737 = vtanh.f32 %v2363_v4  ;;  %v8289_v4 = vld [vmem:[#allocation12 + $0x118] sm:$0xff] }
 0x783   :  { %v6732_v28 = vpop.eup %6731 }
 0x784   :  { %v2373_v27 = vadd.f32 1.0, %v6732_v28  ;;  %v8291_v28 = vld [vmem:[#allocation12 + $0x110] sm:$0xff] }
 0x785   :  { %v6734_v5 = vpop.eup %6733 }
 0x786   :  { %6739 = vrcp.f32 %v2373_v27  ;;  %v2374_v32 = vadd.f32 1.0, %v6734_v5  ;;  %v6736_v17 = vpop.eup %6735  ;;  %v8293_v27 = vld [vmem:[#allocation12 + $0xf8] sm:$0xff]  ;;  %v8296_v5 = vld [vmem:[#allocation12 + $0xf0] sm:$0xff] }
 0x787   :  { %v6738_v36 = vpop.eup %6737  ;;  %v2375_v3 = vadd.f32 1.0, %v6736_v17  ;;  %v8302_v17 = vld [vmem:[#allocation12 + $0xd0] sm:$0xff] }
 0x788   :  { %6741 = vrcp.f32 %v2374_v32  ;;  %v8299_v32 = vld [vmem:[#allocation12 + $0xd8] sm:$0xff] }
 0x789   :  { %6743 = vrcp.f32 %v2375_v3  ;;  %v8317_v3 = vld [vmem:[#allocation12 + $0x78] sm:$0xff] }
 0x78a   :  { %9960 = vst [vmem:[#allocation42_spill] sm:$0xff] %v8317_v3 }
 0x793   :  { %v6740_v42 = vpop.eup %6739 }
 0x794   :  { %v2384_v47 = vmul.f32 %v6740_v42, %v6738_v36  ;;  %v8305_v36 = vld [vmem:[#allocation12 + $0xb8] sm:$0xff]  ;;  %v8308_v42 = vld [vmem:[#allocation12 + $0xb0] sm:$0xff] }
 0x795   :  { %v6742_v51 = vpop.eup %6741 }
 0x796   :  { %v2383_v8 = vmul.f32 %v6742_v51, %v8127_v63  ;;  %v6744_v43 = vpop.eup %6743  ;;  %v8247_v63 = vld [vmem:[#allocation12 + $0x1f8] sm:$0xff]  ;;  %v8314_v51 = vld [vmem:[#allocation12 + $0x90] sm:$0xff] }
 0x797   :  { %9958 = vst [vmem:[#allocation40_spill] sm:$0xff] %v8247_v63  ;;  %2767 = vmatprep.subr.mxu1 %v8247_v63  ;;  %9959 = vst [vmem:[#allocation41_spill] sm:$0xff] %v8314_v51 }
 0x798   :  { %v8206_v13 = vadd.f32 %v2384_v47, %v2383_v8  ;;  %v8311_v47 = vld [vmem:[#allocation12 + $0x98] sm:$0xff]  ;;  %v8320_v8 = vld [vmem:[#allocation12 + $0x70] sm:$0xff] }
 0x799   :  { %9961 = vst [vmem:[#allocation43_spill] sm:$0xff] %v8320_v8 }
 0x79a   :  { %6745 = vtanh.f32 %v8206_v13 }
 0x7a7   :  { %v6746_v21 = vpop.eup %6745 }
 0x7a8   :  { %v8209_v23 = vmul.f32 %v6746_v21, %v6744_v43  ;;  %v8323_v43 = vld [vmem:[#allocation12 + $0x58] sm:$0xff]  ;;  %v8326_v21 = vld [vmem:[#allocation12 + $0x50] sm:$0xff] }
 0x7a9   :  { %9962 = vst [vmem:[#allocation44_spill] sm:$0xff] %v8323_v43  ;;  %9963 = vst [vmem:[#allocation45_spill] sm:$0xff] %v8326_v21 }
 0x7aa   :  { %9957 = vst [vmem:[#allocation39_spill] sm:$0xff] %v8209_v23  ;;  %2522 = vmatmul.mubr.f32.vlgmr.msra.gmra.mxu0 %v8209_v23  ;;  %2593 = vmatmul.mubr.f32.vlgmr.msra.gmra.mxu1 %v8209_v23  ;;  %v8329_v23 = vld [vmem:[#allocation12 + $0x38] sm:$0xff] }
 0x7ab   :  { %2697 = vmatpush1.msra.mxu0 %v8028_v0  ;;  %2760 = vmatprep.mubr.f32.mxu0 %v9950_v16  ;;  %9964 = vst [vmem:[#allocation60_spill] sm:$0xff] %v8329_v23 }
 0x7ac   :  { %2698 = vmatprep.subr.mxu0 %v8031_v25  ;;  %2831 = vmatprep.mubr.f32.mxu1 %v9950_v16  ;;  %v8335_v16 = vld [vmem:[#allocation12 + $0x18] sm:$0xff] }
 0x7ad   :  { %2699 = vmatpush1.msra.mxu0 %v8034_v61  ;;  %2768 = vmatpush1.msra.mxu1 %v8250_v22  ;;  %9966 = vst [vmem:[#allocation27_spill] sm:$0xff] %v8335_v16 }
 0x7ae   :  { %2700 = vmatprep.subr.mxu0 %v8037_v44  ;;  %2769 = vmatprep.subr.mxu1 %v8253_v55 }
 0x7af   :  { %2701 = vmatpush1.msra.mxu0 %v8040_v33  ;;  %2770 = vmatpush1.msra.mxu1 %v8256_v38 }
 0x7b0   :  { %2702 = vmatprep.subr.mxu0 %v8043_v12  ;;  %2771 = vmatprep.subr.mxu1 %v8259_v31 }
 0x7b1   :  { %2703 = vmatpush1.msra.mxu0 %v8046_v11 }
 0x7b2   :  { %2704 = vmatprep.subr.mxu0 %v8049_v10 }
 0x7b3   :  { %2705 = vmatpush1.msra.mxu0 %v8052_v24 }
 0x7b4   :  { %2706 = vmatprep.subr.mxu0 %v8055_v41 }
 0x7b5   :  { %2707 = vmatpush1.msra.mxu0 %v8058_v18 }
 0x7b6   :  { %2708 = vmatprep.subr.mxu0 %v8061_v19 }
 0x7b7   :  { %2709 = vmatpush1.msra.mxu0 %v8064_v56 }
 0x7b8   :  { %2710 = vmatprep.subr.mxu0 %v8067_v54 }
 0x7b9   :  { %2711 = vmatpush1.msra.mxu0 %v8069_v30 }
 0x7ba   :  { %2712 = vmatprep.subr.mxu0 %v8071_v37 }
 0x7bb   :  { %2713 = vmatpush1.msra.mxu0 %v8074_v52 }
 0x7bc   :  { %2714 = vmatprep.subr.mxu0 %v8077_v2 }
 0x7bd   :  { %2715 = vmatpush1.msra.mxu0 %v8080_v49 }
 0x7be   :  { %2716 = vmatprep.subr.mxu0 %v8083_v57 }
 0x7bf   :  { %2717 = vmatpush1.msra.mxu0 %v8086_v46 }
 0x7c0   :  { %2718 = vmatprep.subr.mxu0 %v8089_v58 }
 0x7c1   :  { %2719 = vmatpush1.msra.mxu0 %v8092_v50 }
 0x7c2   :  { %2720 = vmatprep.subr.mxu0 %v9935_v40 }
 0x7c3   :  { %2721 = vmatpush1.msra.mxu0 %v9937_v45 }
 0x7c4   :  { %2722 = vmatprep.subr.mxu0 %v9939_v48 }
 0x7c5   :  { %2723 = vmatpush1.msra.mxu0 %v9941_v60 }
 0x7c6   :  { %2724 = vmatprep.subr.mxu0 %v9943_v6 }
 0x7c7   :  { %2725 = vmatpush1.msra.mxu0 %v9945_v9 }
 0x7c8   :  { %2726 = vmatprep.subr.mxu0 %v9947_v14  ;;  %v9967_v14 = vld [vmem:[#allocation28_spill] sm:$0xff] }
 0x7c9   :  { %2727 = vmatpush1.msra.mxu0 %v9949_v15 }
 0x7ca   :  { %2935 = vmatprep.subr.mxu0 %v9951_v20  ;;  %v8262_v20 = vld [vmem:[#allocation12 + $0x1b0] sm:$0xff] }
 0x7cb   :  { %2772 = vmatpush1.msra.mxu1 %v8262_v20 }
 0x7cc   :  { %2773 = vmatprep.subr.mxu1 %v8265_v34 }
 0x7cd   :  { %2774 = vmatpush1.msra.mxu1 %v8268_v35 }
 0x7ce   :  { %2775 = vmatprep.subr.mxu1 %v8271_v59 }
 0x7cf   :  { %2776 = vmatpush1.msra.mxu1 %v8274_v39 }
 0x7d0   :  { %2777 = vmatprep.subr.mxu1 %v8277_v62 }
 0x7d1   :  { %2778 = vmatpush1.msra.mxu1 %v8280_v29 }
 0x7d2   :  { %2779 = vmatprep.subr.mxu1 %v8283_v1 }
 0x7d3   :  { %2780 = vmatpush1.msra.mxu1 %v8286_v7 }
 0x7d4   :  { %2781 = vmatprep.subr.mxu1 %v8289_v4 }
 0x7d5   :  { %2782 = vmatpush1.msra.mxu1 %v8291_v28 }
 0x7d6   :  { %2783 = vmatprep.subr.mxu1 %v8293_v27 }
 0x7d7   :  { %2784 = vmatpush1.msra.mxu1 %v8296_v5 }
 0x7d8   :  { %2785 = vmatprep.subr.mxu1 %v8299_v32 }
 0x7d9   :  { %2786 = vmatpush1.msra.mxu1 %v8302_v17 }
 0x7da   :  { %2787 = vmatprep.subr.mxu1 %v8305_v36 }
 0x7db   :  { %2788 = vmatpush1.msra.mxu1 %v8308_v42 }
 0x7dc   :  { %2789 = vmatprep.subr.mxu1 %v8311_v47 }
 0x7dd   :  { %2790 = vmatpush1.msra.mxu1 %v8314_v51 }
 0x7de   :  { %2791 = vmatprep.subr.mxu1 %v8317_v3 }
 0x7df   :  { %2792 = vmatpush1.msra.mxu1 %v8320_v8 }
 0x7e0   :  { %2793 = vmatprep.subr.mxu1 %v8323_v43  ;;  %v9968_v43 = vld [vmem:[#allocation29_spill] sm:$0xff] }
 0x7e1   :  { %2794 = vmatpush1.msra.mxu1 %v8326_v21 }
 0x7e2   :  { %2795 = vmatprep.subr.mxu1 %v8329_v23  ;;  %v9969_v23 = vld [vmem:[#allocation48_spill] sm:$0xff] }
 0x7e3   :  { %2796 = vmatpush1.msra.mxu1 %v8332_v26 }
 0x7e4   :  { %2797 = vmatprep.subr.mxu1 %v8335_v16  ;;  %v9970_v16 = vld [vmem:[#allocation49_spill] sm:$0xff] }
 0x7e5   :  { %2798 = vmatpush1.msra.mxu1 %v8198_v53 }
 0x7e6   :  { %3006 = vmatprep.subr.mxu1 %v8247_v63 }
 0x86a   :  { %v2523_v15 = vpop.f32.mrf.mxu0  ;;  %v2594_v8 = vpop.f32.mrf.mxu1 }
 0x86b   :  { %v2599_v9 = vadd.f32 %v2523_v15, %v9967_v14  ;;  %v2601_v45 = vadd.f32 %v2594_v8, %v9969_v23 }
 0x86c   :  { %v2525_v6 = vpop.f32.mrf.mxu0  ;;  %v2596_v26 = vpop.f32.mrf.mxu1 }
 0x86d   :  { %v6109_v60 = vmul.f32 -1.442695, %v2599_v9  ;;  %v2600_v48 = vadd.f32 %v2525_v6, %v9968_v43  ;;  %v6111_v3 = vmul.f32 -1.442695, %v2601_v45  ;;  %v2602_v40 = vadd.f32 %v2596_v26, %v9970_v16 }
 0x86f   :  { %6747 = vpow2.f32 %v6109_v60  ;;  %v6110_v21 = vmul.f32 -1.442695, %v2600_v48 }
 0x871   :  { %6749 = vpow2.f32 %v6110_v21 }
 0x872   :  { %6751 = vpow2.f32 %v6111_v3  ;;  %v9993_v3 = vld [vmem:[#allocation50_spill] sm:$0xff] }
 0x873   :  { %6753 = vtanh.f32 %v2602_v40 }
 0x87c   :  { %v6748_v53 = vpop.eup %6747 }
 0x87d   :  { %v2612_v51 = vadd.f32 1.0, %v6748_v53  ;;  %v9992_v53 = vld [vmem:[#allocation31_spill] sm:$0xff] }
 0x87e   :  { %v6750_v63 = vpop.eup %6749 }
 0x87f   :  { %6755 = vrcp.f32 %v2612_v51  ;;  %v2613_v14 = vadd.f32 1.0, %v6750_v63  ;;  %v6752_v9 = vpop.eup %6751 }
 0x880   :  { %v6754_v6 = vpop.eup %6753  ;;  %v2614_v43 = vadd.f32 1.0, %v6752_v9 }
 0x881   :  { %6757 = vrcp.f32 %v2613_v14 }
 0x882   :  { %6759 = vrcp.f32 %v2614_v43 }
 0x88c   :  { %v6756_v60 = vpop.eup %6755 }
 0x88d   :  { %v2623_v48 = vmul.f32 %v6756_v60, %v6754_v6  ;;  %v9994_v6 = vld [vmem:[#allocation52_spill] sm:$0xff] }
 0x88e   :  { %v6758_v15 = vpop.eup %6757 }
 0x88f   :  { %v2622_v23 = vmul.f32 %v6758_v15, %v8206_v13  ;;  %v6760_v26 = vpop.eup %6759 }
 0x891   :  { %v8347_v8 = vadd.f32 %v2623_v48, %v2622_v23 }
 0x893   :  { %6761 = vtanh.f32 %v8347_v8 }
 0x8a0   :  { %v6762_v45 = vpop.eup %6761 }
 0x8a1   :  { %v8350_v16 = vmul.f32 %v6762_v45, %v6760_v26 }
 0x8a3   :  { %9971 = vst [vmem:[#allocation46_spill] sm:$0xff] %v8350_v16  ;;  %2761 = vmatmul.mubr.f32.vlgmr.msra.gmra.mxu0 %v8350_v16  ;;  %2832 = vmatmul.mubr.f32.vlgmr.msra.gmra.mxu1 %v8350_v16  ;;  %v8556_v16 = vld [vmem:[#allocation12] sm:$0xff] }
 0x8a4   :  { %2936 = vmatpush1.msra.mxu0 %v8028_v0  ;;  %3007 = vmatpush1.msra.mxu1 %v8250_v22  ;;  %v9972_v0 = vld [vmem:[#allocation41_spill] sm:$0xff] }
 0x8a5   :  { %2937 = vmatprep.subr.mxu0 %v8031_v25  ;;  %3008 = vmatprep.subr.mxu1 %v8253_v55  ;;  %v9973_v25 = vld [vmem:[#allocation61_spill] sm:$0xff] }
 0x8a6   :  { %2938 = vmatpush1.msra.mxu0 %v8034_v61  ;;  %3009 = vmatpush1.msra.mxu1 %v8256_v38  ;;  %v9974_v61 = vld [vmem:[#allocation42_spill] sm:$0xff] }
 0x8a7   :  { %2939 = vmatprep.subr.mxu0 %v8037_v44  ;;  %3010 = vmatprep.subr.mxu1 %v8259_v31  ;;  %v9975_v44 = vld [vmem:[#allocation62_spill] sm:$0xff] }
 0x8a8   :  { %2940 = vmatpush1.msra.mxu0 %v8040_v33  ;;  %3011 = vmatpush1.msra.mxu1 %v8262_v20  ;;  %v9976_v33 = vld [vmem:[#allocation43_spill] sm:$0xff] }
 0x8a9   :  { %2941 = vmatprep.subr.mxu0 %v8043_v12  ;;  %3012 = vmatprep.subr.mxu1 %v8265_v34  ;;  %v9977_v12 = vld [vmem:[#allocation63_spill] sm:$0xff] }
 0x8aa   :  { %2942 = vmatpush1.msra.mxu0 %v8046_v11  ;;  %3013 = vmatpush1.msra.mxu1 %v8268_v35  ;;  %v9979_v11 = vld [vmem:[#allocation64_spill] sm:$0xff] }
 0x8ab   :  { %2943 = vmatprep.subr.mxu0 %v8049_v10  ;;  %3014 = vmatprep.subr.mxu1 %v8271_v59  ;;  %v9981_v10 = vld [vmem:[#allocation65_spill] sm:$0xff]  ;;  %10003 = vst [vmem:[#allocation64_spill] sm:$0xff] %v8556_v16 }
 0x8ac   :  { %2944 = vmatpush1.msra.mxu0 %v8052_v24  ;;  %3015 = vmatpush1.msra.mxu1 %v8274_v39  ;;  %v9983_v24 = vld [vmem:[#allocation66_spill] sm:$0xff] }
 0x8ad   :  { %2945 = vmatprep.subr.mxu0 %v8055_v41  ;;  %3016 = vmatprep.subr.mxu1 %v8277_v62  ;;  %v9984_v41 = vld [vmem:[#allocation26_spill] sm:$0xff] }
 0x8ae   :  { %2946 = vmatpush1.msra.mxu0 %v8058_v18  ;;  %3017 = vmatpush1.msra.mxu1 %v8280_v29  ;;  %v9985_v18 = vld [vmem:[#allocation67_spill] sm:$0xff] }
 0x8af   :  { %2947 = vmatprep.subr.mxu0 %v8061_v19  ;;  %3018 = vmatprep.subr.mxu1 %v8283_v1  ;;  %v9986_v19 = vld [vmem:[#allocation27_spill] sm:$0xff] }
 0x8b0   :  { %2948 = vmatpush1.msra.mxu0 %v8064_v56  ;;  %3019 = vmatpush1.msra.mxu1 %v8286_v7  ;;  %v9987_v56 = vld [vmem:[#allocation68_spill] sm:$0xff] }
 0x8b1   :  { %2949 = vmatprep.subr.mxu0 %v8067_v54  ;;  %3020 = vmatprep.subr.mxu1 %v8289_v4  ;;  %v9988_v54 = vmov 0.0  }
 0x8b2   :  { %2950 = vmatpush1.msra.mxu0 %v8069_v30  ;;  %3021 = vmatpush1.msra.mxu1 %v8291_v28  ;;  %v9989_v30 = vld [vmem:[#allocation38_spill] sm:$0xff] }
 0x8b3   :  { %2951 = vmatprep.subr.mxu0 %v8071_v37  ;;  %3022 = vmatprep.subr.mxu1 %v8293_v27  ;;  %v9990_v37 = vld [vmem:[#allocation40_spill] sm:$0xff] }
 0x8b4   :  { %2952 = vmatpush1.msra.mxu0 %v8074_v52  ;;  %3023 = vmatpush1.msra.mxu1 %v8296_v5 }
 0x8b5   :  { %2953 = vmatprep.subr.mxu0 %v8077_v2  ;;  %3024 = vmatprep.subr.mxu1 %v8299_v32  ;;  %v9991_v2 = vld [vmem:[#allocation30_spill] sm:$0xff] }
 0x8b6   :  { %2954 = vmatpush1.msra.mxu0 %v8080_v49  ;;  %3025 = vmatpush1.msra.mxu1 %v8302_v17 }
 0x8b7   :  { %2955 = vmatprep.subr.mxu0 %v8083_v57  ;;  %3026 = vmatprep.subr.mxu1 %v8305_v36 }
 0x8b8   :  { %2956 = vmatpush1.msra.mxu0 %v8086_v46  ;;  %3027 = vmatpush1.msra.mxu1 %v8308_v42  ;;  %v9978_v46 = vld [vmem:[#allocation44_spill] sm:$0xff] }
 0x8b9   :  { %2957 = vmatprep.subr.mxu0 %v8089_v58  ;;  %3028 = vmatprep.subr.mxu1 %v8311_v47  ;;  %v9980_v58 = vld [vmem:[#allocation45_spill] sm:$0xff] }
 0x8ba   :  { %2958 = vmatpush1.msra.mxu0 %v8092_v50  ;;  %3029 = vmatpush1.msra.mxu1 %v9972_v0  ;;  %v9982_v50 = vld [vmem:[#allocation60_spill] sm:$0xff] }
 0x8bb   :  { %2959 = vmatprep.subr.mxu0 %v9973_v25  ;;  %3030 = vmatprep.subr.mxu1 %v9974_v61 }
 0x8bc   :  { %2960 = vmatpush1.msra.mxu0 %v9975_v44  ;;  %3031 = vmatpush1.msra.mxu1 %v9976_v33 }
 0x8bd   :  { %2961 = vmatprep.subr.mxu0 %v9977_v12  ;;  %3032 = vmatprep.subr.mxu1 %v9978_v46 }
 0x8be   :  { %2962 = vmatpush1.msra.mxu0 %v9979_v11  ;;  %3033 = vmatpush1.msra.mxu1 %v9980_v58 }
 0x8bf   :  { %2963 = vmatprep.subr.mxu0 %v9981_v10  ;;  %3034 = vmatprep.subr.mxu1 %v9982_v50 }
 0x8c0   :  { %2964 = vmatpush1.msra.mxu0 %v9983_v24  ;;  %3035 = vmatpush1.msra.mxu1 %v9984_v41 }
 0x8c1   :  { %2965 = vmatprep.subr.mxu0 %v9985_v18  ;;  %3036 = vmatprep.subr.mxu1 %v9986_v19 }
 0x8c2   :  { %2966 = vmatpush1.msra.mxu0 %v9987_v56  ;;  %2999 = vmatprep.mubr.f32.mxu0 %v9988_v54 }
 0x8c3   :  { %3037 = vmatpush1.msra.mxu1 %v9989_v30  ;;  %3070 = vmatprep.mubr.f32.mxu1 %v9988_v54 }
 0x8c4   :  { %3245 = vmatprep.subr.mxu1 %v9990_v37 }
 0x963   :  { %v2762_v52 = vpop.f32.mrf.mxu0  ;;  %v2833_v51 = vpop.f32.mrf.mxu1 }
 0x964   :  { %v2838_v49 = vadd.f32 %v2762_v52, %v9991_v2  ;;  %v2840_v21 = vadd.f32 %v2833_v51, %v9993_v3  ;;  %v8468_v2 = vld [vmem:[#allocation12 + $0x1e0] sm:$0xff]  ;;  %v8495_v51 = vld [vmem:[#allocation12 + $0x148] sm:$0xff] }
 0x965   :  { %v2764_v57 = vpop.f32.mrf.mxu0  ;;  %v2835_v14 = vpop.f32.mrf.mxu1  ;;  %v8498_v3 = vld [vmem:[#allocation12 + $0x140] sm:$0xff] }
 0x966   :  { %v6112_v40 = vmul.f32 -1.442695, %v2838_v49  ;;  %v2839_v13 = vadd.f32 %v2764_v57, %v9992_v53  ;;  %v6114_v9 = vmul.f32 -1.442695, %v2840_v21  ;;  %v2841_v60 = vadd.f32 %v2835_v14, %v9994_v6  ;;  %v8471_v49 = vld [vmem:[#allocation12 + $0x1c8] sm:$0xff]  ;;  %v8474_v57 = vld [vmem:[#allocation12 + $0x1c0] sm:$0xff] }
 0x967   :  { %v8486_v53 = vld [vmem:[#allocation12 + $0x180] sm:$0xff]  ;;  %v8501_v21 = vld [vmem:[#allocation12 + $0x128] sm:$0xff] }
 0x968   :  { %6763 = vpow2.f32 %v6112_v40  ;;  %v6113_v63 = vmul.f32 -1.442695, %v2839_v13  ;;  %v8477_v40 = vld [vmem:[#allocation12 + $0x1a8] sm:$0xff]  ;;  %v8504_v14 = vld [vmem:[#allocation12 + $0x120] sm:$0xff] }
 0x969   :  { %v8489_v13 = vld [vmem:[#allocation12 + $0x168] sm:$0xff]  ;;  %v8509_v6 = vld [vmem:[#allocation12 + $0x100] sm:$0xff] }
 0x96a   :  { %6765 = vpow2.f32 %v6113_v63  ;;  %v8492_v63 = vld [vmem:[#allocation12 + $0x160] sm:$0xff] }
 0x96b   :  { %6767 = vpow2.f32 %v6114_v9  ;;  %v8507_v9 = vld [vmem:[#allocation12 + $0x108] sm:$0xff] }
 0x96c   :  { %6769 = vtanh.f32 %v2841_v60  ;;  %v8511_v60 = vld [vmem:[#allocation12 + $0xe8] sm:$0xff] }
 0x975   :  { %v6764_v48 = vpop.eup %6763 }
 0x976   :  { %v2851_v15 = vadd.f32 1.0, %v6764_v48  ;;  %v8514_v48 = vld [vmem:[#allocation12 + $0xe0] sm:$0xff] }
 0x977   :  { %v6766_v43 = vpop.eup %6765 }
 0x978   :  { %6771 = vrcp.f32 %v2851_v15  ;;  %v2852_v23 = vadd.f32 1.0, %v6766_v43  ;;  %v6768_v26 = vpop.eup %6767  ;;  %v8517_v15 = vld [vmem:[#allocation12 + $0xc8] sm:$0xff]  ;;  %v8520_v43 = vld [vmem:[#allocation12 + $0xc0] sm:$0xff] }
 0x979   :  { %v6770_v45 = vpop.eup %6769  ;;  %v2853_v11 = vadd.f32 1.0, %v6768_v26  ;;  %v8526_v26 = vld [vmem:[#allocation12 + $0xa0] sm:$0xff] }
 0x97a   :  { %6773 = vrcp.f32 %v2852_v23  ;;  %v8523_v23 = vld [vmem:[#allocation12 + $0xa8] sm:$0xff] }
 0x97b   :  { %6775 = vrcp.f32 %v2853_v11  ;;  %v8541_v11 = vld [vmem:[#allocation12 + $0x48] sm:$0xff] }
 0x97c   :  { %9998 = vst [vmem:[#allocation48_spill] sm:$0xff] %v8541_v11 }
 0x985   :  { %v6772_v25 = vpop.eup %6771 }
 0x986   :  { %v2862_v44 = vmul.f32 %v6772_v25, %v6770_v45  ;;  %v8529_v45 = vld [vmem:[#allocation12 + $0x88] sm:$0xff]  ;;  %v8532_v25 = vld [vmem:[#allocation12 + $0x80] sm:$0xff] }
 0x987   :  { %v6774_v12 = vpop.eup %6773 }
 0x988   :  { %v2861_v10 = vmul.f32 %v6774_v12, %v8347_v8  ;;  %v6776_v18 = vpop.eup %6775  ;;  %v8465_v8 = vld [vmem:[#allocation12 + $0x1e8] sm:$0xff]  ;;  %v8538_v12 = vld [vmem:[#allocation12 + $0x60] sm:$0xff] }
 0x989   :  { %3174 = vmatprep.subr.mxu0 %v8465_v8  ;;  %9997 = vst [vmem:[#allocation29_spill] sm:$0xff] %v8538_v12 }
 0x98a   :  { %v8424_v24 = vadd.f32 %v2862_v44, %v2861_v10  ;;  %v8535_v44 = vld [vmem:[#allocation12 + $0x68] sm:$0xff]  ;;  %v8544_v10 = vld [vmem:[#allocation12 + $0x40] sm:$0xff] }
 0x98b   :  { %9996 = vst [vmem:[#allocation28_spill] sm:$0xff] %v8535_v44  ;;  %9999 = vst [vmem:[#allocation49_spill] sm:$0xff] %v8544_v10 }
 0x98c   :  { %6777 = vtanh.f32 %v8424_v24 }
 0x999   :  { %v6778_v56 = vpop.eup %6777 }
 0x99a   :  { %v8427_v52 = vmul.f32 %v6778_v56, %v6776_v18  ;;  %v8547_v18 = vld [vmem:[#allocation12 + $0x28] sm:$0xff]  ;;  %v8550_v56 = vld [vmem:[#allocation12 + $0x20] sm:$0xff] }
 0x99b   :  { %10000 = vst [vmem:[#allocation61_spill] sm:$0xff] %v8547_v18  ;;  %10001 = vst [vmem:[#allocation62_spill] sm:$0xff] %v8550_v56 }
 0x99c   :  { %9995 = vst [vmem:[#allocation47_spill] sm:$0xff] %v8427_v52  ;;  %3000 = vmatmul.mubr.f32.vlgmr.msra.gmra.mxu0 %v8427_v52  ;;  %3071 = vmatmul.mubr.f32.vlgmr.msra.gmra.mxu1 %v8427_v52  ;;  %v8553_v52 = vld [vmem:[#allocation12 + $0x8] sm:$0xff] }
 0x99d   :  { %3246 = vmatpush1.msra.mxu1 %v8250_v22  ;;  %3238 = vmatprep.mubr.f32.mxu0 %v9988_v54  ;;  %10002 = vst [vmem:[#allocation63_spill] sm:$0xff] %v8553_v52 }
 0x99e   :  { %3247 = vmatprep.subr.mxu1 %v8253_v55  ;;  %3309 = vmatprep.mubr.f32.mxu1 %v9988_v54 }
 0x99f   :  { %3248 = vmatpush1.msra.mxu1 %v8256_v38  ;;  %3175 = vmatpush1.msra.mxu0 %v8468_v2 }
 0x9a0   :  { %3249 = vmatprep.subr.mxu1 %v8259_v31  ;;  %3176 = vmatprep.subr.mxu0 %v8471_v49 }
 0x9a1   :  { %3250 = vmatpush1.msra.mxu1 %v8262_v20  ;;  %3177 = vmatpush1.msra.mxu0 %v8474_v57 }
 0x9a2   :  { %3251 = vmatprep.subr.mxu1 %v8265_v34  ;;  %3178 = vmatprep.subr.mxu0 %v8477_v40 }
 0x9a3   :  { %3252 = vmatpush1.msra.mxu1 %v8268_v35 }
 0x9a4   :  { %3253 = vmatprep.subr.mxu1 %v8271_v59 }
 0x9a5   :  { %3254 = vmatpush1.msra.mxu1 %v8274_v39 }
 0x9a6   :  { %3255 = vmatprep.subr.mxu1 %v8277_v62 }
 0x9a7   :  { %3256 = vmatpush1.msra.mxu1 %v8280_v29 }
 0x9a8   :  { %3257 = vmatprep.subr.mxu1 %v8283_v1 }
 0x9a9   :  { %3258 = vmatpush1.msra.mxu1 %v8286_v7 }
 0x9aa   :  { %3259 = vmatprep.subr.mxu1 %v8289_v4 }
 0x9ab   :  { %3260 = vmatpush1.msra.mxu1 %v8291_v28 }
 0x9ac   :  { %3261 = vmatprep.subr.mxu1 %v8293_v27 }
 0x9ad   :  { %3262 = vmatpush1.msra.mxu1 %v8296_v5 }
 0x9ae   :  { %3263 = vmatprep.subr.mxu1 %v8299_v32 }
 0x9af   :  { %3264 = vmatpush1.msra.mxu1 %v8302_v17 }
 0x9b0   :  { %3265 = vmatprep.subr.mxu1 %v8305_v36 }
 0x9b1   :  { %3266 = vmatpush1.msra.mxu1 %v8308_v42 }
 0x9b2   :  { %3267 = vmatprep.subr.mxu1 %v8311_v47 }
 0x9b3   :  { %3268 = vmatpush1.msra.mxu1 %v9972_v0 }
 0x9b4   :  { %3269 = vmatprep.subr.mxu1 %v9974_v61 }
 0x9b5   :  { %3270 = vmatpush1.msra.mxu1 %v9976_v33  ;;  %v10006_v33 = vld [vmem:[#allocation53_spill] sm:$0xff] }
 0x9b6   :  { %3271 = vmatprep.subr.mxu1 %v9978_v46 }
 0x9b7   :  { %3272 = vmatpush1.msra.mxu1 %v9980_v58 }
 0x9b8   :  { %3273 = vmatprep.subr.mxu1 %v9982_v50 }
 0x9b9   :  { %3274 = vmatpush1.msra.mxu1 %v9984_v41 }
 0x9ba   :  { %3275 = vmatprep.subr.mxu1 %v9986_v19  ;;  %v10004_v19 = vld [vmem:[#allocation32_spill] sm:$0xff] }
 0x9bb   :  { %3276 = vmatpush1.msra.mxu1 %v9989_v30  ;;  %v8480_v30 = vld [vmem:[#allocation12 + $0x1a0] sm:$0xff] }
 0x9bc   :  { %3484 = vmatprep.subr.mxu1 %v9990_v37  ;;  %3179 = vmatpush1.msra.mxu0 %v8480_v30  ;;  %v8483_v37 = vld [vmem:[#allocation12 + $0x188] sm:$0xff] }
 0x9bd   :  { %3180 = vmatprep.subr.mxu0 %v8483_v37 }
 0x9be   :  { %3181 = vmatpush1.msra.mxu0 %v8486_v53 }
 0x9bf   :  { %3182 = vmatprep.subr.mxu0 %v8489_v13 }
 0x9c0   :  { %3183 = vmatpush1.msra.mxu0 %v8492_v63 }
 0x9c1   :  { %3184 = vmatprep.subr.mxu0 %v8495_v51 }
 0x9c2   :  { %3185 = vmatpush1.msra.mxu0 %v8498_v3 }
 0x9c3   :  { %3186 = vmatprep.subr.mxu0 %v8501_v21 }
 0x9c4   :  { %3187 = vmatpush1.msra.mxu0 %v8504_v14 }
 0x9c5   :  { %3188 = vmatprep.subr.mxu0 %v8507_v9 }
 0x9c6   :  { %3189 = vmatpush1.msra.mxu0 %v8509_v6 }
 0x9c7   :  { %3190 = vmatprep.subr.mxu0 %v8511_v60 }
 0x9c8   :  { %3191 = vmatpush1.msra.mxu0 %v8514_v48 }
 0x9c9   :  { %3192 = vmatprep.subr.mxu0 %v8517_v15 }
 0x9ca   :  { %3193 = vmatpush1.msra.mxu0 %v8520_v43 }
 0x9cb   :  { %3194 = vmatprep.subr.mxu0 %v8523_v23 }
 0x9cc   :  { %3195 = vmatpush1.msra.mxu0 %v8526_v26 }
 0x9cd   :  { %3196 = vmatprep.subr.mxu0 %v8529_v45 }
 0x9ce   :  { %3197 = vmatpush1.msra.mxu0 %v8532_v25 }
 0x9cf   :  { %3198 = vmatprep.subr.mxu0 %v8535_v44 }
 0x9d0   :  { %3199 = vmatpush1.msra.mxu0 %v8538_v12 }
 0x9d1   :  { %3200 = vmatprep.subr.mxu0 %v8541_v11 }
 0x9d2   :  { %3201 = vmatpush1.msra.mxu0 %v8544_v10  ;;  %v10005_v10 = vld [vmem:[#allocation33_spill] sm:$0xff] }
 0x9d3   :  { %3202 = vmatprep.subr.mxu0 %v8547_v18 }
 0x9d4   :  { %3203 = vmatpush1.msra.mxu0 %v8550_v56 }
 0x9d5   :  { %3204 = vmatprep.subr.mxu0 %v8553_v52  ;;  %v10007_v52 = vld [vmem:[#allocation54_spill] sm:$0xff] }
 0x9d6   :  { %3205 = vmatpush1.msra.mxu0 %v8556_v16 }
 0x9d7   :  { %3413 = vmatprep.subr.mxu0 %v8465_v8 }
 0xa5c   :  { %v3001_v54 = vpop.f32.mrf.mxu0  ;;  %v3072_v18 = vpop.f32.mrf.mxu1 }
 0xa5d   :  { %v3077_v41 = vadd.f32 %v3001_v54, %v10004_v19  ;;  %v3079_v12 = vadd.f32 %v3072_v18, %v10006_v33 }
 0xa5e   :  { %v3003_v50 = vpop.f32.mrf.mxu0  ;;  %v3074_v56 = vpop.f32.mrf.mxu1 }
 0xa5f   :  { %v6115_v58 = vmul.f32 -1.442695, %v3077_v41  ;;  %v3078_v46 = vadd.f32 %v3003_v50, %v10005_v10  ;;  %v6117_v61 = vmul.f32 -1.442695, %v3079_v12  ;;  %v3080_v44 = vadd.f32 %v3074_v56, %v10007_v52  ;;  %v3654_v56 = vld [vmem:[#allocation10 + $0x1e0] sm:$0xff] }
 0xa61   :  { %6779 = vpow2.f32 %v6115_v58  ;;  %v6116_v11 = vmul.f32 -1.442695, %v3078_v46 }
 0xa63   :  { %6781 = vpow2.f32 %v6116_v11 }
 0xa64   :  { %6783 = vpow2.f32 %v6117_v61 }
 0xa65   :  { %6785 = vtanh.f32 %v3080_v44 }
 0xa6e   :  { %v6780_v16 = vpop.eup %6779 }
 0xa6f   :  { %v3090_v0 = vadd.f32 1.0, %v6780_v16 }
 0xa70   :  { %v6782_v8 = vpop.eup %6781 }
 0xa71   :  { %6787 = vrcp.f32 %v3090_v0  ;;  %v3091_v19 = vadd.f32 1.0, %v6782_v8  ;;  %v6784_v41 = vpop.eup %6783  ;;  %v3656_v8 = vld [vmem:[#allocation10 + $0x1f0] sm:$0xff] }
 0xa72   :  { %v6786_v50 = vpop.eup %6785  ;;  %v3092_v11 = vadd.f32 1.0, %v6784_v41  ;;  %v3653_v41 = vld [vmem:[#allocation10 + $0x1d8] sm:$0xff] }
 0xa73   :  { %6789 = vrcp.f32 %v3091_v19  ;;  %v3651_v19 = vld [vmem:[#allocation10 + $0x1c8] sm:$0xff] }
 0xa74   :  { %6791 = vrcp.f32 %v3092_v11  ;;  %v3646_v11 = vld [vmem:[#allocation10 + $0x1a0] sm:$0xff] }
 0xa7e   :  { %v6788_v58 = vpop.eup %6787 }
 0xa7f   :  { %v3101_v46 = vmul.f32 %v6788_v58, %v6786_v50  ;;  %v3650_v50 = vld [vmem:[#allocation10 + $0x1c0] sm:$0xff]  ;;  %v3652_v58 = vld [vmem:[#allocation10 + $0x1d0] sm:$0xff] }
 0xa80   :  { %v6790_v54 = vpop.eup %6789 }
 0xa81   :  { %v3100_v33 = vmul.f32 %v6790_v54, %v8424_v24  ;;  %v6792_v16 = vpop.eup %6791  ;;  %v3649_v54 = vld [vmem:[#allocation10 + $0x1b8] sm:$0xff] }
 0xa83   :  { %v8567_v10 = vadd.f32 %v3101_v46, %v3100_v33  ;;  %v3647_v46 = vld [vmem:[#allocation10 + $0x1a8] sm:$0xff]  ;;  %v3648_v33 = vld [vmem:[#allocation10 + $0x1b0] sm:$0xff] }
 0xa85   :  { %6793 = vtanh.f32 %v8567_v10 }
 0xa92   :  { %v6794_v61 = vpop.eup %6793 }
 0xa93   :  { %v8570_v52 = vmul.f32 %v6794_v61, %v6792_v16  ;;  %v3645_v16 = vld [vmem:[#allocation10 + $0x198] sm:$0xff]  ;;  %v3642_v61 = vld [vmem:[#allocation10 + $0x180] sm:$0xff] }
 0xa95   :  { %3239 = vmatmul.mubr.f32.vlgmr.msra.gmra.mxu0 %v8570_v52  ;;  %3310 = vmatmul.mubr.f32.vlgmr.msra.gmra.mxu1 %v8570_v52 }
 0xa96   :  { %3414 = vmatpush1.msra.mxu0 %v8468_v2  ;;  %3485 = vmatpush1.msra.mxu1 %v8250_v22  ;;  %v10008_v22 = vld [vmem:[#allocation41_spill] sm:$0xff] }
 0xa97   :  { %3415 = vmatprep.subr.mxu0 %v8471_v49  ;;  %3486 = vmatprep.subr.mxu1 %v8253_v55  ;;  %v10009_v55 = vld [vmem:[#allocation28_spill] sm:$0xff]  ;;  %v10026_v49 = vld [vmem:[#allocation35_spill] sm:$0xff] }
 0xa98   :  { %3416 = vmatpush1.msra.mxu0 %v8474_v57  ;;  %3487 = vmatpush1.msra.mxu1 %v8256_v38  ;;  %v10010_v38 = vld [vmem:[#allocation42_spill] sm:$0xff] }
 0xa99   :  { %3417 = vmatprep.subr.mxu0 %v8477_v40  ;;  %3488 = vmatprep.subr.mxu1 %v8259_v31  ;;  %v10011_v31 = vld [vmem:[#allocation29_spill] sm:$0xff] }
 0xa9a   :  { %3418 = vmatpush1.msra.mxu0 %v8480_v30  ;;  %3489 = vmatpush1.msra.mxu1 %v8262_v20  ;;  %v10012_v20 = vld [vmem:[#allocation43_spill] sm:$0xff] }
 0xa9b   :  { %3419 = vmatprep.subr.mxu0 %v8483_v37  ;;  %3490 = vmatprep.subr.mxu1 %v8265_v34  ;;  %v10013_v34 = vld [vmem:[#allocation48_spill] sm:$0xff]  ;;  %v10027_v37 = vld [vmem:[#allocation55_spill] sm:$0xff] }
 0xa9c   :  { %3420 = vmatpush1.msra.mxu0 %v8486_v53  ;;  %3491 = vmatpush1.msra.mxu1 %v8268_v35  ;;  %v10014_v35 = vld [vmem:[#allocation44_spill] sm:$0xff] }
 0xa9d   :  { %3421 = vmatprep.subr.mxu0 %v8489_v13  ;;  %3492 = vmatprep.subr.mxu1 %v8271_v59  ;;  %v10015_v59 = vld [vmem:[#allocation49_spill] sm:$0xff] }
 0xa9e   :  { %3422 = vmatpush1.msra.mxu0 %v8492_v63  ;;  %3493 = vmatpush1.msra.mxu1 %v8274_v39  ;;  %v10016_v39 = vld [vmem:[#allocation45_spill] sm:$0xff] }
 0xa9f   :  { %3423 = vmatprep.subr.mxu0 %v8495_v51  ;;  %3494 = vmatprep.subr.mxu1 %v8277_v62  ;;  %v10017_v62 = vld [vmem:[#allocation61_spill] sm:$0xff]  ;;  %v10028_v51 = vld [vmem:[#allocation56_spill] sm:$0xff] }
 0xaa0   :  { %3424 = vmatpush1.msra.mxu0 %v8498_v3  ;;  %3495 = vmatpush1.msra.mxu1 %v8280_v29  ;;  %v10018_v29 = vld [vmem:[#allocation60_spill] sm:$0xff] }
 0xaa1   :  { %3425 = vmatprep.subr.mxu0 %v8501_v21  ;;  %3496 = vmatprep.subr.mxu1 %v8283_v1  ;;  %v10019_v1 = vld [vmem:[#allocation62_spill] sm:$0xff] }
 0xaa2   :  { %3426 = vmatpush1.msra.mxu0 %v8504_v14  ;;  %3497 = vmatpush1.msra.mxu1 %v8286_v7  ;;  %v10020_v7 = vld [vmem:[#allocation26_spill] sm:$0xff] }
 0xaa3   :  { %3427 = vmatprep.subr.mxu0 %v8507_v9  ;;  %3498 = vmatprep.subr.mxu1 %v8289_v4  ;;  %v10021_v4 = vld [vmem:[#allocation63_spill] sm:$0xff] }
 0xaa4   :  { %3428 = vmatpush1.msra.mxu0 %v8509_v6  ;;  %3499 = vmatpush1.msra.mxu1 %v8291_v28  ;;  %v10022_v28 = vld [vmem:[#allocation27_spill] sm:$0xff] }
 0xaa5   :  { %3429 = vmatprep.subr.mxu0 %v8511_v60  ;;  %3500 = vmatprep.subr.mxu1 %v8293_v27  ;;  %v10023_v27 = vld [vmem:[#allocation64_spill] sm:$0xff] }
 0xaa6   :  { %3430 = vmatpush1.msra.mxu0 %v8514_v48  ;;  %3501 = vmatpush1.msra.mxu1 %v8296_v5  ;;  %v10024_v5 = vmov 0.0  }
 0xaa7   :  { %3431 = vmatprep.subr.mxu0 %v8517_v15  ;;  %3502 = vmatprep.subr.mxu1 %v8299_v32  ;;  %v3351_v32 = vld [vmem:[#allocation12 + $0x10] sm:$0xff] }
 0xaa8   :  { %3432 = vmatpush1.msra.mxu0 %v8520_v43  ;;  %3503 = vmatpush1.msra.mxu1 %v8302_v17  ;;  %v3655_v17 = vld [vmem:[#allocation10 + $0x1e8] sm:$0xff] }
 0xaa9   :  { %3433 = vmatprep.subr.mxu0 %v8523_v23  ;;  %3504 = vmatprep.subr.mxu1 %v8305_v36  ;;  %v3657_v36 = vld [vmem:[#allocation10 + $0x1f8] sm:$0xff] }
 0xaaa   :  { %3434 = vmatpush1.msra.mxu0 %v8526_v26  ;;  %3505 = vmatpush1.msra.mxu1 %v8308_v42 }
 0xaab   :  { %3435 = vmatprep.subr.mxu0 %v8529_v45  ;;  %3506 = vmatprep.subr.mxu1 %v8311_v47  ;;  %v10025_v47 = vld [vmem:[#allocation34_spill] sm:$0xff] }
 0xaac   :  { %3436 = vmatpush1.msra.mxu0 %v8532_v25  ;;  %3507 = vmatpush1.msra.mxu1 %v10008_v22  ;;  %v3644_v22 = vld [vmem:[#allocation10 + $0x190] sm:$0xff] }
 0xaad   :  { %3437 = vmatprep.subr.mxu0 %v10009_v55  ;;  %3508 = vmatprep.subr.mxu1 %v10010_v38  ;;  %v3639_v55 = vld [vmem:[#allocation10 + $0x168] sm:$0xff]  ;;  %v3641_v38 = vld [vmem:[#allocation10 + $0x178] sm:$0xff] }
 0xaae   :  { %3438 = vmatpush1.msra.mxu0 %v10011_v31  ;;  %3509 = vmatpush1.msra.mxu1 %v10012_v20  ;;  %v3638_v31 = vld [vmem:[#allocation10 + $0x160] sm:$0xff]  ;;  %v3640_v20 = vld [vmem:[#allocation10 + $0x170] sm:$0xff] }
 0xaaf   :  { %3439 = vmatprep.subr.mxu0 %v10013_v34  ;;  %3510 = vmatprep.subr.mxu1 %v10014_v35  ;;  %v3635_v34 = vld [vmem:[#allocation10 + $0x148] sm:$0xff]  ;;  %v3637_v35 = vld [vmem:[#allocation10 + $0x158] sm:$0xff] }
 0xab0   :  { %3440 = vmatpush1.msra.mxu0 %v10015_v59  ;;  %3511 = vmatpush1.msra.mxu1 %v10016_v39  ;;  %v3634_v59 = vld [vmem:[#allocation10 + $0x140] sm:$0xff]  ;;  %v3636_v39 = vld [vmem:[#allocation10 + $0x150] sm:$0xff] }
 0xab1   :  { %3441 = vmatprep.subr.mxu0 %v10017_v62  ;;  %3512 = vmatprep.subr.mxu1 %v10018_v29  ;;  %v3631_v62 = vld [vmem:[#allocation10 + $0x128] sm:$0xff]  ;;  %v3633_v29 = vld [vmem:[#allocation10 + $0x138] sm:$0xff] }
 0xab2   :  { %3442 = vmatpush1.msra.mxu0 %v10019_v1  ;;  %3513 = vmatpush1.msra.mxu1 %v10020_v7  ;;  %v3630_v1 = vld [vmem:[#allocation10 + $0x120] sm:$0xff]  ;;  %v3632_v7 = vld [vmem:[#allocation10 + $0x130] sm:$0xff] }
 0xab3   :  { %3443 = vmatprep.subr.mxu0 %v10021_v4  ;;  %3514 = vmatprep.subr.mxu1 %v10022_v28  ;;  %v3627_v4 = vld [vmem:[#allocation10 + $0x108] sm:$0xff]  ;;  %v3629_v28 = vld [vmem:[#allocation10 + $0x118] sm:$0xff] }
 0xab4   :  { %3444 = vmatpush1.msra.mxu0 %v10023_v27  ;;  %3477 = vmatprep.mubr.f32.mxu0 %v10024_v5  ;;  %v3626_v27 = vld [vmem:[#allocation10 + $0x100] sm:$0xff] }
 0xab5   :  { %3548 = vmatprep.mubr.f32.mxu1 %v10024_v5  ;;  %3515 = vmatpush1.msra.mxu1 %v3351_v32  ;;  %v3628_v32 = vld [vmem:[#allocation10 + $0x110] sm:$0xff] }
 0xab6   :  { %3681 = vmatprep.subr.mxu0 %v3655_v17  ;;  %3794 = vmatprep.subr.mxu1 %v3657_v36  ;;  %v3623_v17 = vld [vmem:[#allocation10 + $0xe8] sm:$0xff]  ;;  %v3625_v36 = vld [vmem:[#allocation10 + $0xf8] sm:$0xff] }
 0xb55   :  { %v3240_v42 = vpop.f32.mrf.mxu0  ;;  %v3311_v30 = vpop.f32.mrf.mxu1 }
 0xb56   :  { %v3316_v0 = vadd.f32 %v3240_v42, %v10025_v47  ;;  %v3318_v53 = vadd.f32 %v3311_v30, %v10027_v37  ;;  %v3622_v42 = vld [vmem:[#allocation10 + $0xe0] sm:$0xff]  ;;  %v3624_v47 = vld [vmem:[#allocation10 + $0xf0] sm:$0xff] }
 0xb57   :  { %v3242_v24 = vpop.f32.mrf.mxu0  ;;  %v3313_v13 = vpop.f32.mrf.mxu1  ;;  %v3614_v30 = vld [vmem:[#allocation10 + $0xa0] sm:$0xff]  ;;  %v3616_v37 = vld [vmem:[#allocation10 + $0xb0] sm:$0xff] }
 0xb58   :  { %v6118_v2 = vmul.f32 -1.442695, %v3316_v0  ;;  %v3317_v57 = vadd.f32 %v3242_v24, %v10026_v49  ;;  %v6120_v63 = vmul.f32 -1.442695, %v3318_v53  ;;  %v3319_v3 = vadd.f32 %v3313_v13, %v10028_v51  ;;  %v3619_v0 = vld [vmem:[#allocation10 + $0xc8] sm:$0xff]  ;;  %v3621_v24 = vld [vmem:[#allocation10 + $0xd8] sm:$0xff] }
 0xb59   :  { %v3620_v49 = vld [vmem:[#allocation10 + $0xd0] sm:$0xff]  ;;  %v3611_v53 = vld [vmem:[#allocation10 + $0x88] sm:$0xff]  ;;  %v3613_v13 = vld [vmem:[#allocation10 + $0x98] sm:$0xff] }
 0xb5a   :  { %6795 = vpow2.f32 %v6118_v2  ;;  %v6119_v40 = vmul.f32 -1.442695, %v3317_v57  ;;  %v3618_v2 = vld [vmem:[#allocation10 + $0xc0] sm:$0xff]  ;;  %v3615_v57 = vld [vmem:[#allocation10 + $0xa8] sm:$0xff]  ;;  %v3612_v51 = vld [vmem:[#allocation10 + $0x90] sm:$0xff] }
 0xb5c   :  { %6797 = vpow2.f32 %v6119_v40  ;;  %v3617_v40 = vld [vmem:[#allocation10 + $0xb8] sm:$0xff] }
 0xb5d   :  { %6799 = vpow2.f32 %v6120_v63  ;;  %v3610_v63 = vld [vmem:[#allocation10 + $0x80] sm:$0xff] }
 0xb5e   :  { %6801 = vtanh.f32 %v3319_v3  ;;  %v3607_v3 = vld [vmem:[#allocation10 + $0x68] sm:$0xff] }
 0xb67   :  { %v6796_v21 = vpop.eup %6795 }
 0xb68   :  { %v3329_v14 = vadd.f32 1.0, %v6796_v21  ;;  %v3609_v21 = vld [vmem:[#allocation10 + $0x78] sm:$0xff] }
 0xb69   :  { %v6798_v9 = vpop.eup %6797 }
 0xb6a   :  { %6803 = vrcp.f32 %v3329_v14  ;;  %v3330_v6 = vadd.f32 1.0, %v6798_v9  ;;  %v6800_v60 = vpop.eup %6799  ;;  %v3606_v14 = vld [vmem:[#allocation10 + $0x60] sm:$0xff]  ;;  %v3608_v9 = vld [vmem:[#allocation10 + $0x70] sm:$0xff] }
 0xb6b   :  { %v6802_v48 = vpop.eup %6801  ;;  %v3331_v26 = vadd.f32 1.0, %v6800_v60  ;;  %v3605_v60 = vld [vmem:[#allocation10 + $0x58] sm:$0xff] }
 0xb6c   :  { %6805 = vrcp.f32 %v3330_v6  ;;  %v3603_v6 = vld [vmem:[#allocation10 + $0x48] sm:$0xff] }
 0xb6d   :  { %6807 = vrcp.f32 %v3331_v26  ;;  %v3598_v26 = vld [vmem:[#allocation10 + $0x20] sm:$0xff] }
 0xb77   :  { %v6804_v15 = vpop.eup %6803 }
 0xb78   :  { %v3340_v43 = vmul.f32 %v6804_v15, %v6802_v48  ;;  %v3602_v48 = vld [vmem:[#allocation10 + $0x40] sm:$0xff]  ;;  %v3604_v15 = vld [vmem:[#allocation10 + $0x50] sm:$0xff] }
 0xb79   :  { %v6806_v23 = vpop.eup %6805 }
 0xb7a   :  { %v3339_v45 = vmul.f32 %v6806_v23, %v8567_v10  ;;  %v6808_v44 = vpop.eup %6807  ;;  %v3643_v10 = vld [vmem:[#allocation10 + $0x188] sm:$0xff]  ;;  %v3601_v23 = vld [vmem:[#allocation10 + $0x38] sm:$0xff] }
 0xb7c   :  { %v8642_v25 = vadd.f32 %v3340_v43, %v3339_v45  ;;  %v3599_v43 = vld [vmem:[#allocation10 + $0x28] sm:$0xff]  ;;  %v3600_v45 = vld [vmem:[#allocation10 + $0x30] sm:$0xff] }
 0xb7e   :  { %6809 = vtanh.f32 %v8642_v25 }
 0xb8b   :  { %v6810_v12 = vpop.eup %6809 }
 0xb8c   :  { %v8645_v18 = vmul.f32 %v6810_v12, %v6808_v44  ;;  %v3595_v44 = vld [vmem:[#allocation10 + $0x8] sm:$0xff]  ;;  %v3597_v12 = vld [vmem:[#allocation10 + $0x18] sm:$0xff] }
 0xb8e   :  { %3478 = vmatmul.mubr.f32.vlgmr.msra.gmra.mxu0 %v8645_v18  ;;  %3549 = vmatmul.mubr.f32.vlgmr.msra.gmra.mxu1 %v8645_v18 }
 0xb8f   :  { %3682 = vmatpush1.msra.mxu0 %v3654_v56  ;;  %3795 = vmatpush1.msra.mxu1 %v3656_v8  ;;  %v3594_v56 = vld [vmem:[#allocation10] sm:$0xff]  ;;  %v3596_v8 = vld [vmem:[#allocation10 + $0x10] sm:$0xff] }
 0xb90   :  { %3683 = vmatprep.subr.mxu0 %v3651_v19  ;;  %3796 = vmatprep.subr.mxu1 %v3653_v41  ;;  %v10029_v19 = vld [vmem:[#allocation59_spill] sm:$0xff]  ;;  %v10030_v41 = vld [vmem:[#allocation69_spill] sm:$0xff] }
 0xb91   :  { %3684 = vmatpush1.msra.mxu0 %v3650_v50  ;;  %3797 = vmatpush1.msra.mxu1 %v3652_v58  ;;  %v10031_v50 = vld [vmem:[#allocation39_spill] sm:$0xff]  ;;  %v10032_v58 = vld [vmem:[#allocation46_spill] sm:$0xff] }
 0xb92   :  { %3685 = vmatprep.subr.mxu0 %v3647_v46  ;;  %3798 = vmatprep.subr.mxu1 %v3649_v54  ;;  %v10033_v46 = vld [vmem:[#allocation47_spill] sm:$0xff]  ;;  %v8679_v54 = vld [vmem:[#allocation12 + $0x3e8] sm:$0xff] }
 0xb93   :  { %3686 = vmatpush1.msra.mxu0 %v3646_v11  ;;  %3799 = vmatpush1.msra.mxu1 %v3648_v33  ;;  %10034 = vst [vmem:[#allocation65_spill] sm:$0xff] %v8679_v54  ;;  %v8681_v11 = vld [vmem:[#allocation12 + $0x3f8] sm:$0xff]  ;;  %v8687_v33 = vld [vmem:[#allocation12 + $0x3f0] sm:$0xff] }
 0xb94   :  { %3687 = vmatprep.subr.mxu0 %v3643_v10  ;;  %3800 = vmatprep.subr.mxu1 %v3645_v16  ;;  %10035 = vst [vmem:[#allocation66_spill] sm:$0xff] %v8681_v11  ;;  %v8693_v10 = vld [vmem:[#allocation12 + $0x3d8] sm:$0xff]  ;;  %v8697_v16 = vld [vmem:[#allocation12 + $0x3c0] sm:$0xff] }
 0xb95   :  { %3688 = vmatpush1.msra.mxu0 %v3642_v61  ;;  %3801 = vmatpush1.msra.mxu1 %v3644_v22  ;;  %v8699_v61 = vld [vmem:[#allocation12 + $0x3d0] sm:$0xff]  ;;  %v8703_v22 = vld [vmem:[#allocation12 + $0x3a8] sm:$0xff] }
 0xb96   :  { %3689 = vmatprep.subr.mxu0 %v3639_v55  ;;  %3802 = vmatprep.subr.mxu1 %v3641_v38  ;;  %v8705_v55 = vld [vmem:[#allocation12 + $0x3b8] sm:$0xff]  ;;  %v8709_v38 = vld [vmem:[#allocation12 + $0x3a0] sm:$0xff] }
 0xb97   :  { %3690 = vmatpush1.msra.mxu0 %v3638_v31  ;;  %3803 = vmatpush1.msra.mxu1 %v3640_v20  ;;  %v8711_v31 = vld [vmem:[#allocation12 + $0x3b0] sm:$0xff]  ;;  %v8715_v20 = vld [vmem:[#allocation12 + $0x388] sm:$0xff] }
 0xb98   :  { %3691 = vmatprep.subr.mxu0 %v3635_v34  ;;  %3804 = vmatprep.subr.mxu1 %v3637_v35  ;;  %v8717_v34 = vld [vmem:[#allocation12 + $0x398] sm:$0xff]  ;;  %v8721_v35 = vld [vmem:[#allocation12 + $0x380] sm:$0xff] }
 0xb99   :  { %3692 = vmatpush1.msra.mxu0 %v3634_v59  ;;  %3805 = vmatpush1.msra.mxu1 %v3636_v39  ;;  %v8723_v59 = vld [vmem:[#allocation12 + $0x390] sm:$0xff]  ;;  %v8727_v39 = vld [vmem:[#allocation12 + $0x368] sm:$0xff] }
 0xb9a   :  { %3693 = vmatprep.subr.mxu0 %v3631_v62  ;;  %3806 = vmatprep.subr.mxu1 %v3633_v29  ;;  %v8729_v62 = vld [vmem:[#allocation12 + $0x378] sm:$0xff]  ;;  %v8733_v29 = vld [vmem:[#allocation12 + $0x360] sm:$0xff] }
 0xb9b   :  { %3694 = vmatpush1.msra.mxu0 %v3630_v1  ;;  %3807 = vmatpush1.msra.mxu1 %v3632_v7  ;;  %v8735_v1 = vld [vmem:[#allocation12 + $0x370] sm:$0xff]  ;;  %v8739_v7 = vld [vmem:[#allocation12 + $0x348] sm:$0xff] }
 0xb9c   :  { %3695 = vmatprep.subr.mxu0 %v3627_v4  ;;  %3808 = vmatprep.subr.mxu1 %v3629_v28  ;;  %v8741_v4 = vld [vmem:[#allocation12 + $0x358] sm:$0xff]  ;;  %v8745_v28 = vld [vmem:[#allocation12 + $0x340] sm:$0xff] }
 0xb9d   :  { %3696 = vmatpush1.msra.mxu0 %v3626_v27  ;;  %3809 = vmatpush1.msra.mxu1 %v3628_v32  ;;  %v8747_v27 = vld [vmem:[#allocation12 + $0x350] sm:$0xff]  ;;  %v8751_v32 = vld [vmem:[#allocation12 + $0x328] sm:$0xff] }
 0xb9e   :  { %3697 = vmatprep.subr.mxu0 %v3623_v17  ;;  %3810 = vmatprep.subr.mxu1 %v3625_v36  ;;  %v8753_v17 = vld [vmem:[#allocation12 + $0x338] sm:$0xff]  ;;  %v8757_v36 = vld [vmem:[#allocation12 + $0x320] sm:$0xff] }
 0xb9f   :  { %3698 = vmatpush1.msra.mxu0 %v3622_v42  ;;  %3811 = vmatpush1.msra.mxu1 %v3624_v47  ;;  %v8759_v42 = vld [vmem:[#allocation12 + $0x330] sm:$0xff]  ;;  %v8763_v47 = vld [vmem:[#allocation12 + $0x308] sm:$0xff] }
 0xba0   :  { %3699 = vmatprep.subr.mxu0 %v3619_v0  ;;  %3812 = vmatprep.subr.mxu1 %v3621_v24  ;;  %v8765_v0 = vld [vmem:[#allocation12 + $0x318] sm:$0xff]  ;;  %v8769_v24 = vld [vmem:[#allocation12 + $0x300] sm:$0xff] }
 0xba1   :  { %3700 = vmatpush1.msra.mxu0 %v3618_v2  ;;  %3813 = vmatpush1.msra.mxu1 %v3620_v49  ;;  %v8771_v2 = vld [vmem:[#allocation12 + $0x310] sm:$0xff]  ;;  %v8775_v49 = vld [vmem:[#allocation12 + $0x2e8] sm:$0xff] }
 0xba2   :  { %3701 = vmatprep.subr.mxu0 %v3615_v57  ;;  %3814 = vmatprep.subr.mxu1 %v3617_v40  ;;  %v8777_v57 = vld [vmem:[#allocation12 + $0x2f8] sm:$0xff]  ;;  %v8781_v40 = vld [vmem:[#allocation12 + $0x2e0] sm:$0xff] }
 0xba3   :  { %3702 = vmatpush1.msra.mxu0 %v3614_v30  ;;  %3815 = vmatpush1.msra.mxu1 %v3616_v37  ;;  %v8783_v30 = vld [vmem:[#allocation12 + $0x2f0] sm:$0xff]  ;;  %v8787_v37 = vld [vmem:[#allocation12 + $0x2c8] sm:$0xff] }
 0xba4   :  { %3703 = vmatprep.subr.mxu0 %v3611_v53  ;;  %3816 = vmatprep.subr.mxu1 %v3613_v13  ;;  %v8789_v53 = vld [vmem:[#allocation12 + $0x2d8] sm:$0xff]  ;;  %v8793_v13 = vld [vmem:[#allocation12 + $0x2c0] sm:$0xff] }
 0xba5   :  { %3704 = vmatpush1.msra.mxu0 %v3610_v63  ;;  %3817 = vmatpush1.msra.mxu1 %v3612_v51  ;;  %v8795_v63 = vld [vmem:[#allocation12 + $0x2d0] sm:$0xff]  ;;  %v8799_v51 = vld [vmem:[#allocation12 + $0x2a8] sm:$0xff] }
 0xba6   :  { %3705 = vmatprep.subr.mxu0 %v3607_v3  ;;  %3818 = vmatprep.subr.mxu1 %v3609_v21  ;;  %v8801_v3 = vld [vmem:[#allocation12 + $0x2b8] sm:$0xff]  ;;  %v8805_v21 = vld [vmem:[#allocation12 + $0x2a0] sm:$0xff] }
 0xba7   :  { %3706 = vmatpush1.msra.mxu0 %v3606_v14  ;;  %3819 = vmatpush1.msra.mxu1 %v3608_v9  ;;  %v8807_v14 = vld [vmem:[#allocation12 + $0x2b0] sm:$0xff]  ;;  %v8811_v9 = vld [vmem:[#allocation12 + $0x288] sm:$0xff] }
 0xba8   :  { %3707 = vmatprep.subr.mxu0 %v3603_v6  ;;  %3820 = vmatprep.subr.mxu1 %v3605_v60  ;;  %v8813_v6 = vld [vmem:[#allocation12 + $0x298] sm:$0xff]  ;;  %v8817_v60 = vld [vmem:[#allocation12 + $0x280] sm:$0xff] }
 0xba9   :  { %3708 = vmatpush1.msra.mxu0 %v3602_v48  ;;  %3821 = vmatpush1.msra.mxu1 %v3604_v15  ;;  %10036 = vst [vmem:[#allocation67_spill] sm:$0xff] %v8813_v6  ;;  %10037 = vst [vmem:[#allocation68_spill] sm:$0xff] %v8817_v60  ;;  %v8819_v48 = vld [vmem:[#allocation12 + $0x290] sm:$0xff]  ;;  %v8823_v15 = vld [vmem:[#allocation12 + $0x268] sm:$0xff] }
 0xbaa   :  { %3709 = vmatprep.subr.mxu0 %v3599_v43  ;;  %3822 = vmatprep.subr.mxu1 %v3601_v23  ;;  %10038 = vst [vmem:[#allocation38_spill] sm:$0xff] %v8819_v48  ;;  %10039 = vst [vmem:[#allocation40_spill] sm:$0xff] %v8823_v15  ;;  %v8825_v43 = vld [vmem:[#allocation12 + $0x278] sm:$0xff]  ;;  %v8829_v23 = vld [vmem:[#allocation12 + $0x260] sm:$0xff] }
 0xbab   :  { %3710 = vmatpush1.msra.mxu0 %v3598_v26  ;;  %3823 = vmatpush1.msra.mxu1 %v3600_v45  ;;  %10040 = vst [vmem:[#allocation30_spill] sm:$0xff] %v8825_v43  ;;  %10041 = vst [vmem:[#allocation31_spill] sm:$0xff] %v8829_v23  ;;  %v8831_v26 = vld [vmem:[#allocation12 + $0x270] sm:$0xff]  ;;  %v8835_v45 = vld [vmem:[#allocation12 + $0x248] sm:$0xff] }
 0xbac   :  { %3711 = vmatprep.subr.mxu0 %v3595_v44  ;;  %3824 = vmatprep.subr.mxu1 %v3597_v12  ;;  %10042 = vst [vmem:[#allocation50_spill] sm:$0xff] %v8831_v26  ;;  %10043 = vst [vmem:[#allocation52_spill] sm:$0xff] %v8835_v45  ;;  %v8837_v44 = vld [vmem:[#allocation12 + $0x258] sm:$0xff]  ;;  %v8841_v12 = vld [vmem:[#allocation12 + $0x240] sm:$0xff] }
 0xbad   :  { %3712 = vmatpush1.msra.mxu0 %v3594_v56  ;;  %3745 = vmatprep.mubr.f32.mxu0 %v10024_v5  ;;  %10044 = vst [vmem:[#allocation32_spill] sm:$0xff] %v8837_v44  ;;  %10045 = vst [vmem:[#allocation33_spill] sm:$0xff] %v8841_v12  ;;  %v8843_v56 = vld [vmem:[#allocation12 + $0x250] sm:$0xff] }
 0xbae   :  { %3825 = vmatpush1.msra.mxu1 %v3596_v8  ;;  %3858 = vmatprep.mubr.f32.mxu1 %v10024_v5  ;;  %10046 = vst [vmem:[#allocation53_spill] sm:$0xff] %v8843_v56  ;;  %v8847_v8 = vld [vmem:[#allocation12 + $0x228] sm:$0xff] }
 0xbaf   :  { %3746 = vmatmul.mubr.f32.vlgmr.msra.gmra.mxu0 %v10029_v19  ;;  %3859 = vmatmul.mubr.f32.vlgmr.msra.gmra.mxu1 %v10029_v19  ;;  %10047 = vst [vmem:[#allocation54_spill] sm:$0xff] %v8847_v8  ;;  %v8849_v19 = vld [vmem:[#allocation12 + $0x238] sm:$0xff] }
 0xbb0   :  { %3751 = vmatprep.mubr.f32.mxu0 %v10024_v5  ;;  %3864 = vmatprep.mubr.f32.mxu1 %v10024_v5  ;;  %10048 = vst [vmem:[#allocation41_spill] sm:$0xff] %v8849_v19 }
 0xbb1   :  { %4008 = vmatprep.subr.mxu0 %v8679_v54  ;;  %4079 = vmatprep.subr.mxu1 %v8681_v11 }
 0xbb2   :  { %4080 = vmatpush1.msra.mxu1 %v8687_v33 }
 0xbb3   :  { %3752 = vmatmul.mubr.f32.gmra.mxu0 %v10030_v41  ;;  %3865 = vmatmul.mubr.f32.gmra.mxu1 %v10030_v41  ;;  %v8853_v41 = vld [vmem:[#allocation12 + $0x220] sm:$0xff] }
 0xbb4   :  { %3757 = vmatprep.mubr.f32.mxu0 %v10024_v5  ;;  %3870 = vmatprep.mubr.f32.mxu1 %v10024_v5  ;;  %10049 = vst [vmem:[#allocation28_spill] sm:$0xff] %v8853_v41 }
 0xbb5   :  { %4081 = vmatprep.subr.mxu1 %v8693_v10 }
 0xbb6   :  { %4082 = vmatpush1.msra.mxu1 %v8699_v61 }
 0xbb7   :  { %3758 = vmatmul.mubr.f32.gmra.mxu0 %v10031_v50  ;;  %3871 = vmatmul.mubr.f32.gmra.mxu1 %v10031_v50  ;;  %v8855_v50 = vld [vmem:[#allocation12 + $0x230] sm:$0xff] }
 0xbb8   :  { %3763 = vmatprep.mubr.f32.mxu0 %v10024_v5  ;;  %3876 = vmatprep.mubr.f32.mxu1 %v10024_v5  ;;  %10050 = vst [vmem:[#allocation42_spill] sm:$0xff] %v8855_v50 }
 0xbb9   :  { %4083 = vmatprep.subr.mxu1 %v8705_v55 }
 0xbba   :  { %4084 = vmatpush1.msra.mxu1 %v8711_v31 }
 0xbbb   :  { %3764 = vmatmul.mubr.f32.gmra.mxu0 %v10032_v58  ;;  %3877 = vmatmul.mubr.f32.gmra.mxu1 %v10032_v58  ;;  %v8857_v58 = vld [vmem:[#allocation12 + $0x208] sm:$0xff] }
 0xbbc   :  { %3769 = vmatprep.mubr.f32.mxu0 %v10024_v5  ;;  %3882 = vmatprep.mubr.f32.mxu1 %v10024_v5  ;;  %10051 = vst [vmem:[#allocation29_spill] sm:$0xff] %v8857_v58 }
 0xbbd   :  { %4085 = vmatprep.subr.mxu1 %v8717_v34 }
 0xbbe   :  { %4086 = vmatpush1.msra.mxu1 %v8723_v59 }
 0xbbf   :  { %3770 = vmatmul.mubr.f32.gmra.mxu0 %v10033_v46  ;;  %3883 = vmatmul.mubr.f32.gmra.mxu1 %v10033_v46  ;;  %v8861_v46 = vld [vmem:[#allocation12 + $0x218] sm:$0xff] }
 0xbc0   :  { %3775 = vmatprep.mubr.f32.mxu0 %v10024_v5  ;;  %3888 = vmatprep.mubr.f32.mxu1 %v10024_v5  ;;  %10052 = vst [vmem:[#allocation43_spill] sm:$0xff] %v8861_v46 }
 0xbc1   :  { %4087 = vmatprep.subr.mxu1 %v8729_v62 }
 0xbc2   :  { %4088 = vmatpush1.msra.mxu1 %v8735_v1 }
 0xbc3   :  { %3776 = vmatmul.mubr.f32.gmra.mxu0 %v8570_v52  ;;  %3889 = vmatmul.mubr.f32.gmra.mxu1 %v8570_v52  ;;  %v8685_v52 = vld [vmem:[#allocation12 + $0x3e0] sm:$0xff] }
 0xbc4   :  { %3781 = vmatprep.mubr.f32.mxu0 %v10024_v5  ;;  %3894 = vmatprep.mubr.f32.mxu1 %v10024_v5 }
 0xbc5   :  { %4009 = vmatpush1.msra.mxu0 %v8685_v52  ;;  %4089 = vmatprep.subr.mxu1 %v8741_v4 }
 0xbc6   :  { %4090 = vmatpush1.msra.mxu1 %v8747_v27 }
 0xbc7   :  { %3782 = vmatmul.mubr.f32.gmra.mxu0 %v8645_v18  ;;  %3895 = vmatmul.mubr.f32.gmra.mxu1 %v8645_v18  ;;  %v8691_v18 = vld [vmem:[#allocation12 + $0x3c8] sm:$0xff] }
 0xbc8   :  { %3787 = vmatprep.mubr.f32.mxu0 %v10024_v5  ;;  %3900 = vmatprep.mubr.f32.mxu1 %v10024_v5 }
 0xbc9   :  { %4010 = vmatprep.subr.mxu0 %v8691_v18  ;;  %4091 = vmatprep.subr.mxu1 %v8753_v17 }
 0xbca   :  { %4011 = vmatpush1.msra.mxu0 %v8697_v16  ;;  %4092 = vmatpush1.msra.mxu1 %v8759_v42 }
 0xbcb   :  { %4012 = vmatprep.subr.mxu0 %v8703_v22  ;;  %4093 = vmatprep.subr.mxu1 %v8765_v0 }
 0xbcc   :  { %4013 = vmatpush1.msra.mxu0 %v8709_v38  ;;  %4094 = vmatpush1.msra.mxu1 %v8771_v2 }
 0xbcd   :  { %4014 = vmatprep.subr.mxu0 %v8715_v20  ;;  %4095 = vmatprep.subr.mxu1 %v8777_v57 }
 0xbce   :  { %4015 = vmatpush1.msra.mxu0 %v8721_v35  ;;  %4096 = vmatpush1.msra.mxu1 %v8783_v30 }
 0xbcf   :  { %4016 = vmatprep.subr.mxu0 %v8727_v39  ;;  %4097 = vmatprep.subr.mxu1 %v8789_v53 }
 0xbd0   :  { %4017 = vmatpush1.msra.mxu0 %v8733_v29  ;;  %4098 = vmatpush1.msra.mxu1 %v8795_v63 }
 0xbd1   :  { %4018 = vmatprep.subr.mxu0 %v8739_v7  ;;  %4099 = vmatprep.subr.mxu1 %v8801_v3 }
 0xbd2   :  { %4019 = vmatpush1.msra.mxu0 %v8745_v28  ;;  %4100 = vmatpush1.msra.mxu1 %v8807_v14 }
 0xbd3   :  { %4020 = vmatprep.subr.mxu0 %v8751_v32  ;;  %4101 = vmatprep.subr.mxu1 %v8813_v6 }
 0xbd4   :  { %4021 = vmatpush1.msra.mxu0 %v8757_v36  ;;  %4102 = vmatpush1.msra.mxu1 %v8819_v48 }
 0xbd5   :  { %4022 = vmatprep.subr.mxu0 %v8763_v47  ;;  %4103 = vmatprep.subr.mxu1 %v8825_v43 }
 0xbd6   :  { %4023 = vmatpush1.msra.mxu0 %v8769_v24  ;;  %4104 = vmatpush1.msra.mxu1 %v8831_v26 }
 0xbd7   :  { %4024 = vmatprep.subr.mxu0 %v8775_v49  ;;  %4105 = vmatprep.subr.mxu1 %v8837_v44 }
 0xbd8   :  { %4025 = vmatpush1.msra.mxu0 %v8781_v40  ;;  %4106 = vmatpush1.msra.mxu1 %v8843_v56  ;;  %v8863_v56 = vld [vmem:[#allocation12 + $0x200] sm:$0xff] }
 0xbd9   :  { %4026 = vmatprep.subr.mxu0 %v8787_v37  ;;  %4107 = vmatprep.subr.mxu1 %v8849_v19  ;;  %10053 = vst [vmem:[#allocation48_spill] sm:$0xff] %v8863_v56 }
 0xbda   :  { %4027 = vmatpush1.msra.mxu0 %v8793_v13  ;;  %4108 = vmatpush1.msra.mxu1 %v8855_v50  ;;  %v10055_v50 = vld [vmem:[#allocation36_spill] sm:$0xff] }
 0xbdb   :  { %4028 = vmatprep.subr.mxu0 %v8799_v51  ;;  %4109 = vmatprep.subr.mxu1 %v8861_v46  ;;  %v10057_v46 = vld [vmem:[#allocation57_spill] sm:$0xff] }
 0xbdc   :  { %4029 = vmatpush1.msra.mxu0 %v8805_v21 }
 0xbdd   :  { %4030 = vmatprep.subr.mxu0 %v8811_v9 }
 0xbde   :  { %4031 = vmatpush1.msra.mxu0 %v8817_v60 }
 0xbdf   :  { %4032 = vmatprep.subr.mxu0 %v8823_v15 }
 0xbe0   :  { %4033 = vmatpush1.msra.mxu0 %v8829_v23 }
 0xbe1   :  { %4034 = vmatprep.subr.mxu0 %v8835_v45  ;;  %v10056_v45 = vld [vmem:[#allocation37_spill] sm:$0xff] }
 0xbe2   :  { %4035 = vmatpush1.msra.mxu0 %v8841_v12  ;;  %v8865_v12 = vld [vmem:[#allocation12 + $0x210] sm:$0xff] }
 0xbe3   :  { %4036 = vmatprep.subr.mxu0 %v8847_v8  ;;  %10054 = vst [vmem:[#allocation44_spill] sm:$0xff] %v8865_v12  ;;  %4110 = vmatpush1.msra.mxu1 %v8865_v12  ;;  %v10058_v12 = vld [vmem:[#allocation58_spill] sm:$0xff] }
 0xbe4   :  { %4037 = vmatpush1.msra.mxu0 %v8853_v41  ;;  %4318 = vmatprep.subr.mxu1 %v8681_v11 }
 0xbe5   :  { %4038 = vmatprep.subr.mxu0 %v8857_v58 }
 0xbe6   :  { %4039 = vmatpush1.msra.mxu0 %v8863_v56 }
 0xbe7   :  { %4247 = vmatprep.subr.mxu0 %v8679_v54 }
 0xc4e   :  { %v3479_v41 = vpop.f32.mrf.mxu0  ;;  %v3550_v58 = vpop.f32.mrf.mxu1 }
 0xc4f   :  { %v3555_v19 = vadd.f32 %v3479_v41, %v10055_v50  ;;  %v3557_v43 = vadd.f32 %v3550_v58, %v10057_v46 }
 0xc50   :  { %v3481_v8 = vpop.f32.mrf.mxu0  ;;  %v3552_v56 = vpop.f32.mrf.mxu1 }
 0xc51   :  { %v6121_v44 = vmul.f32 -1.442695, %v3555_v19  ;;  %v3556_v26 = vadd.f32 %v3481_v8, %v10056_v45  ;;  %v6123_v15 = vmul.f32 -1.442695, %v3557_v43  ;;  %v3558_v48 = vadd.f32 %v3552_v56, %v10058_v12  ;;  %v709_v8 = vpop.xlane.xlu1 %708  ;;  %v10061_v56 = vld [vmem:[#allocation38_spill] sm:$0xff] }
 0xc52   :  { %v710_v43 = vadd.f32 1e-06, %v709_v8  ;;  %v10068_v8 = vld [vmem:[#allocation33_spill] sm:$0xff] }
 0xc53   :  { %6811 = vpow2.f32 %v6121_v44  ;;  %v6122_v23 = vmul.f32 -1.442695, %v3556_v26 }
 0xc55   :  { %6813 = vpow2.f32 %v6122_v23 }
 0xc56   :  { %6815 = vpow2.f32 %v6123_v15  ;;  %v10059_v15 = vld [vmem:[#allocation24_spill] sm:$0xff] }
 0xc57   :  { %6817 = vtanh.f32 %v3558_v48 }
 0xc60   :  { %v6812_v54 = vpop.eup %6811 }
 0xc61   :  { %v3568_v60 = vadd.f32 1.0, %v6812_v54 }
 0xc62   :  { %v6814_v11 = vpop.eup %6813 }
 0xc63   :  { %6819 = vrcp.f32 %v3568_v60  ;;  %v3569_v41 = vadd.f32 1.0, %v6814_v11  ;;  %v6816_v19 = vpop.eup %6815 }
 0xc64   :  { %v6818_v45 = vpop.eup %6817  ;;  %v3570_v50 = vadd.f32 1.0, %v6816_v19  ;;  %v10063_v19 = vld [vmem:[#allocation30_spill] sm:$0xff] }
 0xc65   :  { %6821 = vrcp.f32 %v3569_v41  ;;  %v10062_v41 = vld [vmem:[#allocation40_spill] sm:$0xff] }
 0xc66   :  { %6823 = vrcp.f32 %v3570_v50  ;;  %v10069_v50 = vld [vmem:[#allocation53_spill] sm:$0xff] }
 0xc70   :  { %v6820_v44 = vpop.eup %6819 }
 0xc71   :  { %v3579_v26 = vmul.f32 %v6820_v44, %v6818_v45  ;;  %v10064_v45 = vld [vmem:[#allocation31_spill] sm:$0xff]  ;;  %v10065_v44 = vld [vmem:[#allocation50_spill] sm:$0xff] }
 0xc72   :  { %v6822_v23 = vpop.eup %6821 }
 0xc73   :  { %v3578_v58 = vmul.f32 %v6822_v23, %v8642_v25  ;;  %v6824_v54 = vpop.eup %6823  ;;  %v10060_v25 = vld [vmem:[#allocation68_spill] sm:$0xff] }
 0xc74   :  { %v10067_v23 = vld [vmem:[#allocation32_spill] sm:$0xff] }
 0xc75   :  { %v3580_v46 = vadd.f32 %v3579_v26, %v3578_v58  ;;  %v10066_v26 = vld [vmem:[#allocation52_spill] sm:$0xff]  ;;  %v10070_v58 = vld [vmem:[#allocation54_spill] sm:$0xff] }
 0xc77   :  { %3585 = vst [vmem:[#allocation16] sm:$0xff] %v3580_v46  ;;  %6825 = vtanh.f32 %v3580_v46  ;;  %v10072_v46 = vld [vmem:[#allocation28_spill] sm:$0xff] }
 0xc78   :  { %6827 = vrcp.f32 %v710_v43  ;;  %v10071_v43 = vld [vmem:[#allocation41_spill] sm:$0xff] }
 0xc84   :  { %v6826_v48 = vpop.eup %6825 }
 0xc85   :  { %v3582_v60 = vmul.f32 %v6826_v48, %v6824_v54  ;;  %v6828_v11 = vpop.eup %6827  ;;  %v10073_v54 = vld [vmem:[#allocation42_spill] sm:$0xff]  ;;  %v10074_v48 = vld [vmem:[#allocation29_spill] sm:$0xff] }
 0xc86   :  { %v712_v12 = vmul.f32 %v6828_v11, %v10059_v15  ;;  %v10076_v11 = vld [vmem:[#allocation48_spill] sm:$0xff] }
 0xc87   :  { %3788 = vmatmul.mubr.f32.gmra.mxu0 %v3582_v60  ;;  %3584 = vst [vmem:[#allocation15] sm:$0xff] %v3582_v60  ;;  %3901 = vmatmul.mubr.f32.gmra.mxu1 %v3582_v60  ;;  %v10075_v60 = vld [vmem:[#allocation43_spill] sm:$0xff]  ;;  %v10077_v15 = vld [vmem:[#allocation44_spill] sm:$0xff] }
 0xc88   :  { %4072 = vmatprep.mubr.f32.mxu0 %v10024_v5  ;;  %4143 = vmatprep.mubr.f32.mxu1 %v10024_v5 }
 0xc8b   :  { %4073 = vmatmul.mubr.f32.vlgmr.msra.gmra.mxu0 %v712_v12  ;;  %4144 = vmatmul.mubr.f32.vlgmr.msra.gmra.mxu1 %v712_v12  ;;  %v10078_v12 = vld [vmem:[#allocation65_spill] sm:$0xff] }
 0xc8c   :  { %4248 = vmatpush1.msra.mxu0 %v8685_v52  ;;  %4319 = vmatpush1.msra.mxu1 %v8687_v33 }
 0xc8d   :  { %4249 = vmatprep.subr.mxu0 %v8691_v18  ;;  %4320 = vmatprep.subr.mxu1 %v8693_v10 }
 0xc8e   :  { %4250 = vmatpush1.msra.mxu0 %v8697_v16  ;;  %4321 = vmatpush1.msra.mxu1 %v8699_v61 }
 0xc8f   :  { %4251 = vmatprep.subr.mxu0 %v8703_v22  ;;  %4322 = vmatprep.subr.mxu1 %v8705_v55 }
 0xc90   :  { %4252 = vmatpush1.msra.mxu0 %v8709_v38  ;;  %4323 = vmatpush1.msra.mxu1 %v8711_v31 }
 0xc91   :  { %4253 = vmatprep.subr.mxu0 %v8715_v20  ;;  %4324 = vmatprep.subr.mxu1 %v8717_v34 }
 0xc92   :  { %4254 = vmatpush1.msra.mxu0 %v8721_v35  ;;  %4325 = vmatpush1.msra.mxu1 %v8723_v59 }
 0xc93   :  { %4255 = vmatprep.subr.mxu0 %v8727_v39  ;;  %4326 = vmatprep.subr.mxu1 %v8729_v62 }
 0xc94   :  { %4256 = vmatpush1.msra.mxu0 %v8733_v29  ;;  %4327 = vmatpush1.msra.mxu1 %v8735_v1 }
 0xc95   :  { %4257 = vmatprep.subr.mxu0 %v8739_v7  ;;  %4328 = vmatprep.subr.mxu1 %v8741_v4 }
 0xc96   :  { %4258 = vmatpush1.msra.mxu0 %v8745_v28  ;;  %4329 = vmatpush1.msra.mxu1 %v8747_v27 }
 0xc97   :  { %4259 = vmatprep.subr.mxu0 %v8751_v32  ;;  %4330 = vmatprep.subr.mxu1 %v8753_v17 }
 0xc98   :  { %4260 = vmatpush1.msra.mxu0 %v8757_v36  ;;  %4331 = vmatpush1.msra.mxu1 %v8759_v42 }
 0xc99   :  { %4261 = vmatprep.subr.mxu0 %v8763_v47  ;;  %4332 = vmatprep.subr.mxu1 %v8765_v0 }
 0xc9a   :  { %4262 = vmatpush1.msra.mxu0 %v8769_v24  ;;  %4333 = vmatpush1.msra.mxu1 %v8771_v2 }
 0xc9b   :  { %4263 = vmatprep.subr.mxu0 %v8775_v49  ;;  %4334 = vmatprep.subr.mxu1 %v8777_v57 }
 0xc9c   :  { %4264 = vmatpush1.msra.mxu0 %v8781_v40  ;;  %4335 = vmatpush1.msra.mxu1 %v8783_v30 }
 0xc9d   :  { %4265 = vmatprep.subr.mxu0 %v8787_v37  ;;  %4336 = vmatprep.subr.mxu1 %v8789_v53 }
 0xc9e   :  { %4266 = vmatpush1.msra.mxu0 %v8793_v13  ;;  %4337 = vmatpush1.msra.mxu1 %v8795_v63 }
 0xc9f   :  { %4267 = vmatprep.subr.mxu0 %v8799_v51  ;;  %4338 = vmatprep.subr.mxu1 %v8801_v3 }
 0xca0   :  { %4268 = vmatpush1.msra.mxu0 %v8805_v21  ;;  %4339 = vmatpush1.msra.mxu1 %v8807_v14 }
 0xca1   :  { %4269 = vmatprep.subr.mxu0 %v8811_v9  ;;  %4340 = vmatprep.subr.mxu1 %v8813_v6 }
 0xca2   :  { %4270 = vmatpush1.msra.mxu0 %v10060_v25  ;;  %4341 = vmatpush1.msra.mxu1 %v10061_v56 }
 0xca3   :  { %4271 = vmatprep.subr.mxu0 %v10062_v41  ;;  %4342 = vmatprep.subr.mxu1 %v10063_v19 }
 0xca4   :  { %4272 = vmatpush1.msra.mxu0 %v10064_v45  ;;  %4343 = vmatpush1.msra.mxu1 %v10065_v44 }
 0xca5   :  { %4273 = vmatprep.subr.mxu0 %v10066_v26  ;;  %4344 = vmatprep.subr.mxu1 %v10067_v23 }
 0xca6   :  { %4274 = vmatpush1.msra.mxu0 %v10068_v8  ;;  %4345 = vmatpush1.msra.mxu1 %v10069_v50  ;;  %v3860_v50 = vpop.f32.mrf.mxu1 }
 0xca7   :  { %4275 = vmatprep.subr.mxu0 %v10070_v58  ;;  %4346 = vmatprep.subr.mxu1 %v10071_v43  ;;  %v10079_v58 = vld [vmem:[#allocation66_spill] sm:$0xff]  ;;  %v3747_v43 = vpop.f32.mrf.mxu0 }
 0xca8   :  { %4276 = vmatpush1.msra.mxu0 %v10072_v46  ;;  %4347 = vmatpush1.msra.mxu1 %v10073_v54 }
 0xca9   :  { %4277 = vmatprep.subr.mxu0 %v10074_v48  ;;  %4348 = vmatprep.subr.mxu1 %v10075_v60  ;;  %v3749_v46 = vpop.f32.mrf.mxu0  ;;  %v3862_v48 = vpop.f32.mrf.mxu1 }
 0xcaa   :  { %4278 = vmatpush1.msra.mxu0 %v10076_v11  ;;  %4311 = vmatprep.mubr.f32.mxu0 %v10024_v5 }
 0xcab   :  { %4349 = vmatpush1.msra.mxu1 %v10077_v15  ;;  %4382 = vmatprep.mubr.f32.mxu1 %v10024_v5  ;;  %v8947_v54 = vpop.f32.mrf.mxu0  ;;  %v8951_v60 = vpop.f32.mrf.mxu1 }
 0xcac   :  { %4486 = vmatprep.subr.mxu0 %v10078_v12  ;;  %4557 = vmatprep.subr.mxu1 %v10079_v58  ;;  %10080 = vst [vmem:[#allocation49_spill] sm:$0xff] %v8947_v54  ;;  %10082 = vst [vmem:[#allocation61_spill] sm:$0xff] %v8951_v60 }
 0xcad   :  { %v8949_v8 = vpop.f32.mrf.mxu0  ;;  %v8955_v23 = vpop.f32.mrf.mxu1 }
 0xcae   :  { %10081 = vst [vmem:[#allocation45_spill] sm:$0xff] %v8949_v8  ;;  %10084 = vst [vmem:[#allocation62_spill] sm:$0xff] %v8955_v23 }
 0xcaf   :  { %v8953_v11 = vpop.f32.mrf.mxu0  ;;  %v8959_v5 = vpop.f32.mrf.mxu1 }
 0xcb0   :  { %10083 = vst [vmem:[#allocation60_spill] sm:$0xff] %v8953_v11  ;;  %10086 = vst [vmem:[#allocation63_spill] sm:$0xff] %v8959_v5 }
 0xcb1   :  { %v8957_v15 = vpop.f32.mrf.mxu0  ;;  %v8963_v58 = vpop.f32.mrf.mxu1 }
 0xcb2   :  { %10085 = vst [vmem:[#allocation26_spill] sm:$0xff] %v8957_v15  ;;  %10088 = vst [vmem:[#allocation64_spill] sm:$0xff] %v8963_v58 }
 0xcb3   :  { %v8961_v12 = vpop.f32.mrf.mxu0  ;;  %v8967_v54 = vpop.f32.mrf.mxu1 }
 0xcb4   :  { %10087 = vst [vmem:[#allocation27_spill] sm:$0xff] %v8961_v12  ;;  %10090 = vst [vmem:[#allocation35_spill] sm:$0xff] %v8967_v54 }
 0xcb5   :  { %v8965_v26 = vpop.f32.mrf.mxu0  ;;  %v8971_v8 = vpop.f32.mrf.mxu1 }
 0xcb6   :  { %10089 = vst [vmem:[#allocation34_spill] sm:$0xff] %v8965_v26  ;;  %10092 = vst [vmem:[#allocation56_spill] sm:$0xff] %v8971_v8 }
 0xcb7   :  { %v8969_v44 = vpop.f32.mrf.mxu0  ;;  %v8975_v11 = vpop.f32.mrf.mxu1 }
 0xcb8   :  { %10091 = vst [vmem:[#allocation55_spill] sm:$0xff] %v8969_v44  ;;  %10094 = vst [vmem:[#allocation69_spill] sm:$0xff] %v8975_v11  ;;  %v6124_v44 = vld [vmem:[%s9677_s11 + $0x4] sm:$0xf] }
 0xcb9   :  { %v8973_v60 = vpop.f32.mrf.mxu0  ;;  %v8979_v15 = vpop.f32.mrf.mxu1 }
 0xcba   :  { %10093 = vst [vmem:[#allocation59_spill] sm:$0xff] %v8973_v60  ;;  %10096 = vst [vmem:[#allocation46_spill] sm:$0xff] %v8979_v15  ;;  %v10102_v60 = vld [vmem:[#allocation25_spill] sm:$0xff] }
 0xcbb   :  { %v8977_v23 = vpop.f32.mrf.mxu0  ;;  %v8983_v12 = vpop.f32.mrf.mxu1  ;;  %v10103_v11 = vsub.s32 0, %v10102_v60  ;;  %v10112_v6 = vsub.s32 2, %v10102_v60 }
 0xcbc   :  { %10095 = vst [vmem:[#allocation39_spill] sm:$0xff] %v8977_v23  ;;  %10098 = vst [vmem:[#allocation36_spill] sm:$0xff] %v8983_v12  ;;  %v10107_v12 = vsub.s32 1, %v10102_v60 }
 0xcbd   :  { %v8981_v5 = vpop.f32.mrf.mxu0  ;;  %v8987_v26 = vpop.f32.mrf.mxu1  ;;  %v8996_v54 = vrot.slane %v6124_v44, %v10103_v11 }
 0xcbe   :  { %10097 = vst [vmem:[#allocation47_spill] sm:$0xff] %v8981_v5  ;;  %10100 = vst [vmem:[#allocation57_spill] sm:$0xff] %v8987_v26  ;;  %v9004_v5 = vrot.slane %v6124_v44, %v10107_v12 }
 0xcbf   :  { %v8985_v58 = vpop.f32.mrf.mxu0  ;;  %10104 = vst [vmem:[#allocation24_spill] sm:$0xff] %v8996_v54  ;;  %v8998_v23 = vpop.f32.mrf.mxu1  ;;  %v3748_v26 = vadd.f32 %v3747_v43, %v8996_v54 }
 0xcc0   :  { %10099 = vst [vmem:[#allocation37_spill] sm:$0xff] %v8985_v58  ;;  %10105 = vst [vmem:[#allocation65_spill] sm:$0xff] %v8998_v23  ;;  %v1289_v54 = vpop.xlane.xlu1 %1288 }
 0xcc1   :  { %v8992_v8 = vpop.f32.mrf.mxu0  ;;  %v9009_v45 = vpop.f32.mrf.mxu1 }
 0xcc2   :  { %10101 = vst [vmem:[#allocation58_spill] sm:$0xff] %v8992_v8  ;;  %10109 = vst [vmem:[#allocation70_spill] sm:$0xff] %v9009_v45  ;;  %v3750_v8 = vadd.f32 %v3749_v46, %v9004_v5  ;;  %v10114_v46 = vsub.s32 3, %v10102_v60 }
 0xd47   :  { %v9000_v15 = vpop.f32.mrf.mxu0  ;;  %v9012_v41 = vpop.f32.mrf.mxu1 }
 0xd48   :  { %10106 = vst [vmem:[#allocation66_spill] sm:$0xff] %v9000_v15  ;;  %10110 = vst [vmem:[#allocation71_spill] sm:$0xff] %v9012_v41  ;;  %v9023_v41 = vrot.slane %v6124_v44, %v10114_v46 }
 0xd49   :  { %v9006_v58 = vpop.f32.mrf.mxu0  ;;  %v9014_v15 = vpop.f32.mrf.mxu1 }
 0xd4a   :  { %10108 = vst [vmem:[#allocation25_spill] sm:$0xff] %v9006_v58  ;;  %10111 = vst [vmem:[#allocation72_spill] sm:$0xff] %v9014_v15  ;;  %v9018_v58 = vrot.slane %v6124_v44, %v10112_v6 }
 0xd4b   :  { %v4074_v19 = vpop.f32.mrf.mxu0  ;;  %v4145_v43 = vpop.f32.mrf.mxu1  ;;  %10115 = vst [vmem:[#allocation74_spill] sm:$0xff] %v9023_v41 }
 0xd4c   :  { %v4150_v11 = vadd.f32 %v4074_v19, %v3748_v26  ;;  %10113 = vst [vmem:[#allocation73_spill] sm:$0xff] %v9018_v58  ;;  %v3861_v45 = vadd.f32 %v3860_v50, %v9018_v58  ;;  %v1290_v26 = vadd.f32 1e-06, %v1289_v54 }
 0xd4d   :  { %v4076_v56 = vpop.f32.mrf.mxu0 }
 0xd4e   :  { %v6125_v23 = vmul.f32 -1.442695, %v4150_v11  ;;  %v4151_v25 = vadd.f32 %v4076_v56, %v3750_v8  ;;  %v4152_v19 = vadd.f32 %v4145_v43, %v3861_v45  ;;  %v4147_v56 = vpop.f32.mrf.mxu1  ;;  %v3863_v8 = vadd.f32 %v3862_v48, %v9023_v41  ;;  %v10116_v45 = vld [vmem:[#allocation51_spill] sm:$0xff] }
 0xd50   :  { %6829 = vpow2.f32 %v6125_v23  ;;  %v6126_v12 = vmul.f32 -1.442695, %v4151_v25  ;;  %v6127_v23 = vmul.f32 -1.442695, %v4152_v19  ;;  %v4153_v11 = vadd.f32 %v4147_v56, %v3863_v8 }
 0xd52   :  { %6831 = vpow2.f32 %v6126_v12 }
 0xd53   :  { %6833 = vrcp.f32 %v1290_v26 }
 0xd54   :  { %6835 = vpow2.f32 %v6127_v23 }
 0xd5d   :  { %v6830_v25 = vpop.eup %6829 }
 0xd5e   :  { %v4163_v6 = vadd.f32 1.0, %v6830_v25  ;;  %v10143_v25 = vld [vmem:[#allocation74_spill] sm:$0xff] }
 0xd5f   :  { %v6832_v15 = vpop.eup %6831 }
 0xd60   :  { %6837 = vrcp.f32 %v4163_v6  ;;  %v4164_v12 = vadd.f32 1.0, %v6832_v15  ;;  %v6834_v50 = vpop.eup %6833 }
 0xd61   :  { %6839 = vtanh.f32 %v4153_v11  ;;  %v6836_v60 = vpop.eup %6835  ;;  %v1292_v54 = vmul.f32 %v6834_v50, %v10116_v45  ;;  %v10144_v11 = vld [vmem:[#allocation62_spill] sm:$0xff] }
 0xd62   :  { %6841 = vrcp.f32 %v4164_v12  ;;  %v4165_v58 = vadd.f32 1.0, %v6836_v60  ;;  %v3869_v6 = vadd.f32 %v10144_v11, %v10143_v25  ;;  %v9148_v11 = vld [vmem:[#allocation12 + $0x3b0] sm:$0xff] }
 0xd64   :  { %6843 = vrcp.f32 %v4165_v58 }
 0xd6d   :  { %v6838_v44 = vpop.eup %6837 }
 0xd6e   :  { %v6840_v46 = vpop.eup %6839 }
 0xd6f   :  { %v6842_v43 = vpop.eup %6841  ;;  %v4174_v19 = vmul.f32 %v6840_v46, %v6838_v44 }
 0xd70   :  { %v4173_v48 = vmul.f32 %v6842_v43, %v1292_v54 }
 0xd71   :  { %v6844_v26 = vpop.eup %6843 }
 0xd72   :  { %v9027_v41 = vadd.f32 %v4174_v19, %v4173_v48 }
 0xd74   :  { %6845 = vtanh.f32 %v9027_v41 }
 0xd81   :  { %v6846_v56 = vpop.eup %6845 }
 0xd82   :  { %v9030_v15 = vmul.f32 %v6846_v56, %v6844_v26 }
 0xd84   :  { %10117 = vst [vmem:[#allocation51_spill] sm:$0xff] %v9030_v15  ;;  %4312 = vmatmul.mubr.f32.vlgmr.msra.gmra.mxu0 %v9030_v15  ;;  %4383 = vmatmul.mubr.f32.vlgmr.msra.gmra.mxu1 %v9030_v15  ;;  %v9202_v15 = vld [vmem:[#allocation12 + $0x318] sm:$0xff] }
 0xd85   :  { %4487 = vmatpush1.msra.mxu0 %v8685_v52  ;;  %4558 = vmatpush1.msra.mxu1 %v8687_v33  ;;  %v10118_v52 = vld [vmem:[#allocation67_spill] sm:$0xff]  ;;  %v10119_v33 = vld [vmem:[#allocation68_spill] sm:$0xff] }
 0xd86   :  { %4488 = vmatprep.subr.mxu0 %v8691_v18  ;;  %4559 = vmatprep.subr.mxu1 %v8693_v10  ;;  %v10120_v18 = vld [vmem:[#allocation38_spill] sm:$0xff]  ;;  %v10121_v10 = vld [vmem:[#allocation40_spill] sm:$0xff] }
 0xd87   :  { %4489 = vmatpush1.msra.mxu0 %v8697_v16  ;;  %4560 = vmatpush1.msra.mxu1 %v8699_v61  ;;  %v10122_v16 = vld [vmem:[#allocation30_spill] sm:$0xff]  ;;  %v10123_v61 = vld [vmem:[#allocation31_spill] sm:$0xff] }
 0xd88   :  { %4490 = vmatprep.subr.mxu0 %v8703_v22  ;;  %4561 = vmatprep.subr.mxu1 %v8705_v55  ;;  %v10124_v22 = vld [vmem:[#allocation50_spill] sm:$0xff]  ;;  %v10125_v55 = vld [vmem:[#allocation52_spill] sm:$0xff] }
 0xd89   :  { %4491 = vmatpush1.msra.mxu0 %v8709_v38  ;;  %4562 = vmatpush1.msra.mxu1 %v8711_v31  ;;  %v10126_v38 = vld [vmem:[#allocation32_spill] sm:$0xff]  ;;  %v10127_v31 = vld [vmem:[#allocation33_spill] sm:$0xff] }
 0xd8a   :  { %4492 = vmatprep.subr.mxu0 %v8715_v20  ;;  %4563 = vmatprep.subr.mxu1 %v8717_v34  ;;  %v10128_v20 = vld [vmem:[#allocation53_spill] sm:$0xff]  ;;  %v10129_v34 = vld [vmem:[#allocation54_spill] sm:$0xff] }
 0xd8b   :  { %4493 = vmatpush1.msra.mxu0 %v8721_v35  ;;  %4564 = vmatpush1.msra.mxu1 %v8723_v59  ;;  %v10130_v35 = vld [vmem:[#allocation41_spill] sm:$0xff]  ;;  %v10131_v59 = vld [vmem:[#allocation28_spill] sm:$0xff] }
 0xd8c   :  { %4494 = vmatprep.subr.mxu0 %v8727_v39  ;;  %4565 = vmatprep.subr.mxu1 %v8729_v62  ;;  %v10132_v39 = vld [vmem:[#allocation42_spill] sm:$0xff]  ;;  %v10133_v62 = vld [vmem:[#allocation29_spill] sm:$0xff] }
 0xd8d   :  { %4495 = vmatpush1.msra.mxu0 %v8733_v29  ;;  %4566 = vmatpush1.msra.mxu1 %v8735_v1  ;;  %v10134_v29 = vld [vmem:[#allocation43_spill] sm:$0xff]  ;;  %v10135_v1 = vld [vmem:[#allocation48_spill] sm:$0xff] }
 0xd8e   :  { %4496 = vmatprep.subr.mxu0 %v8739_v7  ;;  %4567 = vmatprep.subr.mxu1 %v8741_v4  ;;  %v10136_v7 = vmov 0.0   ;;  %v10137_v4 = vld [vmem:[#allocation44_spill] sm:$0xff] }
 0xd8f   :  { %4497 = vmatpush1.msra.mxu0 %v8745_v28  ;;  %4568 = vmatpush1.msra.mxu1 %v8747_v27  ;;  %v10138_v28 = vld [vmem:[#allocation24_spill] sm:$0xff]  ;;  %v10139_v27 = vld [vmem:[#allocation49_spill] sm:$0xff] }
 0xd90   :  { %4498 = vmatprep.subr.mxu0 %v8751_v32  ;;  %4569 = vmatprep.subr.mxu1 %v8753_v17  ;;  %v3754_v32 = vadd.f32 %v10139_v27, %v10138_v28 }
 0xd91   :  { %4499 = vmatpush1.msra.mxu0 %v8757_v36  ;;  %4570 = vmatpush1.msra.mxu1 %v8759_v42  ;;  %v10140_v36 = vld [vmem:[#allocation45_spill] sm:$0xff] }
 0xd92   :  { %4500 = vmatprep.subr.mxu0 %v8763_v47  ;;  %4571 = vmatprep.subr.mxu1 %v8765_v0  ;;  %v3756_v42 = vadd.f32 %v10140_v36, %v9004_v5 }
 0xd93   :  { %4501 = vmatpush1.msra.mxu0 %v8769_v24  ;;  %4572 = vmatpush1.msra.mxu1 %v8771_v2 }
 0xd94   :  { %4502 = vmatprep.subr.mxu0 %v8775_v49  ;;  %4573 = vmatprep.subr.mxu1 %v8777_v57 }
 0xd95   :  { %4503 = vmatpush1.msra.mxu0 %v8781_v40  ;;  %4574 = vmatpush1.msra.mxu1 %v8783_v30  ;;  %v10141_v40 = vld [vmem:[#allocation73_spill] sm:$0xff] }
 0xd96   :  { %4504 = vmatprep.subr.mxu0 %v8787_v37  ;;  %4575 = vmatprep.subr.mxu1 %v8789_v53  ;;  %v10142_v30 = vld [vmem:[#allocation61_spill] sm:$0xff] }
 0xd97   :  { %4505 = vmatpush1.msra.mxu0 %v8793_v13  ;;  %4576 = vmatpush1.msra.mxu1 %v8795_v63  ;;  %v3867_v58 = vadd.f32 %v10142_v30, %v10141_v40  ;;  %v9136_v30 = vld [vmem:[#allocation12 + $0x3d0] sm:$0xff] }
 0xd98   :  { %4506 = vmatprep.subr.mxu0 %v8799_v51  ;;  %4577 = vmatprep.subr.mxu1 %v8801_v3 }
 0xd99   :  { %4507 = vmatpush1.msra.mxu0 %v8805_v21  ;;  %4578 = vmatpush1.msra.mxu1 %v8807_v14 }
 0xd9a   :  { %4508 = vmatprep.subr.mxu0 %v8811_v9  ;;  %4579 = vmatprep.subr.mxu1 %v10118_v52 }
 0xd9b   :  { %4509 = vmatpush1.msra.mxu0 %v10119_v33  ;;  %4580 = vmatpush1.msra.mxu1 %v10120_v18 }
 0xd9c   :  { %4510 = vmatprep.subr.mxu0 %v10121_v10  ;;  %4581 = vmatprep.subr.mxu1 %v10122_v16 }
 0xd9d   :  { %4511 = vmatpush1.msra.mxu0 %v10123_v61  ;;  %4582 = vmatpush1.msra.mxu1 %v10124_v22 }
 0xd9e   :  { %4512 = vmatprep.subr.mxu0 %v10125_v55  ;;  %4583 = vmatprep.subr.mxu1 %v10126_v38 }
 0xd9f   :  { %4513 = vmatpush1.msra.mxu0 %v10127_v31  ;;  %4584 = vmatpush1.msra.mxu1 %v10128_v20 }
 0xda0   :  { %4514 = vmatprep.subr.mxu0 %v10129_v34  ;;  %4585 = vmatprep.subr.mxu1 %v10130_v35 }
 0xda1   :  { %4515 = vmatpush1.msra.mxu0 %v10131_v59  ;;  %4586 = vmatpush1.msra.mxu1 %v10132_v39 }
 0xda2   :  { %4516 = vmatprep.subr.mxu0 %v10133_v62  ;;  %4587 = vmatprep.subr.mxu1 %v10134_v29 }
 0xda3   :  { %4517 = vmatpush1.msra.mxu0 %v10135_v1  ;;  %4550 = vmatprep.mubr.f32.mxu0 %v10136_v7 }
 0xda4   :  { %4588 = vmatpush1.msra.mxu1 %v10137_v4  ;;  %4621 = vmatprep.mubr.f32.mxu1 %v10136_v7 }
 0xe44   :  { %v4313_v17 = vpop.f32.mrf.mxu0  ;;  %v4384_v57 = vpop.f32.mrf.mxu1 }
 0xe45   :  { %v4389_v47 = vadd.f32 %v4313_v17, %v3754_v32  ;;  %v4391_v8 = vadd.f32 %v4384_v57, %v3867_v58  ;;  %v9134_v57 = vld [vmem:[#allocation12 + $0x3c0] sm:$0xff]  ;;  %v9140_v58 = vld [vmem:[#allocation12 + $0x3a8] sm:$0xff] }
 0xe46   :  { %v4315_v0 = vpop.f32.mrf.mxu0  ;;  %v4386_v23 = vpop.f32.mrf.mxu1 }
 0xe47   :  { %v6128_v24 = vmul.f32 -1.442695, %v4389_v47  ;;  %v4390_v2 = vadd.f32 %v4315_v0, %v3756_v42  ;;  %v6130_v12 = vmul.f32 -1.442695, %v4391_v8  ;;  %v4392_v50 = vadd.f32 %v4386_v23, %v3869_v6  ;;  %v9116_v47 = vld [vmem:[#allocation12 + $0x3e8] sm:$0xff]  ;;  %v9122_v0 = vld [vmem:[#allocation12 + $0x3e0] sm:$0xff] }
 0xe48   :  { %10146 = vst [vmem:[#allocation68_spill] sm:$0xff] %v9116_v47  ;;  %4725 = vmatprep.subr.mxu0 %v9116_v47  ;;  %v9142_v8 = vld [vmem:[#allocation12 + $0x3b8] sm:$0xff]  ;;  %v9146_v23 = vld [vmem:[#allocation12 + $0x3a0] sm:$0xff]  ;;  %v9152_v6 = vld [vmem:[#allocation12 + $0x388] sm:$0xff] }
 0xe49   :  { %6847 = vpow2.f32 %v6128_v24  ;;  %v6129_v49 = vmul.f32 -1.442695, %v4390_v2  ;;  %v9124_v24 = vld [vmem:[#allocation12 + $0x3f0] sm:$0xff]  ;;  %v9128_v2 = vld [vmem:[#allocation12 + $0x3c8] sm:$0xff] }
 0xe4b   :  { %6849 = vpow2.f32 %v6129_v49  ;;  %v9130_v49 = vld [vmem:[#allocation12 + $0x3d8] sm:$0xff] }
 0xe4c   :  { %6851 = vpow2.f32 %v6130_v12  ;;  %v9154_v12 = vld [vmem:[#allocation12 + $0x398] sm:$0xff] }
 0xe4d   :  { %6853 = vtanh.f32 %v4392_v50  ;;  %v9158_v50 = vld [vmem:[#allocation12 + $0x380] sm:$0xff] }
 0xe56   :  { %v6848_v60 = vpop.eup %6847 }
 0xe57   :  { %v4402_v44 = vadd.f32 1.0, %v6848_v60  ;;  %v9160_v60 = vld [vmem:[#allocation12 + $0x390] sm:$0xff] }
 0xe58   :  { %v6850_v46 = vpop.eup %6849 }
 0xe59   :  { %6855 = vrcp.f32 %v4402_v44  ;;  %v4403_v45 = vadd.f32 1.0, %v6850_v46  ;;  %v6852_v54 = vpop.eup %6851  ;;  %v9164_v44 = vld [vmem:[#allocation12 + $0x368] sm:$0xff]  ;;  %v9166_v46 = vld [vmem:[#allocation12 + $0x378] sm:$0xff] }
 0xe5a   :  { %v6854_v43 = vpop.eup %6853  ;;  %v4404_v56 = vadd.f32 1.0, %v6852_v54  ;;  %v9172_v54 = vld [vmem:[#allocation12 + $0x370] sm:$0xff] }
 0xe5b   :  { %6857 = vrcp.f32 %v4403_v45  ;;  %v9170_v45 = vld [vmem:[#allocation12 + $0x360] sm:$0xff] }
 0xe5c   :  { %6859 = vrcp.f32 %v4404_v56  ;;  %v9188_v56 = vld [vmem:[#allocation12 + $0x328] sm:$0xff] }
 0xe5d   :  { %10149 = vst [vmem:[#allocation30_spill] sm:$0xff] %v9188_v56 }
 0xe66   :  { %v6856_v48 = vpop.eup %6855 }
 0xe67   :  { %v4413_v19 = vmul.f32 %v6856_v48, %v6854_v43  ;;  %v9176_v43 = vld [vmem:[#allocation12 + $0x348] sm:$0xff]  ;;  %v9178_v48 = vld [vmem:[#allocation12 + $0x358] sm:$0xff] }
 0xe68   :  { %v6858_v26 = vpop.eup %6857 }
 0xe69   :  { %v4412_v27 = vmul.f32 %v6858_v26, %v9027_v41  ;;  %v6860_v17 = vpop.eup %6859  ;;  %v9118_v41 = vld [vmem:[#allocation12 + $0x3f8] sm:$0xff]  ;;  %v9184_v26 = vld [vmem:[#allocation12 + $0x350] sm:$0xff] }
 0xe6a   :  { %10147 = vst [vmem:[#allocation38_spill] sm:$0xff] %v9118_v41  ;;  %4796 = vmatprep.subr.mxu1 %v9118_v41  ;;  %10148 = vst [vmem:[#allocation40_spill] sm:$0xff] %v9184_v26 }
 0xe6b   :  { %v9107_v32 = vadd.f32 %v4413_v19, %v4412_v27  ;;  %v9182_v19 = vld [vmem:[#allocation12 + $0x340] sm:$0xff]  ;;  %v9190_v27 = vld [vmem:[#allocation12 + $0x338] sm:$0xff] }
 0xe6c   :  { %10150 = vst [vmem:[#allocation31_spill] sm:$0xff] %v9190_v27 }
 0xe6d   :  { %6861 = vtanh.f32 %v9107_v32 }
 0xe7a   :  { %v6862_v36 = vpop.eup %6861 }
 0xe7b   :  { %v9110_v42 = vmul.f32 %v6862_v36, %v6860_v17  ;;  %v9194_v17 = vld [vmem:[#allocation12 + $0x320] sm:$0xff]  ;;  %v9196_v36 = vld [vmem:[#allocation12 + $0x330] sm:$0xff] }
 0xe7c   :  { %10151 = vst [vmem:[#allocation50_spill] sm:$0xff] %v9194_v17  ;;  %10152 = vst [vmem:[#allocation52_spill] sm:$0xff] %v9196_v36 }
 0xe7d   :  { %10145 = vst [vmem:[#allocation67_spill] sm:$0xff] %v9110_v42  ;;  %4551 = vmatmul.mubr.f32.vlgmr.msra.gmra.mxu0 %v9110_v42  ;;  %4622 = vmatmul.mubr.f32.vlgmr.msra.gmra.mxu1 %v9110_v42  ;;  %v9200_v42 = vld [vmem:[#allocation12 + $0x308] sm:$0xff] }
 0xe7e   :  { %4789 = vmatprep.mubr.f32.mxu0 %v10136_v7  ;;  %4860 = vmatprep.mubr.f32.mxu1 %v10136_v7  ;;  %v9204_v7 = vld [vmem:[#allocation12 + $0x300] sm:$0xff] }
 0xe7f   :  { %4726 = vmatpush1.msra.mxu0 %v9122_v0  ;;  %4797 = vmatpush1.msra.mxu1 %v9124_v24 }
 0xe80   :  { %4727 = vmatprep.subr.mxu0 %v9128_v2  ;;  %4798 = vmatprep.subr.mxu1 %v9130_v49 }
 0xe81   :  { %4728 = vmatpush1.msra.mxu0 %v9134_v57  ;;  %4799 = vmatpush1.msra.mxu1 %v9136_v30 }
 0xe82   :  { %4729 = vmatprep.subr.mxu0 %v9140_v58  ;;  %4800 = vmatprep.subr.mxu1 %v9142_v8 }
 0xe83   :  { %4730 = vmatpush1.msra.mxu0 %v9146_v23  ;;  %4801 = vmatpush1.msra.mxu1 %v9148_v11 }
 0xe84   :  { %4731 = vmatprep.subr.mxu0 %v9152_v6  ;;  %4802 = vmatprep.subr.mxu1 %v9154_v12 }
 0xe85   :  { %4732 = vmatpush1.msra.mxu0 %v9158_v50  ;;  %4803 = vmatpush1.msra.mxu1 %v9160_v60 }
 0xe86   :  { %4733 = vmatprep.subr.mxu0 %v9164_v44  ;;  %4804 = vmatprep.subr.mxu1 %v9166_v46 }
 0xe87   :  { %4734 = vmatpush1.msra.mxu0 %v9170_v45  ;;  %4805 = vmatpush1.msra.mxu1 %v9172_v54 }
 0xe88   :  { %4735 = vmatprep.subr.mxu0 %v9176_v43  ;;  %4806 = vmatprep.subr.mxu1 %v9178_v48 }
 0xe89   :  { %4736 = vmatpush1.msra.mxu0 %v9182_v19  ;;  %4807 = vmatpush1.msra.mxu1 %v9184_v26  ;;  %v9212_v26 = vld [vmem:[#allocation12 + $0x2f8] sm:$0xff] }
 0xe8a   :  { %4737 = vmatprep.subr.mxu0 %v9188_v56  ;;  %4808 = vmatprep.subr.mxu1 %v9190_v27  ;;  %v9208_v56 = vld [vmem:[#allocation12 + $0x310] sm:$0xff]  ;;  %v9210_v27 = vld [vmem:[#allocation12 + $0x2e8] sm:$0xff] }
 0xe8b   :  { %4738 = vmatpush1.msra.mxu0 %v9194_v17  ;;  %4809 = vmatpush1.msra.mxu1 %v9196_v36  ;;  %v9216_v36 = vld [vmem:[#allocation12 + $0x2e0] sm:$0xff]  ;;  %v9218_v17 = vld [vmem:[#allocation12 + $0x2f0] sm:$0xff] }
 0xe8c   :  { %4739 = vmatprep.subr.mxu0 %v9200_v42  ;;  %4810 = vmatprep.subr.mxu1 %v9202_v15 }
 0xe8d   :  { %4740 = vmatpush1.msra.mxu0 %v9204_v7  ;;  %4811 = vmatpush1.msra.mxu1 %v9208_v56 }
 0xe8e   :  { %4741 = vmatprep.subr.mxu0 %v9210_v27  ;;  %4812 = vmatprep.subr.mxu1 %v9212_v26 }
 0xe8f   :  { %4742 = vmatpush1.msra.mxu0 %v9216_v36  ;;  %4813 = vmatpush1.msra.mxu1 %v9218_v17 }
 0xe90   :  { %4743 = vmatprep.subr.mxu0 %v8787_v37  ;;  %4814 = vmatprep.subr.mxu1 %v8789_v53  ;;  %v10153_v37 = vld [vmem:[#allocation60_spill] sm:$0xff] }
 0xe91   :  { %4744 = vmatpush1.msra.mxu0 %v8793_v13  ;;  %4815 = vmatpush1.msra.mxu1 %v8795_v63  ;;  %v3760_v53 = vadd.f32 %v10153_v37, %v10138_v28  ;;  %v10154_v63 = vld [vmem:[#allocation26_spill] sm:$0xff] }
 0xe92   :  { %4745 = vmatprep.subr.mxu0 %v8799_v51  ;;  %4816 = vmatprep.subr.mxu1 %v8801_v3  ;;  %v3762_v51 = vadd.f32 %v10154_v63, %v9004_v5 }
 0xe93   :  { %4746 = vmatpush1.msra.mxu0 %v8805_v21  ;;  %4817 = vmatpush1.msra.mxu1 %v8807_v14 }
 0xe94   :  { %4747 = vmatprep.subr.mxu0 %v8811_v9  ;;  %4818 = vmatprep.subr.mxu1 %v10118_v52 }
 0xe95   :  { %4748 = vmatpush1.msra.mxu0 %v10119_v33  ;;  %4819 = vmatpush1.msra.mxu1 %v10120_v18  ;;  %v10155_v18 = vld [vmem:[#allocation63_spill] sm:$0xff] }
 0xe96   :  { %4749 = vmatprep.subr.mxu0 %v10121_v10  ;;  %4820 = vmatprep.subr.mxu1 %v10122_v16  ;;  %v3873_v10 = vadd.f32 %v10155_v18, %v10141_v40  ;;  %v9306_v18 = vld [vmem:[#allocation12 + $0x2c8] sm:$0xff] }
 0xe97   :  { %4750 = vmatpush1.msra.mxu0 %v10123_v61  ;;  %4821 = vmatpush1.msra.mxu1 %v10124_v22  ;;  %v10156_v22 = vld [vmem:[#allocation64_spill] sm:$0xff] }
 0xe98   :  { %4751 = vmatprep.subr.mxu0 %v10125_v55  ;;  %4822 = vmatprep.subr.mxu1 %v10126_v38  ;;  %v3875_v55 = vadd.f32 %v10156_v22, %v10143_v25  ;;  %v9316_v22 = vld [vmem:[#allocation12 + $0x2a8] sm:$0xff] }
 0xe99   :  { %4752 = vmatpush1.msra.mxu0 %v10127_v31  ;;  %4823 = vmatpush1.msra.mxu1 %v10128_v20 }
 0xe9a   :  { %4753 = vmatprep.subr.mxu0 %v10129_v34  ;;  %4824 = vmatprep.subr.mxu1 %v10130_v35 }
 0xe9b   :  { %4754 = vmatpush1.msra.mxu0 %v10131_v59  ;;  %4825 = vmatpush1.msra.mxu1 %v10132_v39 }
 0xe9c   :  { %4755 = vmatprep.subr.mxu0 %v10133_v62  ;;  %4826 = vmatprep.subr.mxu1 %v10134_v29 }
 0xe9d   :  { %4756 = vmatpush1.msra.mxu0 %v10135_v1  ;;  %4827 = vmatpush1.msra.mxu1 %v10137_v4 }
 0xe9e   :  { %4964 = vmatprep.subr.mxu0 %v9116_v47  ;;  %5035 = vmatprep.subr.mxu1 %v9118_v41 }
 0xf3d   :  { %v4552_v13 = vpop.f32.mrf.mxu0  ;;  %v4623_v33 = vpop.f32.mrf.mxu1 }
 0xf3e   :  { %v4628_v3 = vadd.f32 %v4552_v13, %v3760_v53  ;;  %v4630_v16 = vadd.f32 %v4623_v33, %v3873_v10  ;;  %v10163_v33 = vmov 0.0   ;;  %v9308_v10 = vld [vmem:[#allocation12 + $0x2d8] sm:$0xff] }
 0xf3f   :  { %v4554_v21 = vpop.f32.mrf.mxu0  ;;  %v4625_v61 = vpop.f32.mrf.mxu1 }
 0xf40   :  { %v6131_v14 = vmul.f32 -1.442695, %v4628_v3  ;;  %v4629_v9 = vadd.f32 %v4554_v21, %v3762_v51  ;;  %v6133_v38 = vmul.f32 -1.442695, %v4630_v16  ;;  %v4631_v31 = vadd.f32 %v4625_v61, %v3875_v55  ;;  %v10159_v21 = vld [vmem:[#allocation30_spill] sm:$0xff]  ;;  %v9310_v16 = vld [vmem:[#allocation12 + $0x2c0] sm:$0xff] }
 0xf41   :  { %v9314_v61 = vld [vmem:[#allocation12 + $0x2d0] sm:$0xff]  ;;  %v9318_v55 = vld [vmem:[#allocation12 + $0x2b8] sm:$0xff] }
 0xf42   :  { %6863 = vpow2.f32 %v6131_v14  ;;  %v6132_v52 = vmul.f32 -1.442695, %v4629_v9  ;;  %v10160_v14 = vld [vmem:[#allocation31_spill] sm:$0xff]  ;;  %v10161_v9 = vld [vmem:[#allocation50_spill] sm:$0xff] }
 0xf44   :  { %6865 = vpow2.f32 %v6132_v52  ;;  %v10162_v52 = vld [vmem:[#allocation52_spill] sm:$0xff] }
 0xf45   :  { %6867 = vpow2.f32 %v6133_v38  ;;  %v9322_v38 = vld [vmem:[#allocation12 + $0x2a0] sm:$0xff] }
 0xf46   :  { %6869 = vtanh.f32 %v4631_v31  ;;  %v9324_v31 = vld [vmem:[#allocation12 + $0x2b0] sm:$0xff] }
 0xf47   :  { %10164 = vst [vmem:[#allocation33_spill] sm:$0xff] %v9324_v31 }
 0xf4f   :  { %v6864_v20 = vpop.eup %6863 }
 0xf50   :  { %v4641_v34 = vadd.f32 1.0, %v6864_v20  ;;  %v9326_v20 = vld [vmem:[#allocation12 + $0x288] sm:$0xff] }
 0xf51   :  { %v6866_v35 = vpop.eup %6865  ;;  %10165 = vst [vmem:[#allocation53_spill] sm:$0xff] %v9326_v20 }
 0xf52   :  { %6871 = vrcp.f32 %v4641_v34  ;;  %v4642_v59 = vadd.f32 1.0, %v6866_v35  ;;  %v6868_v39 = vpop.eup %6867  ;;  %v9330_v34 = vld [vmem:[#allocation12 + $0x298] sm:$0xff]  ;;  %v9332_v35 = vld [vmem:[#allocation12 + $0x280] sm:$0xff] }
 0xf53   :  { %v6870_v62 = vpop.eup %6869  ;;  %v4643_v37 = vadd.f32 1.0, %v6868_v39  ;;  %10166 = vst [vmem:[#allocation54_spill] sm:$0xff] %v9330_v34  ;;  %10167 = vst [vmem:[#allocation41_spill] sm:$0xff] %v9332_v35  ;;  %v9338_v39 = vld [vmem:[#allocation12 + $0x268] sm:$0xff] }
 0xf54   :  { %6873 = vrcp.f32 %v4642_v59  ;;  %v9334_v59 = vld [vmem:[#allocation12 + $0x290] sm:$0xff]  ;;  %10169 = vst [vmem:[#allocation42_spill] sm:$0xff] %v9338_v39 }
 0xf55   :  { %6875 = vrcp.f32 %v4643_v37  ;;  %10168 = vst [vmem:[#allocation28_spill] sm:$0xff] %v9334_v59  ;;  %v9352_v37 = vld [vmem:[#allocation12 + $0x258] sm:$0xff] }
 0xf56   :  { %10174 = vst [vmem:[#allocation49_spill] sm:$0xff] %v9352_v37 }
 0xf5f   :  { %v6872_v29 = vpop.eup %6871 }
 0xf60   :  { %v4652_v1 = vmul.f32 %v6872_v29, %v6870_v62  ;;  %v9340_v62 = vld [vmem:[#allocation12 + $0x278] sm:$0xff]  ;;  %v9344_v29 = vld [vmem:[#allocation12 + $0x260] sm:$0xff] }
 0xf61   :  { %v6874_v4 = vpop.eup %6873  ;;  %10170 = vst [vmem:[#allocation29_spill] sm:$0xff] %v9340_v62  ;;  %10171 = vst [vmem:[#allocation43_spill] sm:$0xff] %v9344_v29 }
 0xf62   :  { %v4651_v53 = vmul.f32 %v6874_v4, %v9107_v32  ;;  %v6876_v63 = vpop.eup %6875  ;;  %v10158_v32 = vld [vmem:[#allocation40_spill] sm:$0xff]  ;;  %v9350_v4 = vld [vmem:[#allocation12 + $0x248] sm:$0xff] }
 0xf63   :  { %10173 = vst [vmem:[#allocation44_spill] sm:$0xff] %v9350_v4 }
 0xf64   :  { %v9263_v13 = vadd.f32 %v4652_v1, %v4651_v53  ;;  %v9346_v1 = vld [vmem:[#allocation12 + $0x270] sm:$0xff]  ;;  %v9356_v53 = vld [vmem:[#allocation12 + $0x240] sm:$0xff] }
 0xf65   :  { %10172 = vst [vmem:[#allocation48_spill] sm:$0xff] %v9346_v1  ;;  %10175 = vst [vmem:[#allocation45_spill] sm:$0xff] %v9356_v53 }
 0xf66   :  { %6877 = vtanh.f32 %v9263_v13 }
 0xf73   :  { %v6878_v51 = vpop.eup %6877 }
 0xf74   :  { %v9266_v3 = vmul.f32 %v6878_v51, %v6876_v63  ;;  %v9358_v63 = vld [vmem:[#allocation12 + $0x250] sm:$0xff]  ;;  %v9362_v51 = vld [vmem:[#allocation12 + $0x228] sm:$0xff] }
 0xf75   :  { %10176 = vst [vmem:[#allocation73_spill] sm:$0xff] %v9358_v63  ;;  %10177 = vst [vmem:[#allocation61_spill] sm:$0xff] %v9362_v51 }
 0xf76   :  { %10157 = vst [vmem:[#allocation32_spill] sm:$0xff] %v9266_v3  ;;  %4790 = vmatmul.mubr.f32.vlgmr.msra.gmra.mxu0 %v9266_v3  ;;  %4861 = vmatmul.mubr.f32.vlgmr.msra.gmra.mxu1 %v9266_v3  ;;  %v9364_v3 = vld [vmem:[#allocation12 + $0x238] sm:$0xff] }
 0xf77   :  { %4965 = vmatpush1.msra.mxu0 %v9122_v0  ;;  %5036 = vmatpush1.msra.mxu1 %v9124_v24  ;;  %10178 = vst [vmem:[#allocation74_spill] sm:$0xff] %v9364_v3 }
 0xf78   :  { %4966 = vmatprep.subr.mxu0 %v9128_v2  ;;  %5037 = vmatprep.subr.mxu1 %v9130_v49 }
 0xf79   :  { %4967 = vmatpush1.msra.mxu0 %v9134_v57  ;;  %5038 = vmatpush1.msra.mxu1 %v9136_v30 }
 0xf7a   :  { %4968 = vmatprep.subr.mxu0 %v9140_v58  ;;  %5039 = vmatprep.subr.mxu1 %v9142_v8 }
 0xf7b   :  { %4969 = vmatpush1.msra.mxu0 %v9146_v23  ;;  %5040 = vmatpush1.msra.mxu1 %v9148_v11 }
 0xf7c   :  { %4970 = vmatprep.subr.mxu0 %v9152_v6  ;;  %5041 = vmatprep.subr.mxu1 %v9154_v12 }
 0xf7d   :  { %4971 = vmatpush1.msra.mxu0 %v9158_v50  ;;  %5042 = vmatpush1.msra.mxu1 %v9160_v60 }
 0xf7e   :  { %4972 = vmatprep.subr.mxu0 %v9164_v44  ;;  %5043 = vmatprep.subr.mxu1 %v9166_v46 }
 0xf7f   :  { %4973 = vmatpush1.msra.mxu0 %v9170_v45  ;;  %5044 = vmatpush1.msra.mxu1 %v9172_v54 }
 0xf80   :  { %4974 = vmatprep.subr.mxu0 %v9176_v43  ;;  %5045 = vmatprep.subr.mxu1 %v9178_v48 }
 0xf81   :  { %4975 = vmatpush1.msra.mxu0 %v9182_v19  ;;  %5046 = vmatpush1.msra.mxu1 %v10158_v32 }
 0xf82   :  { %4976 = vmatprep.subr.mxu0 %v10159_v21  ;;  %5047 = vmatprep.subr.mxu1 %v10160_v14 }
 0xf83   :  { %4977 = vmatpush1.msra.mxu0 %v10161_v9  ;;  %5048 = vmatpush1.msra.mxu1 %v10162_v52 }
 0xf84   :  { %4978 = vmatprep.subr.mxu0 %v9200_v42  ;;  %5049 = vmatprep.subr.mxu1 %v9202_v15 }
 0xf85   :  { %4979 = vmatpush1.msra.mxu0 %v9204_v7  ;;  %5050 = vmatpush1.msra.mxu1 %v9208_v56 }
 0xf86   :  { %4980 = vmatprep.subr.mxu0 %v9210_v27  ;;  %5051 = vmatprep.subr.mxu1 %v9212_v26 }
 0xf87   :  { %4981 = vmatpush1.msra.mxu0 %v9216_v36  ;;  %5052 = vmatpush1.msra.mxu1 %v9218_v17 }
 0xf88   :  { %5028 = vmatprep.mubr.f32.mxu0 %v10163_v33  ;;  %5099 = vmatprep.mubr.f32.mxu1 %v10163_v33  ;;  %v9368_v33 = vld [vmem:[#allocation12 + $0x220] sm:$0xff] }
 0xf89   :  { %4982 = vmatprep.subr.mxu0 %v9306_v18  ;;  %5053 = vmatprep.subr.mxu1 %v9308_v10  ;;  %10179 = vst [vmem:[#allocation62_spill] sm:$0xff] %v9368_v33 }
 0xf8a   :  { %4983 = vmatpush1.msra.mxu0 %v9310_v16  ;;  %5054 = vmatpush1.msra.mxu1 %v9314_v61 }
 0xf8b   :  { %4984 = vmatprep.subr.mxu0 %v9316_v22  ;;  %5055 = vmatprep.subr.mxu1 %v9318_v55 }
 0xf8c   :  { %4985 = vmatpush1.msra.mxu0 %v9322_v38  ;;  %5056 = vmatpush1.msra.mxu1 %v9324_v31 }
 0xf8d   :  { %4986 = vmatprep.subr.mxu0 %v9326_v20  ;;  %5057 = vmatprep.subr.mxu1 %v9330_v34  ;;  %v10188_v34 = vld [vmem:[#allocation56_spill] sm:$0xff] }
 0xf8e   :  { %4987 = vmatpush1.msra.mxu0 %v9332_v35  ;;  %5058 = vmatpush1.msra.mxu1 %v9334_v59 }
 0xf8f   :  { %4988 = vmatprep.subr.mxu0 %v9338_v39  ;;  %5059 = vmatprep.subr.mxu1 %v9340_v62  ;;  %v9370_v39 = vld [vmem:[#allocation12 + $0x230] sm:$0xff]  ;;  %v9374_v62 = vld [vmem:[#allocation12 + $0x208] sm:$0xff] }
 0xf90   :  { %4989 = vmatpush1.msra.mxu0 %v9344_v29  ;;  %5060 = vmatpush1.msra.mxu1 %v9346_v1  ;;  %10180 = vst [vmem:[#allocation60_spill] sm:$0xff] %v9370_v39  ;;  %10181 = vst [vmem:[#allocation26_spill] sm:$0xff] %v9374_v62  ;;  %v9376_v29 = vld [vmem:[#allocation12 + $0x218] sm:$0xff]  ;;  %v9380_v1 = vld [vmem:[#allocation12 + $0x200] sm:$0xff] }
 0xf91   :  { %4990 = vmatprep.subr.mxu0 %v9350_v4  ;;  %5061 = vmatprep.subr.mxu1 %v9352_v37  ;;  %10182 = vst [vmem:[#allocation63_spill] sm:$0xff] %v9376_v29  ;;  %10183 = vst [vmem:[#allocation64_spill] sm:$0xff] %v9380_v1  ;;  %v9382_v4 = vld [vmem:[#allocation12 + $0x210] sm:$0xff] }
 0xf92   :  { %4991 = vmatpush1.msra.mxu0 %v9356_v53  ;;  %5062 = vmatpush1.msra.mxu1 %v9358_v63  ;;  %10184 = vst [vmem:[#allocation40_spill] sm:$0xff] %v9382_v4 }
 0xf93   :  { %4992 = vmatprep.subr.mxu0 %v9362_v51  ;;  %5063 = vmatprep.subr.mxu1 %v9364_v3  ;;  %v10185_v3 = vld [vmem:[#allocation27_spill] sm:$0xff] }
 0xf94   :  { %4993 = vmatpush1.msra.mxu0 %v9368_v33  ;;  %5064 = vmatpush1.msra.mxu1 %v9370_v39  ;;  %v3766_v51 = vadd.f32 %v10185_v3, %v10138_v28  ;;  %v10186_v33 = vld [vmem:[#allocation34_spill] sm:$0xff]  ;;  %v3881_v3 = vadd.f32 %v10188_v34, %v10143_v25 }
 0xf95   :  { %4994 = vmatprep.subr.mxu0 %v9374_v62  ;;  %5065 = vmatprep.subr.mxu1 %v9376_v29  ;;  %v3768_v53 = vadd.f32 %v10186_v33, %v9004_v5  ;;  %v10192_v34 = vld [vmem:[#allocation54_spill] sm:$0xff] }
 0xf96   :  { %4995 = vmatpush1.msra.mxu0 %v9380_v1  ;;  %5066 = vmatpush1.msra.mxu1 %v9382_v4  ;;  %v10187_v4 = vld [vmem:[#allocation35_spill] sm:$0xff] }
 0xf97   :  { %5203 = vmatprep.subr.mxu0 %v9116_v47  ;;  %5274 = vmatprep.subr.mxu1 %v9118_v41  ;;  %v3879_v47 = vadd.f32 %v10187_v4, %v10141_v40 }
0x1036   :  { %v4791_v63 = vpop.f32.mrf.mxu0  ;;  %v4862_v1 = vpop.f32.mrf.mxu1 }
0x1037   :  { %v4867_v39 = vadd.f32 %v4791_v63, %v3766_v51  ;;  %v4869_v35 = vadd.f32 %v4862_v1, %v3879_v47  ;;  %v10194_v51 = vld [vmem:[#allocation28_spill] sm:$0xff] }
0x1038   :  { %v4793_v37 = vpop.f32.mrf.mxu0  ;;  %v4864_v41 = vpop.f32.mrf.mxu1 }
0x1039   :  { %v6134_v62 = vmul.f32 -1.442695, %v4867_v39  ;;  %v4868_v59 = vadd.f32 %v4793_v37, %v3768_v53  ;;  %v6136_v28 = vmul.f32 -1.442695, %v4869_v35  ;;  %v4870_v20 = vadd.f32 %v4864_v41, %v3881_v3  ;;  %v10193_v35 = vld [vmem:[#allocation41_spill] sm:$0xff]  ;;  %v10195_v3 = vld [vmem:[#allocation42_spill] sm:$0xff] }
0x103b   :  { %6879 = vpow2.f32 %v6134_v62  ;;  %v6135_v29 = vmul.f32 -1.442695, %v4868_v59 }
0x103d   :  { %6881 = vpow2.f32 %v6135_v29 }
0x103e   :  { %6883 = vpow2.f32 %v6136_v28 }
0x103f   :  { %6885 = vtanh.f32 %v4870_v20  ;;  %v10191_v20 = vld [vmem:[#allocation53_spill] sm:$0xff] }
0x1048   :  { %v6880_v31 = vpop.eup %6879 }
0x1049   :  { %v4880_v33 = vadd.f32 1.0, %v6880_v31 }
0x104a   :  { %v6882_v63 = vpop.eup %6881 }
0x104b   :  { %6887 = vrcp.f32 %v4880_v33  ;;  %v4881_v39 = vadd.f32 1.0, %v6882_v63  ;;  %v6884_v59 = vpop.eup %6883  ;;  %v10196_v33 = vld [vmem:[#allocation29_spill] sm:$0xff]  ;;  %v10197_v63 = vld [vmem:[#allocation43_spill] sm:$0xff] }
0x104c   :  { %v6886_v62 = vpop.eup %6885  ;;  %v4882_v47 = vadd.f32 1.0, %v6884_v59  ;;  %v10199_v59 = vld [vmem:[#allocation44_spill] sm:$0xff] }
0x104d   :  { %6889 = vrcp.f32 %v4881_v39  ;;  %v10198_v39 = vld [vmem:[#allocation48_spill] sm:$0xff] }
0x104e   :  { %6891 = vrcp.f32 %v4882_v47  ;;  %v10204_v47 = vld [vmem:[#allocation74_spill] sm:$0xff] }
0x1058   :  { %v6888_v29 = vpop.eup %6887 }
0x1059   :  { %v4891_v37 = vmul.f32 %v6888_v29, %v6886_v62  ;;  %v10200_v62 = vld [vmem:[#allocation49_spill] sm:$0xff] }
0x105a   :  { %v6890_v4 = vpop.eup %6889  ;;  %v10201_v29 = vld [vmem:[#allocation45_spill] sm:$0xff] }
0x105b   :  { %v4890_v1 = vmul.f32 %v6890_v4, %v9263_v13  ;;  %v6892_v41 = vpop.eup %6891  ;;  %v10190_v13 = vld [vmem:[#allocation33_spill] sm:$0xff] }
0x105c   :  { %v10203_v4 = vld [vmem:[#allocation61_spill] sm:$0xff] }
0x105d   :  { %v9401_v53 = vadd.f32 %v4891_v37, %v4890_v1  ;;  %v10202_v37 = vld [vmem:[#allocation73_spill] sm:$0xff]  ;;  %v10205_v1 = vld [vmem:[#allocation62_spill] sm:$0xff] }
0x105f   :  { %6893 = vtanh.f32 %v9401_v53 }
0x106c   :  { %v6894_v28 = vpop.eup %6893 }
0x106d   :  { %v9404_v31 = vmul.f32 %v6894_v28, %v6892_v41  ;;  %v10206_v41 = vld [vmem:[#allocation60_spill] sm:$0xff]  ;;  %v10207_v28 = vld [vmem:[#allocation26_spill] sm:$0xff] }
0x106f   :  { %10189 = vst [vmem:[#allocation30_spill] sm:$0xff] %v9404_v31  ;;  %5029 = vmatmul.mubr.f32.vlgmr.msra.gmra.mxu0 %v9404_v31  ;;  %5100 = vmatmul.mubr.f32.vlgmr.msra.gmra.mxu1 %v9404_v31  ;;  %v10208_v31 = vld [vmem:[#allocation63_spill] sm:$0xff] }
0x1070   :  { %5204 = vmatpush1.msra.mxu0 %v9122_v0  ;;  %5275 = vmatpush1.msra.mxu1 %v9124_v24 }
0x1071   :  { %5205 = vmatprep.subr.mxu0 %v9128_v2  ;;  %5276 = vmatprep.subr.mxu1 %v9130_v49 }
0x1072   :  { %5206 = vmatpush1.msra.mxu0 %v9134_v57  ;;  %5277 = vmatpush1.msra.mxu1 %v9136_v30 }
0x1073   :  { %5207 = vmatprep.subr.mxu0 %v9140_v58  ;;  %5278 = vmatprep.subr.mxu1 %v9142_v8 }
0x1074   :  { %5208 = vmatpush1.msra.mxu0 %v9146_v23  ;;  %5279 = vmatpush1.msra.mxu1 %v9148_v11 }
0x1075   :  { %5209 = vmatprep.subr.mxu0 %v9152_v6  ;;  %5280 = vmatprep.subr.mxu1 %v9154_v12 }
0x1076   :  { %5210 = vmatpush1.msra.mxu0 %v9158_v50  ;;  %5281 = vmatpush1.msra.mxu1 %v9160_v60 }
0x1077   :  { %5211 = vmatprep.subr.mxu0 %v9164_v44  ;;  %5282 = vmatprep.subr.mxu1 %v9166_v46 }
0x1078   :  { %5212 = vmatpush1.msra.mxu0 %v9170_v45  ;;  %5283 = vmatpush1.msra.mxu1 %v9172_v54 }
0x1079   :  { %5213 = vmatprep.subr.mxu0 %v9176_v43  ;;  %5284 = vmatprep.subr.mxu1 %v9178_v48 }
0x107a   :  { %5214 = vmatpush1.msra.mxu0 %v9182_v19  ;;  %5285 = vmatpush1.msra.mxu1 %v10158_v32 }
0x107b   :  { %5215 = vmatprep.subr.mxu0 %v10159_v21  ;;  %5286 = vmatprep.subr.mxu1 %v10160_v14 }
0x107c   :  { %5216 = vmatpush1.msra.mxu0 %v10161_v9  ;;  %5287 = vmatpush1.msra.mxu1 %v10162_v52 }
0x107d   :  { %5217 = vmatprep.subr.mxu0 %v9200_v42  ;;  %5288 = vmatprep.subr.mxu1 %v9202_v15 }
0x107e   :  { %5218 = vmatpush1.msra.mxu0 %v9204_v7  ;;  %5289 = vmatpush1.msra.mxu1 %v9208_v56 }
0x107f   :  { %5219 = vmatprep.subr.mxu0 %v9210_v27  ;;  %5290 = vmatprep.subr.mxu1 %v9212_v26 }
0x1080   :  { %5220 = vmatpush1.msra.mxu0 %v9216_v36  ;;  %5291 = vmatpush1.msra.mxu1 %v9218_v17 }
0x1081   :  { %5221 = vmatprep.subr.mxu0 %v9306_v18  ;;  %5292 = vmatprep.subr.mxu1 %v9308_v10 }
0x1082   :  { %5222 = vmatpush1.msra.mxu0 %v9310_v16  ;;  %5293 = vmatpush1.msra.mxu1 %v9314_v61 }
0x1083   :  { %5223 = vmatprep.subr.mxu0 %v9316_v22  ;;  %5294 = vmatprep.subr.mxu1 %v9318_v55 }
0x1084   :  { %5224 = vmatpush1.msra.mxu0 %v9322_v38  ;;  %5295 = vmatpush1.msra.mxu1 %v10190_v13 }
0x1085   :  { %5225 = vmatprep.subr.mxu0 %v10191_v20  ;;  %5296 = vmatprep.subr.mxu1 %v10192_v34  ;;  %v10218_v34 = vld [vmem:[#allocation46_spill] sm:$0xff] }
0x1086   :  { %5226 = vmatpush1.msra.mxu0 %v10193_v35  ;;  %5297 = vmatpush1.msra.mxu1 %v10194_v51 }
0x1087   :  { %5227 = vmatprep.subr.mxu0 %v10195_v3  ;;  %5298 = vmatprep.subr.mxu1 %v10196_v33 }
0x1088   :  { %5228 = vmatpush1.msra.mxu0 %v10197_v63  ;;  %5299 = vmatpush1.msra.mxu1 %v10198_v39  ;;  %v10209_v39 = vld [vmem:[#allocation64_spill] sm:$0xff] }
0x1089   :  { %5229 = vmatprep.subr.mxu0 %v10199_v59  ;;  %5300 = vmatprep.subr.mxu1 %v10200_v62  ;;  %v10210_v59 = vmov 0.0   ;;  %v10211_v62 = vld [vmem:[#allocation40_spill] sm:$0xff] }
0x108a   :  { %5230 = vmatpush1.msra.mxu0 %v10201_v29  ;;  %5301 = vmatpush1.msra.mxu1 %v10202_v37  ;;  %v10212_v37 = vld [vmem:[#allocation68_spill] sm:$0xff] }
0x108b   :  { %5231 = vmatprep.subr.mxu0 %v10203_v4  ;;  %5302 = vmatprep.subr.mxu1 %v10204_v47  ;;  %v10213_v4 = vld [vmem:[#allocation38_spill] sm:$0xff]  ;;  %v10214_v47 = vld [vmem:[#allocation24_spill] sm:$0xff] }
0x108c   :  { %5232 = vmatpush1.msra.mxu0 %v10205_v1  ;;  %5303 = vmatpush1.msra.mxu1 %v10206_v41  ;;  %v10215_v1 = vld [vmem:[#allocation55_spill] sm:$0xff] }
0x108d   :  { %5233 = vmatprep.subr.mxu0 %v10207_v28  ;;  %5304 = vmatprep.subr.mxu1 %v10208_v31  ;;  %v3772_v29 = vadd.f32 %v10215_v1, %v10214_v47  ;;  %v10216_v28 = vld [vmem:[#allocation59_spill] sm:$0xff]  ;;  %v3887_v1 = vadd.f32 %v10218_v34, %v10143_v25 }
0x108e   :  { %5234 = vmatpush1.msra.mxu0 %v10209_v39  ;;  %5267 = vmatprep.mubr.f32.mxu0 %v10210_v59  ;;  %v3774_v63 = vadd.f32 %v10216_v28, %v9004_v5 }
0x108f   :  { %5305 = vmatpush1.msra.mxu1 %v10211_v62  ;;  %5338 = vmatprep.mubr.f32.mxu1 %v10210_v59  ;;  %v10217_v59 = vld [vmem:[#allocation69_spill] sm:$0xff] }
0x1090   :  { %5442 = vmatprep.subr.mxu0 %v10212_v37  ;;  %5513 = vmatprep.subr.mxu1 %v10213_v4  ;;  %v3885_v37 = vadd.f32 %v10217_v59, %v10141_v40 }
0x112f   :  { %v5030_v41 = vpop.f32.mrf.mxu0  ;;  %v5101_v62 = vpop.f32.mrf.mxu1 }
0x1130   :  { %v5106_v31 = vadd.f32 %v5030_v41, %v3772_v29  ;;  %v5108_v35 = vadd.f32 %v5101_v62, %v3885_v37 }
0x1131   :  { %v5032_v33 = vpop.f32.mrf.mxu0  ;;  %v5103_v4 = vpop.f32.mrf.mxu1 }
0x1132   :  { %v6137_v39 = vmul.f32 -1.442695, %v5106_v31  ;;  %v5107_v3 = vadd.f32 %v5032_v33, %v3774_v63  ;;  %v6139_v47 = vmul.f32 -1.442695, %v5108_v35  ;;  %v5109_v20 = vadd.f32 %v5103_v4, %v3887_v1  ;;  %v10245_v4 = vld [vmem:[#allocation57_spill] sm:$0xff] }
0x1133   :  { %v3893_v1 = vadd.f32 %v10245_v4, %v10143_v25  ;;  %v5671_v4 = vld [vmem:[#allocation12 + $0x3b0] sm:$0xff] }
0x1134   :  { %6895 = vpow2.f32 %v6137_v39  ;;  %v6138_v51 = vmul.f32 -1.442695, %v5107_v3 }
0x1136   :  { %6897 = vpow2.f32 %v6138_v51 }
0x1137   :  { %6899 = vpow2.f32 %v6139_v47 }
0x1138   :  { %6901 = vtanh.f32 %v5109_v20 }
0x1141   :  { %v6896_v13 = vpop.eup %6895 }
0x1142   :  { %v5119_v28 = vadd.f32 1.0, %v6896_v13 }
0x1143   :  { %v6898_v29 = vpop.eup %6897 }
0x1144   :  { %6903 = vrcp.f32 %v5119_v28  ;;  %v5120_v31 = vadd.f32 1.0, %v6898_v29  ;;  %v6900_v51 = vpop.eup %6899 }
0x1145   :  { %v6902_v3 = vpop.eup %6901  ;;  %v5121_v59 = vadd.f32 1.0, %v6900_v51 }
0x1146   :  { %6905 = vrcp.f32 %v5120_v31 }
0x1147   :  { %6907 = vrcp.f32 %v5121_v59 }
0x1151   :  { %v6904_v33 = vpop.eup %6903 }
0x1152   :  { %v5130_v63 = vmul.f32 %v6904_v33, %v6902_v3 }
0x1153   :  { %v6906_v39 = vpop.eup %6905 }
0x1154   :  { %v5129_v62 = vmul.f32 %v6906_v39, %v9401_v53  ;;  %v6908_v13 = vpop.eup %6907  ;;  %v10244_v53 = vld [vmem:[#allocation36_spill] sm:$0xff] }
0x1155   :  { %v3891_v20 = vadd.f32 %v10244_v53, %v10141_v40  ;;  %v5670_v53 = vld [vmem:[#allocation12 + $0x3a8] sm:$0xff] }
0x1156   :  { %v9483_v41 = vadd.f32 %v5130_v63, %v5129_v62 }
0x1158   :  { %6909 = vtanh.f32 %v9483_v41 }
0x1165   :  { %v6910_v34 = vpop.eup %6909 }
0x1166   :  { %v9486_v35 = vmul.f32 %v6910_v34, %v6908_v13 }
0x1168   :  { %5268 = vmatmul.mubr.f32.vlgmr.msra.gmra.mxu0 %v9486_v35  ;;  %5339 = vmatmul.mubr.f32.vlgmr.msra.gmra.mxu1 %v9486_v35 }
0x1169   :  { %5443 = vmatpush1.msra.mxu0 %v9122_v0  ;;  %5514 = vmatpush1.msra.mxu1 %v9124_v24  ;;  %v10222_v0 = vld [vmem:[#allocation41_spill] sm:$0xff]  ;;  %v10223_v24 = vld [vmem:[#allocation28_spill] sm:$0xff] }
0x116a   :  { %5444 = vmatprep.subr.mxu0 %v9128_v2  ;;  %5515 = vmatprep.subr.mxu1 %v9130_v49  ;;  %v10224_v2 = vld [vmem:[#allocation42_spill] sm:$0xff]  ;;  %v10225_v49 = vld [vmem:[#allocation29_spill] sm:$0xff] }
0x116b   :  { %5445 = vmatpush1.msra.mxu0 %v9134_v57  ;;  %5516 = vmatpush1.msra.mxu1 %v9136_v30  ;;  %v10226_v57 = vld [vmem:[#allocation43_spill] sm:$0xff]  ;;  %v10227_v30 = vld [vmem:[#allocation48_spill] sm:$0xff] }
0x116c   :  { %5446 = vmatprep.subr.mxu0 %v9140_v58  ;;  %5517 = vmatprep.subr.mxu1 %v9142_v8  ;;  %v10228_v58 = vld [vmem:[#allocation44_spill] sm:$0xff]  ;;  %v10229_v8 = vld [vmem:[#allocation49_spill] sm:$0xff] }
0x116d   :  { %5447 = vmatpush1.msra.mxu0 %v9146_v23  ;;  %5518 = vmatpush1.msra.mxu1 %v9148_v11  ;;  %v10230_v23 = vld [vmem:[#allocation45_spill] sm:$0xff] }
0x116e   :  { %5448 = vmatprep.subr.mxu0 %v9152_v6  ;;  %5519 = vmatprep.subr.mxu1 %v9154_v12  ;;  %v10231_v11 = vld [vmem:[#allocation73_spill] sm:$0xff]  ;;  %v10233_v12 = vld [vmem:[#allocation74_spill] sm:$0xff] }
0x116f   :  { %5449 = vmatpush1.msra.mxu0 %v9158_v50  ;;  %5520 = vmatpush1.msra.mxu1 %v9160_v60  ;;  %v10232_v6 = vld [vmem:[#allocation61_spill] sm:$0xff]  ;;  %v10234_v50 = vld [vmem:[#allocation62_spill] sm:$0xff]  ;;  %v10235_v60 = vld [vmem:[#allocation60_spill] sm:$0xff] }
0x1170   :  { %5450 = vmatprep.subr.mxu0 %v9164_v44  ;;  %5521 = vmatprep.subr.mxu1 %v9166_v46  ;;  %v10236_v44 = vld [vmem:[#allocation26_spill] sm:$0xff]  ;;  %v10237_v46 = vld [vmem:[#allocation63_spill] sm:$0xff] }
0x1171   :  { %5451 = vmatpush1.msra.mxu0 %v9170_v45  ;;  %5522 = vmatpush1.msra.mxu1 %v9172_v54  ;;  %v10238_v45 = vld [vmem:[#allocation64_spill] sm:$0xff]  ;;  %v10239_v54 = vmov 0.0  }
0x1172   :  { %5452 = vmatprep.subr.mxu0 %v9176_v43  ;;  %5523 = vmatprep.subr.mxu1 %v9178_v48  ;;  %v10240_v43 = vld [vmem:[#allocation40_spill] sm:$0xff] }
0x1173   :  { %5453 = vmatpush1.msra.mxu0 %v9182_v19  ;;  %5524 = vmatpush1.msra.mxu1 %v10158_v32  ;;  %v10241_v48 = vld [vmem:[#allocation24_spill] sm:$0xff]  ;;  %v10242_v19 = vld [vmem:[#allocation39_spill] sm:$0xff] }
0x1174   :  { %5454 = vmatprep.subr.mxu0 %v10159_v21  ;;  %5525 = vmatprep.subr.mxu1 %v10160_v14 }
0x1175   :  { %5455 = vmatpush1.msra.mxu0 %v10161_v9  ;;  %5526 = vmatpush1.msra.mxu1 %v10162_v52 }
0x1176   :  { %5456 = vmatprep.subr.mxu0 %v9200_v42  ;;  %5527 = vmatprep.subr.mxu1 %v9202_v15  ;;  %v10219_v15 = vld [vmem:[#allocation33_spill] sm:$0xff]  ;;  %v10221_v42 = vld [vmem:[#allocation54_spill] sm:$0xff] }
0x1177   :  { %5457 = vmatpush1.msra.mxu0 %v9204_v7  ;;  %5528 = vmatpush1.msra.mxu1 %v9208_v56  ;;  %v10220_v7 = vld [vmem:[#allocation53_spill] sm:$0xff] }
0x1178   :  { %5458 = vmatprep.subr.mxu0 %v9210_v27  ;;  %5529 = vmatprep.subr.mxu1 %v9212_v26  ;;  %v3778_v26 = vadd.f32 %v10242_v19, %v10241_v48  ;;  %v10243_v27 = vld [vmem:[#allocation47_spill] sm:$0xff] }
0x1179   :  { %5459 = vmatpush1.msra.mxu0 %v9216_v36  ;;  %5530 = vmatpush1.msra.mxu1 %v9218_v17  ;;  %v3780_v17 = vadd.f32 %v10243_v27, %v9004_v5 }
0x117a   :  { %5460 = vmatprep.subr.mxu0 %v9306_v18  ;;  %5531 = vmatprep.subr.mxu1 %v9308_v10 }
0x117b   :  { %5461 = vmatpush1.msra.mxu0 %v9310_v16  ;;  %5532 = vmatpush1.msra.mxu1 %v9314_v61 }
0x117c   :  { %5462 = vmatprep.subr.mxu0 %v9316_v22  ;;  %5533 = vmatprep.subr.mxu1 %v9318_v55 }
0x117d   :  { %5463 = vmatpush1.msra.mxu0 %v9322_v38  ;;  %5534 = vmatpush1.msra.mxu1 %v10219_v15 }
0x117e   :  { %5464 = vmatprep.subr.mxu0 %v10220_v7  ;;  %5535 = vmatprep.subr.mxu1 %v10221_v42 }
0x117f   :  { %5465 = vmatpush1.msra.mxu0 %v10222_v0  ;;  %5536 = vmatpush1.msra.mxu1 %v10223_v24 }
0x1180   :  { %5466 = vmatprep.subr.mxu0 %v10224_v2  ;;  %5537 = vmatprep.subr.mxu1 %v10225_v49 }
0x1181   :  { %5467 = vmatpush1.msra.mxu0 %v10226_v57  ;;  %5538 = vmatpush1.msra.mxu1 %v10227_v30 }
0x1182   :  { %5468 = vmatprep.subr.mxu0 %v10228_v58  ;;  %5539 = vmatprep.subr.mxu1 %v10229_v8 }
0x1183   :  { %5469 = vmatpush1.msra.mxu0 %v10230_v23  ;;  %5540 = vmatpush1.msra.mxu1 %v10231_v11 }
0x1184   :  { %5470 = vmatprep.subr.mxu0 %v10232_v6  ;;  %5541 = vmatprep.subr.mxu1 %v10233_v12 }
0x1185   :  { %5471 = vmatpush1.msra.mxu0 %v10234_v50  ;;  %5542 = vmatpush1.msra.mxu1 %v10235_v60 }
0x1186   :  { %5472 = vmatprep.subr.mxu0 %v10236_v44  ;;  %5543 = vmatprep.subr.mxu1 %v10237_v46 }
0x1187   :  { %5473 = vmatpush1.msra.mxu0 %v10238_v45  ;;  %5506 = vmatprep.mubr.f32.mxu0 %v10239_v54 }
0x1188   :  { %5544 = vmatpush1.msra.mxu1 %v10240_v43  ;;  %5577 = vmatprep.mubr.f32.mxu1 %v10239_v54 }
0x1228   :  { %v5269_v56 = vpop.f32.mrf.mxu0  ;;  %v5340_v52 = vpop.f32.mrf.mxu1 }
0x1229   :  { %v5345_v36 = vadd.f32 %v5269_v56, %v3778_v26  ;;  %v5347_v47 = vadd.f32 %v5340_v52, %v3891_v20  ;;  %v5676_v52 = vld [vmem:[#allocation12 + $0x3d8] sm:$0xff]  ;;  %v5675_v20 = vld [vmem:[#allocation12 + $0x3d0] sm:$0xff] }
0x122a   :  { %v5271_v32 = vpop.f32.mrf.mxu0  ;;  %v5342_v37 = vpop.f32.mrf.mxu1 }
0x122b   :  { %v6140_v21 = vmul.f32 -1.442695, %v5345_v36  ;;  %v5346_v14 = vadd.f32 %v5271_v32, %v3780_v17  ;;  %v6142_v28 = vmul.f32 -1.442695, %v5347_v47  ;;  %v5348_v29 = vadd.f32 %v5342_v37, %v3893_v1  ;;  %v5678_v36 = vld [vmem:[#allocation12 + $0x3e8] sm:$0xff]  ;;  %v5680_v32 = vld [vmem:[#allocation12 + $0x3f8] sm:$0xff] }
0x122c   :  { %5681 = vmatprep.subr.mxu0 %v5678_v36  ;;  %5752 = vmatprep.subr.mxu1 %v5680_v32  ;;  %v5669_v47 = vld [vmem:[#allocation12 + $0x3a0] sm:$0xff]  ;;  %v5666_v37 = vld [vmem:[#allocation12 + $0x388] sm:$0xff] }
0x122d   :  { %6911 = vpow2.f32 %v6140_v21  ;;  %v6141_v9 = vmul.f32 -1.442695, %v5346_v14  ;;  %v5674_v21 = vld [vmem:[#allocation12 + $0x3c8] sm:$0xff]  ;;  %v5679_v14 = vld [vmem:[#allocation12 + $0x3f0] sm:$0xff]  ;;  %v5665_v1 = vld [vmem:[#allocation12 + $0x380] sm:$0xff] }
0x122e   :  { %v5649_v36 = vld [vmem:[#allocation12 + $0x300] sm:$0xff]  ;;  %v5646_v32 = vld [vmem:[#allocation12 + $0x2e8] sm:$0xff] }
0x122f   :  { %6913 = vpow2.f32 %v6141_v9  ;;  %v5673_v9 = vld [vmem:[#allocation12 + $0x3c0] sm:$0xff] }
0x1230   :  { %6915 = vpow2.f32 %v6142_v28  ;;  %v5668_v28 = vld [vmem:[#allocation12 + $0x398] sm:$0xff] }
0x1231   :  { %6917 = vtanh.f32 %v5348_v29  ;;  %v5662_v29 = vld [vmem:[#allocation12 + $0x368] sm:$0xff] }
0x123a   :  { %v6912_v31 = vpop.eup %6911 }
0x123b   :  { %v5358_v51 = vadd.f32 1.0, %v6912_v31  ;;  %v5667_v31 = vld [vmem:[#allocation12 + $0x390] sm:$0xff] }
0x123c   :  { %v6914_v3 = vpop.eup %6913 }
0x123d   :  { %6919 = vrcp.f32 %v5358_v51  ;;  %v5359_v33 = vadd.f32 1.0, %v6914_v3  ;;  %v6916_v63 = vpop.eup %6915  ;;  %v5661_v51 = vld [vmem:[#allocation12 + $0x360] sm:$0xff]  ;;  %v5664_v3 = vld [vmem:[#allocation12 + $0x378] sm:$0xff] }
0x123e   :  { %v6918_v39 = vpop.eup %6917  ;;  %v5360_v34 = vadd.f32 1.0, %v6916_v63  ;;  %v5663_v63 = vld [vmem:[#allocation12 + $0x370] sm:$0xff] }
0x123f   :  { %6921 = vrcp.f32 %v5359_v33  ;;  %v5658_v33 = vld [vmem:[#allocation12 + $0x348] sm:$0xff] }
0x1240   :  { %6923 = vrcp.f32 %v5360_v34  ;;  %v5653_v34 = vld [vmem:[#allocation12 + $0x320] sm:$0xff] }
0x124a   :  { %v6920_v59 = vpop.eup %6919 }
0x124b   :  { %v5369_v62 = vmul.f32 %v6920_v59, %v6918_v39  ;;  %v5657_v39 = vld [vmem:[#allocation12 + $0x340] sm:$0xff]  ;;  %v5660_v59 = vld [vmem:[#allocation12 + $0x358] sm:$0xff] }
0x124c   :  { %v6922_v13 = vpop.eup %6921 }
0x124d   :  { %v5368_v19 = vmul.f32 %v6922_v13, %v9483_v41  ;;  %v6924_v56 = vpop.eup %6923  ;;  %v5677_v41 = vld [vmem:[#allocation12 + $0x3e0] sm:$0xff]  ;;  %v5659_v13 = vld [vmem:[#allocation12 + $0x350] sm:$0xff] }
0x124f   :  { %v9563_v26 = vadd.f32 %v5369_v62, %v5368_v19  ;;  %v5654_v62 = vld [vmem:[#allocation12 + $0x328] sm:$0xff]  ;;  %v5656_v19 = vld [vmem:[#allocation12 + $0x338] sm:$0xff] }
0x1251   :  { %6925 = vtanh.f32 %v9563_v26 }
0x125e   :  { %v6926_v27 = vpop.eup %6925 }
0x125f   :  { %v9566_v17 = vmul.f32 %v6926_v27, %v6924_v56  ;;  %v5650_v56 = vld [vmem:[#allocation12 + $0x308] sm:$0xff]  ;;  %v5655_v27 = vld [vmem:[#allocation12 + $0x330] sm:$0xff] }
0x1261   :  { %5507 = vmatmul.mubr.f32.vlgmr.msra.gmra.mxu0 %v9566_v17  ;;  %5578 = vmatmul.mubr.f32.vlgmr.msra.gmra.mxu1 %v9566_v17 }
0x1262   :  { %5745 = vmatprep.mubr.f32.mxu0 %v10239_v54  ;;  %5816 = vmatprep.mubr.f32.mxu1 %v10239_v54  ;;  %v5672_v54 = vld [vmem:[#allocation12 + $0x3b8] sm:$0xff] }
0x1263   :  { %5682 = vmatpush1.msra.mxu0 %v5677_v41  ;;  %5753 = vmatpush1.msra.mxu1 %v5679_v14  ;;  %v5652_v41 = vld [vmem:[#allocation12 + $0x318] sm:$0xff]  ;;  %v5645_v14 = vld [vmem:[#allocation12 + $0x2e0] sm:$0xff] }
0x1264   :  { %5683 = vmatprep.subr.mxu0 %v5674_v21  ;;  %5754 = vmatprep.subr.mxu1 %v5676_v52  ;;  %v5651_v21 = vld [vmem:[#allocation12 + $0x310] sm:$0xff] }
0x1265   :  { %5684 = vmatpush1.msra.mxu0 %v5673_v9  ;;  %5755 = vmatpush1.msra.mxu1 %v5675_v20  ;;  %v5648_v9 = vld [vmem:[#allocation12 + $0x2f8] sm:$0xff]  ;;  %v5647_v52 = vld [vmem:[#allocation12 + $0x2f0] sm:$0xff] }
0x1266   :  { %5685 = vmatprep.subr.mxu0 %v5670_v53  ;;  %5756 = vmatprep.subr.mxu1 %v5672_v54 }
0x1267   :  { %5686 = vmatpush1.msra.mxu0 %v5669_v47  ;;  %5757 = vmatpush1.msra.mxu1 %v5671_v4 }
0x1268   :  { %5687 = vmatprep.subr.mxu0 %v5666_v37  ;;  %5758 = vmatprep.subr.mxu1 %v5668_v28  ;;  %v5878_v28 = vld [vmem:[#allocation13 + $0x70] sm:$0xff] }
0x1269   :  { %5688 = vmatpush1.msra.mxu0 %v5665_v1  ;;  %5759 = vmatpush1.msra.mxu1 %v5667_v31  ;;  %v5877_v31 = vld [vmem:[#allocation13 + $0x68] sm:$0xff] }
0x126a   :  { %5689 = vmatprep.subr.mxu0 %v5662_v29  ;;  %5760 = vmatprep.subr.mxu1 %v5664_v3  ;;  %v10250_v29 = vld [vmem:[#allocation51_spill] sm:$0xff]  ;;  %v5874_v3 = vld [vmem:[#allocation13 + $0x50] sm:$0xff] }
0x126b   :  { %5690 = vmatpush1.msra.mxu0 %v5661_v51  ;;  %5761 = vmatpush1.msra.mxu1 %v5663_v63  ;;  %v5876_v51 = vld [vmem:[#allocation13 + $0x60] sm:$0xff] }
0x126c   :  { %5691 = vmatprep.subr.mxu0 %v5658_v33  ;;  %5762 = vmatprep.subr.mxu1 %v5660_v59  ;;  %v5873_v33 = vld [vmem:[#allocation13 + $0x48] sm:$0xff]  ;;  %v5872_v63 = vld [vmem:[#allocation13 + $0x40] sm:$0xff]  ;;  %v5870_v59 = vld [vmem:[#allocation13 + $0x30] sm:$0xff] }
0x126d   :  { %5692 = vmatpush1.msra.mxu0 %v5657_v39  ;;  %5763 = vmatpush1.msra.mxu1 %v5659_v13  ;;  %v5871_v39 = vld [vmem:[#allocation13 + $0x38] sm:$0xff]  ;;  %v5868_v13 = vld [vmem:[#allocation13 + $0x20] sm:$0xff] }
0x126e   :  { %5693 = vmatprep.subr.mxu0 %v5654_v62  ;;  %5764 = vmatprep.subr.mxu1 %v5656_v19  ;;  %v5869_v62 = vld [vmem:[#allocation13 + $0x28] sm:$0xff]  ;;  %v5866_v19 = vld [vmem:[#allocation13 + $0x10] sm:$0xff] }
0x126f   :  { %5694 = vmatpush1.msra.mxu0 %v5653_v34  ;;  %5765 = vmatpush1.msra.mxu1 %v5655_v27  ;;  %v5867_v34 = vld [vmem:[#allocation13 + $0x18] sm:$0xff]  ;;  %v5864_v27 = vld [vmem:[#allocation13] sm:$0xff] }
0x1270   :  { %5695 = vmatprep.subr.mxu0 %v5650_v56  ;;  %5766 = vmatprep.subr.mxu1 %v5652_v41  ;;  %v5865_v56 = vld [vmem:[#allocation13 + $0x8] sm:$0xff]  ;;  %v10252_v41 = vld [vmem:[#allocation32_spill] sm:$0xff] }
0x1271   :  { %5696 = vmatpush1.msra.mxu0 %v5649_v36  ;;  %5767 = vmatpush1.msra.mxu1 %v5651_v21  ;;  %v10251_v36 = vld [vmem:[#allocation67_spill] sm:$0xff]  ;;  %v10254_v21 = vld [vmem:[#allocation66_spill] sm:$0xff] }
0x1272   :  { %5697 = vmatprep.subr.mxu0 %v5646_v32  ;;  %5768 = vmatprep.subr.mxu1 %v5648_v9  ;;  %v10253_v32 = vld [vmem:[#allocation30_spill] sm:$0xff] }
0x1273   :  { %5698 = vmatpush1.msra.mxu0 %v5645_v14  ;;  %5769 = vmatpush1.msra.mxu1 %v5647_v52  ;;  %v3790_v14 = vadd.f32 %v10254_v21, %v10241_v48  ;;  %v10255_v52 = vld [vmem:[#allocation25_spill] sm:$0xff] }
0x1274   :  { %5699 = vmatprep.subr.mxu0 %v9306_v18  ;;  %5770 = vmatprep.subr.mxu1 %v9308_v10  ;;  %v5879_v18 = vld [vmem:[#allocation13 + $0x78] sm:$0xff]  ;;  %v10246_v10 = vld [vmem:[#allocation37_spill] sm:$0xff] }
0x1275   :  { %5700 = vmatpush1.msra.mxu0 %v9310_v16  ;;  %5771 = vmatpush1.msra.mxu1 %v9314_v61  ;;  %v3784_v16 = vadd.f32 %v10246_v10, %v10241_v48 }
0x1276   :  { %5701 = vmatprep.subr.mxu0 %v9316_v22  ;;  %5772 = vmatprep.subr.mxu1 %v9318_v55  ;;  %v10247_v22 = vld [vmem:[#allocation58_spill] sm:$0xff] }
0x1277   :  { %5702 = vmatpush1.msra.mxu0 %v9322_v38  ;;  %5773 = vmatpush1.msra.mxu1 %v10219_v15  ;;  %v3786_v55 = vadd.f32 %v10247_v22, %v9004_v5 }
0x1278   :  { %5703 = vmatprep.subr.mxu0 %v10220_v7  ;;  %5774 = vmatprep.subr.mxu1 %v10221_v42 }
0x1279   :  { %5704 = vmatpush1.msra.mxu0 %v10222_v0  ;;  %5775 = vmatpush1.msra.mxu1 %v10223_v24 }
0x127a   :  { %5705 = vmatprep.subr.mxu0 %v10224_v2  ;;  %5776 = vmatprep.subr.mxu1 %v10225_v49  ;;  %v10248_v2 = vld [vmem:[#allocation65_spill] sm:$0xff] }
0x127b   :  { %5706 = vmatpush1.msra.mxu0 %v10226_v57  ;;  %5777 = vmatpush1.msra.mxu1 %v10227_v30  ;;  %v3897_v49 = vadd.f32 %v10248_v2, %v10141_v40 }
0x127c   :  { %5707 = vmatprep.subr.mxu0 %v10228_v58  ;;  %5778 = vmatprep.subr.mxu1 %v10229_v8  ;;  %v10249_v58 = vld [vmem:[#allocation70_spill] sm:$0xff] }
0x127d   :  { %5708 = vmatpush1.msra.mxu0 %v10230_v23  ;;  %5779 = vmatpush1.msra.mxu1 %v10231_v11  ;;  %v3899_v8 = vadd.f32 %v10249_v58, %v10143_v25 }
0x127e   :  { %5709 = vmatprep.subr.mxu0 %v10232_v6  ;;  %5780 = vmatprep.subr.mxu1 %v10233_v12 }
0x127f   :  { %5710 = vmatpush1.msra.mxu0 %v10234_v50  ;;  %5781 = vmatpush1.msra.mxu1 %v10235_v60 }
0x1280   :  { %5711 = vmatprep.subr.mxu0 %v10236_v44  ;;  %5782 = vmatprep.subr.mxu1 %v10237_v46 }
0x1281   :  { %5712 = vmatpush1.msra.mxu0 %v10238_v45  ;;  %5783 = vmatpush1.msra.mxu1 %v10240_v43 }
0x1282   :  { %6618 = vmatprep.subr.mxu0 %v5879_v18 }
0x1321   :  { %v5508_v61 = vpop.f32.mrf.mxu0  ;;  %v5579_v24 = vpop.f32.mrf.mxu1 }
0x1322   :  { %v5584_v38 = vadd.f32 %v5508_v61, %v3784_v16  ;;  %v5586_v57 = vadd.f32 %v5579_v24, %v3897_v49 }
0x1323   :  { %v5510_v15 = vpop.f32.mrf.mxu0  ;;  %v5581_v30 = vpop.f32.mrf.mxu1 }
0x1324   :  { %v6143_v7 = vmul.f32 -1.442695, %v5584_v38  ;;  %v5585_v42 = vadd.f32 %v5510_v15, %v3786_v55  ;;  %v6145_v23 = vmul.f32 -1.442695, %v5586_v57  ;;  %v5587_v6 = vadd.f32 %v5581_v30, %v3899_v8  ;;  %v6149_v30 = vld [vmem:[%s9679_s13] ss:$0 sm:$0xff] }
0x1326   :  { %6927 = vpow2.f32 %v6143_v7  ;;  %v6144_v0 = vmul.f32 -1.442695, %v5585_v42  ;;  %v10257_v42 = vld [vmem:[#allocation72_spill] sm:$0xff] }
0x1327   :  { %v3905_v48 = vadd.f32 %v10257_v42, %v10143_v25 }
0x1328   :  { %6929 = vpow2.f32 %v6144_v0 }
0x1329   :  { %6931 = vpow2.f32 %v6145_v23 }
0x1333   :  { %v6928_v11 = vpop.eup %6927 }
0x1334   :  { %v5597_v12 = vadd.f32 1.0, %v6928_v11 }
0x1335   :  { %v6930_v50 = vpop.eup %6929 }
0x1336   :  { %6933 = vrcp.f32 %v5597_v12  ;;  %v5598_v60 = vadd.f32 1.0, %v6930_v50  ;;  %v6932_v44 = vpop.eup %6931 }
0x1337   :  { %6935 = vtanh.f32 %v5587_v6  ;;  %v5599_v53 = vadd.f32 1.0, %v6932_v44 }
0x1338   :  { %6937 = vrcp.f32 %v5598_v60 }
0x1339   :  { %6939 = vrcp.f32 %v5599_v53 }
0x1343   :  { %v6934_v46 = vpop.eup %6933 }
0x1344   :  { %v6936_v45 = vpop.eup %6935 }
0x1345   :  { %v6938_v43 = vpop.eup %6937  ;;  %v5608_v47 = vmul.f32 %v6936_v45, %v6934_v46 }
0x1346   :  { %v5607_v20 = vmul.f32 %v6938_v43, %v9563_v26  ;;  %v6940_v37 = vpop.eup %6939  ;;  %v5875_v26 = vld [vmem:[#allocation13 + $0x58] sm:$0xff] }
0x1348   :  { %v9609_v54 = vadd.f32 %v5608_v47, %v5607_v20 }
0x134a   :  { %6941 = vtanh.f32 %v9609_v54 }
0x1357   :  { %v6942_v4 = vpop.eup %6941 }
0x1358   :  { %v5611_v1 = vmul.f32 %v6942_v4, %v6940_v37 }
0x135a   :  { %5746 = vmatmul.mubr.f32.vlgmr.msra.gmra.mxu0 %v5611_v1  ;;  %5817 = vmatmul.mubr.f32.vlgmr.msra.gmra.mxu1 %v5611_v1 }
0x135b   :  { %6619 = vmatpush3.msra.mxu0 %v5879_v18  ;;  %6650 = vmatprep.mubr.f32.mxu0 %v10250_v29  ;;  %v3792_v18 = vadd.f32 %v10255_v52, %v9004_v5 }
0x135c   :  { %6620 = vmatprep.subr.mxu0 %v5878_v28 }
0x135d   :  { %6621 = vmatpush3.msra.mxu0 %v5878_v28 }
0x135e   :  { %6622 = vmatprep.subr.mxu0 %v5877_v31 }
0x135f   :  { %6623 = vmatpush3.msra.mxu0 %v5877_v31 }
0x1360   :  { %6624 = vmatprep.subr.mxu0 %v5876_v51 }
0x1361   :  { %6625 = vmatpush3.msra.mxu0 %v5876_v51 }
0x1362   :  { %6626 = vmatprep.subr.mxu0 %v5875_v26 }
0x1363   :  { %6627 = vmatpush3.msra.mxu0 %v5875_v26 }
0x1364   :  { %6628 = vmatprep.subr.mxu0 %v5874_v3 }
0x1365   :  { %6629 = vmatpush3.msra.mxu0 %v5874_v3 }
0x1366   :  { %6630 = vmatprep.subr.mxu0 %v5873_v33 }
0x1367   :  { %6631 = vmatpush3.msra.mxu0 %v5873_v33 }
0x1368   :  { %6632 = vmatprep.subr.mxu0 %v5872_v63 }
0x1369   :  { %6633 = vmatpush3.msra.mxu0 %v5872_v63 }
0x136a   :  { %6634 = vmatprep.subr.mxu0 %v5871_v39 }
0x136b   :  { %6635 = vmatpush3.msra.mxu0 %v5871_v39 }
0x136c   :  { %6636 = vmatprep.subr.mxu0 %v5870_v59 }
0x136d   :  { %6637 = vmatpush3.msra.mxu0 %v5870_v59 }
0x136e   :  { %6638 = vmatprep.subr.mxu0 %v5869_v62 }
0x136f   :  { %6639 = vmatpush3.msra.mxu0 %v5869_v62 }
0x1370   :  { %6640 = vmatprep.subr.mxu0 %v5868_v13 }
0x1371   :  { %6641 = vmatpush3.msra.mxu0 %v5868_v13 }
0x1372   :  { %6642 = vmatprep.subr.mxu0 %v5867_v34 }
0x1373   :  { %6643 = vmatpush3.msra.mxu0 %v5867_v34 }
0x1374   :  { %6644 = vmatprep.subr.mxu0 %v5866_v19 }
0x1375   :  { %6645 = vmatpush3.msra.mxu0 %v5866_v19 }
0x1376   :  { %6646 = vmatprep.subr.mxu0 %v5865_v56 }
0x1377   :  { %6647 = vmatpush3.msra.mxu0 %v5865_v56 }
0x1378   :  { %6648 = vmatprep.subr.mxu0 %v5864_v27 }
0x1379   :  { %6649 = vmatpush3.msra.mxu0 %v5864_v27 }
0x137a   :  { %6651 = vmatmul.mubr.f32.vlgmr.msra.gmra.mxu0 %v10251_v36 }
0x137b   :  { %6653 = vmatprep.mubr.f32.mxu0 %v10252_v41 }
0x137e   :  { %6654 = vmatmul.mubr.f32.gmra.mxu0 %v10253_v32 }
0x137f   :  { %6656 = vmatprep.mubr.f32.mxu0 %v9486_v35  ;;  %v10256_v35 = vld [vmem:[#allocation71_spill] sm:$0xff] }
0x1380   :  { %v3903_v15 = vadd.f32 %v10256_v35, %v10141_v40 }
0x1382   :  { %6657 = vmatmul.mubr.f32.gmra.mxu0 %v9566_v17 }
0x1383   :  { %6659 = vmatprep.mubr.f32.mxu0 %v5611_v1 }
0x141a   :  { %v5747_v9 = vpop.f32.mrf.mxu0  ;;  %v5818_v38 = vpop.f32.mrf.mxu1 }
0x141b   :  { %v5823_v10 = vadd.f32 %v5747_v9, %v3790_v14  ;;  %v5825_v17 = vadd.f32 %v5818_v38, %v3903_v15 }
0x141c   :  { %v5749_v16 = vpop.f32.mrf.mxu0  ;;  %v5820_v7 = vpop.f32.mrf.mxu1 }
0x141d   :  { %v6146_v61 = vmul.f32 -1.442695, %v5823_v10  ;;  %v5824_v22 = vadd.f32 %v5749_v16, %v3792_v18  ;;  %v6148_v0 = vmul.f32 -1.442695, %v5825_v17  ;;  %v5826_v24 = vadd.f32 %v5820_v7, %v3905_v48 }
0x141f   :  { %6943 = vpow2.f32 %v6146_v61  ;;  %v6147_v55 = vmul.f32 -1.442695, %v5824_v22 }
0x1421   :  { %6945 = vpow2.f32 %v6147_v55 }
0x1422   :  { %6947 = vpow2.f32 %v6148_v0 }
0x1423   :  { %6949 = vtanh.f32 %v5826_v24 }
0x142c   :  { %v6944_v2 = vpop.eup %6943 }
0x142d   :  { %v5836_v5 = vadd.f32 1.0, %v6944_v2 }
0x142e   :  { %v6946_v49 = vpop.eup %6945 }
0x142f   :  { %6951 = vrcp.f32 %v5836_v5  ;;  %v5837_v57 = vadd.f32 1.0, %v6946_v49  ;;  %v6948_v40 = vpop.eup %6947 }
0x1430   :  { %v6950_v8 = vpop.eup %6949  ;;  %v5838_v60 = vadd.f32 1.0, %v6948_v40 }
0x1431   :  { %6953 = vrcp.f32 %v5837_v57 }
0x1432   :  { %6955 = vrcp.f32 %v5838_v60 }
0x143a   :  { %v6652_v58 = vpop.f32.mrf.mxu0 }
0x143b   :  { %v5959_v23 = vadd.f32 %v6652_v58, %v6149_v30 }
0x143c   :  { %v6952_v11 = vpop.eup %6951  ;;  %v5953_v25 = vpop.f32.mrf.mxu0 }
0x143d   :  { %v5847_v6 = vmul.f32 %v6952_v11, %v6950_v8  ;;  %5993 = vst [vmem:[%s9680_s14 + $0x8] sm:$0xff] %v5959_v23  ;;  %v5954_v12 = vadd.f32 %v6149_v30, %v5953_v25 }
0x143e   :  { %v6954_v50 = vpop.eup %6953  ;;  %v6655_v44 = vpop.f32.mrf.mxu0 }
0x143f   :  { %v5846_v46 = vmul.f32 %v6954_v50, %v9609_v54  ;;  %5992 = vst [vmem:[%s9680_s14] sm:$0xff] %v5954_v12  ;;  %v5969_v45 = vadd.f32 %v6655_v44, %v6149_v30  ;;  %v6956_v1 = vpop.eup %6955 }
0x1440   :  { %v5963_v43 = vpop.f32.mrf.mxu0 }
0x1441   :  { %v5848_v53 = vadd.f32 %v5847_v6, %v5846_v46  ;;  %5995 = vst [vmem:[%s9680_s14 + $0x18] sm:$0xff] %v5969_v45  ;;  %v5964_v20 = vadd.f32 %v6149_v30, %v5963_v43 }
0x1442   :  { %v6658_v47 = vpop.f32.mrf.mxu0 }
0x1443   :  { %5855 = vst [vmem:[#allocation16 + $0x8] sm:$0xff] %v5848_v53  ;;  %5994 = vst [vmem:[%s9680_s14 + $0x10] sm:$0xff] %v5964_v20  ;;  %v5979_v54 = vadd.f32 %v6658_v47, %v6149_v30  ;;  %6957 = vtanh.f32 %v5848_v53 }
0x1444   :  { %v5973_v37 = vpop.f32.mrf.mxu0 }
0x1445   :  { %5997 = vst [vmem:[%s9680_s14 + $0x28] sm:$0xff] %v5979_v54  ;;  %v5974_v4 = vadd.f32 %v6149_v30, %v5973_v37 }
0x1447   :  { %5996 = vst [vmem:[%s9680_s14 + $0x20] sm:$0xff] %v5974_v4 }
0x1450   :  { %v6958_v28 = vpop.eup %6957 }
0x1451   :  { %v5850_v29 = vmul.f32 %v6958_v28, %v6956_v1 }
0x1453   :  { %6660 = vmatmul.mubr.f32.gmra.mxu0 %v5850_v29  ;;  %5853 = vst [vmem:[#allocation15 + $0x8] sm:$0xff] %v5850_v29 }
0x1454   :  { %7090 = shalt.err (!%p7087_p6)
}
0x1455   :  { %6013 = dma.vmem_to_hbm [thread:$0]  %s6008_s2, 256, %s9681_s15, [#allocation6], %s7132_s24, %s7132_s24, %s7133_s25  }
0x1456   :  { %s7099_s30 = scalar_lea.vmem %s6020_s28, 256  ;;  %p7104_p8 = scmp.lt.s32.totalorder %s6020_s28, %s6020_s28 }
0x1457   :  { %p7100_p7 = scmp.ne.s32.totalorder %s6020_s28, %s7099_s30  ;;  %p7105_p9 = scmp.lt.s32.totalorder %s7099_s30, %s7099_s30 }
0x1459   :  { %p7106_p10 = por %p7105_p9, %p7104_p8 }
0x145b   :  { %p7107_p11 = pnand %p7106_p10, %p7100_p7 }
0x145d   :  { %7110 = shalt.err (!%p7107_p11)
}
0x145e   :  { %6025 = dma.vmem_to_hbm [thread:$0]  %s6020_s28, 256, %s9682_s16, [#allocation17], %s7132_s24, %s7132_s24, %s7133_s25  }
0x1513   :  { %v6661_v31 = vpop.f32.mrf.mxu0 }
0x1514   :  { %v5989_v51 = vadd.f32 %v6661_v31, %v6149_v30 }
0x1515   :  { %v5983_v26 = vpop.f32.mrf.mxu0 }
0x1516   :  { %5999 = vst [vmem:[%s9680_s14 + $0x38] sm:$0xff] %v5989_v51  ;;  %v5984_v3 = vadd.f32 %v6149_v30, %v5983_v26 }
0x1518   :  { %5998 = vst [vmem:[%s9680_s14 + $0x30] sm:$0xff] %v5984_v3 }
0x1519   :  { %7127 = dma.done.wait [#allocation6], 256  }
0x151a   :  { %7128 = vsyncadd [#allocation6], 4294967040 }
0x151b   :  { %7129 = dma.done.wait [#allocation17], 256  }
0x151c   :  { %7130 = vsyncadd [#allocation17], 4294967040 }
0x151d   :  { %6034 = vsyncpa [#allocation5], 1 }
0x151e   :  { %6035 = vsyncpa [#allocation8], 1 }
0x151f   :  { %6036 = vsyncpa [#allocation11], 1 }
0x1520   :  { %6037 = vsyncpa [#allocation14], 1 }
0x1521   :  { %6038 = vsyncpa [#allocation6], 1 }
0x1522   :  { %6039 = vsyncpa [#allocation17], 1 }

</bundles_post_ra>
